<compile_context>
chip_gen: v7x
topology: tpu7x:2x2x1
jax: 0.10.0
libtpu: 0.0.40
codegen_flags: <defaults>
</compile_context>

<pallas_src>
import functools
import math

import jax
import jax.numpy as jnp
from jax.experimental import pallas as pl
from jax.experimental.pallas import tpu as pltpu


# ----------------------------- fused transformer kernel ------------------------------

def _transformer_kernel(*refs, n_layers, n_heads, eps):
    """Whole Transformer (input proj -> L encoder layers -> output proj) for ONE
    batch element; activations kept on-chip the entire time."""
    (x_ref, in_w, in_b, wqkv, bqkv, wo, bo, w1, b1, w2, b2,
     ln1g, ln1b, ln2g, ln2b, out_w, out_b, o_ref) = refs

    def mm(a, b):
        # bf16 MXU operands, f32 accumulation (weights are already bf16; cast is a no-op).
        return jnp.dot(a.astype(jnp.bfloat16), b.astype(jnp.bfloat16),
                       preferred_element_type=jnp.float32)

    def mm_rhs_t(a, b):
        # a @ b.T without an explicit transpose (contract last dims on the MXU).
        return jax.lax.dot_general(
            a.astype(jnp.bfloat16), b.astype(jnp.bfloat16),
            (((1,), (1,)), ((), ())), preferred_element_type=jnp.float32)

    def layer_norm(x, g, b):
        mu = jnp.mean(x, axis=-1, keepdims=True)
        xc = x - mu
        var = jnp.mean(xc * xc, axis=-1, keepdims=True)
        return xc * jax.lax.rsqrt(var + eps) * g + b

    x = x_ref[0]                                  # (S, d_in) f32
    h = mm(x, in_w[...]) + in_b[...]              # (S, H) f32
    H = h.shape[-1]
    dh = H // n_heads
    scale = 1.0 / math.sqrt(dh)

    for l in range(n_layers):
        # ---- fused QKV projection: one (H, 3H) matmul ----
        qkv = mm(h, wqkv[l]) + bqkv[l]            # (S, 3H) f32

        # ---- multi-head attention, static loop over heads (no XLU transposes) ----
        heads = []
        for hd in range(n_heads):
            qh = qkv[:, hd * dh:(hd + 1) * dh]            # (S, dh)
            kh = qkv[:, H + hd * dh:H + (hd + 1) * dh]
            vh = qkv[:, 2 * H + hd * dh:2 * H + (hd + 1) * dh]
            s = mm_rhs_t(qh, kh) * scale                  # (S, S) f32
            s = s - jnp.max(s, axis=-1, keepdims=True)
            p = jnp.exp(s)
            p = p * pl.reciprocal(jnp.sum(p, axis=-1, keepdims=True), approx=True)
            heads.append(mm(p, vh))                       # (S, dh)
        attn = jnp.concatenate(heads, axis=-1)            # (S, H)

        # ---- output projection + residual + post-LN ----
        o = mm(attn, wo[l]) + bo[l]
        h = layer_norm(h + o, ln1g[l], ln1b[l])

        # ---- ReLU FFN + residual + post-LN ----
        ff = jnp.maximum(mm(h, w1[l]) + b1[l], 0.0)
        ff = mm(ff, w2[l]) + b2[l]
        h = layer_norm(h + ff, ln2g[l], ln2b[l])

    # output projection (fc_out, if any, is already folded into out_w / out_b)
    o_ref[0] = mm(h, out_w[...]) + out_b[...]             # (S, d_final)


def transformer_pallas(p, x, n_heads, fc=None, eps=1e-5):
    """Run a whole Transformer sub-module as a single pallas_call. x: (B, S, d_in)."""
    B, S, d_in = x.shape
    L = p["wqkv"].shape[0]

    out_w = p["out_w"]
    out_b = p["out_b"]
    if fc is not None:
        # Fold the trailing fc_out Linear into the output projection by composition
        # (exact in f32: (h @ W_o + b_o) @ W_fc + b_fc == h @ (W_o W_fc) + (b_o W_fc + b_fc)).
        fc_w, fc_b = fc
        out_b = out_b @ fc_w + fc_b                       # (1, d_final)
        out_w = out_w @ fc_w                              # (H, d_final)
    d_final = out_w.shape[1]

    bf16 = lambda w: w.astype(jnp.bfloat16)               # matmul weights -> bf16 once
    weights = [bf16(p["in_w"]), p["in_b"],
               bf16(p["wqkv"]), p["bqkv"],
               bf16(p["wo"]), p["bo"],
               bf16(p["w1"]), p["b1"],
               bf16(p["w2"]), p["b2"],
               p["ln1_g"], p["ln1_b"], p["ln2_g"], p["ln2_b"],
               bf16(out_w), out_b]

    def _w_spec(w):
        nd = w.ndim
        return pl.BlockSpec(w.shape, lambda b, _nd=nd: (0,) * _nd)   # resident weights

    in_specs = ([pl.BlockSpec((1, S, d_in), lambda b: (b, 0, 0))]
                + [_w_spec(w) for w in weights])
    out_spec = pl.BlockSpec((1, S, d_final), lambda b: (b, 0, 0))

    kernel = functools.partial(_transformer_kernel, n_layers=L, n_heads=n_heads, eps=eps)
    return pl.pallas_call(
        kernel,
        out_shape=jax.ShapeDtypeStruct((B, S, d_final), jnp.float32),
        grid=(B,),
        in_specs=in_specs,
        out_specs=out_spec,
        compiler_params=pltpu.CompilerParams(dimension_semantics=("parallel",)),
    )(x, *weights)


# ------------------------- parameter initialization ------------------------

def _xavier(key, fan_in, fan_out):
    # torch.nn.init.xavier_normal
    std = math.sqrt(2.0 / (fan_in + fan_out))
    return (std * jax.random.normal(key, (fan_in, fan_out))).astype(jnp.float32)


def _bias(*shape):
    # torch init: m.bias.data.fill_(0.1)
    return jnp.full(shape, 0.1, dtype=jnp.float32)


def init_transformer(key, d_in, H, n_layers, n_heads, FF, d_out):
    keys = jax.random.split(key, 2 + 6 * n_layers)
    wqkv, wo, w1, w2 = [], [], [], []
    for l in range(n_layers):
        k = keys[2 + 6 * l: 2 + 6 * (l + 1)]
        wqkv.append(jnp.concatenate(
            [_xavier(k[0], H, H), _xavier(k[1], H, H), _xavier(k[2], H, H)], axis=1))
        wo.append(_xavier(k[3], H, H))
        w1.append(_xavier(k[4], H, FF))
        w2.append(_xavier(k[5], FF, H))
    return {
        "in_w": _xavier(keys[0], d_in, H), "in_b": _bias(1, H),
        "wqkv": jnp.stack(wqkv), "bqkv": _bias(n_layers, 1, 3 * H),
        "wo": jnp.stack(wo), "bo": _bias(n_layers, 1, H),
        "w1": jnp.stack(w1), "b1": _bias(n_layers, 1, FF),
        "w2": jnp.stack(w2), "b2": _bias(n_layers, 1, H),
        "ln1_g": jnp.ones((n_layers, 1, H), jnp.float32),
        "ln1_b": jnp.zeros((n_layers, 1, H), jnp.float32),
        "ln2_g": jnp.ones((n_layers, 1, H), jnp.float32),
        "ln2_b": jnp.zeros((n_layers, 1, H), jnp.float32),
        "out_w": _xavier(keys[1], H, d_out), "out_b": _bias(1, d_out),
    }


def init_encoder_params(key, input_dim, hidden_dim, num_edges, n_layers, n_heads, dim_ff):
    k1, k2, k3, k4, k5 = jax.random.split(key, 5)
    return {
        "t1": init_transformer(k1, input_dim, hidden_dim, n_layers, n_heads, dim_ff, hidden_dim),
        "t2": init_transformer(k2, hidden_dim * 2, hidden_dim, n_layers, n_heads, dim_ff, hidden_dim),
        "t3": init_transformer(k3, hidden_dim, hidden_dim, n_layers, n_heads, dim_ff, hidden_dim),
        "t4": init_transformer(k4, hidden_dim * 3, hidden_dim, n_layers, n_heads, dim_ff, hidden_dim),
        "fc_w": _xavier(k5, hidden_dim, num_edges), "fc_b": _bias(1, num_edges),
    }


# ------------------------------ forward pass --------------------------------

def node2edge(x, recv_idx, send_idx):
    # rel_rec / rel_send are one-hot row selectors (NRI convention) -> pure gathers.
    senders = jnp.take(x, send_idx, axis=1)
    receivers = jnp.take(x, recv_idx, axis=1)
    return jnp.concatenate([senders, receivers], axis=2)


def edge2node(x, rel_rec):
    incoming = jnp.einsum("en,beh->bnh", rel_rec, x)      # rel_rec.T @ x
    return incoming / incoming.shape[1]


def transformer_encoder_forward(params, inputs, rel_rec, rel_send, *, n_heads):
    # matches TransformerEncoder.forward with factor=True
    if inputs.ndim > 3:
        x = inputs.reshape(inputs.shape[0], inputs.shape[1], -1)
    else:
        x = inputs.reshape(1, inputs.shape[0], inputs.shape[1])

    recv_idx = jnp.argmax(rel_rec, axis=1)
    send_idx = jnp.argmax(rel_send, axis=1)

    x = transformer_pallas(params["t1"], x, n_heads)                      # (B, N, H)
    x = node2edge(x, recv_idx, send_idx)                                  # (B, E, 2H)
    x = transformer_pallas(params["t2"], x, n_heads)                      # (B, E, H)
    x_skip = x
    x = edge2node(x, rel_rec)                                             # (B, N, H)
    x = transformer_pallas(params["t3"], x, n_heads)                      # (B, N, H)
    x = node2edge(x, recv_idx, send_idx)                                  # (B, E, 2H)
    x = jnp.concatenate([x, x_skip], axis=2)                              # (B, E, 3H)
    # final fc_out is folded into transformer4's output projection (weight composition)
    x = transformer_pallas(params["t4"], x, n_heads,
                           fc=(params["fc_w"], params["fc_b"]))           # (B, E, num_edges)
    return x


# --------------------------------- main --------------------------------------

if __name__ == "__main__":
    key = jax.random.PRNGKey(0)
    k_inp, k_par = jax.random.split(key)

    # small shapes: batch=2 sims, 4 nodes, 4 timesteps x 4 dims -> input_dim=16
    B, N_nodes, T, D = 2, 4, 4, 4
    input_dim = T * D          # 16
    hidden_dim = 32
    num_edge_types = 4         # output dim of fc_out ("num_edges" ctor arg)
    n_encoder_layers = 2
    n_heads = 4
    dim_feedforward = 64

    inputs = jax.random.normal(k_inp, (B, N_nodes, T, D), dtype=jnp.float32)

    # fully-connected (off-diagonal) relation one-hot matrices: (E, N), E = N*(N-1)
    eye = jnp.eye(N_nodes, dtype=jnp.float32)
    recv_list, send_list = [], []
    for i in range(N_nodes):
        for j in range(N_nodes):
            if i != j:
                recv_list.append(i)
                send_list.append(j)
    rel_rec = eye[jnp.array(recv_list)]
    rel_send = eye[jnp.array(send_list)]

    params = init_encoder_params(k_par, input_dim, hidden_dim, num_edge_types,
                                 n_encoder_layers, n_heads, dim_feedforward)

    fwd = jax.jit(functools.partial(transformer_encoder_forward, n_heads=n_heads))
    out = fwd(params, inputs, rel_rec, rel_send)
    out = jax.block_until_ready(out)

    expected_edges = N_nodes * (N_nodes - 1)
    assert out.shape == (B, expected_edges, num_edge_types), out.shape
    assert bool(jnp.all(jnp.isfinite(out)))
    print("KERNEL_OK")
</pallas_src>

<mosaic_0001>
module attributes {stable_mosaic.version = 11 : i64} {
  func.func @_transformer_kernel(%arg0: i32, %arg1: memref<1x4x16xf32, #tpu.memory_space<vmem>>, %arg2: memref<16x32xbf16, #tpu.memory_space<vmem>>, %arg3: memref<1x32xf32, #tpu.memory_space<vmem>>, %arg4: memref<2x32x96xbf16, #tpu.memory_space<vmem>>, %arg5: memref<2x1x96xf32, #tpu.memory_space<vmem>>, %arg6: memref<2x32x32xbf16, #tpu.memory_space<vmem>>, %arg7: memref<2x1x32xf32, #tpu.memory_space<vmem>>, %arg8: memref<2x32x64xbf16, #tpu.memory_space<vmem>>, %arg9: memref<2x1x64xf32, #tpu.memory_space<vmem>>, %arg10: memref<2x64x32xbf16, #tpu.memory_space<vmem>>, %arg11: memref<2x1x32xf32, #tpu.memory_space<vmem>>, %arg12: memref<2x1x32xf32, #tpu.memory_space<vmem>>, %arg13: memref<2x1x32xf32, #tpu.memory_space<vmem>>, %arg14: memref<2x1x32xf32, #tpu.memory_space<vmem>>, %arg15: memref<2x1x32xf32, #tpu.memory_space<vmem>>, %arg16: memref<32x32xbf16, #tpu.memory_space<vmem>>, %arg17: memref<1x32xf32, #tpu.memory_space<vmem>>, %arg18: memref<1x4x32xf32, #tpu.memory_space<vmem>>) attributes {dimension_semantics = [#tpu.dimension_semantics<parallel>], iteration_bounds = array<i64: 2>, scalar_prefetch = 0 : i64, scratch_operands = 0 : i64, tpu.core_type = #tpu.core_type<tc>, window_params = [{transform_indices = @transform_0, window_bounds = array<i64: 1, 4, 16>}, {pipeline_mode = #tpu.pipeline_mode<synchronous>, transform_indices = @transform_1, window_bounds = array<i64: 16, 32>}, {pipeline_mode = #tpu.pipeline_mode<synchronous>, transform_indices = @transform_2, window_bounds = array<i64: 1, 32>}, {pipeline_mode = #tpu.pipeline_mode<synchronous>, transform_indices = @transform_3, window_bounds = array<i64: 2, 32, 96>}, {pipeline_mode = #tpu.pipeline_mode<synchronous>, transform_indices = @transform_4, window_bounds = array<i64: 2, 1, 96>}, {pipeline_mode = #tpu.pipeline_mode<synchronous>, transform_indices = @transform_5, window_bounds = array<i64: 2, 32, 32>}, {pipeline_mode = #tpu.pipeline_mode<synchronous>, transform_indices = @transform_6, window_bounds = array<i64: 2, 1, 32>}, {pipeline_mode = #tpu.pipeline_mode<synchronous>, transform_indices = @transform_7, window_bounds = array<i64: 2, 32, 64>}, {pipeline_mode = #tpu.pipeline_mode<synchronous>, transform_indices = @transform_8, window_bounds = array<i64: 2, 1, 64>}, {pipeline_mode = #tpu.pipeline_mode<synchronous>, transform_indices = @transform_9, window_bounds = array<i64: 2, 64, 32>}, {pipeline_mode = #tpu.pipeline_mode<synchronous>, transform_indices = @transform_10, window_bounds = array<i64: 2, 1, 32>}, {pipeline_mode = #tpu.pipeline_mode<synchronous>, transform_indices = @transform_11, window_bounds = array<i64: 2, 1, 32>}, {pipeline_mode = #tpu.pipeline_mode<synchronous>, transform_indices = @transform_12, window_bounds = array<i64: 2, 1, 32>}, {pipeline_mode = #tpu.pipeline_mode<synchronous>, transform_indices = @transform_13, window_bounds = array<i64: 2, 1, 32>}, {pipeline_mode = #tpu.pipeline_mode<synchronous>, transform_indices = @transform_14, window_bounds = array<i64: 2, 1, 32>}, {pipeline_mode = #tpu.pipeline_mode<synchronous>, transform_indices = @transform_15, window_bounds = array<i64: 32, 32>}, {pipeline_mode = #tpu.pipeline_mode<synchronous>, transform_indices = @transform_16, window_bounds = array<i64: 1, 32>}, {transform_indices = @transform_17, window_bounds = array<i64: 1, 4, 32>}]} {
    %c0 = arith.constant 0 : index
    %c0_0 = arith.constant 0 : index
    %c0_1 = arith.constant 0 : index
    %0 = vector.load %arg1[%c0, %c0_0, %c0_1] : memref<1x4x16xf32, #tpu.memory_space<vmem>>, vector<1x4x16xf32>
    %1 = vector.shape_cast %0 : vector<1x4x16xf32> to vector<4x16xf32>
    %c0_2 = arith.constant 0 : index
    %c0_3 = arith.constant 0 : index
    %2 = vector.load %arg2[%c0_2, %c0_3] : memref<16x32xbf16, #tpu.memory_space<vmem>>, vector<16x32xbf16>
    %3 = arith.truncf %1 : vector<4x16xf32> to vector<4x16xbf16>
    %cst = arith.constant dense<0.000000e+00> : vector<4x32xf32>
    %4 = tpu.matmul %3, %2, %cst {dimension_numbers = #tpu.dot_dimension_numbers<[1], [0], [0], [1], [0, 0, 1, 1], [], []>} : vector<4x16xbf16>, vector<16x32xbf16>, vector<4x32xf32> -> vector<4x32xf32>
    %c0_4 = arith.constant 0 : index
    %c0_5 = arith.constant 0 : index
    %5 = vector.load %arg3[%c0_4, %c0_5] : memref<1x32xf32, #tpu.memory_space<vmem>>, vector<1x32xf32>
    %6 = vector.broadcast %5 : vector<1x32xf32> to vector<4x32xf32>
    %7 = arith.addf %4, %6 : vector<4x32xf32>
    %c0_6 = arith.constant 0 : index
    %c0_7 = arith.constant 0 : index
    %c0_8 = arith.constant 0 : index
    %8 = vector.load %arg4[%c0_6, %c0_7, %c0_8] : memref<2x32x96xbf16, #tpu.memory_space<vmem>>, vector<1x32x96xbf16>
    %9 = vector.shape_cast %8 : vector<1x32x96xbf16> to vector<32x96xbf16>
    %10 = arith.truncf %7 : vector<4x32xf32> to vector<4x32xbf16>
    %cst_9 = arith.constant dense<0.000000e+00> : vector<4x96xf32>
    %11 = tpu.matmul %10, %9, %cst_9 {dimension_numbers = #tpu.dot_dimension_numbers<[1], [0], [0], [1], [0, 0, 1, 1], [], []>} : vector<4x32xbf16>, vector<32x96xbf16>, vector<4x96xf32> -> vector<4x96xf32>
    %c0_10 = arith.constant 0 : index
    %c0_11 = arith.constant 0 : index
    %c0_12 = arith.constant 0 : index
    %12 = vector.load %arg5[%c0_10, %c0_11, %c0_12] : memref<2x1x96xf32, #tpu.memory_space<vmem>>, vector<1x1x96xf32>
    %13 = vector.shape_cast %12 : vector<1x1x96xf32> to vector<1x96xf32>
    %14 = vector.broadcast %13 : vector<1x96xf32> to vector<4x96xf32>
    %15 = arith.addf %11, %14 : vector<4x96xf32>
    %16 = vector.extract_strided_slice %15 {offsets = [0, 0], sizes = [4, 8], strides = [1, 1]} : vector<4x96xf32> to vector<4x8xf32>
    %17 = vector.extract_strided_slice %15 {offsets = [0, 32], sizes = [4, 8], strides = [1, 1]} : vector<4x96xf32> to vector<4x8xf32>
    %18 = vector.extract_strided_slice %15 {offsets = [0, 64], sizes = [4, 8], strides = [1, 1]} : vector<4x96xf32> to vector<4x8xf32>
    %19 = arith.truncf %16 : vector<4x8xf32> to vector<4x8xbf16>
    %20 = arith.truncf %17 : vector<4x8xf32> to vector<4x8xbf16>
    %cst_13 = arith.constant dense<0.000000e+00> : vector<4x4xf32>
    %21 = tpu.matmul %19, %20, %cst_13 {dimension_numbers = #tpu.dot_dimension_numbers<[1], [1], [0], [0], [0, 0, 1, 0], [], []>} : vector<4x8xbf16>, vector<4x8xbf16>, vector<4x4xf32> -> vector<4x4xf32>
    %cst_14 = arith.constant 0.353553385 : f32
    %22 = vector.broadcast %cst_14 : f32 to vector<4x4xf32>
    %23 = arith.mulf %21, %22 : vector<4x4xf32>
    %cst_15 = arith.constant dense<0xFF800000> : vector<4xf32>
    %24 = vector.multi_reduction <maximumf>, %23, %cst_15 [1] : vector<4x4xf32> to vector<4xf32>
    %25 = vector.shape_cast %24 : vector<4xf32> to vector<4x1xf32>
    %26 = vector.broadcast %25 : vector<4x1xf32> to vector<4x4xf32>
    %27 = arith.subf %23, %26 : vector<4x4xf32>
    %28 = math.exp %27 : vector<4x4xf32>
    %cst_16 = arith.constant dense<0.000000e+00> : vector<4xf32>
    %29 = vector.multi_reduction <add>, %28, %cst_16 [1] : vector<4x4xf32> to vector<4xf32>
    %30 = vector.shape_cast %29 : vector<4xf32> to vector<4x1xf32>
    %31 = tpu.reciprocal %30 {approx = true} : vector<4x1xf32> -> vector<4x1xf32>
    %32 = vector.broadcast %31 : vector<4x1xf32> to vector<4x4xf32>
    %33 = arith.mulf %28, %32 : vector<4x4xf32>
    %34 = arith.truncf %33 : vector<4x4xf32> to vector<4x4xbf16>
    %35 = arith.truncf %18 : vector<4x8xf32> to vector<4x8xbf16>
    %cst_17 = arith.constant dense<0.000000e+00> : vector<4x8xf32>
    %36 = tpu.matmul %34, %35, %cst_17 {dimension_numbers = #tpu.dot_dimension_numbers<[1], [0], [0], [1], [0, 0, 1, 1], [], []>} : vector<4x4xbf16>, vector<4x8xbf16>, vector<4x8xf32> -> vector<4x8xf32>
    %37 = vector.extract_strided_slice %15 {offsets = [0, 8], sizes = [4, 8], strides = [1, 1]} : vector<4x96xf32> to vector<4x8xf32>
    %38 = vector.extract_strided_slice %15 {offsets = [0, 40], sizes = [4, 8], strides = [1, 1]} : vector<4x96xf32> to vector<4x8xf32>
    %39 = vector.extract_strided_slice %15 {offsets = [0, 72], sizes = [4, 8], strides = [1, 1]} : vector<4x96xf32> to vector<4x8xf32>
    %40 = arith.truncf %37 : vector<4x8xf32> to vector<4x8xbf16>
    %41 = arith.truncf %38 : vector<4x8xf32> to vector<4x8xbf16>
    %cst_18 = arith.constant dense<0.000000e+00> : vector<4x4xf32>
    %42 = tpu.matmul %40, %41, %cst_18 {dimension_numbers = #tpu.dot_dimension_numbers<[1], [1], [0], [0], [0, 0, 1, 0], [], []>} : vector<4x8xbf16>, vector<4x8xbf16>, vector<4x4xf32> -> vector<4x4xf32>
    %cst_19 = arith.constant 0.353553385 : f32
    %43 = vector.broadcast %cst_19 : f32 to vector<4x4xf32>
    %44 = arith.mulf %42, %43 : vector<4x4xf32>
    %cst_20 = arith.constant dense<0xFF800000> : vector<4xf32>
    %45 = vector.multi_reduction <maximumf>, %44, %cst_20 [1] : vector<4x4xf32> to vector<4xf32>
    %46 = vector.shape_cast %45 : vector<4xf32> to vector<4x1xf32>
    %47 = vector.broadcast %46 : vector<4x1xf32> to vector<4x4xf32>
    %48 = arith.subf %44, %47 : vector<4x4xf32>
    %49 = math.exp %48 : vector<4x4xf32>
    %cst_21 = arith.constant dense<0.000000e+00> : vector<4xf32>
    %50 = vector.multi_reduction <add>, %49, %cst_21 [1] : vector<4x4xf32> to vector<4xf32>
    %51 = vector.shape_cast %50 : vector<4xf32> to vector<4x1xf32>
    %52 = tpu.reciprocal %51 {approx = true} : vector<4x1xf32> -> vector<4x1xf32>
    %53 = vector.broadcast %52 : vector<4x1xf32> to vector<4x4xf32>
    %54 = arith.mulf %49, %53 : vector<4x4xf32>
    %55 = arith.truncf %54 : vector<4x4xf32> to vector<4x4xbf16>
    %56 = arith.truncf %39 : vector<4x8xf32> to vector<4x8xbf16>
    %cst_22 = arith.constant dense<0.000000e+00> : vector<4x8xf32>
    %57 = tpu.matmul %55, %56, %cst_22 {dimension_numbers = #tpu.dot_dimension_numbers<[1], [0], [0], [1], [0, 0, 1, 1], [], []>} : vector<4x4xbf16>, vector<4x8xbf16>, vector<4x8xf32> -> vector<4x8xf32>
    %58 = vector.extract_strided_slice %15 {offsets = [0, 16], sizes = [4, 8], strides = [1, 1]} : vector<4x96xf32> to vector<4x8xf32>
    %59 = vector.extract_strided_slice %15 {offsets = [0, 48], sizes = [4, 8], strides = [1, 1]} : vector<4x96xf32> to vector<4x8xf32>
    %60 = vector.extract_strided_slice %15 {offsets = [0, 80], sizes = [4, 8], strides = [1, 1]} : vector<4x96xf32> to vector<4x8xf32>
    %61 = arith.truncf %58 : vector<4x8xf32> to vector<4x8xbf16>
    %62 = arith.truncf %59 : vector<4x8xf32> to vector<4x8xbf16>
    %cst_23 = arith.constant dense<0.000000e+00> : vector<4x4xf32>
    %63 = tpu.matmul %61, %62, %cst_23 {dimension_numbers = #tpu.dot_dimension_numbers<[1], [1], [0], [0], [0, 0, 1, 0], [], []>} : vector<4x8xbf16>, vector<4x8xbf16>, vector<4x4xf32> -> vector<4x4xf32>
    %cst_24 = arith.constant 0.353553385 : f32
    %64 = vector.broadcast %cst_24 : f32 to vector<4x4xf32>
    %65 = arith.mulf %63, %64 : vector<4x4xf32>
    %cst_25 = arith.constant dense<0xFF800000> : vector<4xf32>
    %66 = vector.multi_reduction <maximumf>, %65, %cst_25 [1] : vector<4x4xf32> to vector<4xf32>
    %67 = vector.shape_cast %66 : vector<4xf32> to vector<4x1xf32>
    %68 = vector.broadcast %67 : vector<4x1xf32> to vector<4x4xf32>
    %69 = arith.subf %65, %68 : vector<4x4xf32>
    %70 = math.exp %69 : vector<4x4xf32>
    %cst_26 = arith.constant dense<0.000000e+00> : vector<4xf32>
    %71 = vector.multi_reduction <add>, %70, %cst_26 [1] : vector<4x4xf32> to vector<4xf32>
    %72 = vector.shape_cast %71 : vector<4xf32> to vector<4x1xf32>
    %73 = tpu.reciprocal %72 {approx = true} : vector<4x1xf32> -> vector<4x1xf32>
    %74 = vector.broadcast %73 : vector<4x1xf32> to vector<4x4xf32>
    %75 = arith.mulf %70, %74 : vector<4x4xf32>
    %76 = arith.truncf %75 : vector<4x4xf32> to vector<4x4xbf16>
    %77 = arith.truncf %60 : vector<4x8xf32> to vector<4x8xbf16>
    %cst_27 = arith.constant dense<0.000000e+00> : vector<4x8xf32>
    %78 = tpu.matmul %76, %77, %cst_27 {dimension_numbers = #tpu.dot_dimension_numbers<[1], [0], [0], [1], [0, 0, 1, 1], [], []>} : vector<4x4xbf16>, vector<4x8xbf16>, vector<4x8xf32> -> vector<4x8xf32>
    %79 = vector.extract_strided_slice %15 {offsets = [0, 24], sizes = [4, 8], strides = [1, 1]} : vector<4x96xf32> to vector<4x8xf32>
    %80 = vector.extract_strided_slice %15 {offsets = [0, 56], sizes = [4, 8], strides = [1, 1]} : vector<4x96xf32> to vector<4x8xf32>
    %81 = vector.extract_strided_slice %15 {offsets = [0, 88], sizes = [4, 8], strides = [1, 1]} : vector<4x96xf32> to vector<4x8xf32>
    %82 = arith.truncf %79 : vector<4x8xf32> to vector<4x8xbf16>
    %83 = arith.truncf %80 : vector<4x8xf32> to vector<4x8xbf16>
    %cst_28 = arith.constant dense<0.000000e+00> : vector<4x4xf32>
    %84 = tpu.matmul %82, %83, %cst_28 {dimension_numbers = #tpu.dot_dimension_numbers<[1], [1], [0], [0], [0, 0, 1, 0], [], []>} : vector<4x8xbf16>, vector<4x8xbf16>, vector<4x4xf32> -> vector<4x4xf32>
    %cst_29 = arith.constant 0.353553385 : f32
    %85 = vector.broadcast %cst_29 : f32 to vector<4x4xf32>
    %86 = arith.mulf %84, %85 : vector<4x4xf32>
    %cst_30 = arith.constant dense<0xFF800000> : vector<4xf32>
    %87 = vector.multi_reduction <maximumf>, %86, %cst_30 [1] : vector<4x4xf32> to vector<4xf32>
    %88 = vector.shape_cast %87 : vector<4xf32> to vector<4x1xf32>
    %89 = vector.broadcast %88 : vector<4x1xf32> to vector<4x4xf32>
    %90 = arith.subf %86, %89 : vector<4x4xf32>
    %91 = math.exp %90 : vector<4x4xf32>
    %cst_31 = arith.constant dense<0.000000e+00> : vector<4xf32>
    %92 = vector.multi_reduction <add>, %91, %cst_31 [1] : vector<4x4xf32> to vector<4xf32>
    %93 = vector.shape_cast %92 : vector<4xf32> to vector<4x1xf32>
    %94 = tpu.reciprocal %93 {approx = true} : vector<4x1xf32> -> vector<4x1xf32>
    %95 = vector.broadcast %94 : vector<4x1xf32> to vector<4x4xf32>
    %96 = arith.mulf %91, %95 : vector<4x4xf32>
    %97 = arith.truncf %96 : vector<4x4xf32> to vector<4x4xbf16>
    %98 = arith.truncf %81 : vector<4x8xf32> to vector<4x8xbf16>
    %cst_32 = arith.constant dense<0.000000e+00> : vector<4x8xf32>
    %99 = tpu.matmul %97, %98, %cst_32 {dimension_numbers = #tpu.dot_dimension_numbers<[1], [0], [0], [1], [0, 0, 1, 1], [], []>} : vector<4x4xbf16>, vector<4x8xbf16>, vector<4x8xf32> -> vector<4x8xf32>
    %100 = tpu.concatenate %36, %57, %78, %99 in 1 : vector<4x8xf32>, vector<4x8xf32>, vector<4x8xf32>, vector<4x8xf32> -> vector<4x32xf32>
    %c0_33 = arith.constant 0 : index
    %c0_34 = arith.constant 0 : index
    %c0_35 = arith.constant 0 : index
    %101 = vector.load %arg6[%c0_33, %c0_34, %c0_35] : memref<2x32x32xbf16, #tpu.memory_space<vmem>>, vector<1x32x32xbf16>
    %102 = vector.shape_cast %101 : vector<1x32x32xbf16> to vector<32x32xbf16>
    %103 = arith.truncf %100 : vector<4x32xf32> to vector<4x32xbf16>
    %cst_36 = arith.constant dense<0.000000e+00> : vector<4x32xf32>
    %104 = tpu.matmul %103, %102, %cst_36 {dimension_numbers = #tpu.dot_dimension_numbers<[1], [0], [0], [1], [0, 0, 1, 1], [], []>} : vector<4x32xbf16>, vector<32x32xbf16>, vector<4x32xf32> -> vector<4x32xf32>
    %c0_37 = arith.constant 0 : index
    %c0_38 = arith.constant 0 : index
    %c0_39 = arith.constant 0 : index
    %105 = vector.load %arg7[%c0_37, %c0_38, %c0_39] : memref<2x1x32xf32, #tpu.memory_space<vmem>>, vector<1x1x32xf32>
    %106 = vector.shape_cast %105 : vector<1x1x32xf32> to vector<1x32xf32>
    %107 = vector.broadcast %106 : vector<1x32xf32> to vector<4x32xf32>
    %108 = arith.addf %104, %107 : vector<4x32xf32>
    %109 = arith.addf %7, %108 : vector<4x32xf32>
    %c0_40 = arith.constant 0 : index
    %c0_41 = arith.constant 0 : index
    %c0_42 = arith.constant 0 : index
    %110 = vector.load %arg12[%c0_40, %c0_41, %c0_42] : memref<2x1x32xf32, #tpu.memory_space<vmem>>, vector<1x1x32xf32>
    %111 = vector.shape_cast %110 : vector<1x1x32xf32> to vector<1x32xf32>
    %c0_43 = arith.constant 0 : index
    %c0_44 = arith.constant 0 : index
    %c0_45 = arith.constant 0 : index
    %112 = vector.load %arg13[%c0_43, %c0_44, %c0_45] : memref<2x1x32xf32, #tpu.memory_space<vmem>>, vector<1x1x32xf32>
    %113 = vector.shape_cast %112 : vector<1x1x32xf32> to vector<1x32xf32>
    %cst_46 = arith.constant dense<0.000000e+00> : vector<4xf32>
    %114 = vector.multi_reduction <add>, %109, %cst_46 [1] : vector<4x32xf32> to vector<4xf32>
    %115 = vector.shape_cast %114 : vector<4xf32> to vector<4x1xf32>
    %cst_47 = arith.constant 3.200000e+01 : f32
    %116 = vector.broadcast %cst_47 : f32 to vector<4x1xf32>
    %117 = arith.divf %115, %116 : vector<4x1xf32>
    %118 = vector.broadcast %117 : vector<4x1xf32> to vector<4x32xf32>
    %119 = arith.subf %109, %118 : vector<4x32xf32>
    %120 = arith.mulf %119, %119 : vector<4x32xf32>
    %cst_48 = arith.constant dense<0.000000e+00> : vector<4xf32>
    %121 = vector.multi_reduction <add>, %120, %cst_48 [1] : vector<4x32xf32> to vector<4xf32>
    %122 = vector.shape_cast %121 : vector<4xf32> to vector<4x1xf32>
    %cst_49 = arith.constant 3.200000e+01 : f32
    %123 = vector.broadcast %cst_49 : f32 to vector<4x1xf32>
    %124 = arith.divf %122, %123 : vector<4x1xf32>
    %cst_50 = arith.constant 9.99999974E-6 : f32
    %125 = vector.broadcast %cst_50 : f32 to vector<4x1xf32>
    %126 = arith.addf %124, %125 : vector<4x1xf32>
    %127 = math.rsqrt %126 : vector<4x1xf32>
    %128 = vector.broadcast %127 : vector<4x1xf32> to vector<4x32xf32>
    %129 = arith.mulf %119, %128 : vector<4x32xf32>
    %130 = vector.broadcast %111 : vector<1x32xf32> to vector<4x32xf32>
    %131 = arith.mulf %129, %130 : vector<4x32xf32>
    %132 = vector.broadcast %113 : vector<1x32xf32> to vector<4x32xf32>
    %133 = arith.addf %131, %132 : vector<4x32xf32>
    %c0_51 = arith.constant 0 : index
    %c0_52 = arith.constant 0 : index
    %c0_53 = arith.constant 0 : index
    %134 = vector.load %arg8[%c0_51, %c0_52, %c0_53] : memref<2x32x64xbf16, #tpu.memory_space<vmem>>, vector<1x32x64xbf16>
    %135 = vector.shape_cast %134 : vector<1x32x64xbf16> to vector<32x64xbf16>
    %136 = arith.truncf %133 : vector<4x32xf32> to vector<4x32xbf16>
    %cst_54 = arith.constant dense<0.000000e+00> : vector<4x64xf32>
    %137 = tpu.matmul %136, %135, %cst_54 {dimension_numbers = #tpu.dot_dimension_numbers<[1], [0], [0], [1], [0, 0, 1, 1], [], []>} : vector<4x32xbf16>, vector<32x64xbf16>, vector<4x64xf32> -> vector<4x64xf32>
    %c0_55 = arith.constant 0 : index
    %c0_56 = arith.constant 0 : index
    %c0_57 = arith.constant 0 : index
    %138 = vector.load %arg9[%c0_55, %c0_56, %c0_57] : memref<2x1x64xf32, #tpu.memory_space<vmem>>, vector<1x1x64xf32>
    %139 = vector.shape_cast %138 : vector<1x1x64xf32> to vector<1x64xf32>
    %140 = vector.broadcast %139 : vector<1x64xf32> to vector<4x64xf32>
    %141 = arith.addf %137, %140 : vector<4x64xf32>
    %cst_58 = arith.constant 0.000000e+00 : f32
    %142 = vector.broadcast %cst_58 : f32 to vector<4x64xf32>
    %143 = arith.maximumf %141, %142 : vector<4x64xf32>
    %c0_59 = arith.constant 0 : index
    %c0_60 = arith.constant 0 : index
    %c0_61 = arith.constant 0 : index
    %144 = vector.load %arg10[%c0_59, %c0_60, %c0_61] : memref<2x64x32xbf16, #tpu.memory_space<vmem>>, vector<1x64x32xbf16>
    %145 = vector.shape_cast %144 : vector<1x64x32xbf16> to vector<64x32xbf16>
    %146 = arith.truncf %143 : vector<4x64xf32> to vector<4x64xbf16>
    %cst_62 = arith.constant dense<0.000000e+00> : vector<4x32xf32>
    %147 = tpu.matmul %146, %145, %cst_62 {dimension_numbers = #tpu.dot_dimension_numbers<[1], [0], [0], [1], [0, 0, 1, 1], [], []>} : vector<4x64xbf16>, vector<64x32xbf16>, vector<4x32xf32> -> vector<4x32xf32>
    %c0_63 = arith.constant 0 : index
    %c0_64 = arith.constant 0 : index
    %c0_65 = arith.constant 0 : index
    %148 = vector.load %arg11[%c0_63, %c0_64, %c0_65] : memref<2x1x32xf32, #tpu.memory_space<vmem>>, vector<1x1x32xf32>
    %149 = vector.shape_cast %148 : vector<1x1x32xf32> to vector<1x32xf32>
    %150 = vector.broadcast %149 : vector<1x32xf32> to vector<4x32xf32>
    %151 = arith.addf %147, %150 : vector<4x32xf32>
    %152 = arith.addf %133, %151 : vector<4x32xf32>
    %c0_66 = arith.constant 0 : index
    %c0_67 = arith.constant 0 : index
    %c0_68 = arith.constant 0 : index
    %153 = vector.load %arg14[%c0_66, %c0_67, %c0_68] : memref<2x1x32xf32, #tpu.memory_space<vmem>>, vector<1x1x32xf32>
    %154 = vector.shape_cast %153 : vector<1x1x32xf32> to vector<1x32xf32>
    %c0_69 = arith.constant 0 : index
    %c0_70 = arith.constant 0 : index
    %c0_71 = arith.constant 0 : index
    %155 = vector.load %arg15[%c0_69, %c0_70, %c0_71] : memref<2x1x32xf32, #tpu.memory_space<vmem>>, vector<1x1x32xf32>
    %156 = vector.shape_cast %155 : vector<1x1x32xf32> to vector<1x32xf32>
    %cst_72 = arith.constant dense<0.000000e+00> : vector<4xf32>
    %157 = vector.multi_reduction <add>, %152, %cst_72 [1] : vector<4x32xf32> to vector<4xf32>
    %158 = vector.shape_cast %157 : vector<4xf32> to vector<4x1xf32>
    %cst_73 = arith.constant 3.200000e+01 : f32
    %159 = vector.broadcast %cst_73 : f32 to vector<4x1xf32>
    %160 = arith.divf %158, %159 : vector<4x1xf32>
    %161 = vector.broadcast %160 : vector<4x1xf32> to vector<4x32xf32>
    %162 = arith.subf %152, %161 : vector<4x32xf32>
    %163 = arith.mulf %162, %162 : vector<4x32xf32>
    %cst_74 = arith.constant dense<0.000000e+00> : vector<4xf32>
    %164 = vector.multi_reduction <add>, %163, %cst_74 [1] : vector<4x32xf32> to vector<4xf32>
    %165 = vector.shape_cast %164 : vector<4xf32> to vector<4x1xf32>
    %cst_75 = arith.constant 3.200000e+01 : f32
    %166 = vector.broadcast %cst_75 : f32 to vector<4x1xf32>
    %167 = arith.divf %165, %166 : vector<4x1xf32>
    %cst_76 = arith.constant 9.99999974E-6 : f32
    %168 = vector.broadcast %cst_76 : f32 to vector<4x1xf32>
    %169 = arith.addf %167, %168 : vector<4x1xf32>
    %170 = math.rsqrt %169 : vector<4x1xf32>
    %171 = vector.broadcast %170 : vector<4x1xf32> to vector<4x32xf32>
    %172 = arith.mulf %162, %171 : vector<4x32xf32>
    %173 = vector.broadcast %154 : vector<1x32xf32> to vector<4x32xf32>
    %174 = arith.mulf %172, %173 : vector<4x32xf32>
    %175 = vector.broadcast %156 : vector<1x32xf32> to vector<4x32xf32>
    %176 = arith.addf %174, %175 : vector<4x32xf32>
    %c1 = arith.constant 1 : index
    %c0_77 = arith.constant 0 : index
    %c0_78 = arith.constant 0 : index
    %177 = vector.load %arg4[%c1, %c0_77, %c0_78] : memref<2x32x96xbf16, #tpu.memory_space<vmem>>, vector<1x32x96xbf16>
    %178 = vector.shape_cast %177 : vector<1x32x96xbf16> to vector<32x96xbf16>
    %179 = arith.truncf %176 : vector<4x32xf32> to vector<4x32xbf16>
    %cst_79 = arith.constant dense<0.000000e+00> : vector<4x96xf32>
    %180 = tpu.matmul %179, %178, %cst_79 {dimension_numbers = #tpu.dot_dimension_numbers<[1], [0], [0], [1], [0, 0, 1, 1], [], []>} : vector<4x32xbf16>, vector<32x96xbf16>, vector<4x96xf32> -> vector<4x96xf32>
    %c1_80 = arith.constant 1 : index
    %c0_81 = arith.constant 0 : index
    %c0_82 = arith.constant 0 : index
    %181 = vector.load %arg5[%c1_80, %c0_81, %c0_82] : memref<2x1x96xf32, #tpu.memory_space<vmem>>, vector<1x1x96xf32>
    %182 = vector.shape_cast %181 : vector<1x1x96xf32> to vector<1x96xf32>
    %183 = vector.broadcast %182 : vector<1x96xf32> to vector<4x96xf32>
    %184 = arith.addf %180, %183 : vector<4x96xf32>
    %185 = vector.extract_strided_slice %184 {offsets = [0, 0], sizes = [4, 8], strides = [1, 1]} : vector<4x96xf32> to vector<4x8xf32>
    %186 = vector.extract_strided_slice %184 {offsets = [0, 32], sizes = [4, 8], strides = [1, 1]} : vector<4x96xf32> to vector<4x8xf32>
    %187 = vector.extract_strided_slice %184 {offsets = [0, 64], sizes = [4, 8], strides = [1, 1]} : vector<4x96xf32> to vector<4x8xf32>
    %188 = arith.truncf %185 : vector<4x8xf32> to vector<4x8xbf16>
    %189 = arith.truncf %186 : vector<4x8xf32> to vector<4x8xbf16>
    %cst_83 = arith.constant dense<0.000000e+00> : vector<4x4xf32>
    %190 = tpu.matmul %188, %189, %cst_83 {dimension_numbers = #tpu.dot_dimension_numbers<[1], [1], [0], [0], [0, 0, 1, 0], [], []>} : vector<4x8xbf16>, vector<4x8xbf16>, vector<4x4xf32> -> vector<4x4xf32>
    %cst_84 = arith.constant 0.353553385 : f32
    %191 = vector.broadcast %cst_84 : f32 to vector<4x4xf32>
    %192 = arith.mulf %190, %191 : vector<4x4xf32>
    %cst_85 = arith.constant dense<0xFF800000> : vector<4xf32>
    %193 = vector.multi_reduction <maximumf>, %192, %cst_85 [1] : vector<4x4xf32> to vector<4xf32>
    %194 = vector.shape_cast %193 : vector<4xf32> to vector<4x1xf32>
    %195 = vector.broadcast %194 : vector<4x1xf32> to vector<4x4xf32>
    %196 = arith.subf %192, %195 : vector<4x4xf32>
    %197 = math.exp %196 : vector<4x4xf32>
    %cst_86 = arith.constant dense<0.000000e+00> : vector<4xf32>
    %198 = vector.multi_reduction <add>, %197, %cst_86 [1] : vector<4x4xf32> to vector<4xf32>
    %199 = vector.shape_cast %198 : vector<4xf32> to vector<4x1xf32>
    %200 = tpu.reciprocal %199 {approx = true} : vector<4x1xf32> -> vector<4x1xf32>
    %201 = vector.broadcast %200 : vector<4x1xf32> to vector<4x4xf32>
    %202 = arith.mulf %197, %201 : vector<4x4xf32>
    %203 = arith.truncf %202 : vector<4x4xf32> to vector<4x4xbf16>
    %204 = arith.truncf %187 : vector<4x8xf32> to vector<4x8xbf16>
    %cst_87 = arith.constant dense<0.000000e+00> : vector<4x8xf32>
    %205 = tpu.matmul %203, %204, %cst_87 {dimension_numbers = #tpu.dot_dimension_numbers<[1], [0], [0], [1], [0, 0, 1, 1], [], []>} : vector<4x4xbf16>, vector<4x8xbf16>, vector<4x8xf32> -> vector<4x8xf32>
    %206 = vector.extract_strided_slice %184 {offsets = [0, 8], sizes = [4, 8], strides = [1, 1]} : vector<4x96xf32> to vector<4x8xf32>
    %207 = vector.extract_strided_slice %184 {offsets = [0, 40], sizes = [4, 8], strides = [1, 1]} : vector<4x96xf32> to vector<4x8xf32>
    %208 = vector.extract_strided_slice %184 {offsets = [0, 72], sizes = [4, 8], strides = [1, 1]} : vector<4x96xf32> to vector<4x8xf32>
    %209 = arith.truncf %206 : vector<4x8xf32> to vector<4x8xbf16>
    %210 = arith.truncf %207 : vector<4x8xf32> to vector<4x8xbf16>
    %cst_88 = arith.constant dense<0.000000e+00> : vector<4x4xf32>
    %211 = tpu.matmul %209, %210, %cst_88 {dimension_numbers = #tpu.dot_dimension_numbers<[1], [1], [0], [0], [0, 0, 1, 0], [], []>} : vector<4x8xbf16>, vector<4x8xbf16>, vector<4x4xf32> -> vector<4x4xf32>
    %cst_89 = arith.constant 0.353553385 : f32
    %212 = vector.broadcast %cst_89 : f32 to vector<4x4xf32>
    %213 = arith.mulf %211, %212 : vector<4x4xf32>
    %cst_90 = arith.constant dense<0xFF800000> : vector<4xf32>
    %214 = vector.multi_reduction <maximumf>, %213, %cst_90 [1] : vector<4x4xf32> to vector<4xf32>
    %215 = vector.shape_cast %214 : vector<4xf32> to vector<4x1xf32>
    %216 = vector.broadcast %215 : vector<4x1xf32> to vector<4x4xf32>
    %217 = arith.subf %213, %216 : vector<4x4xf32>
    %218 = math.exp %217 : vector<4x4xf32>
    %cst_91 = arith.constant dense<0.000000e+00> : vector<4xf32>
    %219 = vector.multi_reduction <add>, %218, %cst_91 [1] : vector<4x4xf32> to vector<4xf32>
    %220 = vector.shape_cast %219 : vector<4xf32> to vector<4x1xf32>
    %221 = tpu.reciprocal %220 {approx = true} : vector<4x1xf32> -> vector<4x1xf32>
    %222 = vector.broadcast %221 : vector<4x1xf32> to vector<4x4xf32>
    %223 = arith.mulf %218, %222 : vector<4x4xf32>
    %224 = arith.truncf %223 : vector<4x4xf32> to vector<4x4xbf16>
    %225 = arith.truncf %208 : vector<4x8xf32> to vector<4x8xbf16>
    %cst_92 = arith.constant dense<0.000000e+00> : vector<4x8xf32>
    %226 = tpu.matmul %224, %225, %cst_92 {dimension_numbers = #tpu.dot_dimension_numbers<[1], [0], [0], [1], [0, 0, 1, 1], [], []>} : vector<4x4xbf16>, vector<4x8xbf16>, vector<4x8xf32> -> vector<4x8xf32>
    %227 = vector.extract_strided_slice %184 {offsets = [0, 16], sizes = [4, 8], strides = [1, 1]} : vector<4x96xf32> to vector<4x8xf32>
    %228 = vector.extract_strided_slice %184 {offsets = [0, 48], sizes = [4, 8], strides = [1, 1]} : vector<4x96xf32> to vector<4x8xf32>
    %229 = vector.extract_strided_slice %184 {offsets = [0, 80], sizes = [4, 8], strides = [1, 1]} : vector<4x96xf32> to vector<4x8xf32>
    %230 = arith.truncf %227 : vector<4x8xf32> to vector<4x8xbf16>
    %231 = arith.truncf %228 : vector<4x8xf32> to vector<4x8xbf16>
    %cst_93 = arith.constant dense<0.000000e+00> : vector<4x4xf32>
    %232 = tpu.matmul %230, %231, %cst_93 {dimension_numbers = #tpu.dot_dimension_numbers<[1], [1], [0], [0], [0, 0, 1, 0], [], []>} : vector<4x8xbf16>, vector<4x8xbf16>, vector<4x4xf32> -> vector<4x4xf32>
    %cst_94 = arith.constant 0.353553385 : f32
    %233 = vector.broadcast %cst_94 : f32 to vector<4x4xf32>
    %234 = arith.mulf %232, %233 : vector<4x4xf32>
    %cst_95 = arith.constant dense<0xFF800000> : vector<4xf32>
    %235 = vector.multi_reduction <maximumf>, %234, %cst_95 [1] : vector<4x4xf32> to vector<4xf32>
    %236 = vector.shape_cast %235 : vector<4xf32> to vector<4x1xf32>
    %237 = vector.broadcast %236 : vector<4x1xf32> to vector<4x4xf32>
    %238 = arith.subf %234, %237 : vector<4x4xf32>
    %239 = math.exp %238 : vector<4x4xf32>
    %cst_96 = arith.constant dense<0.000000e+00> : vector<4xf32>
    %240 = vector.multi_reduction <add>, %239, %cst_96 [1] : vector<4x4xf32> to vector<4xf32>
    %241 = vector.shape_cast %240 : vector<4xf32> to vector<4x1xf32>
    %242 = tpu.reciprocal %241 {approx = true} : vector<4x1xf32> -> vector<4x1xf32>
    %243 = vector.broadcast %242 : vector<4x1xf32> to vector<4x4xf32>
    %244 = arith.mulf %239, %243 : vector<4x4xf32>
    %245 = arith.truncf %244 : vector<4x4xf32> to vector<4x4xbf16>
    %246 = arith.truncf %229 : vector<4x8xf32> to vector<4x8xbf16>
    %cst_97 = arith.constant dense<0.000000e+00> : vector<4x8xf32>
    %247 = tpu.matmul %245, %246, %cst_97 {dimension_numbers = #tpu.dot_dimension_numbers<[1], [0], [0], [1], [0, 0, 1, 1], [], []>} : vector<4x4xbf16>, vector<4x8xbf16>, vector<4x8xf32> -> vector<4x8xf32>
    %248 = vector.extract_strided_slice %184 {offsets = [0, 24], sizes = [4, 8], strides = [1, 1]} : vector<4x96xf32> to vector<4x8xf32>
    %249 = vector.extract_strided_slice %184 {offsets = [0, 56], sizes = [4, 8], strides = [1, 1]} : vector<4x96xf32> to vector<4x8xf32>
    %250 = vector.extract_strided_slice %184 {offsets = [0, 88], sizes = [4, 8], strides = [1, 1]} : vector<4x96xf32> to vector<4x8xf32>
    %251 = arith.truncf %248 : vector<4x8xf32> to vector<4x8xbf16>
    %252 = arith.truncf %249 : vector<4x8xf32> to vector<4x8xbf16>
    %cst_98 = arith.constant dense<0.000000e+00> : vector<4x4xf32>
    %253 = tpu.matmul %251, %252, %cst_98 {dimension_numbers = #tpu.dot_dimension_numbers<[1], [1], [0], [0], [0, 0, 1, 0], [], []>} : vector<4x8xbf16>, vector<4x8xbf16>, vector<4x4xf32> -> vector<4x4xf32>
    %cst_99 = arith.constant 0.353553385 : f32
    %254 = vector.broadcast %cst_99 : f32 to vector<4x4xf32>
    %255 = arith.mulf %253, %254 : vector<4x4xf32>
    %cst_100 = arith.constant dense<0xFF800000> : vector<4xf32>
    %256 = vector.multi_reduction <maximumf>, %255, %cst_100 [1] : vector<4x4xf32> to vector<4xf32>
    %257 = vector.shape_cast %256 : vector<4xf32> to vector<4x1xf32>
    %258 = vector.broadcast %257 : vector<4x1xf32> to vector<4x4xf32>
    %259 = arith.subf %255, %258 : vector<4x4xf32>
    %260 = math.exp %259 : vector<4x4xf32>
    %cst_101 = arith.constant dense<0.000000e+00> : vector<4xf32>
    %261 = vector.multi_reduction <add>, %260, %cst_101 [1] : vector<4x4xf32> to vector<4xf32>
    %262 = vector.shape_cast %261 : vector<4xf32> to vector<4x1xf32>
    %263 = tpu.reciprocal %262 {approx = true} : vector<4x1xf32> -> vector<4x1xf32>
    %264 = vector.broadcast %263 : vector<4x1xf32> to vector<4x4xf32>
    %265 = arith.mulf %260, %264 : vector<4x4xf32>
    %266 = arith.truncf %265 : vector<4x4xf32> to vector<4x4xbf16>
    %267 = arith.truncf %250 : vector<4x8xf32> to vector<4x8xbf16>
    %cst_102 = arith.constant dense<0.000000e+00> : vector<4x8xf32>
    %268 = tpu.matmul %266, %267, %cst_102 {dimension_numbers = #tpu.dot_dimension_numbers<[1], [0], [0], [1], [0, 0, 1, 1], [], []>} : vector<4x4xbf16>, vector<4x8xbf16>, vector<4x8xf32> -> vector<4x8xf32>
    %269 = tpu.concatenate %205, %226, %247, %268 in 1 : vector<4x8xf32>, vector<4x8xf32>, vector<4x8xf32>, vector<4x8xf32> -> vector<4x32xf32>
    %c1_103 = arith.constant 1 : index
    %c0_104 = arith.constant 0 : index
    %c0_105 = arith.constant 0 : index
    %270 = vector.load %arg6[%c1_103, %c0_104, %c0_105] : memref<2x32x32xbf16, #tpu.memory_space<vmem>>, vector<1x32x32xbf16>
    %271 = vector.shape_cast %270 : vector<1x32x32xbf16> to vector<32x32xbf16>
    %272 = arith.truncf %269 : vector<4x32xf32> to vector<4x32xbf16>
    %cst_106 = arith.constant dense<0.000000e+00> : vector<4x32xf32>
    %273 = tpu.matmul %272, %271, %cst_106 {dimension_numbers = #tpu.dot_dimension_numbers<[1], [0], [0], [1], [0, 0, 1, 1], [], []>} : vector<4x32xbf16>, vector<32x32xbf16>, vector<4x32xf32> -> vector<4x32xf32>
    %c1_107 = arith.constant 1 : index
    %c0_108 = arith.constant 0 : index
    %c0_109 = arith.constant 0 : index
    %274 = vector.load %arg7[%c1_107, %c0_108, %c0_109] : memref<2x1x32xf32, #tpu.memory_space<vmem>>, vector<1x1x32xf32>
    %275 = vector.shape_cast %274 : vector<1x1x32xf32> to vector<1x32xf32>
    %276 = vector.broadcast %275 : vector<1x32xf32> to vector<4x32xf32>
    %277 = arith.addf %273, %276 : vector<4x32xf32>
    %278 = arith.addf %176, %277 : vector<4x32xf32>
    %c1_110 = arith.constant 1 : index
    %c0_111 = arith.constant 0 : index
    %c0_112 = arith.constant 0 : index
    %279 = vector.load %arg12[%c1_110, %c0_111, %c0_112] : memref<2x1x32xf32, #tpu.memory_space<vmem>>, vector<1x1x32xf32>
    %280 = vector.shape_cast %279 : vector<1x1x32xf32> to vector<1x32xf32>
    %c1_113 = arith.constant 1 : index
    %c0_114 = arith.constant 0 : index
    %c0_115 = arith.constant 0 : index
    %281 = vector.load %arg13[%c1_113, %c0_114, %c0_115] : memref<2x1x32xf32, #tpu.memory_space<vmem>>, vector<1x1x32xf32>
    %282 = vector.shape_cast %281 : vector<1x1x32xf32> to vector<1x32xf32>
    %cst_116 = arith.constant dense<0.000000e+00> : vector<4xf32>
    %283 = vector.multi_reduction <add>, %278, %cst_116 [1] : vector<4x32xf32> to vector<4xf32>
    %284 = vector.shape_cast %283 : vector<4xf32> to vector<4x1xf32>
    %cst_117 = arith.constant 3.200000e+01 : f32
    %285 = vector.broadcast %cst_117 : f32 to vector<4x1xf32>
    %286 = arith.divf %284, %285 : vector<4x1xf32>
    %287 = vector.broadcast %286 : vector<4x1xf32> to vector<4x32xf32>
    %288 = arith.subf %278, %287 : vector<4x32xf32>
    %289 = arith.mulf %288, %288 : vector<4x32xf32>
    %cst_118 = arith.constant dense<0.000000e+00> : vector<4xf32>
    %290 = vector.multi_reduction <add>, %289, %cst_118 [1] : vector<4x32xf32> to vector<4xf32>
    %291 = vector.shape_cast %290 : vector<4xf32> to vector<4x1xf32>
    %cst_119 = arith.constant 3.200000e+01 : f32
    %292 = vector.broadcast %cst_119 : f32 to vector<4x1xf32>
    %293 = arith.divf %291, %292 : vector<4x1xf32>
    %cst_120 = arith.constant 9.99999974E-6 : f32
    %294 = vector.broadcast %cst_120 : f32 to vector<4x1xf32>
    %295 = arith.addf %293, %294 : vector<4x1xf32>
    %296 = math.rsqrt %295 : vector<4x1xf32>
    %297 = vector.broadcast %296 : vector<4x1xf32> to vector<4x32xf32>
    %298 = arith.mulf %288, %297 : vector<4x32xf32>
    %299 = vector.broadcast %280 : vector<1x32xf32> to vector<4x32xf32>
    %300 = arith.mulf %298, %299 : vector<4x32xf32>
    %301 = vector.broadcast %282 : vector<1x32xf32> to vector<4x32xf32>
    %302 = arith.addf %300, %301 : vector<4x32xf32>
    %c1_121 = arith.constant 1 : index
    %c0_122 = arith.constant 0 : index
    %c0_123 = arith.constant 0 : index
    %303 = vector.load %arg8[%c1_121, %c0_122, %c0_123] : memref<2x32x64xbf16, #tpu.memory_space<vmem>>, vector<1x32x64xbf16>
    %304 = vector.shape_cast %303 : vector<1x32x64xbf16> to vector<32x64xbf16>
    %305 = arith.truncf %302 : vector<4x32xf32> to vector<4x32xbf16>
    %cst_124 = arith.constant dense<0.000000e+00> : vector<4x64xf32>
    %306 = tpu.matmul %305, %304, %cst_124 {dimension_numbers = #tpu.dot_dimension_numbers<[1], [0], [0], [1], [0, 0, 1, 1], [], []>} : vector<4x32xbf16>, vector<32x64xbf16>, vector<4x64xf32> -> vector<4x64xf32>
    %c1_125 = arith.constant 1 : index
    %c0_126 = arith.constant 0 : index
    %c0_127 = arith.constant 0 : index
    %307 = vector.load %arg9[%c1_125, %c0_126, %c0_127] : memref<2x1x64xf32, #tpu.memory_space<vmem>>, vector<1x1x64xf32>
    %308 = vector.shape_cast %307 : vector<1x1x64xf32> to vector<1x64xf32>
    %309 = vector.broadcast %308 : vector<1x64xf32> to vector<4x64xf32>
    %310 = arith.addf %306, %309 : vector<4x64xf32>
    %cst_128 = arith.constant 0.000000e+00 : f32
    %311 = vector.broadcast %cst_128 : f32 to vector<4x64xf32>
    %312 = arith.maximumf %310, %311 : vector<4x64xf32>
    %c1_129 = arith.constant 1 : index
    %c0_130 = arith.constant 0 : index
    %c0_131 = arith.constant 0 : index
    %313 = vector.load %arg10[%c1_129, %c0_130, %c0_131] : memref<2x64x32xbf16, #tpu.memory_space<vmem>>, vector<1x64x32xbf16>
    %314 = vector.shape_cast %313 : vector<1x64x32xbf16> to vector<64x32xbf16>
    %315 = arith.truncf %312 : vector<4x64xf32> to vector<4x64xbf16>
    %cst_132 = arith.constant dense<0.000000e+00> : vector<4x32xf32>
    %316 = tpu.matmul %315, %314, %cst_132 {dimension_numbers = #tpu.dot_dimension_numbers<[1], [0], [0], [1], [0, 0, 1, 1], [], []>} : vector<4x64xbf16>, vector<64x32xbf16>, vector<4x32xf32> -> vector<4x32xf32>
    %c1_133 = arith.constant 1 : index
    %c0_134 = arith.constant 0 : index
    %c0_135 = arith.constant 0 : index
    %317 = vector.load %arg11[%c1_133, %c0_134, %c0_135] : memref<2x1x32xf32, #tpu.memory_space<vmem>>, vector<1x1x32xf32>
    %318 = vector.shape_cast %317 : vector<1x1x32xf32> to vector<1x32xf32>
    %319 = vector.broadcast %318 : vector<1x32xf32> to vector<4x32xf32>
    %320 = arith.addf %316, %319 : vector<4x32xf32>
    %321 = arith.addf %302, %320 : vector<4x32xf32>
    %c1_136 = arith.constant 1 : index
    %c0_137 = arith.constant 0 : index
    %c0_138 = arith.constant 0 : index
    %322 = vector.load %arg14[%c1_136, %c0_137, %c0_138] : memref<2x1x32xf32, #tpu.memory_space<vmem>>, vector<1x1x32xf32>
    %323 = vector.shape_cast %322 : vector<1x1x32xf32> to vector<1x32xf32>
    %c1_139 = arith.constant 1 : index
    %c0_140 = arith.constant 0 : index
    %c0_141 = arith.constant 0 : index
    %324 = vector.load %arg15[%c1_139, %c0_140, %c0_141] : memref<2x1x32xf32, #tpu.memory_space<vmem>>, vector<1x1x32xf32>
    %325 = vector.shape_cast %324 : vector<1x1x32xf32> to vector<1x32xf32>
    %cst_142 = arith.constant dense<0.000000e+00> : vector<4xf32>
    %326 = vector.multi_reduction <add>, %321, %cst_142 [1] : vector<4x32xf32> to vector<4xf32>
    %327 = vector.shape_cast %326 : vector<4xf32> to vector<4x1xf32>
    %cst_143 = arith.constant 3.200000e+01 : f32
    %328 = vector.broadcast %cst_143 : f32 to vector<4x1xf32>
    %329 = arith.divf %327, %328 : vector<4x1xf32>
    %330 = vector.broadcast %329 : vector<4x1xf32> to vector<4x32xf32>
    %331 = arith.subf %321, %330 : vector<4x32xf32>
    %332 = arith.mulf %331, %331 : vector<4x32xf32>
    %cst_144 = arith.constant dense<0.000000e+00> : vector<4xf32>
    %333 = vector.multi_reduction <add>, %332, %cst_144 [1] : vector<4x32xf32> to vector<4xf32>
    %334 = vector.shape_cast %333 : vector<4xf32> to vector<4x1xf32>
    %cst_145 = arith.constant 3.200000e+01 : f32
    %335 = vector.broadcast %cst_145 : f32 to vector<4x1xf32>
    %336 = arith.divf %334, %335 : vector<4x1xf32>
    %cst_146 = arith.constant 9.99999974E-6 : f32
    %337 = vector.broadcast %cst_146 : f32 to vector<4x1xf32>
    %338 = arith.addf %336, %337 : vector<4x1xf32>
    %339 = math.rsqrt %338 : vector<4x1xf32>
    %340 = vector.broadcast %339 : vector<4x1xf32> to vector<4x32xf32>
    %341 = arith.mulf %331, %340 : vector<4x32xf32>
    %342 = vector.broadcast %323 : vector<1x32xf32> to vector<4x32xf32>
    %343 = arith.mulf %341, %342 : vector<4x32xf32>
    %344 = vector.broadcast %325 : vector<1x32xf32> to vector<4x32xf32>
    %345 = arith.addf %343, %344 : vector<4x32xf32>
    %c0_147 = arith.constant 0 : index
    %c0_148 = arith.constant 0 : index
    %346 = vector.load %arg16[%c0_147, %c0_148] : memref<32x32xbf16, #tpu.memory_space<vmem>>, vector<32x32xbf16>
    %347 = arith.truncf %345 : vector<4x32xf32> to vector<4x32xbf16>
    %cst_149 = arith.constant dense<0.000000e+00> : vector<4x32xf32>
    %348 = tpu.matmul %347, %346, %cst_149 {dimension_numbers = #tpu.dot_dimension_numbers<[1], [0], [0], [1], [0, 0, 1, 1], [], []>} : vector<4x32xbf16>, vector<32x32xbf16>, vector<4x32xf32> -> vector<4x32xf32>
    %c0_150 = arith.constant 0 : index
    %c0_151 = arith.constant 0 : index
    %349 = vector.load %arg17[%c0_150, %c0_151] : memref<1x32xf32, #tpu.memory_space<vmem>>, vector<1x32xf32>
    %350 = vector.broadcast %349 : vector<1x32xf32> to vector<4x32xf32>
    %351 = arith.addf %348, %350 : vector<4x32xf32>
    %c0_152 = arith.constant 0 : index
    %c0_153 = arith.constant 0 : index
    %c0_154 = arith.constant 0 : index
    %352 = vector.load %arg18[%c0_152, %c0_153, %c0_154] : memref<1x4x32xf32, #tpu.memory_space<vmem>>, vector<1x4x32xf32>
    %353 = vector.shape_cast %352 : vector<1x4x32xf32> to vector<4x32xf32>
    %354 = vector.shape_cast %351 : vector<4x32xf32> to vector<1x4x32xf32>
    tpu.vector_store %arg18[%c0_152, %c0_153, %c0_154], %354 {strides = array<i32>} : memref<1x4x32xf32, #tpu.memory_space<vmem>>, vector<1x4x32xf32>,
    return
  }
  func.func @transform_0(%arg0: i32) -> (i32, i32, i32) {
    %c0_i32 = arith.constant 0 : i32
    %c0_i32_0 = arith.constant 0 : i32
    %c0_i32_1 = arith.constant 0 : i32
    return %arg0, %c0_i32, %c0_i32_0 : i32, i32, i32
  }
  func.func @transform_1(%arg0: i32) -> (i32, i32) {
    %c0_i32 = arith.constant 0 : i32
    %c0_i32_0 = arith.constant 0 : i32
    %c0_i32_1 = arith.constant 0 : i32
    return %c0_i32, %c0_i32_0 : i32, i32
  }
  func.func @transform_2(%arg0: i32) -> (i32, i32) {
    %c0_i32 = arith.constant 0 : i32
    %c0_i32_0 = arith.constant 0 : i32
    %c0_i32_1 = arith.constant 0 : i32
    return %c0_i32, %c0_i32_0 : i32, i32
  }
  func.func @transform_3(%arg0: i32) -> (i32, i32, i32) {
    %c0_i32 = arith.constant 0 : i32
    %c0_i32_0 = arith.constant 0 : i32
    %c0_i32_1 = arith.constant 0 : i32
    %c0_i32_2 = arith.constant 0 : i32
    return %c0_i32, %c0_i32_0, %c0_i32_1 : i32, i32, i32
  }
  func.func @transform_4(%arg0: i32) -> (i32, i32, i32) {
    %c0_i32 = arith.constant 0 : i32
    %c0_i32_0 = arith.constant 0 : i32
    %c0_i32_1 = arith.constant 0 : i32
    %c0_i32_2 = arith.constant 0 : i32
    return %c0_i32, %c0_i32_0, %c0_i32_1 : i32, i32, i32
  }
  func.func @transform_5(%arg0: i32) -> (i32, i32, i32) {
    %c0_i32 = arith.constant 0 : i32
    %c0_i32_0 = arith.constant 0 : i32
    %c0_i32_1 = arith.constant 0 : i32
    %c0_i32_2 = arith.constant 0 : i32
    return %c0_i32, %c0_i32_0, %c0_i32_1 : i32, i32, i32
  }
  func.func @transform_6(%arg0: i32) -> (i32, i32, i32) {
    %c0_i32 = arith.constant 0 : i32
    %c0_i32_0 = arith.constant 0 : i32
    %c0_i32_1 = arith.constant 0 : i32
    %c0_i32_2 = arith.constant 0 : i32
    return %c0_i32, %c0_i32_0, %c0_i32_1 : i32, i32, i32
  }
  func.func @transform_7(%arg0: i32) -> (i32, i32, i32) {
    %c0_i32 = arith.constant 0 : i32
    %c0_i32_0 = arith.constant 0 : i32
    %c0_i32_1 = arith.constant 0 : i32
    %c0_i32_2 = arith.constant 0 : i32
    return %c0_i32, %c0_i32_0, %c0_i32_1 : i32, i32, i32
  }
  func.func @transform_8(%arg0: i32) -> (i32, i32, i32) {
    %c0_i32 = arith.constant 0 : i32
    %c0_i32_0 = arith.constant 0 : i32
    %c0_i32_1 = arith.constant 0 : i32
    %c0_i32_2 = arith.constant 0 : i32
    return %c0_i32, %c0_i32_0, %c0_i32_1 : i32, i32, i32
  }
  func.func @transform_9(%arg0: i32) -> (i32, i32, i32) {
    %c0_i32 = arith.constant 0 : i32
    %c0_i32_0 = arith.constant 0 : i32
    %c0_i32_1 = arith.constant 0 : i32
    %c0_i32_2 = arith.constant 0 : i32
    return %c0_i32, %c0_i32_0, %c0_i32_1 : i32, i32, i32
  }
  func.func @transform_10(%arg0: i32) -> (i32, i32, i32) {
    %c0_i32 = arith.constant 0 : i32
    %c0_i32_0 = arith.constant 0 : i32
    %c0_i32_1 = arith.constant 0 : i32
    %c0_i32_2 = arith.constant 0 : i32
    return %c0_i32, %c0_i32_0, %c0_i32_1 : i32, i32, i32
  }
  func.func @transform_11(%arg0: i32) -> (i32, i32, i32) {
    %c0_i32 = arith.constant 0 : i32
    %c0_i32_0 = arith.constant 0 : i32
    %c0_i32_1 = arith.constant 0 : i32
    %c0_i32_2 = arith.constant 0 : i32
    return %c0_i32, %c0_i32_0, %c0_i32_1 : i32, i32, i32
  }
  func.func @transform_12(%arg0: i32) -> (i32, i32, i32) {
    %c0_i32 = arith.constant 0 : i32
    %c0_i32_0 = arith.constant 0 : i32
    %c0_i32_1 = arith.constant 0 : i32
    %c0_i32_2 = arith.constant 0 : i32
    return %c0_i32, %c0_i32_0, %c0_i32_1 : i32, i32, i32
  }
  func.func @transform_13(%arg0: i32) -> (i32, i32, i32) {
    %c0_i32 = arith.constant 0 : i32
    %c0_i32_0 = arith.constant 0 : i32
    %c0_i32_1 = arith.constant 0 : i32
    %c0_i32_2 = arith.constant 0 : i32
    return %c0_i32, %c0_i32_0, %c0_i32_1 : i32, i32, i32
  }
  func.func @transform_14(%arg0: i32) -> (i32, i32, i32) {
    %c0_i32 = arith.constant 0 : i32
    %c0_i32_0 = arith.constant 0 : i32
    %c0_i32_1 = arith.constant 0 : i32
    %c0_i32_2 = arith.constant 0 : i32
    return %c0_i32, %c0_i32_0, %c0_i32_1 : i32, i32, i32
  }
  func.func @transform_15(%arg0: i32) -> (i32, i32) {
    %c0_i32 = arith.constant 0 : i32
    %c0_i32_0 = arith.constant 0 : i32
    %c0_i32_1 = arith.constant 0 : i32
    return %c0_i32, %c0_i32_0 : i32, i32
  }
  func.func @transform_16(%arg0: i32) -> (i32, i32) {
    %c0_i32 = arith.constant 0 : i32
    %c0_i32_0 = arith.constant 0 : i32
    %c0_i32_1 = arith.constant 0 : i32
    return %c0_i32, %c0_i32_0 : i32, i32
  }
  func.func @transform_17(%arg0: i32) -> (i32, i32, i32) {
    %c0_i32 = arith.constant 0 : i32
    %c0_i32_0 = arith.constant 0 : i32
    %c0_i32_1 = arith.constant 0 : i32
    return %arg0, %c0_i32, %c0_i32_0 : i32, i32, i32
  }
}

module attributes {stable_mosaic.version = 11 : i64} {
  func.func @_transformer_kernel(%arg0: i32, %arg1: memref<1x4x32xf32, #tpu.memory_space<vmem>>, %arg2: memref<32x32xbf16, #tpu.memory_space<vmem>>, %arg3: memref<1x32xf32, #tpu.memory_space<vmem>>, %arg4: memref<2x32x96xbf16, #tpu.memory_space<vmem>>, %arg5: memref<2x1x96xf32, #tpu.memory_space<vmem>>, %arg6: memref<2x32x32xbf16, #tpu.memory_space<vmem>>, %arg7: memref<2x1x32xf32, #tpu.memory_space<vmem>>, %arg8: memref<2x32x64xbf16, #tpu.memory_space<vmem>>, %arg9: memref<2x1x64xf32, #tpu.memory_space<vmem>>, %arg10: memref<2x64x32xbf16, #tpu.memory_space<vmem>>, %arg11: memref<2x1x32xf32, #tpu.memory_space<vmem>>, %arg12: memref<2x1x32xf32, #tpu.memory_space<vmem>>, %arg13: memref<2x1x32xf32, #tpu.memory_space<vmem>>, %arg14: memref<2x1x32xf32, #tpu.memory_space<vmem>>, %arg15: memref<2x1x32xf32, #tpu.memory_space<vmem>>, %arg16: memref<32x32xbf16, #tpu.memory_space<vmem>>, %arg17: memref<1x32xf32, #tpu.memory_space<vmem>>, %arg18: memref<1x4x32xf32, #tpu.memory_space<vmem>>) attributes {dimension_semantics = [#tpu.dimension_semantics<parallel>], iteration_bounds = array<i64: 2>, scalar_prefetch = 0 : i64, scratch_operands = 0 : i64, tpu.core_type = #tpu.core_type<tc>, window_params = [{transform_indices = @transform_0, window_bounds = array<i64: 1, 4, 32>}, {pipeline_mode = #tpu.pipeline_mode<synchronous>, transform_indices = @transform_1, window_bounds = array<i64: 32, 32>}, {pipeline_mode = #tpu.pipeline_mode<synchronous>, transform_indices = @transform_2, window_bounds = array<i64: 1, 32>}, {pipeline_mode = #tpu.pipeline_mode<synchronous>, transform_indices = @transform_3, window_bounds = array<i64: 2, 32, 96>}, {pipeline_mode = #tpu.pipeline_mode<synchronous>, transform_indices = @transform_4, window_bounds = array<i64: 2, 1, 96>}, {pipeline_mode = #tpu.pipeline_mode<synchronous>, transform_indices = @transform_5, window_bounds = array<i64: 2, 32, 32>}, {pipeline_mode = #tpu.pipeline_mode<synchronous>, transform_indices = @transform_6, window_bounds = array<i64: 2, 1, 32>}, {pipeline_mode = #tpu.pipeline_mode<synchronous>, transform_indices = @transform_7, window_bounds = array<i64: 2, 32, 64>}, {pipeline_mode = #tpu.pipeline_mode<synchronous>, transform_indices = @transform_8, window_bounds = array<i64: 2, 1, 64>}, {pipeline_mode = #tpu.pipeline_mode<synchronous>, transform_indices = @transform_9, window_bounds = array<i64: 2, 64, 32>}, {pipeline_mode = #tpu.pipeline_mode<synchronous>, transform_indices = @transform_10, window_bounds = array<i64: 2, 1, 32>}, {pipeline_mode = #tpu.pipeline_mode<synchronous>, transform_indices = @transform_11, window_bounds = array<i64: 2, 1, 32>}, {pipeline_mode = #tpu.pipeline_mode<synchronous>, transform_indices = @transform_12, window_bounds = array<i64: 2, 1, 32>}, {pipeline_mode = #tpu.pipeline_mode<synchronous>, transform_indices = @transform_13, window_bounds = array<i64: 2, 1, 32>}, {pipeline_mode = #tpu.pipeline_mode<synchronous>, transform_indices = @transform_14, window_bounds = array<i64: 2, 1, 32>}, {pipeline_mode = #tpu.pipeline_mode<synchronous>, transform_indices = @transform_15, window_bounds = array<i64: 32, 32>}, {pipeline_mode = #tpu.pipeline_mode<synchronous>, transform_indices = @transform_16, window_bounds = array<i64: 1, 32>}, {transform_indices = @transform_17, window_bounds = array<i64: 1, 4, 32>}]} {
    %c0 = arith.constant 0 : index
    %c0_0 = arith.constant 0 : index
    %c0_1 = arith.constant 0 : index
    %0 = vector.load %arg1[%c0, %c0_0, %c0_1] : memref<1x4x32xf32, #tpu.memory_space<vmem>>, vector<1x4x32xf32>
    %1 = vector.shape_cast %0 : vector<1x4x32xf32> to vector<4x32xf32>
    %c0_2 = arith.constant 0 : index
    %c0_3 = arith.constant 0 : index
    %2 = vector.load %arg2[%c0_2, %c0_3] : memref<32x32xbf16, #tpu.memory_space<vmem>>, vector<32x32xbf16>
    %3 = arith.truncf %1 : vector<4x32xf32> to vector<4x32xbf16>
    %cst = arith.constant dense<0.000000e+00> : vector<4x32xf32>
    %4 = tpu.matmul %3, %2, %cst {dimension_numbers = #tpu.dot_dimension_numbers<[1], [0], [0], [1], [0, 0, 1, 1], [], []>} : vector<4x32xbf16>, vector<32x32xbf16>, vector<4x32xf32> -> vector<4x32xf32>
    %c0_4 = arith.constant 0 : index
    %c0_5 = arith.constant 0 : index
    %5 = vector.load %arg3[%c0_4, %c0_5] : memref<1x32xf32, #tpu.memory_space<vmem>>, vector<1x32xf32>
    %6 = vector.broadcast %5 : vector<1x32xf32> to vector<4x32xf32>
    %7 = arith.addf %4, %6 : vector<4x32xf32>
    %c0_6 = arith.constant 0 : index
    %c0_7 = arith.constant 0 : index
    %c0_8 = arith.constant 0 : index
    %8 = vector.load %arg4[%c0_6, %c0_7, %c0_8] : memref<2x32x96xbf16, #tpu.memory_space<vmem>>, vector<1x32x96xbf16>
    %9 = vector.shape_cast %8 : vector<1x32x96xbf16> to vector<32x96xbf16>
    %10 = arith.truncf %7 : vector<4x32xf32> to vector<4x32xbf16>
    %cst_9 = arith.constant dense<0.000000e+00> : vector<4x96xf32>
    %11 = tpu.matmul %10, %9, %cst_9 {dimension_numbers = #tpu.dot_dimension_numbers<[1], [0], [0], [1], [0, 0, 1, 1], [], []>} : vector<4x32xbf16>, vector<32x96xbf16>, vector<4x96xf32> -> vector<4x96xf32>
    %c0_10 = arith.constant 0 : index
    %c0_11 = arith.constant 0 : index
    %c0_12 = arith.constant 0 : index
    %12 = vector.load %arg5[%c0_10, %c0_11, %c0_12] : memref<2x1x96xf32, #tpu.memory_space<vmem>>, vector<1x1x96xf32>
    %13 = vector.shape_cast %12 : vector<1x1x96xf32> to vector<1x96xf32>
    %14 = vector.broadcast %13 : vector<1x96xf32> to vector<4x96xf32>
    %15 = arith.addf %11, %14 : vector<4x96xf32>
    %16 = vector.extract_strided_slice %15 {offsets = [0, 0], sizes = [4, 8], strides = [1, 1]} : vector<4x96xf32> to vector<4x8xf32>
    %17 = vector.extract_strided_slice %15 {offsets = [0, 32], sizes = [4, 8], strides = [1, 1]} : vector<4x96xf32> to vector<4x8xf32>
    %18 = vector.extract_strided_slice %15 {offsets = [0, 64], sizes = [4, 8], strides = [1, 1]} : vector<4x96xf32> to vector<4x8xf32>
    %19 = arith.truncf %16 : vector<4x8xf32> to vector<4x8xbf16>
    %20 = arith.truncf %17 : vector<4x8xf32> to vector<4x8xbf16>
    %cst_13 = arith.constant dense<0.000000e+00> : vector<4x4xf32>
    %21 = tpu.matmul %19, %20, %cst_13 {dimension_numbers = #tpu.dot_dimension_numbers<[1], [1], [0], [0], [0, 0, 1, 0], [], []>} : vector<4x8xbf16>, vector<4x8xbf16>, vector<4x4xf32> -> vector<4x4xf32>
    %cst_14 = arith.constant 0.353553385 : f32
    %22 = vector.broadcast %cst_14 : f32 to vector<4x4xf32>
    %23 = arith.mulf %21, %22 : vector<4x4xf32>
    %cst_15 = arith.constant dense<0xFF800000> : vector<4xf32>
    %24 = vector.multi_reduction <maximumf>, %23, %cst_15 [1] : vector<4x4xf32> to vector<4xf32>
    %25 = vector.shape_cast %24 : vector<4xf32> to vector<4x1xf32>
    %26 = vector.broadcast %25 : vector<4x1xf32> to vector<4x4xf32>
    %27 = arith.subf %23, %26 : vector<4x4xf32>
    %28 = math.exp %27 : vector<4x4xf32>
    %cst_16 = arith.constant dense<0.000000e+00> : vector<4xf32>
    %29 = vector.multi_reduction <add>, %28, %cst_16 [1] : vector<4x4xf32> to vector<4xf32>
    %30 = vector.shape_cast %29 : vector<4xf32> to vector<4x1xf32>
    %31 = tpu.reciprocal %30 {approx = true} : vector<4x1xf32> -> vector<4x1xf32>
    %32 = vector.broadcast %31 : vector<4x1xf32> to vector<4x4xf32>
    %33 = arith.mulf %28, %32 : vector<4x4xf32>
    %34 = arith.truncf %33 : vector<4x4xf32> to vector<4x4xbf16>
    %35 = arith.truncf %18 : vector<4x8xf32> to vector<4x8xbf16>
    %cst_17 = arith.constant dense<0.000000e+00> : vector<4x8xf32>
    %36 = tpu.matmul %34, %35, %cst_17 {dimension_numbers = #tpu.dot_dimension_numbers<[1], [0], [0], [1], [0, 0, 1, 1], [], []>} : vector<4x4xbf16>, vector<4x8xbf16>, vector<4x8xf32> -> vector<4x8xf32>
    %37 = vector.extract_strided_slice %15 {offsets = [0, 8], sizes = [4, 8], strides = [1, 1]} : vector<4x96xf32> to vector<4x8xf32>
    %38 = vector.extract_strided_slice %15 {offsets = [0, 40], sizes = [4, 8], strides = [1, 1]} : vector<4x96xf32> to vector<4x8xf32>
    %39 = vector.extract_strided_slice %15 {offsets = [0, 72], sizes = [4, 8], strides = [1, 1]} : vector<4x96xf32> to vector<4x8xf32>
    %40 = arith.truncf %37 : vector<4x8xf32> to vector<4x8xbf16>
    %41 = arith.truncf %38 : vector<4x8xf32> to vector<4x8xbf16>
    %cst_18 = arith.constant dense<0.000000e+00> : vector<4x4xf32>
    %42 = tpu.matmul %40, %41, %cst_18 {dimension_numbers = #tpu.dot_dimension_numbers<[1], [1], [0], [0], [0, 0, 1, 0], [], []>} : vector<4x8xbf16>, vector<4x8xbf16>, vector<4x4xf32> -> vector<4x4xf32>
    %cst_19 = arith.constant 0.353553385 : f32
    %43 = vector.broadcast %cst_19 : f32 to vector<4x4xf32>
    %44 = arith.mulf %42, %43 : vector<4x4xf32>
    %cst_20 = arith.constant dense<0xFF800000> : vector<4xf32>
    %45 = vector.multi_reduction <maximumf>, %44, %cst_20 [1] : vector<4x4xf32> to vector<4xf32>
    %46 = vector.shape_cast %45 : vector<4xf32> to vector<4x1xf32>
    %47 = vector.broadcast %46 : vector<4x1xf32> to vector<4x4xf32>
    %48 = arith.subf %44, %47 : vector<4x4xf32>
    %49 = math.exp %48 : vector<4x4xf32>
    %cst_21 = arith.constant dense<0.000000e+00> : vector<4xf32>
    %50 = vector.multi_reduction <add>, %49, %cst_21 [1] : vector<4x4xf32> to vector<4xf32>
    %51 = vector.shape_cast %50 : vector<4xf32> to vector<4x1xf32>
    %52 = tpu.reciprocal %51 {approx = true} : vector<4x1xf32> -> vector<4x1xf32>
    %53 = vector.broadcast %52 : vector<4x1xf32> to vector<4x4xf32>
    %54 = arith.mulf %49, %53 : vector<4x4xf32>
    %55 = arith.truncf %54 : vector<4x4xf32> to vector<4x4xbf16>
    %56 = arith.truncf %39 : vector<4x8xf32> to vector<4x8xbf16>
    %cst_22 = arith.constant dense<0.000000e+00> : vector<4x8xf32>
    %57 = tpu.matmul %55, %56, %cst_22 {dimension_numbers = #tpu.dot_dimension_numbers<[1], [0], [0], [1], [0, 0, 1, 1], [], []>} : vector<4x4xbf16>, vector<4x8xbf16>, vector<4x8xf32> -> vector<4x8xf32>
    %58 = vector.extract_strided_slice %15 {offsets = [0, 16], sizes = [4, 8], strides = [1, 1]} : vector<4x96xf32> to vector<4x8xf32>
    %59 = vector.extract_strided_slice %15 {offsets = [0, 48], sizes = [4, 8], strides = [1, 1]} : vector<4x96xf32> to vector<4x8xf32>
    %60 = vector.extract_strided_slice %15 {offsets = [0, 80], sizes = [4, 8], strides = [1, 1]} : vector<4x96xf32> to vector<4x8xf32>
    %61 = arith.truncf %58 : vector<4x8xf32> to vector<4x8xbf16>
    %62 = arith.truncf %59 : vector<4x8xf32> to vector<4x8xbf16>
    %cst_23 = arith.constant dense<0.000000e+00> : vector<4x4xf32>
    %63 = tpu.matmul %61, %62, %cst_23 {dimension_numbers = #tpu.dot_dimension_numbers<[1], [1], [0], [0], [0, 0, 1, 0], [], []>} : vector<4x8xbf16>, vector<4x8xbf16>, vector<4x4xf32> -> vector<4x4xf32>
    %cst_24 = arith.constant 0.353553385 : f32
    %64 = vector.broadcast %cst_24 : f32 to vector<4x4xf32>
    %65 = arith.mulf %63, %64 : vector<4x4xf32>
    %cst_25 = arith.constant dense<0xFF800000> : vector<4xf32>
    %66 = vector.multi_reduction <maximumf>, %65, %cst_25 [1] : vector<4x4xf32> to vector<4xf32>
    %67 = vector.shape_cast %66 : vector<4xf32> to vector<4x1xf32>
    %68 = vector.broadcast %67 : vector<4x1xf32> to vector<4x4xf32>
    %69 = arith.subf %65, %68 : vector<4x4xf32>
    %70 = math.exp %69 : vector<4x4xf32>
    %cst_26 = arith.constant dense<0.000000e+00> : vector<4xf32>
    %71 = vector.multi_reduction <add>, %70, %cst_26 [1] : vector<4x4xf32> to vector<4xf32>
    %72 = vector.shape_cast %71 : vector<4xf32> to vector<4x1xf32>
    %73 = tpu.reciprocal %72 {approx = true} : vector<4x1xf32> -> vector<4x1xf32>
    %74 = vector.broadcast %73 : vector<4x1xf32> to vector<4x4xf32>
    %75 = arith.mulf %70, %74 : vector<4x4xf32>
    %76 = arith.truncf %75 : vector<4x4xf32> to vector<4x4xbf16>
    %77 = arith.truncf %60 : vector<4x8xf32> to vector<4x8xbf16>
    %cst_27 = arith.constant dense<0.000000e+00> : vector<4x8xf32>
    %78 = tpu.matmul %76, %77, %cst_27 {dimension_numbers = #tpu.dot_dimension_numbers<[1], [0], [0], [1], [0, 0, 1, 1], [], []>} : vector<4x4xbf16>, vector<4x8xbf16>, vector<4x8xf32> -> vector<4x8xf32>
    %79 = vector.extract_strided_slice %15 {offsets = [0, 24], sizes = [4, 8], strides = [1, 1]} : vector<4x96xf32> to vector<4x8xf32>
    %80 = vector.extract_strided_slice %15 {offsets = [0, 56], sizes = [4, 8], strides = [1, 1]} : vector<4x96xf32> to vector<4x8xf32>
    %81 = vector.extract_strided_slice %15 {offsets = [0, 88], sizes = [4, 8], strides = [1, 1]} : vector<4x96xf32> to vector<4x8xf32>
    %82 = arith.truncf %79 : vector<4x8xf32> to vector<4x8xbf16>
    %83 = arith.truncf %80 : vector<4x8xf32> to vector<4x8xbf16>
    %cst_28 = arith.constant dense<0.000000e+00> : vector<4x4xf32>
    %84 = tpu.matmul %82, %83, %cst_28 {dimension_numbers = #tpu.dot_dimension_numbers<[1], [1], [0], [0], [0, 0, 1, 0], [], []>} : vector<4x8xbf16>, vector<4x8xbf16>, vector<4x4xf32> -> vector<4x4xf32>
    %cst_29 = arith.constant 0.353553385 : f32
    %85 = vector.broadcast %cst_29 : f32 to vector<4x4xf32>
    %86 = arith.mulf %84, %85 : vector<4x4xf32>
    %cst_30 = arith.constant dense<0xFF800000> : vector<4xf32>
    %87 = vector.multi_reduction <maximumf>, %86, %cst_30 [1] : vector<4x4xf32> to vector<4xf32>
    %88 = vector.shape_cast %87 : vector<4xf32> to vector<4x1xf32>
    %89 = vector.broadcast %88 : vector<4x1xf32> to vector<4x4xf32>
    %90 = arith.subf %86, %89 : vector<4x4xf32>
    %91 = math.exp %90 : vector<4x4xf32>
    %cst_31 = arith.constant dense<0.000000e+00> : vector<4xf32>
    %92 = vector.multi_reduction <add>, %91, %cst_31 [1] : vector<4x4xf32> to vector<4xf32>
    %93 = vector.shape_cast %92 : vector<4xf32> to vector<4x1xf32>
    %94 = tpu.reciprocal %93 {approx = true} : vector<4x1xf32> -> vector<4x1xf32>
    %95 = vector.broadcast %94 : vector<4x1xf32> to vector<4x4xf32>
    %96 = arith.mulf %91, %95 : vector<4x4xf32>
    %97 = arith.truncf %96 : vector<4x4xf32> to vector<4x4xbf16>
    %98 = arith.truncf %81 : vector<4x8xf32> to vector<4x8xbf16>
    %cst_32 = arith.constant dense<0.000000e+00> : vector<4x8xf32>
    %99 = tpu.matmul %97, %98, %cst_32 {dimension_numbers = #tpu.dot_dimension_numbers<[1], [0], [0], [1], [0, 0, 1, 1], [], []>} : vector<4x4xbf16>, vector<4x8xbf16>, vector<4x8xf32> -> vector<4x8xf32>
    %100 = tpu.concatenate %36, %57, %78, %99 in 1 : vector<4x8xf32>, vector<4x8xf32>, vector<4x8xf32>, vector<4x8xf32> -> vector<4x32xf32>
    %c0_33 = arith.constant 0 : index
    %c0_34 = arith.constant 0 : index
    %c0_35 = arith.constant 0 : index
    %101 = vector.load %arg6[%c0_33, %c0_34, %c0_35] : memref<2x32x32xbf16, #tpu.memory_space<vmem>>, vector<1x32x32xbf16>
    %102 = vector.shape_cast %101 : vector<1x32x32xbf16> to vector<32x32xbf16>
    %103 = arith.truncf %100 : vector<4x32xf32> to vector<4x32xbf16>
    %cst_36 = arith.constant dense<0.000000e+00> : vector<4x32xf32>
    %104 = tpu.matmul %103, %102, %cst_36 {dimension_numbers = #tpu.dot_dimension_numbers<[1], [0], [0], [1], [0, 0, 1, 1], [], []>} : vector<4x32xbf16>, vector<32x32xbf16>, vector<4x32xf32> -> vector<4x32xf32>
    %c0_37 = arith.constant 0 : index
    %c0_38 = arith.constant 0 : index
    %c0_39 = arith.constant 0 : index
    %105 = vector.load %arg7[%c0_37, %c0_38, %c0_39] : memref<2x1x32xf32, #tpu.memory_space<vmem>>, vector<1x1x32xf32>
    %106 = vector.shape_cast %105 : vector<1x1x32xf32> to vector<1x32xf32>
    %107 = vector.broadcast %106 : vector<1x32xf32> to vector<4x32xf32>
    %108 = arith.addf %104, %107 : vector<4x32xf32>
    %109 = arith.addf %7, %108 : vector<4x32xf32>
    %c0_40 = arith.constant 0 : index
    %c0_41 = arith.constant 0 : index
    %c0_42 = arith.constant 0 : index
    %110 = vector.load %arg12[%c0_40, %c0_41, %c0_42] : memref<2x1x32xf32, #tpu.memory_space<vmem>>, vector<1x1x32xf32>
    %111 = vector.shape_cast %110 : vector<1x1x32xf32> to vector<1x32xf32>
    %c0_43 = arith.constant 0 : index
    %c0_44 = arith.constant 0 : index
    %c0_45 = arith.constant 0 : index
    %112 = vector.load %arg13[%c0_43, %c0_44, %c0_45] : memref<2x1x32xf32, #tpu.memory_space<vmem>>, vector<1x1x32xf32>
    %113 = vector.shape_cast %112 : vector<1x1x32xf32> to vector<1x32xf32>
    %cst_46 = arith.constant dense<0.000000e+00> : vector<4xf32>
    %114 = vector.multi_reduction <add>, %109, %cst_46 [1] : vector<4x32xf32> to vector<4xf32>
    %115 = vector.shape_cast %114 : vector<4xf32> to vector<4x1xf32>
    %cst_47 = arith.constant 3.200000e+01 : f32
    %116 = vector.broadcast %cst_47 : f32 to vector<4x1xf32>
    %117 = arith.divf %115, %116 : vector<4x1xf32>
    %118 = vector.broadcast %117 : vector<4x1xf32> to vector<4x32xf32>
    %119 = arith.subf %109, %118 : vector<4x32xf32>
    %120 = arith.mulf %119, %119 : vector<4x32xf32>
    %cst_48 = arith.constant dense<0.000000e+00> : vector<4xf32>
    %121 = vector.multi_reduction <add>, %120, %cst_48 [1] : vector<4x32xf32> to vector<4xf32>
    %122 = vector.shape_cast %121 : vector<4xf32> to vector<4x1xf32>
    %cst_49 = arith.constant 3.200000e+01 : f32
    %123 = vector.broadcast %cst_49 : f32 to vector<4x1xf32>
    %124 = arith.divf %122, %123 : vector<4x1xf32>
    %cst_50 = arith.constant 9.99999974E-6 : f32
    %125 = vector.broadcast %cst_50 : f32 to vector<4x1xf32>
    %126 = arith.addf %124, %125 : vector<4x1xf32>
    %127 = math.rsqrt %126 : vector<4x1xf32>
    %128 = vector.broadcast %127 : vector<4x1xf32> to vector<4x32xf32>
    %129 = arith.mulf %119, %128 : vector<4x32xf32>
    %130 = vector.broadcast %111 : vector<1x32xf32> to vector<4x32xf32>
    %131 = arith.mulf %129, %130 : vector<4x32xf32>
    %132 = vector.broadcast %113 : vector<1x32xf32> to vector<4x32xf32>
    %133 = arith.addf %131, %132 : vector<4x32xf32>
    %c0_51 = arith.constant 0 : index
    %c0_52 = arith.constant 0 : index
    %c0_53 = arith.constant 0 : index
    %134 = vector.load %arg8[%c0_51, %c0_52, %c0_53] : memref<2x32x64xbf16, #tpu.memory_space<vmem>>, vector<1x32x64xbf16>
    %135 = vector.shape_cast %134 : vector<1x32x64xbf16> to vector<32x64xbf16>
    %136 = arith.truncf %133 : vector<4x32xf32> to vector<4x32xbf16>
    %cst_54 = arith.constant dense<0.000000e+00> : vector<4x64xf32>
    %137 = tpu.matmul %136, %135, %cst_54 {dimension_numbers = #tpu.dot_dimension_numbers<[1], [0], [0], [1], [0, 0, 1, 1], [], []>} : vector<4x32xbf16>, vector<32x64xbf16>, vector<4x64xf32> -> vector<4x64xf32>
    %c0_55 = arith.constant 0 : index
    %c0_56 = arith.constant 0 : index
    %c0_57 = arith.constant 0 : index
    %138 = vector.load %arg9[%c0_55, %c0_56, %c0_57] : memref<2x1x64xf32, #tpu.memory_space<vmem>>, vector<1x1x64xf32>
    %139 = vector.shape_cast %138 : vector<1x1x64xf32> to vector<1x64xf32>
    %140 = vector.broadcast %139 : vector<1x64xf32> to vector<4x64xf32>
    %141 = arith.addf %137, %140 : vector<4x64xf32>
    %cst_58 = arith.constant 0.000000e+00 : f32
    %142 = vector.broadcast %cst_58 : f32 to vector<4x64xf32>
    %143 = arith.maximumf %141, %142 : vector<4x64xf32>
    %c0_59 = arith.constant 0 : index
    %c0_60 = arith.constant 0 : index
    %c0_61 = arith.constant 0 : index
    %144 = vector.load %arg10[%c0_59, %c0_60, %c0_61] : memref<2x64x32xbf16, #tpu.memory_space<vmem>>, vector<1x64x32xbf16>
    %145 = vector.shape_cast %144 : vector<1x64x32xbf16> to vector<64x32xbf16>
    %146 = arith.truncf %143 : vector<4x64xf32> to vector<4x64xbf16>
    %cst_62 = arith.constant dense<0.000000e+00> : vector<4x32xf32>
    %147 = tpu.matmul %146, %145, %cst_62 {dimension_numbers = #tpu.dot_dimension_numbers<[1], [0], [0], [1], [0, 0, 1, 1], [], []>} : vector<4x64xbf16>, vector<64x32xbf16>, vector<4x32xf32> -> vector<4x32xf32>
    %c0_63 = arith.constant 0 : index
    %c0_64 = arith.constant 0 : index
    %c0_65 = arith.constant 0 : index
    %148 = vector.load %arg11[%c0_63, %c0_64, %c0_65] : memref<2x1x32xf32, #tpu.memory_space<vmem>>, vector<1x1x32xf32>
    %149 = vector.shape_cast %148 : vector<1x1x32xf32> to vector<1x32xf32>
    %150 = vector.broadcast %149 : vector<1x32xf32> to vector<4x32xf32>
    %151 = arith.addf %147, %150 : vector<4x32xf32>
    %152 = arith.addf %133, %151 : vector<4x32xf32>
    %c0_66 = arith.constant 0 : index
    %c0_67 = arith.constant 0 : index
    %c0_68 = arith.constant 0 : index
    %153 = vector.load %arg14[%c0_66, %c0_67, %c0_68] : memref<2x1x32xf32, #tpu.memory_space<vmem>>, vector<1x1x32xf32>
    %154 = vector.shape_cast %153 : vector<1x1x32xf32> to vector<1x32xf32>
    %c0_69 = arith.constant 0 : index
    %c0_70 = arith.constant 0 : index
    %c0_71 = arith.constant 0 : index
    %155 = vector.load %arg15[%c0_69, %c0_70, %c0_71] : memref<2x1x32xf32, #tpu.memory_space<vmem>>, vector<1x1x32xf32>
    %156 = vector.shape_cast %155 : vector<1x1x32xf32> to vector<1x32xf32>
    %cst_72 = arith.constant dense<0.000000e+00> : vector<4xf32>
    %157 = vector.multi_reduction <add>, %152, %cst_72 [1] : vector<4x32xf32> to vector<4xf32>
    %158 = vector.shape_cast %157 : vector<4xf32> to vector<4x1xf32>
    %cst_73 = arith.constant 3.200000e+01 : f32
    %159 = vector.broadcast %cst_73 : f32 to vector<4x1xf32>
    %160 = arith.divf %158, %159 : vector<4x1xf32>
    %161 = vector.broadcast %160 : vector<4x1xf32> to vector<4x32xf32>
    %162 = arith.subf %152, %161 : vector<4x32xf32>
    %163 = arith.mulf %162, %162 : vector<4x32xf32>
    %cst_74 = arith.constant dense<0.000000e+00> : vector<4xf32>
    %164 = vector.multi_reduction <add>, %163, %cst_74 [1] : vector<4x32xf32> to vector<4xf32>
    %165 = vector.shape_cast %164 : vector<4xf32> to vector<4x1xf32>
    %cst_75 = arith.constant 3.200000e+01 : f32
    %166 = vector.broadcast %cst_75 : f32 to vector<4x1xf32>
    %167 = arith.divf %165, %166 : vector<4x1xf32>
    %cst_76 = arith.constant 9.99999974E-6 : f32
    %168 = vector.broadcast %cst_76 : f32 to vector<4x1xf32>
    %169 = arith.addf %167, %168 : vector<4x1xf32>
    %170 = math.rsqrt %169 : vector<4x1xf32>
    %171 = vector.broadcast %170 : vector<4x1xf32> to vector<4x32xf32>
    %172 = arith.mulf %162, %171 : vector<4x32xf32>
    %173 = vector.broadcast %154 : vector<1x32xf32> to vector<4x32xf32>
    %174 = arith.mulf %172, %173 : vector<4x32xf32>
    %175 = vector.broadcast %156 : vector<1x32xf32> to vector<4x32xf32>
    %176 = arith.addf %174, %175 : vector<4x32xf32>
    %c1 = arith.constant 1 : index
    %c0_77 = arith.constant 0 : index
    %c0_78 = arith.constant 0 : index
    %177 = vector.load %arg4[%c1, %c0_77, %c0_78] : memref<2x32x96xbf16, #tpu.memory_space<vmem>>, vector<1x32x96xbf16>
    %178 = vector.shape_cast %177 : vector<1x32x96xbf16> to vector<32x96xbf16>
    %179 = arith.truncf %176 : vector<4x32xf32> to vector<4x32xbf16>
    %cst_79 = arith.constant dense<0.000000e+00> : vector<4x96xf32>
    %180 = tpu.matmul %179, %178, %cst_79 {dimension_numbers = #tpu.dot_dimension_numbers<[1], [0], [0], [1], [0, 0, 1, 1], [], []>} : vector<4x32xbf16>, vector<32x96xbf16>, vector<4x96xf32> -> vector<4x96xf32>
    %c1_80 = arith.constant 1 : index
    %c0_81 = arith.constant 0 : index
    %c0_82 = arith.constant 0 : index
    %181 = vector.load %arg5[%c1_80, %c0_81, %c0_82] : memref<2x1x96xf32, #tpu.memory_space<vmem>>, vector<1x1x96xf32>
    %182 = vector.shape_cast %181 : vector<1x1x96xf32> to vector<1x96xf32>
    %183 = vector.broadcast %182 : vector<1x96xf32> to vector<4x96xf32>
    %184 = arith.addf %180, %183 : vector<4x96xf32>
    %185 = vector.extract_strided_slice %184 {offsets = [0, 0], sizes = [4, 8], strides = [1, 1]} : vector<4x96xf32> to vector<4x8xf32>
    %186 = vector.extract_strided_slice %184 {offsets = [0, 32], sizes = [4, 8], strides = [1, 1]} : vector<4x96xf32> to vector<4x8xf32>
    %187 = vector.extract_strided_slice %184 {offsets = [0, 64], sizes = [4, 8], strides = [1, 1]} : vector<4x96xf32> to vector<4x8xf32>
    %188 = arith.truncf %185 : vector<4x8xf32> to vector<4x8xbf16>
    %189 = arith.truncf %186 : vector<4x8xf32> to vector<4x8xbf16>
    %cst_83 = arith.constant dense<0.000000e+00> : vector<4x4xf32>
    %190 = tpu.matmul %188, %189, %cst_83 {dimension_numbers = #tpu.dot_dimension_numbers<[1], [1], [0], [0], [0, 0, 1, 0], [], []>} : vector<4x8xbf16>, vector<4x8xbf16>, vector<4x4xf32> -> vector<4x4xf32>
    %cst_84 = arith.constant 0.353553385 : f32
    %191 = vector.broadcast %cst_84 : f32 to vector<4x4xf32>
    %192 = arith.mulf %190, %191 : vector<4x4xf32>
    %cst_85 = arith.constant dense<0xFF800000> : vector<4xf32>
    %193 = vector.multi_reduction <maximumf>, %192, %cst_85 [1] : vector<4x4xf32> to vector<4xf32>
    %194 = vector.shape_cast %193 : vector<4xf32> to vector<4x1xf32>
    %195 = vector.broadcast %194 : vector<4x1xf32> to vector<4x4xf32>
    %196 = arith.subf %192, %195 : vector<4x4xf32>
    %197 = math.exp %196 : vector<4x4xf32>
    %cst_86 = arith.constant dense<0.000000e+00> : vector<4xf32>
    %198 = vector.multi_reduction <add>, %197, %cst_86 [1] : vector<4x4xf32> to vector<4xf32>
    %199 = vector.shape_cast %198 : vector<4xf32> to vector<4x1xf32>
    %200 = tpu.reciprocal %199 {approx = true} : vector<4x1xf32> -> vector<4x1xf32>
    %201 = vector.broadcast %200 : vector<4x1xf32> to vector<4x4xf32>
    %202 = arith.mulf %197, %201 : vector<4x4xf32>
    %203 = arith.truncf %202 : vector<4x4xf32> to vector<4x4xbf16>
    %204 = arith.truncf %187 : vector<4x8xf32> to vector<4x8xbf16>
    %cst_87 = arith.constant dense<0.000000e+00> : vector<4x8xf32>
    %205 = tpu.matmul %203, %204, %cst_87 {dimension_numbers = #tpu.dot_dimension_numbers<[1], [0], [0], [1], [0, 0, 1, 1], [], []>} : vector<4x4xbf16>, vector<4x8xbf16>, vector<4x8xf32> -> vector<4x8xf32>
    %206 = vector.extract_strided_slice %184 {offsets = [0, 8], sizes = [4, 8], strides = [1, 1]} : vector<4x96xf32> to vector<4x8xf32>
    %207 = vector.extract_strided_slice %184 {offsets = [0, 40], sizes = [4, 8], strides = [1, 1]} : vector<4x96xf32> to vector<4x8xf32>
    %208 = vector.extract_strided_slice %184 {offsets = [0, 72], sizes = [4, 8], strides = [1, 1]} : vector<4x96xf32> to vector<4x8xf32>
    %209 = arith.truncf %206 : vector<4x8xf32> to vector<4x8xbf16>
    %210 = arith.truncf %207 : vector<4x8xf32> to vector<4x8xbf16>
    %cst_88 = arith.constant dense<0.000000e+00> : vector<4x4xf32>
    %211 = tpu.matmul %209, %210, %cst_88 {dimension_numbers = #tpu.dot_dimension_numbers<[1], [1], [0], [0], [0, 0, 1, 0], [], []>} : vector<4x8xbf16>, vector<4x8xbf16>, vector<4x4xf32> -> vector<4x4xf32>
    %cst_89 = arith.constant 0.353553385 : f32
    %212 = vector.broadcast %cst_89 : f32 to vector<4x4xf32>
    %213 = arith.mulf %211, %212 : vector<4x4xf32>
    %cst_90 = arith.constant dense<0xFF800000> : vector<4xf32>
    %214 = vector.multi_reduction <maximumf>, %213, %cst_90 [1] : vector<4x4xf32> to vector<4xf32>
    %215 = vector.shape_cast %214 : vector<4xf32> to vector<4x1xf32>
    %216 = vector.broadcast %215 : vector<4x1xf32> to vector<4x4xf32>
    %217 = arith.subf %213, %216 : vector<4x4xf32>
    %218 = math.exp %217 : vector<4x4xf32>
    %cst_91 = arith.constant dense<0.000000e+00> : vector<4xf32>
    %219 = vector.multi_reduction <add>, %218, %cst_91 [1] : vector<4x4xf32> to vector<4xf32>
    %220 = vector.shape_cast %219 : vector<4xf32> to vector<4x1xf32>
    %221 = tpu.reciprocal %220 {approx = true} : vector<4x1xf32> -> vector<4x1xf32>
    %222 = vector.broadcast %221 : vector<4x1xf32> to vector<4x4xf32>
    %223 = arith.mulf %218, %222 : vector<4x4xf32>
    %224 = arith.truncf %223 : vector<4x4xf32> to vector<4x4xbf16>
    %225 = arith.truncf %208 : vector<4x8xf32> to vector<4x8xbf16>
    %cst_92 = arith.constant dense<0.000000e+00> : vector<4x8xf32>
    %226 = tpu.matmul %224, %225, %cst_92 {dimension_numbers = #tpu.dot_dimension_numbers<[1], [0], [0], [1], [0, 0, 1, 1], [], []>} : vector<4x4xbf16>, vector<4x8xbf16>, vector<4x8xf32> -> vector<4x8xf32>
    %227 = vector.extract_strided_slice %184 {offsets = [0, 16], sizes = [4, 8], strides = [1, 1]} : vector<4x96xf32> to vector<4x8xf32>
    %228 = vector.extract_strided_slice %184 {offsets = [0, 48], sizes = [4, 8], strides = [1, 1]} : vector<4x96xf32> to vector<4x8xf32>
    %229 = vector.extract_strided_slice %184 {offsets = [0, 80], sizes = [4, 8], strides = [1, 1]} : vector<4x96xf32> to vector<4x8xf32>
    %230 = arith.truncf %227 : vector<4x8xf32> to vector<4x8xbf16>
    %231 = arith.truncf %228 : vector<4x8xf32> to vector<4x8xbf16>
    %cst_93 = arith.constant dense<0.000000e+00> : vector<4x4xf32>
    %232 = tpu.matmul %230, %231, %cst_93 {dimension_numbers = #tpu.dot_dimension_numbers<[1], [1], [0], [0], [0, 0, 1, 0], [], []>} : vector<4x8xbf16>, vector<4x8xbf16>, vector<4x4xf32> -> vector<4x4xf32>
    %cst_94 = arith.constant 0.353553385 : f32
    %233 = vector.broadcast %cst_94 : f32 to vector<4x4xf32>
    %234 = arith.mulf %232, %233 : vector<4x4xf32>
    %cst_95 = arith.constant dense<0xFF800000> : vector<4xf32>
    %235 = vector.multi_reduction <maximumf>, %234, %cst_95 [1] : vector<4x4xf32> to vector<4xf32>
    %236 = vector.shape_cast %235 : vector<4xf32> to vector<4x1xf32>
    %237 = vector.broadcast %236 : vector<4x1xf32> to vector<4x4xf32>
    %238 = arith.subf %234, %237 : vector<4x4xf32>
    %239 = math.exp %238 : vector<4x4xf32>
    %cst_96 = arith.constant dense<0.000000e+00> : vector<4xf32>
    %240 = vector.multi_reduction <add>, %239, %cst_96 [1] : vector<4x4xf32> to vector<4xf32>
    %241 = vector.shape_cast %240 : vector<4xf32> to vector<4x1xf32>
    %242 = tpu.reciprocal %241 {approx = true} : vector<4x1xf32> -> vector<4x1xf32>
    %243 = vector.broadcast %242 : vector<4x1xf32> to vector<4x4xf32>
    %244 = arith.mulf %239, %243 : vector<4x4xf32>
    %245 = arith.truncf %244 : vector<4x4xf32> to vector<4x4xbf16>
    %246 = arith.truncf %229 : vector<4x8xf32> to vector<4x8xbf16>
    %cst_97 = arith.constant dense<0.000000e+00> : vector<4x8xf32>
    %247 = tpu.matmul %245, %246, %cst_97 {dimension_numbers = #tpu.dot_dimension_numbers<[1], [0], [0], [1], [0, 0, 1, 1], [], []>} : vector<4x4xbf16>, vector<4x8xbf16>, vector<4x8xf32> -> vector<4x8xf32>
    %248 = vector.extract_strided_slice %184 {offsets = [0, 24], sizes = [4, 8], strides = [1, 1]} : vector<4x96xf32> to vector<4x8xf32>
    %249 = vector.extract_strided_slice %184 {offsets = [0, 56], sizes = [4, 8], strides = [1, 1]} : vector<4x96xf32> to vector<4x8xf32>
    %250 = vector.extract_strided_slice %184 {offsets = [0, 88], sizes = [4, 8], strides = [1, 1]} : vector<4x96xf32> to vector<4x8xf32>
    %251 = arith.truncf %248 : vector<4x8xf32> to vector<4x8xbf16>
    %252 = arith.truncf %249 : vector<4x8xf32> to vector<4x8xbf16>
    %cst_98 = arith.constant dense<0.000000e+00> : vector<4x4xf32>
    %253 = tpu.matmul %251, %252, %cst_98 {dimension_numbers = #tpu.dot_dimension_numbers<[1], [1], [0], [0], [0, 0, 1, 0], [], []>} : vector<4x8xbf16>, vector<4x8xbf16>, vector<4x4xf32> -> vector<4x4xf32>
    %cst_99 = arith.constant 0.353553385 : f32
    %254 = vector.broadcast %cst_99 : f32 to vector<4x4xf32>
    %255 = arith.mulf %253, %254 : vector<4x4xf32>
    %cst_100 = arith.constant dense<0xFF800000> : vector<4xf32>
    %256 = vector.multi_reduction <maximumf>, %255, %cst_100 [1] : vector<4x4xf32> to vector<4xf32>
    %257 = vector.shape_cast %256 : vector<4xf32> to vector<4x1xf32>
    %258 = vector.broadcast %257 : vector<4x1xf32> to vector<4x4xf32>
    %259 = arith.subf %255, %258 : vector<4x4xf32>
    %260 = math.exp %259 : vector<4x4xf32>
    %cst_101 = arith.constant dense<0.000000e+00> : vector<4xf32>
    %261 = vector.multi_reduction <add>, %260, %cst_101 [1] : vector<4x4xf32> to vector<4xf32>
    %262 = vector.shape_cast %261 : vector<4xf32> to vector<4x1xf32>
    %263 = tpu.reciprocal %262 {approx = true} : vector<4x1xf32> -> vector<4x1xf32>
    %264 = vector.broadcast %263 : vector<4x1xf32> to vector<4x4xf32>
    %265 = arith.mulf %260, %264 : vector<4x4xf32>
    %266 = arith.truncf %265 : vector<4x4xf32> to vector<4x4xbf16>
    %267 = arith.truncf %250 : vector<4x8xf32> to vector<4x8xbf16>
    %cst_102 = arith.constant dense<0.000000e+00> : vector<4x8xf32>
    %268 = tpu.matmul %266, %267, %cst_102 {dimension_numbers = #tpu.dot_dimension_numbers<[1], [0], [0], [1], [0, 0, 1, 1], [], []>} : vector<4x4xbf16>, vector<4x8xbf16>, vector<4x8xf32> -> vector<4x8xf32>
    %269 = tpu.concatenate %205, %226, %247, %268 in 1 : vector<4x8xf32>, vector<4x8xf32>, vector<4x8xf32>, vector<4x8xf32> -> vector<4x32xf32>
    %c1_103 = arith.constant 1 : index
    %c0_104 = arith.constant 0 : index
    %c0_105 = arith.constant 0 : index
    %270 = vector.load %arg6[%c1_103, %c0_104, %c0_105] : memref<2x32x32xbf16, #tpu.memory_space<vmem>>, vector<1x32x32xbf16>
    %271 = vector.shape_cast %270 : vector<1x32x32xbf16> to vector<32x32xbf16>
    %272 = arith.truncf %269 : vector<4x32xf32> to vector<4x32xbf16>
    %cst_106 = arith.constant dense<0.000000e+00> : vector<4x32xf32>
    %273 = tpu.matmul %272, %271, %cst_106 {dimension_numbers = #tpu.dot_dimension_numbers<[1], [0], [0], [1], [0, 0, 1, 1], [], []>} : vector<4x32xbf16>, vector<32x32xbf16>, vector<4x32xf32> -> vector<4x32xf32>
    %c1_107 = arith.constant 1 : index
    %c0_108 = arith.constant 0 : index
    %c0_109 = arith.constant 0 : index
    %274 = vector.load %arg7[%c1_107, %c0_108, %c0_109] : memref<2x1x32xf32, #tpu.memory_space<vmem>>, vector<1x1x32xf32>
    %275 = vector.shape_cast %274 : vector<1x1x32xf32> to vector<1x32xf32>
    %276 = vector.broadcast %275 : vector<1x32xf32> to vector<4x32xf32>
    %277 = arith.addf %273, %276 : vector<4x32xf32>
    %278 = arith.addf %176, %277 : vector<4x32xf32>
    %c1_110 = arith.constant 1 : index
    %c0_111 = arith.constant 0 : index
    %c0_112 = arith.constant 0 : index
    %279 = vector.load %arg12[%c1_110, %c0_111, %c0_112] : memref<2x1x32xf32, #tpu.memory_space<vmem>>, vector<1x1x32xf32>
    %280 = vector.shape_cast %279 : vector<1x1x32xf32> to vector<1x32xf32>
    %c1_113 = arith.constant 1 : index
    %c0_114 = arith.constant 0 : index
    %c0_115 = arith.constant 0 : index
    %281 = vector.load %arg13[%c1_113, %c0_114, %c0_115] : memref<2x1x32xf32, #tpu.memory_space<vmem>>, vector<1x1x32xf32>
    %282 = vector.shape_cast %281 : vector<1x1x32xf32> to vector<1x32xf32>
    %cst_116 = arith.constant dense<0.000000e+00> : vector<4xf32>
    %283 = vector.multi_reduction <add>, %278, %cst_116 [1] : vector<4x32xf32> to vector<4xf32>
    %284 = vector.shape_cast %283 : vector<4xf32> to vector<4x1xf32>
    %cst_117 = arith.constant 3.200000e+01 : f32
    %285 = vector.broadcast %cst_117 : f32 to vector<4x1xf32>
    %286 = arith.divf %284, %285 : vector<4x1xf32>
    %287 = vector.broadcast %286 : vector<4x1xf32> to vector<4x32xf32>
    %288 = arith.subf %278, %287 : vector<4x32xf32>
    %289 = arith.mulf %288, %288 : vector<4x32xf32>
    %cst_118 = arith.constant dense<0.000000e+00> : vector<4xf32>
    %290 = vector.multi_reduction <add>, %289, %cst_118 [1] : vector<4x32xf32> to vector<4xf32>
    %291 = vector.shape_cast %290 : vector<4xf32> to vector<4x1xf32>
    %cst_119 = arith.constant 3.200000e+01 : f32
    %292 = vector.broadcast %cst_119 : f32 to vector<4x1xf32>
    %293 = arith.divf %291, %292 : vector<4x1xf32>
    %cst_120 = arith.constant 9.99999974E-6 : f32
    %294 = vector.broadcast %cst_120 : f32 to vector<4x1xf32>
    %295 = arith.addf %293, %294 : vector<4x1xf32>
    %296 = math.rsqrt %295 : vector<4x1xf32>
    %297 = vector.broadcast %296 : vector<4x1xf32> to vector<4x32xf32>
    %298 = arith.mulf %288, %297 : vector<4x32xf32>
    %299 = vector.broadcast %280 : vector<1x32xf32> to vector<4x32xf32>
    %300 = arith.mulf %298, %299 : vector<4x32xf32>
    %301 = vector.broadcast %282 : vector<1x32xf32> to vector<4x32xf32>
    %302 = arith.addf %300, %301 : vector<4x32xf32>
    %c1_121 = arith.constant 1 : index
    %c0_122 = arith.constant 0 : index
    %c0_123 = arith.constant 0 : index
    %303 = vector.load %arg8[%c1_121, %c0_122, %c0_123] : memref<2x32x64xbf16, #tpu.memory_space<vmem>>, vector<1x32x64xbf16>
    %304 = vector.shape_cast %303 : vector<1x32x64xbf16> to vector<32x64xbf16>
    %305 = arith.truncf %302 : vector<4x32xf32> to vector<4x32xbf16>
    %cst_124 = arith.constant dense<0.000000e+00> : vector<4x64xf32>
    %306 = tpu.matmul %305, %304, %cst_124 {dimension_numbers = #tpu.dot_dimension_numbers<[1], [0], [0], [1], [0, 0, 1, 1], [], []>} : vector<4x32xbf16>, vector<32x64xbf16>, vector<4x64xf32> -> vector<4x64xf32>
    %c1_125 = arith.constant 1 : index
    %c0_126 = arith.constant 0 : index
    %c0_127 = arith.constant 0 : index
    %307 = vector.load %arg9[%c1_125, %c0_126, %c0_127] : memref<2x1x64xf32, #tpu.memory_space<vmem>>, vector<1x1x64xf32>
    %308 = vector.shape_cast %307 : vector<1x1x64xf32> to vector<1x64xf32>
    %309 = vector.broadcast %308 : vector<1x64xf32> to vector<4x64xf32>
    %310 = arith.addf %306, %309 : vector<4x64xf32>
    %cst_128 = arith.constant 0.000000e+00 : f32
    %311 = vector.broadcast %cst_128 : f32 to vector<4x64xf32>
    %312 = arith.maximumf %310, %311 : vector<4x64xf32>
    %c1_129 = arith.constant 1 : index
    %c0_130 = arith.constant 0 : index
    %c0_131 = arith.constant 0 : index
    %313 = vector.load %arg10[%c1_129, %c0_130, %c0_131] : memref<2x64x32xbf16, #tpu.memory_space<vmem>>, vector<1x64x32xbf16>
    %314 = vector.shape_cast %313 : vector<1x64x32xbf16> to vector<64x32xbf16>
    %315 = arith.truncf %312 : vector<4x64xf32> to vector<4x64xbf16>
    %cst_132 = arith.constant dense<0.000000e+00> : vector<4x32xf32>
    %316 = tpu.matmul %315, %314, %cst_132 {dimension_numbers = #tpu.dot_dimension_numbers<[1], [0], [0], [1], [0, 0, 1, 1], [], []>} : vector<4x64xbf16>, vector<64x32xbf16>, vector<4x32xf32> -> vector<4x32xf32>
    %c1_133 = arith.constant 1 : index
    %c0_134 = arith.constant 0 : index
    %c0_135 = arith.constant 0 : index
    %317 = vector.load %arg11[%c1_133, %c0_134, %c0_135] : memref<2x1x32xf32, #tpu.memory_space<vmem>>, vector<1x1x32xf32>
    %318 = vector.shape_cast %317 : vector<1x1x32xf32> to vector<1x32xf32>
    %319 = vector.broadcast %318 : vector<1x32xf32> to vector<4x32xf32>
    %320 = arith.addf %316, %319 : vector<4x32xf32>
    %321 = arith.addf %302, %320 : vector<4x32xf32>
    %c1_136 = arith.constant 1 : index
    %c0_137 = arith.constant 0 : index
    %c0_138 = arith.constant 0 : index
    %322 = vector.load %arg14[%c1_136, %c0_137, %c0_138] : memref<2x1x32xf32, #tpu.memory_space<vmem>>, vector<1x1x32xf32>
    %323 = vector.shape_cast %322 : vector<1x1x32xf32> to vector<1x32xf32>
    %c1_139 = arith.constant 1 : index
    %c0_140 = arith.constant 0 : index
    %c0_141 = arith.constant 0 : index
    %324 = vector.load %arg15[%c1_139, %c0_140, %c0_141] : memref<2x1x32xf32, #tpu.memory_space<vmem>>, vector<1x1x32xf32>
    %325 = vector.shape_cast %324 : vector<1x1x32xf32> to vector<1x32xf32>
    %cst_142 = arith.constant dense<0.000000e+00> : vector<4xf32>
    %326 = vector.multi_reduction <add>, %321, %cst_142 [1] : vector<4x32xf32> to vector<4xf32>
    %327 = vector.shape_cast %326 : vector<4xf32> to vector<4x1xf32>
    %cst_143 = arith.constant 3.200000e+01 : f32
    %328 = vector.broadcast %cst_143 : f32 to vector<4x1xf32>
    %329 = arith.divf %327, %328 : vector<4x1xf32>
    %330 = vector.broadcast %329 : vector<4x1xf32> to vector<4x32xf32>
    %331 = arith.subf %321, %330 : vector<4x32xf32>
    %332 = arith.mulf %331, %331 : vector<4x32xf32>
    %cst_144 = arith.constant dense<0.000000e+00> : vector<4xf32>
    %333 = vector.multi_reduction <add>, %332, %cst_144 [1] : vector<4x32xf32> to vector<4xf32>
    %334 = vector.shape_cast %333 : vector<4xf32> to vector<4x1xf32>
    %cst_145 = arith.constant 3.200000e+01 : f32
    %335 = vector.broadcast %cst_145 : f32 to vector<4x1xf32>
    %336 = arith.divf %334, %335 : vector<4x1xf32>
    %cst_146 = arith.constant 9.99999974E-6 : f32
    %337 = vector.broadcast %cst_146 : f32 to vector<4x1xf32>
    %338 = arith.addf %336, %337 : vector<4x1xf32>
    %339 = math.rsqrt %338 : vector<4x1xf32>
    %340 = vector.broadcast %339 : vector<4x1xf32> to vector<4x32xf32>
    %341 = arith.mulf %331, %340 : vector<4x32xf32>
    %342 = vector.broadcast %323 : vector<1x32xf32> to vector<4x32xf32>
    %343 = arith.mulf %341, %342 : vector<4x32xf32>
    %344 = vector.broadcast %325 : vector<1x32xf32> to vector<4x32xf32>
    %345 = arith.addf %343, %344 : vector<4x32xf32>
    %c0_147 = arith.constant 0 : index
    %c0_148 = arith.constant 0 : index
    %346 = vector.load %arg16[%c0_147, %c0_148] : memref<32x32xbf16, #tpu.memory_space<vmem>>, vector<32x32xbf16>
    %347 = arith.truncf %345 : vector<4x32xf32> to vector<4x32xbf16>
    %cst_149 = arith.constant dense<0.000000e+00> : vector<4x32xf32>
    %348 = tpu.matmul %347, %346, %cst_149 {dimension_numbers = #tpu.dot_dimension_numbers<[1], [0], [0], [1], [0, 0, 1, 1], [], []>} : vector<4x32xbf16>, vector<32x32xbf16>, vector<4x32xf32> -> vector<4x32xf32>
    %c0_150 = arith.constant 0 : index
    %c0_151 = arith.constant 0 : index
    %349 = vector.load %arg17[%c0_150, %c0_151] : memref<1x32xf32, #tpu.memory_space<vmem>>, vector<1x32xf32>
    %350 = vector.broadcast %349 : vector<1x32xf32> to vector<4x32xf32>
    %351 = arith.addf %348, %350 : vector<4x32xf32>
    %c0_152 = arith.constant 0 : index
    %c0_153 = arith.constant 0 : index
    %c0_154 = arith.constant 0 : index
    %352 = vector.load %arg18[%c0_152, %c0_153, %c0_154] : memref<1x4x32xf32, #tpu.memory_space<vmem>>, vector<1x4x32xf32>
    %353 = vector.shape_cast %352 : vector<1x4x32xf32> to vector<4x32xf32>
    %354 = vector.shape_cast %351 : vector<4x32xf32> to vector<1x4x32xf32>
    tpu.vector_store %arg18[%c0_152, %c0_153, %c0_154], %354 {strides = array<i32>} : memref<1x4x32xf32, #tpu.memory_space<vmem>>, vector<1x4x32xf32>,
    return
  }
  func.func @transform_0(%arg0: i32) -> (i32, i32, i32) {
    %c0_i32 = arith.constant 0 : i32
    %c0_i32_0 = arith.constant 0 : i32
    %c0_i32_1 = arith.constant 0 : i32
    return %arg0, %c0_i32, %c0_i32_0 : i32, i32, i32
  }
  func.func @transform_1(%arg0: i32) -> (i32, i32) {
    %c0_i32 = arith.constant 0 : i32
    %c0_i32_0 = arith.constant 0 : i32
    %c0_i32_1 = arith.constant 0 : i32
    return %c0_i32, %c0_i32_0 : i32, i32
  }
  func.func @transform_2(%arg0: i32) -> (i32, i32) {
    %c0_i32 = arith.constant 0 : i32
    %c0_i32_0 = arith.constant 0 : i32
    %c0_i32_1 = arith.constant 0 : i32
    return %c0_i32, %c0_i32_0 : i32, i32
  }
  func.func @transform_3(%arg0: i32) -> (i32, i32, i32) {
    %c0_i32 = arith.constant 0 : i32
    %c0_i32_0 = arith.constant 0 : i32
    %c0_i32_1 = arith.constant 0 : i32
    %c0_i32_2 = arith.constant 0 : i32
    return %c0_i32, %c0_i32_0, %c0_i32_1 : i32, i32, i32
  }
  func.func @transform_4(%arg0: i32) -> (i32, i32, i32) {
    %c0_i32 = arith.constant 0 : i32
    %c0_i32_0 = arith.constant 0 : i32
    %c0_i32_1 = arith.constant 0 : i32
    %c0_i32_2 = arith.constant 0 : i32
    return %c0_i32, %c0_i32_0, %c0_i32_1 : i32, i32, i32
  }
  func.func @transform_5(%arg0: i32) -> (i32, i32, i32) {
    %c0_i32 = arith.constant 0 : i32
    %c0_i32_0 = arith.constant 0 : i32
    %c0_i32_1 = arith.constant 0 : i32
    %c0_i32_2 = arith.constant 0 : i32
    return %c0_i32, %c0_i32_0, %c0_i32_1 : i32, i32, i32
  }
  func.func @transform_6(%arg0: i32) -> (i32, i32, i32) {
    %c0_i32 = arith.constant 0 : i32
    %c0_i32_0 = arith.constant 0 : i32
    %c0_i32_1 = arith.constant 0 : i32
    %c0_i32_2 = arith.constant 0 : i32
    return %c0_i32, %c0_i32_0, %c0_i32_1 : i32, i32, i32
  }
  func.func @transform_7(%arg0: i32) -> (i32, i32, i32) {
    %c0_i32 = arith.constant 0 : i32
    %c0_i32_0 = arith.constant 0 : i32
    %c0_i32_1 = arith.constant 0 : i32
    %c0_i32_2 = arith.constant 0 : i32
    return %c0_i32, %c0_i32_0, %c0_i32_1 : i32, i32, i32
  }
  func.func @transform_8(%arg0: i32) -> (i32, i32, i32) {
    %c0_i32 = arith.constant 0 : i32
    %c0_i32_0 = arith.constant 0 : i32
    %c0_i32_1 = arith.constant 0 : i32
    %c0_i32_2 = arith.constant 0 : i32
    return %c0_i32, %c0_i32_0, %c0_i32_1 : i32, i32, i32
  }
  func.func @transform_9(%arg0: i32) -> (i32, i32, i32) {
    %c0_i32 = arith.constant 0 : i32
    %c0_i32_0 = arith.constant 0 : i32
    %c0_i32_1 = arith.constant 0 : i32
    %c0_i32_2 = arith.constant 0 : i32
    return %c0_i32, %c0_i32_0, %c0_i32_1 : i32, i32, i32
  }
  func.func @transform_10(%arg0: i32) -> (i32, i32, i32) {
    %c0_i32 = arith.constant 0 : i32
    %c0_i32_0 = arith.constant 0 : i32
    %c0_i32_1 = arith.constant 0 : i32
    %c0_i32_2 = arith.constant 0 : i32
    return %c0_i32, %c0_i32_0, %c0_i32_1 : i32, i32, i32
  }
  func.func @transform_11(%arg0: i32) -> (i32, i32, i32) {
    %c0_i32 = arith.constant 0 : i32
    %c0_i32_0 = arith.constant 0 : i32
    %c0_i32_1 = arith.constant 0 : i32
    %c0_i32_2 = arith.constant 0 : i32
    return %c0_i32, %c0_i32_0, %c0_i32_1 : i32, i32, i32
  }
  func.func @transform_12(%arg0: i32) -> (i32, i32, i32) {
    %c0_i32 = arith.constant 0 : i32
    %c0_i32_0 = arith.constant 0 : i32
    %c0_i32_1 = arith.constant 0 : i32
    %c0_i32_2 = arith.constant 0 : i32
    return %c0_i32, %c0_i32_0, %c0_i32_1 : i32, i32, i32
  }
  func.func @transform_13(%arg0: i32) -> (i32, i32, i32) {
    %c0_i32 = arith.constant 0 : i32
    %c0_i32_0 = arith.constant 0 : i32
    %c0_i32_1 = arith.constant 0 : i32
    %c0_i32_2 = arith.constant 0 : i32
    return %c0_i32, %c0_i32_0, %c0_i32_1 : i32, i32, i32
  }
  func.func @transform_14(%arg0: i32) -> (i32, i32, i32) {
    %c0_i32 = arith.constant 0 : i32
    %c0_i32_0 = arith.constant 0 : i32
    %c0_i32_1 = arith.constant 0 : i32
    %c0_i32_2 = arith.constant 0 : i32
    return %c0_i32, %c0_i32_0, %c0_i32_1 : i32, i32, i32
  }
  func.func @transform_15(%arg0: i32) -> (i32, i32) {
    %c0_i32 = arith.constant 0 : i32
    %c0_i32_0 = arith.constant 0 : i32
    %c0_i32_1 = arith.constant 0 : i32
    return %c0_i32, %c0_i32_0 : i32, i32
  }
  func.func @transform_16(%arg0: i32) -> (i32, i32) {
    %c0_i32 = arith.constant 0 : i32
    %c0_i32_0 = arith.constant 0 : i32
    %c0_i32_1 = arith.constant 0 : i32
    return %c0_i32, %c0_i32_0 : i32, i32
  }
  func.func @transform_17(%arg0: i32) -> (i32, i32, i32) {
    %c0_i32 = arith.constant 0 : i32
    %c0_i32_0 = arith.constant 0 : i32
    %c0_i32_1 = arith.constant 0 : i32
    return %arg0, %c0_i32, %c0_i32_0 : i32, i32, i32
  }
}

module attributes {stable_mosaic.version = 11 : i64} {
  func.func @_transformer_kernel(%arg0: i32, %arg1: memref<1x12x64xf32, #tpu.memory_space<vmem>>, %arg2: memref<64x32xbf16, #tpu.memory_space<vmem>>, %arg3: memref<1x32xf32, #tpu.memory_space<vmem>>, %arg4: memref<2x32x96xbf16, #tpu.memory_space<vmem>>, %arg5: memref<2x1x96xf32, #tpu.memory_space<vmem>>, %arg6: memref<2x32x32xbf16, #tpu.memory_space<vmem>>, %arg7: memref<2x1x32xf32, #tpu.memory_space<vmem>>, %arg8: memref<2x32x64xbf16, #tpu.memory_space<vmem>>, %arg9: memref<2x1x64xf32, #tpu.memory_space<vmem>>, %arg10: memref<2x64x32xbf16, #tpu.memory_space<vmem>>, %arg11: memref<2x1x32xf32, #tpu.memory_space<vmem>>, %arg12: memref<2x1x32xf32, #tpu.memory_space<vmem>>, %arg13: memref<2x1x32xf32, #tpu.memory_space<vmem>>, %arg14: memref<2x1x32xf32, #tpu.memory_space<vmem>>, %arg15: memref<2x1x32xf32, #tpu.memory_space<vmem>>, %arg16: memref<32x32xbf16, #tpu.memory_space<vmem>>, %arg17: memref<1x32xf32, #tpu.memory_space<vmem>>, %arg18: memref<1x12x32xf32, #tpu.memory_space<vmem>>) attributes {dimension_semantics = [#tpu.dimension_semantics<parallel>], iteration_bounds = array<i64: 2>, scalar_prefetch = 0 : i64, scratch_operands = 0 : i64, tpu.core_type = #tpu.core_type<tc>, window_params = [{transform_indices = @transform_0, window_bounds = array<i64: 1, 12, 64>}, {pipeline_mode = #tpu.pipeline_mode<synchronous>, transform_indices = @transform_1, window_bounds = array<i64: 64, 32>}, {pipeline_mode = #tpu.pipeline_mode<synchronous>, transform_indices = @transform_2, window_bounds = array<i64: 1, 32>}, {pipeline_mode = #tpu.pipeline_mode<synchronous>, transform_indices = @transform_3, window_bounds = array<i64: 2, 32, 96>}, {pipeline_mode = #tpu.pipeline_mode<synchronous>, transform_indices = @transform_4, window_bounds = array<i64: 2, 1, 96>}, {pipeline_mode = #tpu.pipeline_mode<synchronous>, transform_indices = @transform_5, window_bounds = array<i64: 2, 32, 32>}, {pipeline_mode = #tpu.pipeline_mode<synchronous>, transform_indices = @transform_6, window_bounds = array<i64: 2, 1, 32>}, {pipeline_mode = #tpu.pipeline_mode<synchronous>, transform_indices = @transform_7, window_bounds = array<i64: 2, 32, 64>}, {pipeline_mode = #tpu.pipeline_mode<synchronous>, transform_indices = @transform_8, window_bounds = array<i64: 2, 1, 64>}, {pipeline_mode = #tpu.pipeline_mode<synchronous>, transform_indices = @transform_9, window_bounds = array<i64: 2, 64, 32>}, {pipeline_mode = #tpu.pipeline_mode<synchronous>, transform_indices = @transform_10, window_bounds = array<i64: 2, 1, 32>}, {pipeline_mode = #tpu.pipeline_mode<synchronous>, transform_indices = @transform_11, window_bounds = array<i64: 2, 1, 32>}, {pipeline_mode = #tpu.pipeline_mode<synchronous>, transform_indices = @transform_12, window_bounds = array<i64: 2, 1, 32>}, {pipeline_mode = #tpu.pipeline_mode<synchronous>, transform_indices = @transform_13, window_bounds = array<i64: 2, 1, 32>}, {pipeline_mode = #tpu.pipeline_mode<synchronous>, transform_indices = @transform_14, window_bounds = array<i64: 2, 1, 32>}, {pipeline_mode = #tpu.pipeline_mode<synchronous>, transform_indices = @transform_15, window_bounds = array<i64: 32, 32>}, {pipeline_mode = #tpu.pipeline_mode<synchronous>, transform_indices = @transform_16, window_bounds = array<i64: 1, 32>}, {transform_indices = @transform_17, window_bounds = array<i64: 1, 12, 32>}]} {
    %c0 = arith.constant 0 : index
    %c0_0 = arith.constant 0 : index
    %c0_1 = arith.constant 0 : index
    %0 = vector.load %arg1[%c0, %c0_0, %c0_1] : memref<1x12x64xf32, #tpu.memory_space<vmem>>, vector<1x12x64xf32>
    %1 = vector.shape_cast %0 : vector<1x12x64xf32> to vector<12x64xf32>
    %c0_2 = arith.constant 0 : index
    %c0_3 = arith.constant 0 : index
    %2 = vector.load %arg2[%c0_2, %c0_3] : memref<64x32xbf16, #tpu.memory_space<vmem>>, vector<64x32xbf16>
    %3 = arith.truncf %1 : vector<12x64xf32> to vector<12x64xbf16>
    %cst = arith.constant dense<0.000000e+00> : vector<12x32xf32>
    %4 = tpu.matmul %3, %2, %cst {dimension_numbers = #tpu.dot_dimension_numbers<[1], [0], [0], [1], [0, 0, 1, 1], [], []>} : vector<12x64xbf16>, vector<64x32xbf16>, vector<12x32xf32> -> vector<12x32xf32>
    %c0_4 = arith.constant 0 : index
    %c0_5 = arith.constant 0 : index
    %5 = vector.load %arg3[%c0_4, %c0_5] : memref<1x32xf32, #tpu.memory_space<vmem>>, vector<1x32xf32>
    %6 = vector.broadcast %5 : vector<1x32xf32> to vector<12x32xf32>
    %7 = arith.addf %4, %6 : vector<12x32xf32>
    %c0_6 = arith.constant 0 : index
    %c0_7 = arith.constant 0 : index
    %c0_8 = arith.constant 0 : index
    %8 = vector.load %arg4[%c0_6, %c0_7, %c0_8] : memref<2x32x96xbf16, #tpu.memory_space<vmem>>, vector<1x32x96xbf16>
    %9 = vector.shape_cast %8 : vector<1x32x96xbf16> to vector<32x96xbf16>
    %10 = arith.truncf %7 : vector<12x32xf32> to vector<12x32xbf16>
    %cst_9 = arith.constant dense<0.000000e+00> : vector<12x96xf32>
    %11 = tpu.matmul %10, %9, %cst_9 {dimension_numbers = #tpu.dot_dimension_numbers<[1], [0], [0], [1], [0, 0, 1, 1], [], []>} : vector<12x32xbf16>, vector<32x96xbf16>, vector<12x96xf32> -> vector<12x96xf32>
    %c0_10 = arith.constant 0 : index
    %c0_11 = arith.constant 0 : index
    %c0_12 = arith.constant 0 : index
    %12 = vector.load %arg5[%c0_10, %c0_11, %c0_12] : memref<2x1x96xf32, #tpu.memory_space<vmem>>, vector<1x1x96xf32>
    %13 = vector.shape_cast %12 : vector<1x1x96xf32> to vector<1x96xf32>
    %14 = vector.broadcast %13 : vector<1x96xf32> to vector<12x96xf32>
    %15 = arith.addf %11, %14 : vector<12x96xf32>
    %16 = vector.extract_strided_slice %15 {offsets = [0, 0], sizes = [12, 8], strides = [1, 1]} : vector<12x96xf32> to vector<12x8xf32>
    %17 = vector.extract_strided_slice %15 {offsets = [0, 32], sizes = [12, 8], strides = [1, 1]} : vector<12x96xf32> to vector<12x8xf32>
    %18 = vector.extract_strided_slice %15 {offsets = [0, 64], sizes = [12, 8], strides = [1, 1]} : vector<12x96xf32> to vector<12x8xf32>
    %19 = arith.truncf %16 : vector<12x8xf32> to vector<12x8xbf16>
    %20 = arith.truncf %17 : vector<12x8xf32> to vector<12x8xbf16>
    %cst_13 = arith.constant dense<0.000000e+00> : vector<12x12xf32>
    %21 = tpu.matmul %19, %20, %cst_13 {dimension_numbers = #tpu.dot_dimension_numbers<[1], [1], [0], [0], [0, 0, 1, 0], [], []>} : vector<12x8xbf16>, vector<12x8xbf16>, vector<12x12xf32> -> vector<12x12xf32>
    %cst_14 = arith.constant 0.353553385 : f32
    %22 = vector.broadcast %cst_14 : f32 to vector<12x12xf32>
    %23 = arith.mulf %21, %22 : vector<12x12xf32>
    %cst_15 = arith.constant dense<0xFF800000> : vector<12xf32>
    %24 = vector.multi_reduction <maximumf>, %23, %cst_15 [1] : vector<12x12xf32> to vector<12xf32>
    %25 = vector.shape_cast %24 : vector<12xf32> to vector<12x1xf32>
    %26 = vector.broadcast %25 : vector<12x1xf32> to vector<12x12xf32>
    %27 = arith.subf %23, %26 : vector<12x12xf32>
    %28 = math.exp %27 : vector<12x12xf32>
    %cst_16 = arith.constant dense<0.000000e+00> : vector<12xf32>
    %29 = vector.multi_reduction <add>, %28, %cst_16 [1] : vector<12x12xf32> to vector<12xf32>
    %30 = vector.shape_cast %29 : vector<12xf32> to vector<12x1xf32>
    %31 = tpu.reciprocal %30 {approx = true} : vector<12x1xf32> -> vector<12x1xf32>
    %32 = vector.broadcast %31 : vector<12x1xf32> to vector<12x12xf32>
    %33 = arith.mulf %28, %32 : vector<12x12xf32>
    %34 = arith.truncf %33 : vector<12x12xf32> to vector<12x12xbf16>
    %35 = arith.truncf %18 : vector<12x8xf32> to vector<12x8xbf16>
    %cst_17 = arith.constant dense<0.000000e+00> : vector<12x8xf32>
    %36 = tpu.matmul %34, %35, %cst_17 {dimension_numbers = #tpu.dot_dimension_numbers<[1], [0], [0], [1], [0, 0, 1, 1], [], []>} : vector<12x12xbf16>, vector<12x8xbf16>, vector<12x8xf32> -> vector<12x8xf32>
    %37 = vector.extract_strided_slice %15 {offsets = [0, 8], sizes = [12, 8], strides = [1, 1]} : vector<12x96xf32> to vector<12x8xf32>
    %38 = vector.extract_strided_slice %15 {offsets = [0, 40], sizes = [12, 8], strides = [1, 1]} : vector<12x96xf32> to vector<12x8xf32>
    %39 = vector.extract_strided_slice %15 {offsets = [0, 72], sizes = [12, 8], strides = [1, 1]} : vector<12x96xf32> to vector<12x8xf32>
    %40 = arith.truncf %37 : vector<12x8xf32> to vector<12x8xbf16>
    %41 = arith.truncf %38 : vector<12x8xf32> to vector<12x8xbf16>
    %cst_18 = arith.constant dense<0.000000e+00> : vector<12x12xf32>
    %42 = tpu.matmul %40, %41, %cst_18 {dimension_numbers = #tpu.dot_dimension_numbers<[1], [1], [0], [0], [0, 0, 1, 0], [], []>} : vector<12x8xbf16>, vector<12x8xbf16>, vector<12x12xf32> -> vector<12x12xf32>
    %cst_19 = arith.constant 0.353553385 : f32
    %43 = vector.broadcast %cst_19 : f32 to vector<12x12xf32>
    %44 = arith.mulf %42, %43 : vector<12x12xf32>
    %cst_20 = arith.constant dense<0xFF800000> : vector<12xf32>
    %45 = vector.multi_reduction <maximumf>, %44, %cst_20 [1] : vector<12x12xf32> to vector<12xf32>
    %46 = vector.shape_cast %45 : vector<12xf32> to vector<12x1xf32>
    %47 = vector.broadcast %46 : vector<12x1xf32> to vector<12x12xf32>
    %48 = arith.subf %44, %47 : vector<12x12xf32>
    %49 = math.exp %48 : vector<12x12xf32>
    %cst_21 = arith.constant dense<0.000000e+00> : vector<12xf32>
    %50 = vector.multi_reduction <add>, %49, %cst_21 [1] : vector<12x12xf32> to vector<12xf32>
    %51 = vector.shape_cast %50 : vector<12xf32> to vector<12x1xf32>
    %52 = tpu.reciprocal %51 {approx = true} : vector<12x1xf32> -> vector<12x1xf32>
    %53 = vector.broadcast %52 : vector<12x1xf32> to vector<12x12xf32>
    %54 = arith.mulf %49, %53 : vector<12x12xf32>
    %55 = arith.truncf %54 : vector<12x12xf32> to vector<12x12xbf16>
    %56 = arith.truncf %39 : vector<12x8xf32> to vector<12x8xbf16>
    %cst_22 = arith.constant dense<0.000000e+00> : vector<12x8xf32>
    %57 = tpu.matmul %55, %56, %cst_22 {dimension_numbers = #tpu.dot_dimension_numbers<[1], [0], [0], [1], [0, 0, 1, 1], [], []>} : vector<12x12xbf16>, vector<12x8xbf16>, vector<12x8xf32> -> vector<12x8xf32>
    %58 = vector.extract_strided_slice %15 {offsets = [0, 16], sizes = [12, 8], strides = [1, 1]} : vector<12x96xf32> to vector<12x8xf32>
    %59 = vector.extract_strided_slice %15 {offsets = [0, 48], sizes = [12, 8], strides = [1, 1]} : vector<12x96xf32> to vector<12x8xf32>
    %60 = vector.extract_strided_slice %15 {offsets = [0, 80], sizes = [12, 8], strides = [1, 1]} : vector<12x96xf32> to vector<12x8xf32>
    %61 = arith.truncf %58 : vector<12x8xf32> to vector<12x8xbf16>
    %62 = arith.truncf %59 : vector<12x8xf32> to vector<12x8xbf16>
    %cst_23 = arith.constant dense<0.000000e+00> : vector<12x12xf32>
    %63 = tpu.matmul %61, %62, %cst_23 {dimension_numbers = #tpu.dot_dimension_numbers<[1], [1], [0], [0], [0, 0, 1, 0], [], []>} : vector<12x8xbf16>, vector<12x8xbf16>, vector<12x12xf32> -> vector<12x12xf32>
    %cst_24 = arith.constant 0.353553385 : f32
    %64 = vector.broadcast %cst_24 : f32 to vector<12x12xf32>
    %65 = arith.mulf %63, %64 : vector<12x12xf32>
    %cst_25 = arith.constant dense<0xFF800000> : vector<12xf32>
    %66 = vector.multi_reduction <maximumf>, %65, %cst_25 [1] : vector<12x12xf32> to vector<12xf32>
    %67 = vector.shape_cast %66 : vector<12xf32> to vector<12x1xf32>
    %68 = vector.broadcast %67 : vector<12x1xf32> to vector<12x12xf32>
    %69 = arith.subf %65, %68 : vector<12x12xf32>
    %70 = math.exp %69 : vector<12x12xf32>
    %cst_26 = arith.constant dense<0.000000e+00> : vector<12xf32>
    %71 = vector.multi_reduction <add>, %70, %cst_26 [1] : vector<12x12xf32> to vector<12xf32>
    %72 = vector.shape_cast %71 : vector<12xf32> to vector<12x1xf32>
    %73 = tpu.reciprocal %72 {approx = true} : vector<12x1xf32> -> vector<12x1xf32>
    %74 = vector.broadcast %73 : vector<12x1xf32> to vector<12x12xf32>
    %75 = arith.mulf %70, %74 : vector<12x12xf32>
    %76 = arith.truncf %75 : vector<12x12xf32> to vector<12x12xbf16>
    %77 = arith.truncf %60 : vector<12x8xf32> to vector<12x8xbf16>
    %cst_27 = arith.constant dense<0.000000e+00> : vector<12x8xf32>
    %78 = tpu.matmul %76, %77, %cst_27 {dimension_numbers = #tpu.dot_dimension_numbers<[1], [0], [0], [1], [0, 0, 1, 1], [], []>} : vector<12x12xbf16>, vector<12x8xbf16>, vector<12x8xf32> -> vector<12x8xf32>
    %79 = vector.extract_strided_slice %15 {offsets = [0, 24], sizes = [12, 8], strides = [1, 1]} : vector<12x96xf32> to vector<12x8xf32>
    %80 = vector.extract_strided_slice %15 {offsets = [0, 56], sizes = [12, 8], strides = [1, 1]} : vector<12x96xf32> to vector<12x8xf32>
    %81 = vector.extract_strided_slice %15 {offsets = [0, 88], sizes = [12, 8], strides = [1, 1]} : vector<12x96xf32> to vector<12x8xf32>
    %82 = arith.truncf %79 : vector<12x8xf32> to vector<12x8xbf16>
    %83 = arith.truncf %80 : vector<12x8xf32> to vector<12x8xbf16>
    %cst_28 = arith.constant dense<0.000000e+00> : vector<12x12xf32>
    %84 = tpu.matmul %82, %83, %cst_28 {dimension_numbers = #tpu.dot_dimension_numbers<[1], [1], [0], [0], [0, 0, 1, 0], [], []>} : vector<12x8xbf16>, vector<12x8xbf16>, vector<12x12xf32> -> vector<12x12xf32>
    %cst_29 = arith.constant 0.353553385 : f32
    %85 = vector.broadcast %cst_29 : f32 to vector<12x12xf32>
    %86 = arith.mulf %84, %85 : vector<12x12xf32>
    %cst_30 = arith.constant dense<0xFF800000> : vector<12xf32>
    %87 = vector.multi_reduction <maximumf>, %86, %cst_30 [1] : vector<12x12xf32> to vector<12xf32>
    %88 = vector.shape_cast %87 : vector<12xf32> to vector<12x1xf32>
    %89 = vector.broadcast %88 : vector<12x1xf32> to vector<12x12xf32>
    %90 = arith.subf %86, %89 : vector<12x12xf32>
    %91 = math.exp %90 : vector<12x12xf32>
    %cst_31 = arith.constant dense<0.000000e+00> : vector<12xf32>
    %92 = vector.multi_reduction <add>, %91, %cst_31 [1] : vector<12x12xf32> to vector<12xf32>
    %93 = vector.shape_cast %92 : vector<12xf32> to vector<12x1xf32>
    %94 = tpu.reciprocal %93 {approx = true} : vector<12x1xf32> -> vector<12x1xf32>
    %95 = vector.broadcast %94 : vector<12x1xf32> to vector<12x12xf32>
    %96 = arith.mulf %91, %95 : vector<12x12xf32>
    %97 = arith.truncf %96 : vector<12x12xf32> to vector<12x12xbf16>
    %98 = arith.truncf %81 : vector<12x8xf32> to vector<12x8xbf16>
    %cst_32 = arith.constant dense<0.000000e+00> : vector<12x8xf32>
    %99 = tpu.matmul %97, %98, %cst_32 {dimension_numbers = #tpu.dot_dimension_numbers<[1], [0], [0], [1], [0, 0, 1, 1], [], []>} : vector<12x12xbf16>, vector<12x8xbf16>, vector<12x8xf32> -> vector<12x8xf32>
    %100 = tpu.concatenate %36, %57, %78, %99 in 1 : vector<12x8xf32>, vector<12x8xf32>, vector<12x8xf32>, vector<12x8xf32> -> vector<12x32xf32>
    %c0_33 = arith.constant 0 : index
    %c0_34 = arith.constant 0 : index
    %c0_35 = arith.constant 0 : index
    %101 = vector.load %arg6[%c0_33, %c0_34, %c0_35] : memref<2x32x32xbf16, #tpu.memory_space<vmem>>, vector<1x32x32xbf16>
    %102 = vector.shape_cast %101 : vector<1x32x32xbf16> to vector<32x32xbf16>
    %103 = arith.truncf %100 : vector<12x32xf32> to vector<12x32xbf16>
    %cst_36 = arith.constant dense<0.000000e+00> : vector<12x32xf32>
    %104 = tpu.matmul %103, %102, %cst_36 {dimension_numbers = #tpu.dot_dimension_numbers<[1], [0], [0], [1], [0, 0, 1, 1], [], []>} : vector<12x32xbf16>, vector<32x32xbf16>, vector<12x32xf32> -> vector<12x32xf32>
    %c0_37 = arith.constant 0 : index
    %c0_38 = arith.constant 0 : index
    %c0_39 = arith.constant 0 : index
    %105 = vector.load %arg7[%c0_37, %c0_38, %c0_39] : memref<2x1x32xf32, #tpu.memory_space<vmem>>, vector<1x1x32xf32>
    %106 = vector.shape_cast %105 : vector<1x1x32xf32> to vector<1x32xf32>
    %107 = vector.broadcast %106 : vector<1x32xf32> to vector<12x32xf32>
    %108 = arith.addf %104, %107 : vector<12x32xf32>
    %109 = arith.addf %7, %108 : vector<12x32xf32>
    %c0_40 = arith.constant 0 : index
    %c0_41 = arith.constant 0 : index
    %c0_42 = arith.constant 0 : index
    %110 = vector.load %arg12[%c0_40, %c0_41, %c0_42] : memref<2x1x32xf32, #tpu.memory_space<vmem>>, vector<1x1x32xf32>
    %111 = vector.shape_cast %110 : vector<1x1x32xf32> to vector<1x32xf32>
    %c0_43 = arith.constant 0 : index
    %c0_44 = arith.constant 0 : index
    %c0_45 = arith.constant 0 : index
    %112 = vector.load %arg13[%c0_43, %c0_44, %c0_45] : memref<2x1x32xf32, #tpu.memory_space<vmem>>, vector<1x1x32xf32>
    %113 = vector.shape_cast %112 : vector<1x1x32xf32> to vector<1x32xf32>
    %cst_46 = arith.constant dense<0.000000e+00> : vector<12xf32>
    %114 = vector.multi_reduction <add>, %109, %cst_46 [1] : vector<12x32xf32> to vector<12xf32>
    %115 = vector.shape_cast %114 : vector<12xf32> to vector<12x1xf32>
    %cst_47 = arith.constant 3.200000e+01 : f32
    %116 = vector.broadcast %cst_47 : f32 to vector<12x1xf32>
    %117 = arith.divf %115, %116 : vector<12x1xf32>
    %118 = vector.broadcast %117 : vector<12x1xf32> to vector<12x32xf32>
    %119 = arith.subf %109, %118 : vector<12x32xf32>
    %120 = arith.mulf %119, %119 : vector<12x32xf32>
    %cst_48 = arith.constant dense<0.000000e+00> : vector<12xf32>
    %121 = vector.multi_reduction <add>, %120, %cst_48 [1] : vector<12x32xf32> to vector<12xf32>
    %122 = vector.shape_cast %121 : vector<12xf32> to vector<12x1xf32>
    %cst_49 = arith.constant 3.200000e+01 : f32
    %123 = vector.broadcast %cst_49 : f32 to vector<12x1xf32>
    %124 = arith.divf %122, %123 : vector<12x1xf32>
    %cst_50 = arith.constant 9.99999974E-6 : f32
    %125 = vector.broadcast %cst_50 : f32 to vector<12x1xf32>
    %126 = arith.addf %124, %125 : vector<12x1xf32>
    %127 = math.rsqrt %126 : vector<12x1xf32>
    %128 = vector.broadcast %127 : vector<12x1xf32> to vector<12x32xf32>
    %129 = arith.mulf %119, %128 : vector<12x32xf32>
    %130 = vector.broadcast %111 : vector<1x32xf32> to vector<12x32xf32>
    %131 = arith.mulf %129, %130 : vector<12x32xf32>
    %132 = vector.broadcast %113 : vector<1x32xf32> to vector<12x32xf32>
    %133 = arith.addf %131, %132 : vector<12x32xf32>
    %c0_51 = arith.constant 0 : index
    %c0_52 = arith.constant 0 : index
    %c0_53 = arith.constant 0 : index
    %134 = vector.load %arg8[%c0_51, %c0_52, %c0_53] : memref<2x32x64xbf16, #tpu.memory_space<vmem>>, vector<1x32x64xbf16>
    %135 = vector.shape_cast %134 : vector<1x32x64xbf16> to vector<32x64xbf16>
    %136 = arith.truncf %133 : vector<12x32xf32> to vector<12x32xbf16>
    %cst_54 = arith.constant dense<0.000000e+00> : vector<12x64xf32>
    %137 = tpu.matmul %136, %135, %cst_54 {dimension_numbers = #tpu.dot_dimension_numbers<[1], [0], [0], [1], [0, 0, 1, 1], [], []>} : vector<12x32xbf16>, vector<32x64xbf16>, vector<12x64xf32> -> vector<12x64xf32>
    %c0_55 = arith.constant 0 : index
    %c0_56 = arith.constant 0 : index
    %c0_57 = arith.constant 0 : index
    %138 = vector.load %arg9[%c0_55, %c0_56, %c0_57] : memref<2x1x64xf32, #tpu.memory_space<vmem>>, vector<1x1x64xf32>
    %139 = vector.shape_cast %138 : vector<1x1x64xf32> to vector<1x64xf32>
    %140 = vector.broadcast %139 : vector<1x64xf32> to vector<12x64xf32>
    %141 = arith.addf %137, %140 : vector<12x64xf32>
    %cst_58 = arith.constant 0.000000e+00 : f32
    %142 = vector.broadcast %cst_58 : f32 to vector<12x64xf32>
    %143 = arith.maximumf %141, %142 : vector<12x64xf32>
    %c0_59 = arith.constant 0 : index
    %c0_60 = arith.constant 0 : index
    %c0_61 = arith.constant 0 : index
    %144 = vector.load %arg10[%c0_59, %c0_60, %c0_61] : memref<2x64x32xbf16, #tpu.memory_space<vmem>>, vector<1x64x32xbf16>
    %145 = vector.shape_cast %144 : vector<1x64x32xbf16> to vector<64x32xbf16>
    %146 = arith.truncf %143 : vector<12x64xf32> to vector<12x64xbf16>
    %cst_62 = arith.constant dense<0.000000e+00> : vector<12x32xf32>
    %147 = tpu.matmul %146, %145, %cst_62 {dimension_numbers = #tpu.dot_dimension_numbers<[1], [0], [0], [1], [0, 0, 1, 1], [], []>} : vector<12x64xbf16>, vector<64x32xbf16>, vector<12x32xf32> -> vector<12x32xf32>
    %c0_63 = arith.constant 0 : index
    %c0_64 = arith.constant 0 : index
    %c0_65 = arith.constant 0 : index
    %148 = vector.load %arg11[%c0_63, %c0_64, %c0_65] : memref<2x1x32xf32, #tpu.memory_space<vmem>>, vector<1x1x32xf32>
    %149 = vector.shape_cast %148 : vector<1x1x32xf32> to vector<1x32xf32>
    %150 = vector.broadcast %149 : vector<1x32xf32> to vector<12x32xf32>
    %151 = arith.addf %147, %150 : vector<12x32xf32>
    %152 = arith.addf %133, %151 : vector<12x32xf32>
    %c0_66 = arith.constant 0 : index
    %c0_67 = arith.constant 0 : index
    %c0_68 = arith.constant 0 : index
    %153 = vector.load %arg14[%c0_66, %c0_67, %c0_68] : memref<2x1x32xf32, #tpu.memory_space<vmem>>, vector<1x1x32xf32>
    %154 = vector.shape_cast %153 : vector<1x1x32xf32> to vector<1x32xf32>
    %c0_69 = arith.constant 0 : index
    %c0_70 = arith.constant 0 : index
    %c0_71 = arith.constant 0 : index
    %155 = vector.load %arg15[%c0_69, %c0_70, %c0_71] : memref<2x1x32xf32, #tpu.memory_space<vmem>>, vector<1x1x32xf32>
    %156 = vector.shape_cast %155 : vector<1x1x32xf32> to vector<1x32xf32>
    %cst_72 = arith.constant dense<0.000000e+00> : vector<12xf32>
    %157 = vector.multi_reduction <add>, %152, %cst_72 [1] : vector<12x32xf32> to vector<12xf32>
    %158 = vector.shape_cast %157 : vector<12xf32> to vector<12x1xf32>
    %cst_73 = arith.constant 3.200000e+01 : f32
    %159 = vector.broadcast %cst_73 : f32 to vector<12x1xf32>
    %160 = arith.divf %158, %159 : vector<12x1xf32>
    %161 = vector.broadcast %160 : vector<12x1xf32> to vector<12x32xf32>
    %162 = arith.subf %152, %161 : vector<12x32xf32>
    %163 = arith.mulf %162, %162 : vector<12x32xf32>
    %cst_74 = arith.constant dense<0.000000e+00> : vector<12xf32>
    %164 = vector.multi_reduction <add>, %163, %cst_74 [1] : vector<12x32xf32> to vector<12xf32>
    %165 = vector.shape_cast %164 : vector<12xf32> to vector<12x1xf32>
    %cst_75 = arith.constant 3.200000e+01 : f32
    %166 = vector.broadcast %cst_75 : f32 to vector<12x1xf32>
    %167 = arith.divf %165, %166 : vector<12x1xf32>
    %cst_76 = arith.constant 9.99999974E-6 : f32
    %168 = vector.broadcast %cst_76 : f32 to vector<12x1xf32>
    %169 = arith.addf %167, %168 : vector<12x1xf32>
    %170 = math.rsqrt %169 : vector<12x1xf32>
    %171 = vector.broadcast %170 : vector<12x1xf32> to vector<12x32xf32>
    %172 = arith.mulf %162, %171 : vector<12x32xf32>
    %173 = vector.broadcast %154 : vector<1x32xf32> to vector<12x32xf32>
    %174 = arith.mulf %172, %173 : vector<12x32xf32>
    %175 = vector.broadcast %156 : vector<1x32xf32> to vector<12x32xf32>
    %176 = arith.addf %174, %175 : vector<12x32xf32>
    %c1 = arith.constant 1 : index
    %c0_77 = arith.constant 0 : index
    %c0_78 = arith.constant 0 : index
    %177 = vector.load %arg4[%c1, %c0_77, %c0_78] : memref<2x32x96xbf16, #tpu.memory_space<vmem>>, vector<1x32x96xbf16>
    %178 = vector.shape_cast %177 : vector<1x32x96xbf16> to vector<32x96xbf16>
    %179 = arith.truncf %176 : vector<12x32xf32> to vector<12x32xbf16>
    %cst_79 = arith.constant dense<0.000000e+00> : vector<12x96xf32>
    %180 = tpu.matmul %179, %178, %cst_79 {dimension_numbers = #tpu.dot_dimension_numbers<[1], [0], [0], [1], [0, 0, 1, 1], [], []>} : vector<12x32xbf16>, vector<32x96xbf16>, vector<12x96xf32> -> vector<12x96xf32>
    %c1_80 = arith.constant 1 : index
    %c0_81 = arith.constant 0 : index
    %c0_82 = arith.constant 0 : index
    %181 = vector.load %arg5[%c1_80, %c0_81, %c0_82] : memref<2x1x96xf32, #tpu.memory_space<vmem>>, vector<1x1x96xf32>
    %182 = vector.shape_cast %181 : vector<1x1x96xf32> to vector<1x96xf32>
    %183 = vector.broadcast %182 : vector<1x96xf32> to vector<12x96xf32>
    %184 = arith.addf %180, %183 : vector<12x96xf32>
    %185 = vector.extract_strided_slice %184 {offsets = [0, 0], sizes = [12, 8], strides = [1, 1]} : vector<12x96xf32> to vector<12x8xf32>
    %186 = vector.extract_strided_slice %184 {offsets = [0, 32], sizes = [12, 8], strides = [1, 1]} : vector<12x96xf32> to vector<12x8xf32>
    %187 = vector.extract_strided_slice %184 {offsets = [0, 64], sizes = [12, 8], strides = [1, 1]} : vector<12x96xf32> to vector<12x8xf32>
    %188 = arith.truncf %185 : vector<12x8xf32> to vector<12x8xbf16>
    %189 = arith.truncf %186 : vector<12x8xf32> to vector<12x8xbf16>
    %cst_83 = arith.constant dense<0.000000e+00> : vector<12x12xf32>
    %190 = tpu.matmul %188, %189, %cst_83 {dimension_numbers = #tpu.dot_dimension_numbers<[1], [1], [0], [0], [0, 0, 1, 0], [], []>} : vector<12x8xbf16>, vector<12x8xbf16>, vector<12x12xf32> -> vector<12x12xf32>
    %cst_84 = arith.constant 0.353553385 : f32
    %191 = vector.broadcast %cst_84 : f32 to vector<12x12xf32>
    %192 = arith.mulf %190, %191 : vector<12x12xf32>
    %cst_85 = arith.constant dense<0xFF800000> : vector<12xf32>
    %193 = vector.multi_reduction <maximumf>, %192, %cst_85 [1] : vector<12x12xf32> to vector<12xf32>
    %194 = vector.shape_cast %193 : vector<12xf32> to vector<12x1xf32>
    %195 = vector.broadcast %194 : vector<12x1xf32> to vector<12x12xf32>
    %196 = arith.subf %192, %195 : vector<12x12xf32>
    %197 = math.exp %196 : vector<12x12xf32>
    %cst_86 = arith.constant dense<0.000000e+00> : vector<12xf32>
    %198 = vector.multi_reduction <add>, %197, %cst_86 [1] : vector<12x12xf32> to vector<12xf32>
    %199 = vector.shape_cast %198 : vector<12xf32> to vector<12x1xf32>
    %200 = tpu.reciprocal %199 {approx = true} : vector<12x1xf32> -> vector<12x1xf32>
    %201 = vector.broadcast %200 : vector<12x1xf32> to vector<12x12xf32>
    %202 = arith.mulf %197, %201 : vector<12x12xf32>
    %203 = arith.truncf %202 : vector<12x12xf32> to vector<12x12xbf16>
    %204 = arith.truncf %187 : vector<12x8xf32> to vector<12x8xbf16>
    %cst_87 = arith.constant dense<0.000000e+00> : vector<12x8xf32>
    %205 = tpu.matmul %203, %204, %cst_87 {dimension_numbers = #tpu.dot_dimension_numbers<[1], [0], [0], [1], [0, 0, 1, 1], [], []>} : vector<12x12xbf16>, vector<12x8xbf16>, vector<12x8xf32> -> vector<12x8xf32>
    %206 = vector.extract_strided_slice %184 {offsets = [0, 8], sizes = [12, 8], strides = [1, 1]} : vector<12x96xf32> to vector<12x8xf32>
    %207 = vector.extract_strided_slice %184 {offsets = [0, 40], sizes = [12, 8], strides = [1, 1]} : vector<12x96xf32> to vector<12x8xf32>
    %208 = vector.extract_strided_slice %184 {offsets = [0, 72], sizes = [12, 8], strides = [1, 1]} : vector<12x96xf32> to vector<12x8xf32>
    %209 = arith.truncf %206 : vector<12x8xf32> to vector<12x8xbf16>
    %210 = arith.truncf %207 : vector<12x8xf32> to vector<12x8xbf16>
    %cst_88 = arith.constant dense<0.000000e+00> : vector<12x12xf32>
    %211 = tpu.matmul %209, %210, %cst_88 {dimension_numbers = #tpu.dot_dimension_numbers<[1], [1], [0], [0], [0, 0, 1, 0], [], []>} : vector<12x8xbf16>, vector<12x8xbf16>, vector<12x12xf32> -> vector<12x12xf32>
    %cst_89 = arith.constant 0.353553385 : f32
    %212 = vector.broadcast %cst_89 : f32 to vector<12x12xf32>
    %213 = arith.mulf %211, %212 : vector<12x12xf32>
    %cst_90 = arith.constant dense<0xFF800000> : vector<12xf32>
    %214 = vector.multi_reduction <maximumf>, %213, %cst_90 [1] : vector<12x12xf32> to vector<12xf32>
    %215 = vector.shape_cast %214 : vector<12xf32> to vector<12x1xf32>
    %216 = vector.broadcast %215 : vector<12x1xf32> to vector<12x12xf32>
    %217 = arith.subf %213, %216 : vector<12x12xf32>
    %218 = math.exp %217 : vector<12x12xf32>
    %cst_91 = arith.constant dense<0.000000e+00> : vector<12xf32>
    %219 = vector.multi_reduction <add>, %218, %cst_91 [1] : vector<12x12xf32> to vector<12xf32>
    %220 = vector.shape_cast %219 : vector<12xf32> to vector<12x1xf32>
    %221 = tpu.reciprocal %220 {approx = true} : vector<12x1xf32> -> vector<12x1xf32>
    %222 = vector.broadcast %221 : vector<12x1xf32> to vector<12x12xf32>
    %223 = arith.mulf %218, %222 : vector<12x12xf32>
    %224 = arith.truncf %223 : vector<12x12xf32> to vector<12x12xbf16>
    %225 = arith.truncf %208 : vector<12x8xf32> to vector<12x8xbf16>
    %cst_92 = arith.constant dense<0.000000e+00> : vector<12x8xf32>
    %226 = tpu.matmul %224, %225, %cst_92 {dimension_numbers = #tpu.dot_dimension_numbers<[1], [0], [0], [1], [0, 0, 1, 1], [], []>} : vector<12x12xbf16>, vector<12x8xbf16>, vector<12x8xf32> -> vector<12x8xf32>
    %227 = vector.extract_strided_slice %184 {offsets = [0, 16], sizes = [12, 8], strides = [1, 1]} : vector<12x96xf32> to vector<12x8xf32>
    %228 = vector.extract_strided_slice %184 {offsets = [0, 48], sizes = [12, 8], strides = [1, 1]} : vector<12x96xf32> to vector<12x8xf32>
    %229 = vector.extract_strided_slice %184 {offsets = [0, 80], sizes = [12, 8], strides = [1, 1]} : vector<12x96xf32> to vector<12x8xf32>
    %230 = arith.truncf %227 : vector<12x8xf32> to vector<12x8xbf16>
    %231 = arith.truncf %228 : vector<12x8xf32> to vector<12x8xbf16>
    %cst_93 = arith.constant dense<0.000000e+00> : vector<12x12xf32>
    %232 = tpu.matmul %230, %231, %cst_93 {dimension_numbers = #tpu.dot_dimension_numbers<[1], [1], [0], [0], [0, 0, 1, 0], [], []>} : vector<12x8xbf16>, vector<12x8xbf16>, vector<12x12xf32> -> vector<12x12xf32>
    %cst_94 = arith.constant 0.353553385 : f32
    %233 = vector.broadcast %cst_94 : f32 to vector<12x12xf32>
    %234 = arith.mulf %232, %233 : vector<12x12xf32>
    %cst_95 = arith.constant dense<0xFF800000> : vector<12xf32>
    %235 = vector.multi_reduction <maximumf>, %234, %cst_95 [1] : vector<12x12xf32> to vector<12xf32>
    %236 = vector.shape_cast %235 : vector<12xf32> to vector<12x1xf32>
    %237 = vector.broadcast %236 : vector<12x1xf32> to vector<12x12xf32>
    %238 = arith.subf %234, %237 : vector<12x12xf32>
    %239 = math.exp %238 : vector<12x12xf32>
    %cst_96 = arith.constant dense<0.000000e+00> : vector<12xf32>
    %240 = vector.multi_reduction <add>, %239, %cst_96 [1] : vector<12x12xf32> to vector<12xf32>
    %241 = vector.shape_cast %240 : vector<12xf32> to vector<12x1xf32>
    %242 = tpu.reciprocal %241 {approx = true} : vector<12x1xf32> -> vector<12x1xf32>
    %243 = vector.broadcast %242 : vector<12x1xf32> to vector<12x12xf32>
    %244 = arith.mulf %239, %243 : vector<12x12xf32>
    %245 = arith.truncf %244 : vector<12x12xf32> to vector<12x12xbf16>
    %246 = arith.truncf %229 : vector<12x8xf32> to vector<12x8xbf16>
    %cst_97 = arith.constant dense<0.000000e+00> : vector<12x8xf32>
    %247 = tpu.matmul %245, %246, %cst_97 {dimension_numbers = #tpu.dot_dimension_numbers<[1], [0], [0], [1], [0, 0, 1, 1], [], []>} : vector<12x12xbf16>, vector<12x8xbf16>, vector<12x8xf32> -> vector<12x8xf32>
    %248 = vector.extract_strided_slice %184 {offsets = [0, 24], sizes = [12, 8], strides = [1, 1]} : vector<12x96xf32> to vector<12x8xf32>
    %249 = vector.extract_strided_slice %184 {offsets = [0, 56], sizes = [12, 8], strides = [1, 1]} : vector<12x96xf32> to vector<12x8xf32>
    %250 = vector.extract_strided_slice %184 {offsets = [0, 88], sizes = [12, 8], strides = [1, 1]} : vector<12x96xf32> to vector<12x8xf32>
    %251 = arith.truncf %248 : vector<12x8xf32> to vector<12x8xbf16>
    %252 = arith.truncf %249 : vector<12x8xf32> to vector<12x8xbf16>
    %cst_98 = arith.constant dense<0.000000e+00> : vector<12x12xf32>
    %253 = tpu.matmul %251, %252, %cst_98 {dimension_numbers = #tpu.dot_dimension_numbers<[1], [1], [0], [0], [0, 0, 1, 0], [], []>} : vector<12x8xbf16>, vector<12x8xbf16>, vector<12x12xf32> -> vector<12x12xf32>
    %cst_99 = arith.constant 0.353553385 : f32
    %254 = vector.broadcast %cst_99 : f32 to vector<12x12xf32>
    %255 = arith.mulf %253, %254 : vector<12x12xf32>
    %cst_100 = arith.constant dense<0xFF800000> : vector<12xf32>
    %256 = vector.multi_reduction <maximumf>, %255, %cst_100 [1] : vector<12x12xf32> to vector<12xf32>
    %257 = vector.shape_cast %256 : vector<12xf32> to vector<12x1xf32>
    %258 = vector.broadcast %257 : vector<12x1xf32> to vector<12x12xf32>
    %259 = arith.subf %255, %258 : vector<12x12xf32>
    %260 = math.exp %259 : vector<12x12xf32>
    %cst_101 = arith.constant dense<0.000000e+00> : vector<12xf32>
    %261 = vector.multi_reduction <add>, %260, %cst_101 [1] : vector<12x12xf32> to vector<12xf32>
    %262 = vector.shape_cast %261 : vector<12xf32> to vector<12x1xf32>
    %263 = tpu.reciprocal %262 {approx = true} : vector<12x1xf32> -> vector<12x1xf32>
    %264 = vector.broadcast %263 : vector<12x1xf32> to vector<12x12xf32>
    %265 = arith.mulf %260, %264 : vector<12x12xf32>
    %266 = arith.truncf %265 : vector<12x12xf32> to vector<12x12xbf16>
    %267 = arith.truncf %250 : vector<12x8xf32> to vector<12x8xbf16>
    %cst_102 = arith.constant dense<0.000000e+00> : vector<12x8xf32>
    %268 = tpu.matmul %266, %267, %cst_102 {dimension_numbers = #tpu.dot_dimension_numbers<[1], [0], [0], [1], [0, 0, 1, 1], [], []>} : vector<12x12xbf16>, vector<12x8xbf16>, vector<12x8xf32> -> vector<12x8xf32>
    %269 = tpu.concatenate %205, %226, %247, %268 in 1 : vector<12x8xf32>, vector<12x8xf32>, vector<12x8xf32>, vector<12x8xf32> -> vector<12x32xf32>
    %c1_103 = arith.constant 1 : index
    %c0_104 = arith.constant 0 : index
    %c0_105 = arith.constant 0 : index
    %270 = vector.load %arg6[%c1_103, %c0_104, %c0_105] : memref<2x32x32xbf16, #tpu.memory_space<vmem>>, vector<1x32x32xbf16>
    %271 = vector.shape_cast %270 : vector<1x32x32xbf16> to vector<32x32xbf16>
    %272 = arith.truncf %269 : vector<12x32xf32> to vector<12x32xbf16>
    %cst_106 = arith.constant dense<0.000000e+00> : vector<12x32xf32>
    %273 = tpu.matmul %272, %271, %cst_106 {dimension_numbers = #tpu.dot_dimension_numbers<[1], [0], [0], [1], [0, 0, 1, 1], [], []>} : vector<12x32xbf16>, vector<32x32xbf16>, vector<12x32xf32> -> vector<12x32xf32>
    %c1_107 = arith.constant 1 : index
    %c0_108 = arith.constant 0 : index
    %c0_109 = arith.constant 0 : index
    %274 = vector.load %arg7[%c1_107, %c0_108, %c0_109] : memref<2x1x32xf32, #tpu.memory_space<vmem>>, vector<1x1x32xf32>
    %275 = vector.shape_cast %274 : vector<1x1x32xf32> to vector<1x32xf32>
    %276 = vector.broadcast %275 : vector<1x32xf32> to vector<12x32xf32>
    %277 = arith.addf %273, %276 : vector<12x32xf32>
    %278 = arith.addf %176, %277 : vector<12x32xf32>
    %c1_110 = arith.constant 1 : index
    %c0_111 = arith.constant 0 : index
    %c0_112 = arith.constant 0 : index
    %279 = vector.load %arg12[%c1_110, %c0_111, %c0_112] : memref<2x1x32xf32, #tpu.memory_space<vmem>>, vector<1x1x32xf32>
    %280 = vector.shape_cast %279 : vector<1x1x32xf32> to vector<1x32xf32>
    %c1_113 = arith.constant 1 : index
    %c0_114 = arith.constant 0 : index
    %c0_115 = arith.constant 0 : index
    %281 = vector.load %arg13[%c1_113, %c0_114, %c0_115] : memref<2x1x32xf32, #tpu.memory_space<vmem>>, vector<1x1x32xf32>
    %282 = vector.shape_cast %281 : vector<1x1x32xf32> to vector<1x32xf32>
    %cst_116 = arith.constant dense<0.000000e+00> : vector<12xf32>
    %283 = vector.multi_reduction <add>, %278, %cst_116 [1] : vector<12x32xf32> to vector<12xf32>
    %284 = vector.shape_cast %283 : vector<12xf32> to vector<12x1xf32>
    %cst_117 = arith.constant 3.200000e+01 : f32
    %285 = vector.broadcast %cst_117 : f32 to vector<12x1xf32>
    %286 = arith.divf %284, %285 : vector<12x1xf32>
    %287 = vector.broadcast %286 : vector<12x1xf32> to vector<12x32xf32>
    %288 = arith.subf %278, %287 : vector<12x32xf32>
    %289 = arith.mulf %288, %288 : vector<12x32xf32>
    %cst_118 = arith.constant dense<0.000000e+00> : vector<12xf32>
    %290 = vector.multi_reduction <add>, %289, %cst_118 [1] : vector<12x32xf32> to vector<12xf32>
    %291 = vector.shape_cast %290 : vector<12xf32> to vector<12x1xf32>
    %cst_119 = arith.constant 3.200000e+01 : f32
    %292 = vector.broadcast %cst_119 : f32 to vector<12x1xf32>
    %293 = arith.divf %291, %292 : vector<12x1xf32>
    %cst_120 = arith.constant 9.99999974E-6 : f32
    %294 = vector.broadcast %cst_120 : f32 to vector<12x1xf32>
    %295 = arith.addf %293, %294 : vector<12x1xf32>
    %296 = math.rsqrt %295 : vector<12x1xf32>
    %297 = vector.broadcast %296 : vector<12x1xf32> to vector<12x32xf32>
    %298 = arith.mulf %288, %297 : vector<12x32xf32>
    %299 = vector.broadcast %280 : vector<1x32xf32> to vector<12x32xf32>
    %300 = arith.mulf %298, %299 : vector<12x32xf32>
    %301 = vector.broadcast %282 : vector<1x32xf32> to vector<12x32xf32>
    %302 = arith.addf %300, %301 : vector<12x32xf32>
    %c1_121 = arith.constant 1 : index
    %c0_122 = arith.constant 0 : index
    %c0_123 = arith.constant 0 : index
    %303 = vector.load %arg8[%c1_121, %c0_122, %c0_123] : memref<2x32x64xbf16, #tpu.memory_space<vmem>>, vector<1x32x64xbf16>
    %304 = vector.shape_cast %303 : vector<1x32x64xbf16> to vector<32x64xbf16>
    %305 = arith.truncf %302 : vector<12x32xf32> to vector<12x32xbf16>
    %cst_124 = arith.constant dense<0.000000e+00> : vector<12x64xf32>
    %306 = tpu.matmul %305, %304, %cst_124 {dimension_numbers = #tpu.dot_dimension_numbers<[1], [0], [0], [1], [0, 0, 1, 1], [], []>} : vector<12x32xbf16>, vector<32x64xbf16>, vector<12x64xf32> -> vector<12x64xf32>
    %c1_125 = arith.constant 1 : index
    %c0_126 = arith.constant 0 : index
    %c0_127 = arith.constant 0 : index
    %307 = vector.load %arg9[%c1_125, %c0_126, %c0_127] : memref<2x1x64xf32, #tpu.memory_space<vmem>>, vector<1x1x64xf32>
    %308 = vector.shape_cast %307 : vector<1x1x64xf32> to vector<1x64xf32>
    %309 = vector.broadcast %308 : vector<1x64xf32> to vector<12x64xf32>
    %310 = arith.addf %306, %309 : vector<12x64xf32>
    %cst_128 = arith.constant 0.000000e+00 : f32
    %311 = vector.broadcast %cst_128 : f32 to vector<12x64xf32>
    %312 = arith.maximumf %310, %311 : vector<12x64xf32>
    %c1_129 = arith.constant 1 : index
    %c0_130 = arith.constant 0 : index
    %c0_131 = arith.constant 0 : index
    %313 = vector.load %arg10[%c1_129, %c0_130, %c0_131] : memref<2x64x32xbf16, #tpu.memory_space<vmem>>, vector<1x64x32xbf16>
    %314 = vector.shape_cast %313 : vector<1x64x32xbf16> to vector<64x32xbf16>
    %315 = arith.truncf %312 : vector<12x64xf32> to vector<12x64xbf16>
    %cst_132 = arith.constant dense<0.000000e+00> : vector<12x32xf32>
    %316 = tpu.matmul %315, %314, %cst_132 {dimension_numbers = #tpu.dot_dimension_numbers<[1], [0], [0], [1], [0, 0, 1, 1], [], []>} : vector<12x64xbf16>, vector<64x32xbf16>, vector<12x32xf32> -> vector<12x32xf32>
    %c1_133 = arith.constant 1 : index
    %c0_134 = arith.constant 0 : index
    %c0_135 = arith.constant 0 : index
    %317 = vector.load %arg11[%c1_133, %c0_134, %c0_135] : memref<2x1x32xf32, #tpu.memory_space<vmem>>, vector<1x1x32xf32>
    %318 = vector.shape_cast %317 : vector<1x1x32xf32> to vector<1x32xf32>
    %319 = vector.broadcast %318 : vector<1x32xf32> to vector<12x32xf32>
    %320 = arith.addf %316, %319 : vector<12x32xf32>
    %321 = arith.addf %302, %320 : vector<12x32xf32>
    %c1_136 = arith.constant 1 : index
    %c0_137 = arith.constant 0 : index
    %c0_138 = arith.constant 0 : index
    %322 = vector.load %arg14[%c1_136, %c0_137, %c0_138] : memref<2x1x32xf32, #tpu.memory_space<vmem>>, vector<1x1x32xf32>
    %323 = vector.shape_cast %322 : vector<1x1x32xf32> to vector<1x32xf32>
    %c1_139 = arith.constant 1 : index
    %c0_140 = arith.constant 0 : index
    %c0_141 = arith.constant 0 : index
    %324 = vector.load %arg15[%c1_139, %c0_140, %c0_141] : memref<2x1x32xf32, #tpu.memory_space<vmem>>, vector<1x1x32xf32>
    %325 = vector.shape_cast %324 : vector<1x1x32xf32> to vector<1x32xf32>
    %cst_142 = arith.constant dense<0.000000e+00> : vector<12xf32>
    %326 = vector.multi_reduction <add>, %321, %cst_142 [1] : vector<12x32xf32> to vector<12xf32>
    %327 = vector.shape_cast %326 : vector<12xf32> to vector<12x1xf32>
    %cst_143 = arith.constant 3.200000e+01 : f32
    %328 = vector.broadcast %cst_143 : f32 to vector<12x1xf32>
    %329 = arith.divf %327, %328 : vector<12x1xf32>
    %330 = vector.broadcast %329 : vector<12x1xf32> to vector<12x32xf32>
    %331 = arith.subf %321, %330 : vector<12x32xf32>
    %332 = arith.mulf %331, %331 : vector<12x32xf32>
    %cst_144 = arith.constant dense<0.000000e+00> : vector<12xf32>
    %333 = vector.multi_reduction <add>, %332, %cst_144 [1] : vector<12x32xf32> to vector<12xf32>
    %334 = vector.shape_cast %333 : vector<12xf32> to vector<12x1xf32>
    %cst_145 = arith.constant 3.200000e+01 : f32
    %335 = vector.broadcast %cst_145 : f32 to vector<12x1xf32>
    %336 = arith.divf %334, %335 : vector<12x1xf32>
    %cst_146 = arith.constant 9.99999974E-6 : f32
    %337 = vector.broadcast %cst_146 : f32 to vector<12x1xf32>
    %338 = arith.addf %336, %337 : vector<12x1xf32>
    %339 = math.rsqrt %338 : vector<12x1xf32>
    %340 = vector.broadcast %339 : vector<12x1xf32> to vector<12x32xf32>
    %341 = arith.mulf %331, %340 : vector<12x32xf32>
    %342 = vector.broadcast %323 : vector<1x32xf32> to vector<12x32xf32>
    %343 = arith.mulf %341, %342 : vector<12x32xf32>
    %344 = vector.broadcast %325 : vector<1x32xf32> to vector<12x32xf32>
    %345 = arith.addf %343, %344 : vector<12x32xf32>
    %c0_147 = arith.constant 0 : index
    %c0_148 = arith.constant 0 : index
    %346 = vector.load %arg16[%c0_147, %c0_148] : memref<32x32xbf16, #tpu.memory_space<vmem>>, vector<32x32xbf16>
    %347 = arith.truncf %345 : vector<12x32xf32> to vector<12x32xbf16>
    %cst_149 = arith.constant dense<0.000000e+00> : vector<12x32xf32>
    %348 = tpu.matmul %347, %346, %cst_149 {dimension_numbers = #tpu.dot_dimension_numbers<[1], [0], [0], [1], [0, 0, 1, 1], [], []>} : vector<12x32xbf16>, vector<32x32xbf16>, vector<12x32xf32> -> vector<12x32xf32>
    %c0_150 = arith.constant 0 : index
    %c0_151 = arith.constant 0 : index
    %349 = vector.load %arg17[%c0_150, %c0_151] : memref<1x32xf32, #tpu.memory_space<vmem>>, vector<1x32xf32>
    %350 = vector.broadcast %349 : vector<1x32xf32> to vector<12x32xf32>
    %351 = arith.addf %348, %350 : vector<12x32xf32>
    %c0_152 = arith.constant 0 : index
    %c0_153 = arith.constant 0 : index
    %c0_154 = arith.constant 0 : index
    %352 = vector.load %arg18[%c0_152, %c0_153, %c0_154] : memref<1x12x32xf32, #tpu.memory_space<vmem>>, vector<1x12x32xf32>
    %353 = vector.shape_cast %352 : vector<1x12x32xf32> to vector<12x32xf32>
    %354 = vector.shape_cast %351 : vector<12x32xf32> to vector<1x12x32xf32>
    tpu.vector_store %arg18[%c0_152, %c0_153, %c0_154], %354 {strides = array<i32>} : memref<1x12x32xf32, #tpu.memory_space<vmem>>, vector<1x12x32xf32>,
    return
  }
  func.func @transform_0(%arg0: i32) -> (i32, i32, i32) {
    %c0_i32 = arith.constant 0 : i32
    %c0_i32_0 = arith.constant 0 : i32
    %c0_i32_1 = arith.constant 0 : i32
    return %arg0, %c0_i32, %c0_i32_0 : i32, i32, i32
  }
  func.func @transform_1(%arg0: i32) -> (i32, i32) {
    %c0_i32 = arith.constant 0 : i32
    %c0_i32_0 = arith.constant 0 : i32
    %c0_i32_1 = arith.constant 0 : i32
    return %c0_i32, %c0_i32_0 : i32, i32
  }
  func.func @transform_2(%arg0: i32) -> (i32, i32) {
    %c0_i32 = arith.constant 0 : i32
    %c0_i32_0 = arith.constant 0 : i32
    %c0_i32_1 = arith.constant 0 : i32
    return %c0_i32, %c0_i32_0 : i32, i32
  }
  func.func @transform_3(%arg0: i32) -> (i32, i32, i32) {
    %c0_i32 = arith.constant 0 : i32
    %c0_i32_0 = arith.constant 0 : i32
    %c0_i32_1 = arith.constant 0 : i32
    %c0_i32_2 = arith.constant 0 : i32
    return %c0_i32, %c0_i32_0, %c0_i32_1 : i32, i32, i32
  }
  func.func @transform_4(%arg0: i32) -> (i32, i32, i32) {
    %c0_i32 = arith.constant 0 : i32
    %c0_i32_0 = arith.constant 0 : i32
    %c0_i32_1 = arith.constant 0 : i32
    %c0_i32_2 = arith.constant 0 : i32
    return %c0_i32, %c0_i32_0, %c0_i32_1 : i32, i32, i32
  }
  func.func @transform_5(%arg0: i32) -> (i32, i32, i32) {
    %c0_i32 = arith.constant 0 : i32
    %c0_i32_0 = arith.constant 0 : i32
    %c0_i32_1 = arith.constant 0 : i32
    %c0_i32_2 = arith.constant 0 : i32
    return %c0_i32, %c0_i32_0, %c0_i32_1 : i32, i32, i32
  }
  func.func @transform_6(%arg0: i32) -> (i32, i32, i32) {
    %c0_i32 = arith.constant 0 : i32
    %c0_i32_0 = arith.constant 0 : i32
    %c0_i32_1 = arith.constant 0 : i32
    %c0_i32_2 = arith.constant 0 : i32
    return %c0_i32, %c0_i32_0, %c0_i32_1 : i32, i32, i32
  }
  func.func @transform_7(%arg0: i32) -> (i32, i32, i32) {
    %c0_i32 = arith.constant 0 : i32
    %c0_i32_0 = arith.constant 0 : i32
    %c0_i32_1 = arith.constant 0 : i32
    %c0_i32_2 = arith.constant 0 : i32
    return %c0_i32, %c0_i32_0, %c0_i32_1 : i32, i32, i32
  }
  func.func @transform_8(%arg0: i32) -> (i32, i32, i32) {
    %c0_i32 = arith.constant 0 : i32
    %c0_i32_0 = arith.constant 0 : i32
    %c0_i32_1 = arith.constant 0 : i32
    %c0_i32_2 = arith.constant 0 : i32
    return %c0_i32, %c0_i32_0, %c0_i32_1 : i32, i32, i32
  }
  func.func @transform_9(%arg0: i32) -> (i32, i32, i32) {
    %c0_i32 = arith.constant 0 : i32
    %c0_i32_0 = arith.constant 0 : i32
    %c0_i32_1 = arith.constant 0 : i32
    %c0_i32_2 = arith.constant 0 : i32
    return %c0_i32, %c0_i32_0, %c0_i32_1 : i32, i32, i32
  }
  func.func @transform_10(%arg0: i32) -> (i32, i32, i32) {
    %c0_i32 = arith.constant 0 : i32
    %c0_i32_0 = arith.constant 0 : i32
    %c0_i32_1 = arith.constant 0 : i32
    %c0_i32_2 = arith.constant 0 : i32
    return %c0_i32, %c0_i32_0, %c0_i32_1 : i32, i32, i32
  }
  func.func @transform_11(%arg0: i32) -> (i32, i32, i32) {
    %c0_i32 = arith.constant 0 : i32
    %c0_i32_0 = arith.constant 0 : i32
    %c0_i32_1 = arith.constant 0 : i32
    %c0_i32_2 = arith.constant 0 : i32
    return %c0_i32, %c0_i32_0, %c0_i32_1 : i32, i32, i32
  }
  func.func @transform_12(%arg0: i32) -> (i32, i32, i32) {
    %c0_i32 = arith.constant 0 : i32
    %c0_i32_0 = arith.constant 0 : i32
    %c0_i32_1 = arith.constant 0 : i32
    %c0_i32_2 = arith.constant 0 : i32
    return %c0_i32, %c0_i32_0, %c0_i32_1 : i32, i32, i32
  }
  func.func @transform_13(%arg0: i32) -> (i32, i32, i32) {
    %c0_i32 = arith.constant 0 : i32
    %c0_i32_0 = arith.constant 0 : i32
    %c0_i32_1 = arith.constant 0 : i32
    %c0_i32_2 = arith.constant 0 : i32
    return %c0_i32, %c0_i32_0, %c0_i32_1 : i32, i32, i32
  }
  func.func @transform_14(%arg0: i32) -> (i32, i32, i32) {
    %c0_i32 = arith.constant 0 : i32
    %c0_i32_0 = arith.constant 0 : i32
    %c0_i32_1 = arith.constant 0 : i32
    %c0_i32_2 = arith.constant 0 : i32
    return %c0_i32, %c0_i32_0, %c0_i32_1 : i32, i32, i32
  }
  func.func @transform_15(%arg0: i32) -> (i32, i32) {
    %c0_i32 = arith.constant 0 : i32
    %c0_i32_0 = arith.constant 0 : i32
    %c0_i32_1 = arith.constant 0 : i32
    return %c0_i32, %c0_i32_0 : i32, i32
  }
  func.func @transform_16(%arg0: i32) -> (i32, i32) {
    %c0_i32 = arith.constant 0 : i32
    %c0_i32_0 = arith.constant 0 : i32
    %c0_i32_1 = arith.constant 0 : i32
    return %c0_i32, %c0_i32_0 : i32, i32
  }
  func.func @transform_17(%arg0: i32) -> (i32, i32, i32) {
    %c0_i32 = arith.constant 0 : i32
    %c0_i32_0 = arith.constant 0 : i32
    %c0_i32_1 = arith.constant 0 : i32
    return %arg0, %c0_i32, %c0_i32_0 : i32, i32, i32
  }
}

module attributes {stable_mosaic.version = 11 : i64} {
  func.func @_transformer_kernel(%arg0: i32, %arg1: memref<1x12x96xf32, #tpu.memory_space<vmem>>, %arg2: memref<96x32xbf16, #tpu.memory_space<vmem>>, %arg3: memref<1x32xf32, #tpu.memory_space<vmem>>, %arg4: memref<2x32x96xbf16, #tpu.memory_space<vmem>>, %arg5: memref<2x1x96xf32, #tpu.memory_space<vmem>>, %arg6: memref<2x32x32xbf16, #tpu.memory_space<vmem>>, %arg7: memref<2x1x32xf32, #tpu.memory_space<vmem>>, %arg8: memref<2x32x64xbf16, #tpu.memory_space<vmem>>, %arg9: memref<2x1x64xf32, #tpu.memory_space<vmem>>, %arg10: memref<2x64x32xbf16, #tpu.memory_space<vmem>>, %arg11: memref<2x1x32xf32, #tpu.memory_space<vmem>>, %arg12: memref<2x1x32xf32, #tpu.memory_space<vmem>>, %arg13: memref<2x1x32xf32, #tpu.memory_space<vmem>>, %arg14: memref<2x1x32xf32, #tpu.memory_space<vmem>>, %arg15: memref<2x1x32xf32, #tpu.memory_space<vmem>>, %arg16: memref<32x4xbf16, #tpu.memory_space<vmem>>, %arg17: memref<1x4xf32, #tpu.memory_space<vmem>>, %arg18: memref<1x12x4xf32, #tpu.memory_space<vmem>>) attributes {dimension_semantics = [#tpu.dimension_semantics<parallel>], iteration_bounds = array<i64: 2>, scalar_prefetch = 0 : i64, scratch_operands = 0 : i64, tpu.core_type = #tpu.core_type<tc>, window_params = [{transform_indices = @transform_0, window_bounds = array<i64: 1, 12, 96>}, {pipeline_mode = #tpu.pipeline_mode<synchronous>, transform_indices = @transform_1, window_bounds = array<i64: 96, 32>}, {pipeline_mode = #tpu.pipeline_mode<synchronous>, transform_indices = @transform_2, window_bounds = array<i64: 1, 32>}, {pipeline_mode = #tpu.pipeline_mode<synchronous>, transform_indices = @transform_3, window_bounds = array<i64: 2, 32, 96>}, {pipeline_mode = #tpu.pipeline_mode<synchronous>, transform_indices = @transform_4, window_bounds = array<i64: 2, 1, 96>}, {pipeline_mode = #tpu.pipeline_mode<synchronous>, transform_indices = @transform_5, window_bounds = array<i64: 2, 32, 32>}, {pipeline_mode = #tpu.pipeline_mode<synchronous>, transform_indices = @transform_6, window_bounds = array<i64: 2, 1, 32>}, {pipeline_mode = #tpu.pipeline_mode<synchronous>, transform_indices = @transform_7, window_bounds = array<i64: 2, 32, 64>}, {pipeline_mode = #tpu.pipeline_mode<synchronous>, transform_indices = @transform_8, window_bounds = array<i64: 2, 1, 64>}, {pipeline_mode = #tpu.pipeline_mode<synchronous>, transform_indices = @transform_9, window_bounds = array<i64: 2, 64, 32>}, {pipeline_mode = #tpu.pipeline_mode<synchronous>, transform_indices = @transform_10, window_bounds = array<i64: 2, 1, 32>}, {pipeline_mode = #tpu.pipeline_mode<synchronous>, transform_indices = @transform_11, window_bounds = array<i64: 2, 1, 32>}, {pipeline_mode = #tpu.pipeline_mode<synchronous>, transform_indices = @transform_12, window_bounds = array<i64: 2, 1, 32>}, {pipeline_mode = #tpu.pipeline_mode<synchronous>, transform_indices = @transform_13, window_bounds = array<i64: 2, 1, 32>}, {pipeline_mode = #tpu.pipeline_mode<synchronous>, transform_indices = @transform_14, window_bounds = array<i64: 2, 1, 32>}, {pipeline_mode = #tpu.pipeline_mode<synchronous>, transform_indices = @transform_15, window_bounds = array<i64: 32, 4>}, {pipeline_mode = #tpu.pipeline_mode<synchronous>, transform_indices = @transform_16, window_bounds = array<i64: 1, 4>}, {transform_indices = @transform_17, window_bounds = array<i64: 1, 12, 4>}]} {
    %c0 = arith.constant 0 : index
    %c0_0 = arith.constant 0 : index
    %c0_1 = arith.constant 0 : index
    %0 = vector.load %arg1[%c0, %c0_0, %c0_1] : memref<1x12x96xf32, #tpu.memory_space<vmem>>, vector<1x12x96xf32>
    %1 = vector.shape_cast %0 : vector<1x12x96xf32> to vector<12x96xf32>
    %c0_2 = arith.constant 0 : index
    %c0_3 = arith.constant 0 : index
    %2 = vector.load %arg2[%c0_2, %c0_3] : memref<96x32xbf16, #tpu.memory_space<vmem>>, vector<96x32xbf16>
    %3 = arith.truncf %1 : vector<12x96xf32> to vector<12x96xbf16>
    %cst = arith.constant dense<0.000000e+00> : vector<12x32xf32>
    %4 = tpu.matmul %3, %2, %cst {dimension_numbers = #tpu.dot_dimension_numbers<[1], [0], [0], [1], [0, 0, 1, 1], [], []>} : vector<12x96xbf16>, vector<96x32xbf16>, vector<12x32xf32> -> vector<12x32xf32>
    %c0_4 = arith.constant 0 : index
    %c0_5 = arith.constant 0 : index
    %5 = vector.load %arg3[%c0_4, %c0_5] : memref<1x32xf32, #tpu.memory_space<vmem>>, vector<1x32xf32>
    %6 = vector.broadcast %5 : vector<1x32xf32> to vector<12x32xf32>
    %7 = arith.addf %4, %6 : vector<12x32xf32>
    %c0_6 = arith.constant 0 : index
    %c0_7 = arith.constant 0 : index
    %c0_8 = arith.constant 0 : index
    %8 = vector.load %arg4[%c0_6, %c0_7, %c0_8] : memref<2x32x96xbf16, #tpu.memory_space<vmem>>, vector<1x32x96xbf16>
    %9 = vector.shape_cast %8 : vector<1x32x96xbf16> to vector<32x96xbf16>
    %10 = arith.truncf %7 : vector<12x32xf32> to vector<12x32xbf16>
    %cst_9 = arith.constant dense<0.000000e+00> : vector<12x96xf32>
    %11 = tpu.matmul %10, %9, %cst_9 {dimension_numbers = #tpu.dot_dimension_numbers<[1], [0], [0], [1], [0, 0, 1, 1], [], []>} : vector<12x32xbf16>, vector<32x96xbf16>, vector<12x96xf32> -> vector<12x96xf32>
    %c0_10 = arith.constant 0 : index
    %c0_11 = arith.constant 0 : index
    %c0_12 = arith.constant 0 : index
    %12 = vector.load %arg5[%c0_10, %c0_11, %c0_12] : memref<2x1x96xf32, #tpu.memory_space<vmem>>, vector<1x1x96xf32>
    %13 = vector.shape_cast %12 : vector<1x1x96xf32> to vector<1x96xf32>
    %14 = vector.broadcast %13 : vector<1x96xf32> to vector<12x96xf32>
    %15 = arith.addf %11, %14 : vector<12x96xf32>
    %16 = vector.extract_strided_slice %15 {offsets = [0, 0], sizes = [12, 8], strides = [1, 1]} : vector<12x96xf32> to vector<12x8xf32>
    %17 = vector.extract_strided_slice %15 {offsets = [0, 32], sizes = [12, 8], strides = [1, 1]} : vector<12x96xf32> to vector<12x8xf32>
    %18 = vector.extract_strided_slice %15 {offsets = [0, 64], sizes = [12, 8], strides = [1, 1]} : vector<12x96xf32> to vector<12x8xf32>
    %19 = arith.truncf %16 : vector<12x8xf32> to vector<12x8xbf16>
    %20 = arith.truncf %17 : vector<12x8xf32> to vector<12x8xbf16>
    %cst_13 = arith.constant dense<0.000000e+00> : vector<12x12xf32>
    %21 = tpu.matmul %19, %20, %cst_13 {dimension_numbers = #tpu.dot_dimension_numbers<[1], [1], [0], [0], [0, 0, 1, 0], [], []>} : vector<12x8xbf16>, vector<12x8xbf16>, vector<12x12xf32> -> vector<12x12xf32>
    %cst_14 = arith.constant 0.353553385 : f32
    %22 = vector.broadcast %cst_14 : f32 to vector<12x12xf32>
    %23 = arith.mulf %21, %22 : vector<12x12xf32>
    %cst_15 = arith.constant dense<0xFF800000> : vector<12xf32>
    %24 = vector.multi_reduction <maximumf>, %23, %cst_15 [1] : vector<12x12xf32> to vector<12xf32>
    %25 = vector.shape_cast %24 : vector<12xf32> to vector<12x1xf32>
    %26 = vector.broadcast %25 : vector<12x1xf32> to vector<12x12xf32>
    %27 = arith.subf %23, %26 : vector<12x12xf32>
    %28 = math.exp %27 : vector<12x12xf32>
    %cst_16 = arith.constant dense<0.000000e+00> : vector<12xf32>
    %29 = vector.multi_reduction <add>, %28, %cst_16 [1] : vector<12x12xf32> to vector<12xf32>
    %30 = vector.shape_cast %29 : vector<12xf32> to vector<12x1xf32>
    %31 = tpu.reciprocal %30 {approx = true} : vector<12x1xf32> -> vector<12x1xf32>
    %32 = vector.broadcast %31 : vector<12x1xf32> to vector<12x12xf32>
    %33 = arith.mulf %28, %32 : vector<12x12xf32>
    %34 = arith.truncf %33 : vector<12x12xf32> to vector<12x12xbf16>
    %35 = arith.truncf %18 : vector<12x8xf32> to vector<12x8xbf16>
    %cst_17 = arith.constant dense<0.000000e+00> : vector<12x8xf32>
    %36 = tpu.matmul %34, %35, %cst_17 {dimension_numbers = #tpu.dot_dimension_numbers<[1], [0], [0], [1], [0, 0, 1, 1], [], []>} : vector<12x12xbf16>, vector<12x8xbf16>, vector<12x8xf32> -> vector<12x8xf32>
    %37 = vector.extract_strided_slice %15 {offsets = [0, 8], sizes = [12, 8], strides = [1, 1]} : vector<12x96xf32> to vector<12x8xf32>
    %38 = vector.extract_strided_slice %15 {offsets = [0, 40], sizes = [12, 8], strides = [1, 1]} : vector<12x96xf32> to vector<12x8xf32>
    %39 = vector.extract_strided_slice %15 {offsets = [0, 72], sizes = [12, 8], strides = [1, 1]} : vector<12x96xf32> to vector<12x8xf32>
    %40 = arith.truncf %37 : vector<12x8xf32> to vector<12x8xbf16>
    %41 = arith.truncf %38 : vector<12x8xf32> to vector<12x8xbf16>
    %cst_18 = arith.constant dense<0.000000e+00> : vector<12x12xf32>
    %42 = tpu.matmul %40, %41, %cst_18 {dimension_numbers = #tpu.dot_dimension_numbers<[1], [1], [0], [0], [0, 0, 1, 0], [], []>} : vector<12x8xbf16>, vector<12x8xbf16>, vector<12x12xf32> -> vector<12x12xf32>
    %cst_19 = arith.constant 0.353553385 : f32
    %43 = vector.broadcast %cst_19 : f32 to vector<12x12xf32>
    %44 = arith.mulf %42, %43 : vector<12x12xf32>
    %cst_20 = arith.constant dense<0xFF800000> : vector<12xf32>
    %45 = vector.multi_reduction <maximumf>, %44, %cst_20 [1] : vector<12x12xf32> to vector<12xf32>
    %46 = vector.shape_cast %45 : vector<12xf32> to vector<12x1xf32>
    %47 = vector.broadcast %46 : vector<12x1xf32> to vector<12x12xf32>
    %48 = arith.subf %44, %47 : vector<12x12xf32>
    %49 = math.exp %48 : vector<12x12xf32>
    %cst_21 = arith.constant dense<0.000000e+00> : vector<12xf32>
    %50 = vector.multi_reduction <add>, %49, %cst_21 [1] : vector<12x12xf32> to vector<12xf32>
    %51 = vector.shape_cast %50 : vector<12xf32> to vector<12x1xf32>
    %52 = tpu.reciprocal %51 {approx = true} : vector<12x1xf32> -> vector<12x1xf32>
    %53 = vector.broadcast %52 : vector<12x1xf32> to vector<12x12xf32>
    %54 = arith.mulf %49, %53 : vector<12x12xf32>
    %55 = arith.truncf %54 : vector<12x12xf32> to vector<12x12xbf16>
    %56 = arith.truncf %39 : vector<12x8xf32> to vector<12x8xbf16>
    %cst_22 = arith.constant dense<0.000000e+00> : vector<12x8xf32>
    %57 = tpu.matmul %55, %56, %cst_22 {dimension_numbers = #tpu.dot_dimension_numbers<[1], [0], [0], [1], [0, 0, 1, 1], [], []>} : vector<12x12xbf16>, vector<12x8xbf16>, vector<12x8xf32> -> vector<12x8xf32>
    %58 = vector.extract_strided_slice %15 {offsets = [0, 16], sizes = [12, 8], strides = [1, 1]} : vector<12x96xf32> to vector<12x8xf32>
    %59 = vector.extract_strided_slice %15 {offsets = [0, 48], sizes = [12, 8], strides = [1, 1]} : vector<12x96xf32> to vector<12x8xf32>
    %60 = vector.extract_strided_slice %15 {offsets = [0, 80], sizes = [12, 8], strides = [1, 1]} : vector<12x96xf32> to vector<12x8xf32>
    %61 = arith.truncf %58 : vector<12x8xf32> to vector<12x8xbf16>
    %62 = arith.truncf %59 : vector<12x8xf32> to vector<12x8xbf16>
    %cst_23 = arith.constant dense<0.000000e+00> : vector<12x12xf32>
    %63 = tpu.matmul %61, %62, %cst_23 {dimension_numbers = #tpu.dot_dimension_numbers<[1], [1], [0], [0], [0, 0, 1, 0], [], []>} : vector<12x8xbf16>, vector<12x8xbf16>, vector<12x12xf32> -> vector<12x12xf32>
    %cst_24 = arith.constant 0.353553385 : f32
    %64 = vector.broadcast %cst_24 : f32 to vector<12x12xf32>
    %65 = arith.mulf %63, %64 : vector<12x12xf32>
    %cst_25 = arith.constant dense<0xFF800000> : vector<12xf32>
    %66 = vector.multi_reduction <maximumf>, %65, %cst_25 [1] : vector<12x12xf32> to vector<12xf32>
    %67 = vector.shape_cast %66 : vector<12xf32> to vector<12x1xf32>
    %68 = vector.broadcast %67 : vector<12x1xf32> to vector<12x12xf32>
    %69 = arith.subf %65, %68 : vector<12x12xf32>
    %70 = math.exp %69 : vector<12x12xf32>
    %cst_26 = arith.constant dense<0.000000e+00> : vector<12xf32>
    %71 = vector.multi_reduction <add>, %70, %cst_26 [1] : vector<12x12xf32> to vector<12xf32>
    %72 = vector.shape_cast %71 : vector<12xf32> to vector<12x1xf32>
    %73 = tpu.reciprocal %72 {approx = true} : vector<12x1xf32> -> vector<12x1xf32>
    %74 = vector.broadcast %73 : vector<12x1xf32> to vector<12x12xf32>
    %75 = arith.mulf %70, %74 : vector<12x12xf32>
    %76 = arith.truncf %75 : vector<12x12xf32> to vector<12x12xbf16>
    %77 = arith.truncf %60 : vector<12x8xf32> to vector<12x8xbf16>
    %cst_27 = arith.constant dense<0.000000e+00> : vector<12x8xf32>
    %78 = tpu.matmul %76, %77, %cst_27 {dimension_numbers = #tpu.dot_dimension_numbers<[1], [0], [0], [1], [0, 0, 1, 1], [], []>} : vector<12x12xbf16>, vector<12x8xbf16>, vector<12x8xf32> -> vector<12x8xf32>
    %79 = vector.extract_strided_slice %15 {offsets = [0, 24], sizes = [12, 8], strides = [1, 1]} : vector<12x96xf32> to vector<12x8xf32>
    %80 = vector.extract_strided_slice %15 {offsets = [0, 56], sizes = [12, 8], strides = [1, 1]} : vector<12x96xf32> to vector<12x8xf32>
    %81 = vector.extract_strided_slice %15 {offsets = [0, 88], sizes = [12, 8], strides = [1, 1]} : vector<12x96xf32> to vector<12x8xf32>
    %82 = arith.truncf %79 : vector<12x8xf32> to vector<12x8xbf16>
    %83 = arith.truncf %80 : vector<12x8xf32> to vector<12x8xbf16>
    %cst_28 = arith.constant dense<0.000000e+00> : vector<12x12xf32>
    %84 = tpu.matmul %82, %83, %cst_28 {dimension_numbers = #tpu.dot_dimension_numbers<[1], [1], [0], [0], [0, 0, 1, 0], [], []>} : vector<12x8xbf16>, vector<12x8xbf16>, vector<12x12xf32> -> vector<12x12xf32>
    %cst_29 = arith.constant 0.353553385 : f32
    %85 = vector.broadcast %cst_29 : f32 to vector<12x12xf32>
    %86 = arith.mulf %84, %85 : vector<12x12xf32>
    %cst_30 = arith.constant dense<0xFF800000> : vector<12xf32>
    %87 = vector.multi_reduction <maximumf>, %86, %cst_30 [1] : vector<12x12xf32> to vector<12xf32>
    %88 = vector.shape_cast %87 : vector<12xf32> to vector<12x1xf32>
    %89 = vector.broadcast %88 : vector<12x1xf32> to vector<12x12xf32>
    %90 = arith.subf %86, %89 : vector<12x12xf32>
    %91 = math.exp %90 : vector<12x12xf32>
    %cst_31 = arith.constant dense<0.000000e+00> : vector<12xf32>
    %92 = vector.multi_reduction <add>, %91, %cst_31 [1] : vector<12x12xf32> to vector<12xf32>
    %93 = vector.shape_cast %92 : vector<12xf32> to vector<12x1xf32>
    %94 = tpu.reciprocal %93 {approx = true} : vector<12x1xf32> -> vector<12x1xf32>
    %95 = vector.broadcast %94 : vector<12x1xf32> to vector<12x12xf32>
    %96 = arith.mulf %91, %95 : vector<12x12xf32>
    %97 = arith.truncf %96 : vector<12x12xf32> to vector<12x12xbf16>
    %98 = arith.truncf %81 : vector<12x8xf32> to vector<12x8xbf16>
    %cst_32 = arith.constant dense<0.000000e+00> : vector<12x8xf32>
    %99 = tpu.matmul %97, %98, %cst_32 {dimension_numbers = #tpu.dot_dimension_numbers<[1], [0], [0], [1], [0, 0, 1, 1], [], []>} : vector<12x12xbf16>, vector<12x8xbf16>, vector<12x8xf32> -> vector<12x8xf32>
    %100 = tpu.concatenate %36, %57, %78, %99 in 1 : vector<12x8xf32>, vector<12x8xf32>, vector<12x8xf32>, vector<12x8xf32> -> vector<12x32xf32>
    %c0_33 = arith.constant 0 : index
    %c0_34 = arith.constant 0 : index
    %c0_35 = arith.constant 0 : index
    %101 = vector.load %arg6[%c0_33, %c0_34, %c0_35] : memref<2x32x32xbf16, #tpu.memory_space<vmem>>, vector<1x32x32xbf16>
    %102 = vector.shape_cast %101 : vector<1x32x32xbf16> to vector<32x32xbf16>
    %103 = arith.truncf %100 : vector<12x32xf32> to vector<12x32xbf16>
    %cst_36 = arith.constant dense<0.000000e+00> : vector<12x32xf32>
    %104 = tpu.matmul %103, %102, %cst_36 {dimension_numbers = #tpu.dot_dimension_numbers<[1], [0], [0], [1], [0, 0, 1, 1], [], []>} : vector<12x32xbf16>, vector<32x32xbf16>, vector<12x32xf32> -> vector<12x32xf32>
    %c0_37 = arith.constant 0 : index
    %c0_38 = arith.constant 0 : index
    %c0_39 = arith.constant 0 : index
    %105 = vector.load %arg7[%c0_37, %c0_38, %c0_39] : memref<2x1x32xf32, #tpu.memory_space<vmem>>, vector<1x1x32xf32>
    %106 = vector.shape_cast %105 : vector<1x1x32xf32> to vector<1x32xf32>
    %107 = vector.broadcast %106 : vector<1x32xf32> to vector<12x32xf32>
    %108 = arith.addf %104, %107 : vector<12x32xf32>
    %109 = arith.addf %7, %108 : vector<12x32xf32>
    %c0_40 = arith.constant 0 : index
    %c0_41 = arith.constant 0 : index
    %c0_42 = arith.constant 0 : index
    %110 = vector.load %arg12[%c0_40, %c0_41, %c0_42] : memref<2x1x32xf32, #tpu.memory_space<vmem>>, vector<1x1x32xf32>
    %111 = vector.shape_cast %110 : vector<1x1x32xf32> to vector<1x32xf32>
    %c0_43 = arith.constant 0 : index
    %c0_44 = arith.constant 0 : index
    %c0_45 = arith.constant 0 : index
    %112 = vector.load %arg13[%c0_43, %c0_44, %c0_45] : memref<2x1x32xf32, #tpu.memory_space<vmem>>, vector<1x1x32xf32>
    %113 = vector.shape_cast %112 : vector<1x1x32xf32> to vector<1x32xf32>
    %cst_46 = arith.constant dense<0.000000e+00> : vector<12xf32>
    %114 = vector.multi_reduction <add>, %109, %cst_46 [1] : vector<12x32xf32> to vector<12xf32>
    %115 = vector.shape_cast %114 : vector<12xf32> to vector<12x1xf32>
    %cst_47 = arith.constant 3.200000e+01 : f32
    %116 = vector.broadcast %cst_47 : f32 to vector<12x1xf32>
    %117 = arith.divf %115, %116 : vector<12x1xf32>
    %118 = vector.broadcast %117 : vector<12x1xf32> to vector<12x32xf32>
    %119 = arith.subf %109, %118 : vector<12x32xf32>
    %120 = arith.mulf %119, %119 : vector<12x32xf32>
    %cst_48 = arith.constant dense<0.000000e+00> : vector<12xf32>
    %121 = vector.multi_reduction <add>, %120, %cst_48 [1] : vector<12x32xf32> to vector<12xf32>
    %122 = vector.shape_cast %121 : vector<12xf32> to vector<12x1xf32>
    %cst_49 = arith.constant 3.200000e+01 : f32
    %123 = vector.broadcast %cst_49 : f32 to vector<12x1xf32>
    %124 = arith.divf %122, %123 : vector<12x1xf32>
    %cst_50 = arith.constant 9.99999974E-6 : f32
    %125 = vector.broadcast %cst_50 : f32 to vector<12x1xf32>
    %126 = arith.addf %124, %125 : vector<12x1xf32>
    %127 = math.rsqrt %126 : vector<12x1xf32>
    %128 = vector.broadcast %127 : vector<12x1xf32> to vector<12x32xf32>
    %129 = arith.mulf %119, %128 : vector<12x32xf32>
    %130 = vector.broadcast %111 : vector<1x32xf32> to vector<12x32xf32>
    %131 = arith.mulf %129, %130 : vector<12x32xf32>
    %132 = vector.broadcast %113 : vector<1x32xf32> to vector<12x32xf32>
    %133 = arith.addf %131, %132 : vector<12x32xf32>
    %c0_51 = arith.constant 0 : index
    %c0_52 = arith.constant 0 : index
    %c0_53 = arith.constant 0 : index
    %134 = vector.load %arg8[%c0_51, %c0_52, %c0_53] : memref<2x32x64xbf16, #tpu.memory_space<vmem>>, vector<1x32x64xbf16>
    %135 = vector.shape_cast %134 : vector<1x32x64xbf16> to vector<32x64xbf16>
    %136 = arith.truncf %133 : vector<12x32xf32> to vector<12x32xbf16>
    %cst_54 = arith.constant dense<0.000000e+00> : vector<12x64xf32>
    %137 = tpu.matmul %136, %135, %cst_54 {dimension_numbers = #tpu.dot_dimension_numbers<[1], [0], [0], [1], [0, 0, 1, 1], [], []>} : vector<12x32xbf16>, vector<32x64xbf16>, vector<12x64xf32> -> vector<12x64xf32>
    %c0_55 = arith.constant 0 : index
    %c0_56 = arith.constant 0 : index
    %c0_57 = arith.constant 0 : index
    %138 = vector.load %arg9[%c0_55, %c0_56, %c0_57] : memref<2x1x64xf32, #tpu.memory_space<vmem>>, vector<1x1x64xf32>
    %139 = vector.shape_cast %138 : vector<1x1x64xf32> to vector<1x64xf32>
    %140 = vector.broadcast %139 : vector<1x64xf32> to vector<12x64xf32>
    %141 = arith.addf %137, %140 : vector<12x64xf32>
    %cst_58 = arith.constant 0.000000e+00 : f32
    %142 = vector.broadcast %cst_58 : f32 to vector<12x64xf32>
    %143 = arith.maximumf %141, %142 : vector<12x64xf32>
    %c0_59 = arith.constant 0 : index
    %c0_60 = arith.constant 0 : index
    %c0_61 = arith.constant 0 : index
    %144 = vector.load %arg10[%c0_59, %c0_60, %c0_61] : memref<2x64x32xbf16, #tpu.memory_space<vmem>>, vector<1x64x32xbf16>
    %145 = vector.shape_cast %144 : vector<1x64x32xbf16> to vector<64x32xbf16>
    %146 = arith.truncf %143 : vector<12x64xf32> to vector<12x64xbf16>
    %cst_62 = arith.constant dense<0.000000e+00> : vector<12x32xf32>
    %147 = tpu.matmul %146, %145, %cst_62 {dimension_numbers = #tpu.dot_dimension_numbers<[1], [0], [0], [1], [0, 0, 1, 1], [], []>} : vector<12x64xbf16>, vector<64x32xbf16>, vector<12x32xf32> -> vector<12x32xf32>
    %c0_63 = arith.constant 0 : index
    %c0_64 = arith.constant 0 : index
    %c0_65 = arith.constant 0 : index
    %148 = vector.load %arg11[%c0_63, %c0_64, %c0_65] : memref<2x1x32xf32, #tpu.memory_space<vmem>>, vector<1x1x32xf32>
    %149 = vector.shape_cast %148 : vector<1x1x32xf32> to vector<1x32xf32>
    %150 = vector.broadcast %149 : vector<1x32xf32> to vector<12x32xf32>
    %151 = arith.addf %147, %150 : vector<12x32xf32>
    %152 = arith.addf %133, %151 : vector<12x32xf32>
    %c0_66 = arith.constant 0 : index
    %c0_67 = arith.constant 0 : index
    %c0_68 = arith.constant 0 : index
    %153 = vector.load %arg14[%c0_66, %c0_67, %c0_68] : memref<2x1x32xf32, #tpu.memory_space<vmem>>, vector<1x1x32xf32>
    %154 = vector.shape_cast %153 : vector<1x1x32xf32> to vector<1x32xf32>
    %c0_69 = arith.constant 0 : index
    %c0_70 = arith.constant 0 : index
    %c0_71 = arith.constant 0 : index
    %155 = vector.load %arg15[%c0_69, %c0_70, %c0_71] : memref<2x1x32xf32, #tpu.memory_space<vmem>>, vector<1x1x32xf32>
    %156 = vector.shape_cast %155 : vector<1x1x32xf32> to vector<1x32xf32>
    %cst_72 = arith.constant dense<0.000000e+00> : vector<12xf32>
    %157 = vector.multi_reduction <add>, %152, %cst_72 [1] : vector<12x32xf32> to vector<12xf32>
    %158 = vector.shape_cast %157 : vector<12xf32> to vector<12x1xf32>
    %cst_73 = arith.constant 3.200000e+01 : f32
    %159 = vector.broadcast %cst_73 : f32 to vector<12x1xf32>
    %160 = arith.divf %158, %159 : vector<12x1xf32>
    %161 = vector.broadcast %160 : vector<12x1xf32> to vector<12x32xf32>
    %162 = arith.subf %152, %161 : vector<12x32xf32>
    %163 = arith.mulf %162, %162 : vector<12x32xf32>
    %cst_74 = arith.constant dense<0.000000e+00> : vector<12xf32>
    %164 = vector.multi_reduction <add>, %163, %cst_74 [1] : vector<12x32xf32> to vector<12xf32>
    %165 = vector.shape_cast %164 : vector<12xf32> to vector<12x1xf32>
    %cst_75 = arith.constant 3.200000e+01 : f32
    %166 = vector.broadcast %cst_75 : f32 to vector<12x1xf32>
    %167 = arith.divf %165, %166 : vector<12x1xf32>
    %cst_76 = arith.constant 9.99999974E-6 : f32
    %168 = vector.broadcast %cst_76 : f32 to vector<12x1xf32>
    %169 = arith.addf %167, %168 : vector<12x1xf32>
    %170 = math.rsqrt %169 : vector<12x1xf32>
    %171 = vector.broadcast %170 : vector<12x1xf32> to vector<12x32xf32>
    %172 = arith.mulf %162, %171 : vector<12x32xf32>
    %173 = vector.broadcast %154 : vector<1x32xf32> to vector<12x32xf32>
    %174 = arith.mulf %172, %173 : vector<12x32xf32>
    %175 = vector.broadcast %156 : vector<1x32xf32> to vector<12x32xf32>
    %176 = arith.addf %174, %175 : vector<12x32xf32>
    %c1 = arith.constant 1 : index
    %c0_77 = arith.constant 0 : index
    %c0_78 = arith.constant 0 : index
    %177 = vector.load %arg4[%c1, %c0_77, %c0_78] : memref<2x32x96xbf16, #tpu.memory_space<vmem>>, vector<1x32x96xbf16>
    %178 = vector.shape_cast %177 : vector<1x32x96xbf16> to vector<32x96xbf16>
    %179 = arith.truncf %176 : vector<12x32xf32> to vector<12x32xbf16>
    %cst_79 = arith.constant dense<0.000000e+00> : vector<12x96xf32>
    %180 = tpu.matmul %179, %178, %cst_79 {dimension_numbers = #tpu.dot_dimension_numbers<[1], [0], [0], [1], [0, 0, 1, 1], [], []>} : vector<12x32xbf16>, vector<32x96xbf16>, vector<12x96xf32> -> vector<12x96xf32>
    %c1_80 = arith.constant 1 : index
    %c0_81 = arith.constant 0 : index
    %c0_82 = arith.constant 0 : index
    %181 = vector.load %arg5[%c1_80, %c0_81, %c0_82] : memref<2x1x96xf32, #tpu.memory_space<vmem>>, vector<1x1x96xf32>
    %182 = vector.shape_cast %181 : vector<1x1x96xf32> to vector<1x96xf32>
    %183 = vector.broadcast %182 : vector<1x96xf32> to vector<12x96xf32>
    %184 = arith.addf %180, %183 : vector<12x96xf32>
    %185 = vector.extract_strided_slice %184 {offsets = [0, 0], sizes = [12, 8], strides = [1, 1]} : vector<12x96xf32> to vector<12x8xf32>
    %186 = vector.extract_strided_slice %184 {offsets = [0, 32], sizes = [12, 8], strides = [1, 1]} : vector<12x96xf32> to vector<12x8xf32>
    %187 = vector.extract_strided_slice %184 {offsets = [0, 64], sizes = [12, 8], strides = [1, 1]} : vector<12x96xf32> to vector<12x8xf32>
    %188 = arith.truncf %185 : vector<12x8xf32> to vector<12x8xbf16>
    %189 = arith.truncf %186 : vector<12x8xf32> to vector<12x8xbf16>
    %cst_83 = arith.constant dense<0.000000e+00> : vector<12x12xf32>
    %190 = tpu.matmul %188, %189, %cst_83 {dimension_numbers = #tpu.dot_dimension_numbers<[1], [1], [0], [0], [0, 0, 1, 0], [], []>} : vector<12x8xbf16>, vector<12x8xbf16>, vector<12x12xf32> -> vector<12x12xf32>
    %cst_84 = arith.constant 0.353553385 : f32
    %191 = vector.broadcast %cst_84 : f32 to vector<12x12xf32>
    %192 = arith.mulf %190, %191 : vector<12x12xf32>
    %cst_85 = arith.constant dense<0xFF800000> : vector<12xf32>
    %193 = vector.multi_reduction <maximumf>, %192, %cst_85 [1] : vector<12x12xf32> to vector<12xf32>
    %194 = vector.shape_cast %193 : vector<12xf32> to vector<12x1xf32>
    %195 = vector.broadcast %194 : vector<12x1xf32> to vector<12x12xf32>
    %196 = arith.subf %192, %195 : vector<12x12xf32>
    %197 = math.exp %196 : vector<12x12xf32>
    %cst_86 = arith.constant dense<0.000000e+00> : vector<12xf32>
    %198 = vector.multi_reduction <add>, %197, %cst_86 [1] : vector<12x12xf32> to vector<12xf32>
    %199 = vector.shape_cast %198 : vector<12xf32> to vector<12x1xf32>
    %200 = tpu.reciprocal %199 {approx = true} : vector<12x1xf32> -> vector<12x1xf32>
    %201 = vector.broadcast %200 : vector<12x1xf32> to vector<12x12xf32>
    %202 = arith.mulf %197, %201 : vector<12x12xf32>
    %203 = arith.truncf %202 : vector<12x12xf32> to vector<12x12xbf16>
    %204 = arith.truncf %187 : vector<12x8xf32> to vector<12x8xbf16>
    %cst_87 = arith.constant dense<0.000000e+00> : vector<12x8xf32>
    %205 = tpu.matmul %203, %204, %cst_87 {dimension_numbers = #tpu.dot_dimension_numbers<[1], [0], [0], [1], [0, 0, 1, 1], [], []>} : vector<12x12xbf16>, vector<12x8xbf16>, vector<12x8xf32> -> vector<12x8xf32>
    %206 = vector.extract_strided_slice %184 {offsets = [0, 8], sizes = [12, 8], strides = [1, 1]} : vector<12x96xf32> to vector<12x8xf32>
    %207 = vector.extract_strided_slice %184 {offsets = [0, 40], sizes = [12, 8], strides = [1, 1]} : vector<12x96xf32> to vector<12x8xf32>
    %208 = vector.extract_strided_slice %184 {offsets = [0, 72], sizes = [12, 8], strides = [1, 1]} : vector<12x96xf32> to vector<12x8xf32>
    %209 = arith.truncf %206 : vector<12x8xf32> to vector<12x8xbf16>
    %210 = arith.truncf %207 : vector<12x8xf32> to vector<12x8xbf16>
    %cst_88 = arith.constant dense<0.000000e+00> : vector<12x12xf32>
    %211 = tpu.matmul %209, %210, %cst_88 {dimension_numbers = #tpu.dot_dimension_numbers<[1], [1], [0], [0], [0, 0, 1, 0], [], []>} : vector<12x8xbf16>, vector<12x8xbf16>, vector<12x12xf32> -> vector<12x12xf32>
    %cst_89 = arith.constant 0.353553385 : f32
    %212 = vector.broadcast %cst_89 : f32 to vector<12x12xf32>
    %213 = arith.mulf %211, %212 : vector<12x12xf32>
    %cst_90 = arith.constant dense<0xFF800000> : vector<12xf32>
    %214 = vector.multi_reduction <maximumf>, %213, %cst_90 [1] : vector<12x12xf32> to vector<12xf32>
    %215 = vector.shape_cast %214 : vector<12xf32> to vector<12x1xf32>
    %216 = vector.broadcast %215 : vector<12x1xf32> to vector<12x12xf32>
    %217 = arith.subf %213, %216 : vector<12x12xf32>
    %218 = math.exp %217 : vector<12x12xf32>
    %cst_91 = arith.constant dense<0.000000e+00> : vector<12xf32>
    %219 = vector.multi_reduction <add>, %218, %cst_91 [1] : vector<12x12xf32> to vector<12xf32>
    %220 = vector.shape_cast %219 : vector<12xf32> to vector<12x1xf32>
    %221 = tpu.reciprocal %220 {approx = true} : vector<12x1xf32> -> vector<12x1xf32>
    %222 = vector.broadcast %221 : vector<12x1xf32> to vector<12x12xf32>
    %223 = arith.mulf %218, %222 : vector<12x12xf32>
    %224 = arith.truncf %223 : vector<12x12xf32> to vector<12x12xbf16>
    %225 = arith.truncf %208 : vector<12x8xf32> to vector<12x8xbf16>
    %cst_92 = arith.constant dense<0.000000e+00> : vector<12x8xf32>
    %226 = tpu.matmul %224, %225, %cst_92 {dimension_numbers = #tpu.dot_dimension_numbers<[1], [0], [0], [1], [0, 0, 1, 1], [], []>} : vector<12x12xbf16>, vector<12x8xbf16>, vector<12x8xf32> -> vector<12x8xf32>
    %227 = vector.extract_strided_slice %184 {offsets = [0, 16], sizes = [12, 8], strides = [1, 1]} : vector<12x96xf32> to vector<12x8xf32>
    %228 = vector.extract_strided_slice %184 {offsets = [0, 48], sizes = [12, 8], strides = [1, 1]} : vector<12x96xf32> to vector<12x8xf32>
    %229 = vector.extract_strided_slice %184 {offsets = [0, 80], sizes = [12, 8], strides = [1, 1]} : vector<12x96xf32> to vector<12x8xf32>
    %230 = arith.truncf %227 : vector<12x8xf32> to vector<12x8xbf16>
    %231 = arith.truncf %228 : vector<12x8xf32> to vector<12x8xbf16>
    %cst_93 = arith.constant dense<0.000000e+00> : vector<12x12xf32>
    %232 = tpu.matmul %230, %231, %cst_93 {dimension_numbers = #tpu.dot_dimension_numbers<[1], [1], [0], [0], [0, 0, 1, 0], [], []>} : vector<12x8xbf16>, vector<12x8xbf16>, vector<12x12xf32> -> vector<12x12xf32>
    %cst_94 = arith.constant 0.353553385 : f32
    %233 = vector.broadcast %cst_94 : f32 to vector<12x12xf32>
    %234 = arith.mulf %232, %233 : vector<12x12xf32>
    %cst_95 = arith.constant dense<0xFF800000> : vector<12xf32>
    %235 = vector.multi_reduction <maximumf>, %234, %cst_95 [1] : vector<12x12xf32> to vector<12xf32>
    %236 = vector.shape_cast %235 : vector<12xf32> to vector<12x1xf32>
    %237 = vector.broadcast %236 : vector<12x1xf32> to vector<12x12xf32>
    %238 = arith.subf %234, %237 : vector<12x12xf32>
    %239 = math.exp %238 : vector<12x12xf32>
    %cst_96 = arith.constant dense<0.000000e+00> : vector<12xf32>
    %240 = vector.multi_reduction <add>, %239, %cst_96 [1] : vector<12x12xf32> to vector<12xf32>
    %241 = vector.shape_cast %240 : vector<12xf32> to vector<12x1xf32>
    %242 = tpu.reciprocal %241 {approx = true} : vector<12x1xf32> -> vector<12x1xf32>
    %243 = vector.broadcast %242 : vector<12x1xf32> to vector<12x12xf32>
    %244 = arith.mulf %239, %243 : vector<12x12xf32>
    %245 = arith.truncf %244 : vector<12x12xf32> to vector<12x12xbf16>
    %246 = arith.truncf %229 : vector<12x8xf32> to vector<12x8xbf16>
    %cst_97 = arith.constant dense<0.000000e+00> : vector<12x8xf32>
    %247 = tpu.matmul %245, %246, %cst_97 {dimension_numbers = #tpu.dot_dimension_numbers<[1], [0], [0], [1], [0, 0, 1, 1], [], []>} : vector<12x12xbf16>, vector<12x8xbf16>, vector<12x8xf32> -> vector<12x8xf32>
    %248 = vector.extract_strided_slice %184 {offsets = [0, 24], sizes = [12, 8], strides = [1, 1]} : vector<12x96xf32> to vector<12x8xf32>
    %249 = vector.extract_strided_slice %184 {offsets = [0, 56], sizes = [12, 8], strides = [1, 1]} : vector<12x96xf32> to vector<12x8xf32>
    %250 = vector.extract_strided_slice %184 {offsets = [0, 88], sizes = [12, 8], strides = [1, 1]} : vector<12x96xf32> to vector<12x8xf32>
    %251 = arith.truncf %248 : vector<12x8xf32> to vector<12x8xbf16>
    %252 = arith.truncf %249 : vector<12x8xf32> to vector<12x8xbf16>
    %cst_98 = arith.constant dense<0.000000e+00> : vector<12x12xf32>
    %253 = tpu.matmul %251, %252, %cst_98 {dimension_numbers = #tpu.dot_dimension_numbers<[1], [1], [0], [0], [0, 0, 1, 0], [], []>} : vector<12x8xbf16>, vector<12x8xbf16>, vector<12x12xf32> -> vector<12x12xf32>
    %cst_99 = arith.constant 0.353553385 : f32
    %254 = vector.broadcast %cst_99 : f32 to vector<12x12xf32>
    %255 = arith.mulf %253, %254 : vector<12x12xf32>
    %cst_100 = arith.constant dense<0xFF800000> : vector<12xf32>
    %256 = vector.multi_reduction <maximumf>, %255, %cst_100 [1] : vector<12x12xf32> to vector<12xf32>
    %257 = vector.shape_cast %256 : vector<12xf32> to vector<12x1xf32>
    %258 = vector.broadcast %257 : vector<12x1xf32> to vector<12x12xf32>
    %259 = arith.subf %255, %258 : vector<12x12xf32>
    %260 = math.exp %259 : vector<12x12xf32>
    %cst_101 = arith.constant dense<0.000000e+00> : vector<12xf32>
    %261 = vector.multi_reduction <add>, %260, %cst_101 [1] : vector<12x12xf32> to vector<12xf32>
    %262 = vector.shape_cast %261 : vector<12xf32> to vector<12x1xf32>
    %263 = tpu.reciprocal %262 {approx = true} : vector<12x1xf32> -> vector<12x1xf32>
    %264 = vector.broadcast %263 : vector<12x1xf32> to vector<12x12xf32>
    %265 = arith.mulf %260, %264 : vector<12x12xf32>
    %266 = arith.truncf %265 : vector<12x12xf32> to vector<12x12xbf16>
    %267 = arith.truncf %250 : vector<12x8xf32> to vector<12x8xbf16>
    %cst_102 = arith.constant dense<0.000000e+00> : vector<12x8xf32>
    %268 = tpu.matmul %266, %267, %cst_102 {dimension_numbers = #tpu.dot_dimension_numbers<[1], [0], [0], [1], [0, 0, 1, 1], [], []>} : vector<12x12xbf16>, vector<12x8xbf16>, vector<12x8xf32> -> vector<12x8xf32>
    %269 = tpu.concatenate %205, %226, %247, %268 in 1 : vector<12x8xf32>, vector<12x8xf32>, vector<12x8xf32>, vector<12x8xf32> -> vector<12x32xf32>
    %c1_103 = arith.constant 1 : index
    %c0_104 = arith.constant 0 : index
    %c0_105 = arith.constant 0 : index
    %270 = vector.load %arg6[%c1_103, %c0_104, %c0_105] : memref<2x32x32xbf16, #tpu.memory_space<vmem>>, vector<1x32x32xbf16>
    %271 = vector.shape_cast %270 : vector<1x32x32xbf16> to vector<32x32xbf16>
    %272 = arith.truncf %269 : vector<12x32xf32> to vector<12x32xbf16>
    %cst_106 = arith.constant dense<0.000000e+00> : vector<12x32xf32>
    %273 = tpu.matmul %272, %271, %cst_106 {dimension_numbers = #tpu.dot_dimension_numbers<[1], [0], [0], [1], [0, 0, 1, 1], [], []>} : vector<12x32xbf16>, vector<32x32xbf16>, vector<12x32xf32> -> vector<12x32xf32>
    %c1_107 = arith.constant 1 : index
    %c0_108 = arith.constant 0 : index
    %c0_109 = arith.constant 0 : index
    %274 = vector.load %arg7[%c1_107, %c0_108, %c0_109] : memref<2x1x32xf32, #tpu.memory_space<vmem>>, vector<1x1x32xf32>
    %275 = vector.shape_cast %274 : vector<1x1x32xf32> to vector<1x32xf32>
    %276 = vector.broadcast %275 : vector<1x32xf32> to vector<12x32xf32>
    %277 = arith.addf %273, %276 : vector<12x32xf32>
    %278 = arith.addf %176, %277 : vector<12x32xf32>
    %c1_110 = arith.constant 1 : index
    %c0_111 = arith.constant 0 : index
    %c0_112 = arith.constant 0 : index
    %279 = vector.load %arg12[%c1_110, %c0_111, %c0_112] : memref<2x1x32xf32, #tpu.memory_space<vmem>>, vector<1x1x32xf32>
    %280 = vector.shape_cast %279 : vector<1x1x32xf32> to vector<1x32xf32>
    %c1_113 = arith.constant 1 : index
    %c0_114 = arith.constant 0 : index
    %c0_115 = arith.constant 0 : index
    %281 = vector.load %arg13[%c1_113, %c0_114, %c0_115] : memref<2x1x32xf32, #tpu.memory_space<vmem>>, vector<1x1x32xf32>
    %282 = vector.shape_cast %281 : vector<1x1x32xf32> to vector<1x32xf32>
    %cst_116 = arith.constant dense<0.000000e+00> : vector<12xf32>
    %283 = vector.multi_reduction <add>, %278, %cst_116 [1] : vector<12x32xf32> to vector<12xf32>
    %284 = vector.shape_cast %283 : vector<12xf32> to vector<12x1xf32>
    %cst_117 = arith.constant 3.200000e+01 : f32
    %285 = vector.broadcast %cst_117 : f32 to vector<12x1xf32>
    %286 = arith.divf %284, %285 : vector<12x1xf32>
    %287 = vector.broadcast %286 : vector<12x1xf32> to vector<12x32xf32>
    %288 = arith.subf %278, %287 : vector<12x32xf32>
    %289 = arith.mulf %288, %288 : vector<12x32xf32>
    %cst_118 = arith.constant dense<0.000000e+00> : vector<12xf32>
    %290 = vector.multi_reduction <add>, %289, %cst_118 [1] : vector<12x32xf32> to vector<12xf32>
    %291 = vector.shape_cast %290 : vector<12xf32> to vector<12x1xf32>
    %cst_119 = arith.constant 3.200000e+01 : f32
    %292 = vector.broadcast %cst_119 : f32 to vector<12x1xf32>
    %293 = arith.divf %291, %292 : vector<12x1xf32>
    %cst_120 = arith.constant 9.99999974E-6 : f32
    %294 = vector.broadcast %cst_120 : f32 to vector<12x1xf32>
    %295 = arith.addf %293, %294 : vector<12x1xf32>
    %296 = math.rsqrt %295 : vector<12x1xf32>
    %297 = vector.broadcast %296 : vector<12x1xf32> to vector<12x32xf32>
    %298 = arith.mulf %288, %297 : vector<12x32xf32>
    %299 = vector.broadcast %280 : vector<1x32xf32> to vector<12x32xf32>
    %300 = arith.mulf %298, %299 : vector<12x32xf32>
    %301 = vector.broadcast %282 : vector<1x32xf32> to vector<12x32xf32>
    %302 = arith.addf %300, %301 : vector<12x32xf32>
    %c1_121 = arith.constant 1 : index
    %c0_122 = arith.constant 0 : index
    %c0_123 = arith.constant 0 : index
    %303 = vector.load %arg8[%c1_121, %c0_122, %c0_123] : memref<2x32x64xbf16, #tpu.memory_space<vmem>>, vector<1x32x64xbf16>
    %304 = vector.shape_cast %303 : vector<1x32x64xbf16> to vector<32x64xbf16>
    %305 = arith.truncf %302 : vector<12x32xf32> to vector<12x32xbf16>
    %cst_124 = arith.constant dense<0.000000e+00> : vector<12x64xf32>
    %306 = tpu.matmul %305, %304, %cst_124 {dimension_numbers = #tpu.dot_dimension_numbers<[1], [0], [0], [1], [0, 0, 1, 1], [], []>} : vector<12x32xbf16>, vector<32x64xbf16>, vector<12x64xf32> -> vector<12x64xf32>
    %c1_125 = arith.constant 1 : index
    %c0_126 = arith.constant 0 : index
    %c0_127 = arith.constant 0 : index
    %307 = vector.load %arg9[%c1_125, %c0_126, %c0_127] : memref<2x1x64xf32, #tpu.memory_space<vmem>>, vector<1x1x64xf32>
    %308 = vector.shape_cast %307 : vector<1x1x64xf32> to vector<1x64xf32>
    %309 = vector.broadcast %308 : vector<1x64xf32> to vector<12x64xf32>
    %310 = arith.addf %306, %309 : vector<12x64xf32>
    %cst_128 = arith.constant 0.000000e+00 : f32
    %311 = vector.broadcast %cst_128 : f32 to vector<12x64xf32>
    %312 = arith.maximumf %310, %311 : vector<12x64xf32>
    %c1_129 = arith.constant 1 : index
    %c0_130 = arith.constant 0 : index
    %c0_131 = arith.constant 0 : index
    %313 = vector.load %arg10[%c1_129, %c0_130, %c0_131] : memref<2x64x32xbf16, #tpu.memory_space<vmem>>, vector<1x64x32xbf16>
    %314 = vector.shape_cast %313 : vector<1x64x32xbf16> to vector<64x32xbf16>
    %315 = arith.truncf %312 : vector<12x64xf32> to vector<12x64xbf16>
    %cst_132 = arith.constant dense<0.000000e+00> : vector<12x32xf32>
    %316 = tpu.matmul %315, %314, %cst_132 {dimension_numbers = #tpu.dot_dimension_numbers<[1], [0], [0], [1], [0, 0, 1, 1], [], []>} : vector<12x64xbf16>, vector<64x32xbf16>, vector<12x32xf32> -> vector<12x32xf32>
    %c1_133 = arith.constant 1 : index
    %c0_134 = arith.constant 0 : index
    %c0_135 = arith.constant 0 : index
    %317 = vector.load %arg11[%c1_133, %c0_134, %c0_135] : memref<2x1x32xf32, #tpu.memory_space<vmem>>, vector<1x1x32xf32>
    %318 = vector.shape_cast %317 : vector<1x1x32xf32> to vector<1x32xf32>
    %319 = vector.broadcast %318 : vector<1x32xf32> to vector<12x32xf32>
    %320 = arith.addf %316, %319 : vector<12x32xf32>
    %321 = arith.addf %302, %320 : vector<12x32xf32>
    %c1_136 = arith.constant 1 : index
    %c0_137 = arith.constant 0 : index
    %c0_138 = arith.constant 0 : index
    %322 = vector.load %arg14[%c1_136, %c0_137, %c0_138] : memref<2x1x32xf32, #tpu.memory_space<vmem>>, vector<1x1x32xf32>
    %323 = vector.shape_cast %322 : vector<1x1x32xf32> to vector<1x32xf32>
    %c1_139 = arith.constant 1 : index
    %c0_140 = arith.constant 0 : index
    %c0_141 = arith.constant 0 : index
    %324 = vector.load %arg15[%c1_139, %c0_140, %c0_141] : memref<2x1x32xf32, #tpu.memory_space<vmem>>, vector<1x1x32xf32>
    %325 = vector.shape_cast %324 : vector<1x1x32xf32> to vector<1x32xf32>
    %cst_142 = arith.constant dense<0.000000e+00> : vector<12xf32>
    %326 = vector.multi_reduction <add>, %321, %cst_142 [1] : vector<12x32xf32> to vector<12xf32>
    %327 = vector.shape_cast %326 : vector<12xf32> to vector<12x1xf32>
    %cst_143 = arith.constant 3.200000e+01 : f32
    %328 = vector.broadcast %cst_143 : f32 to vector<12x1xf32>
    %329 = arith.divf %327, %328 : vector<12x1xf32>
    %330 = vector.broadcast %329 : vector<12x1xf32> to vector<12x32xf32>
    %331 = arith.subf %321, %330 : vector<12x32xf32>
    %332 = arith.mulf %331, %331 : vector<12x32xf32>
    %cst_144 = arith.constant dense<0.000000e+00> : vector<12xf32>
    %333 = vector.multi_reduction <add>, %332, %cst_144 [1] : vector<12x32xf32> to vector<12xf32>
    %334 = vector.shape_cast %333 : vector<12xf32> to vector<12x1xf32>
    %cst_145 = arith.constant 3.200000e+01 : f32
    %335 = vector.broadcast %cst_145 : f32 to vector<12x1xf32>
    %336 = arith.divf %334, %335 : vector<12x1xf32>
    %cst_146 = arith.constant 9.99999974E-6 : f32
    %337 = vector.broadcast %cst_146 : f32 to vector<12x1xf32>
    %338 = arith.addf %336, %337 : vector<12x1xf32>
    %339 = math.rsqrt %338 : vector<12x1xf32>
    %340 = vector.broadcast %339 : vector<12x1xf32> to vector<12x32xf32>
    %341 = arith.mulf %331, %340 : vector<12x32xf32>
    %342 = vector.broadcast %323 : vector<1x32xf32> to vector<12x32xf32>
    %343 = arith.mulf %341, %342 : vector<12x32xf32>
    %344 = vector.broadcast %325 : vector<1x32xf32> to vector<12x32xf32>
    %345 = arith.addf %343, %344 : vector<12x32xf32>
    %c0_147 = arith.constant 0 : index
    %c0_148 = arith.constant 0 : index
    %346 = vector.load %arg16[%c0_147, %c0_148] : memref<32x4xbf16, #tpu.memory_space<vmem>>, vector<32x4xbf16>
    %347 = arith.truncf %345 : vector<12x32xf32> to vector<12x32xbf16>
    %cst_149 = arith.constant dense<0.000000e+00> : vector<12x4xf32>
    %348 = tpu.matmul %347, %346, %cst_149 {dimension_numbers = #tpu.dot_dimension_numbers<[1], [0], [0], [1], [0, 0, 1, 1], [], []>} : vector<12x32xbf16>, vector<32x4xbf16>, vector<12x4xf32> -> vector<12x4xf32>
    %c0_150 = arith.constant 0 : index
    %c0_151 = arith.constant 0 : index
    %349 = vector.load %arg17[%c0_150, %c0_151] : memref<1x4xf32, #tpu.memory_space<vmem>>, vector<1x4xf32>
    %350 = vector.broadcast %349 : vector<1x4xf32> to vector<12x4xf32>
    %351 = arith.addf %348, %350 : vector<12x4xf32>
    %c0_152 = arith.constant 0 : index
    %c0_153 = arith.constant 0 : index
    %c0_154 = arith.constant 0 : index
    %352 = vector.load %arg18[%c0_152, %c0_153, %c0_154] : memref<1x12x4xf32, #tpu.memory_space<vmem>>, vector<1x12x4xf32>
    %353 = vector.shape_cast %352 : vector<1x12x4xf32> to vector<12x4xf32>
    %354 = vector.shape_cast %351 : vector<12x4xf32> to vector<1x12x4xf32>
    tpu.vector_store %arg18[%c0_152, %c0_153, %c0_154], %354 {strides = array<i32>} : memref<1x12x4xf32, #tpu.memory_space<vmem>>, vector<1x12x4xf32>,
    return
  }
  func.func @transform_0(%arg0: i32) -> (i32, i32, i32) {
    %c0_i32 = arith.constant 0 : i32
    %c0_i32_0 = arith.constant 0 : i32
    %c0_i32_1 = arith.constant 0 : i32
    return %arg0, %c0_i32, %c0_i32_0 : i32, i32, i32
  }
  func.func @transform_1(%arg0: i32) -> (i32, i32) {
    %c0_i32 = arith.constant 0 : i32
    %c0_i32_0 = arith.constant 0 : i32
    %c0_i32_1 = arith.constant 0 : i32
    return %c0_i32, %c0_i32_0 : i32, i32
  }
  func.func @transform_2(%arg0: i32) -> (i32, i32) {
    %c0_i32 = arith.constant 0 : i32
    %c0_i32_0 = arith.constant 0 : i32
    %c0_i32_1 = arith.constant 0 : i32
    return %c0_i32, %c0_i32_0 : i32, i32
  }
  func.func @transform_3(%arg0: i32) -> (i32, i32, i32) {
    %c0_i32 = arith.constant 0 : i32
    %c0_i32_0 = arith.constant 0 : i32
    %c0_i32_1 = arith.constant 0 : i32
    %c0_i32_2 = arith.constant 0 : i32
    return %c0_i32, %c0_i32_0, %c0_i32_1 : i32, i32, i32
  }
  func.func @transform_4(%arg0: i32) -> (i32, i32, i32) {
    %c0_i32 = arith.constant 0 : i32
    %c0_i32_0 = arith.constant 0 : i32
    %c0_i32_1 = arith.constant 0 : i32
    %c0_i32_2 = arith.constant 0 : i32
    return %c0_i32, %c0_i32_0, %c0_i32_1 : i32, i32, i32
  }
  func.func @transform_5(%arg0: i32) -> (i32, i32, i32) {
    %c0_i32 = arith.constant 0 : i32
    %c0_i32_0 = arith.constant 0 : i32
    %c0_i32_1 = arith.constant 0 : i32
    %c0_i32_2 = arith.constant 0 : i32
    return %c0_i32, %c0_i32_0, %c0_i32_1 : i32, i32, i32
  }
  func.func @transform_6(%arg0: i32) -> (i32, i32, i32) {
    %c0_i32 = arith.constant 0 : i32
    %c0_i32_0 = arith.constant 0 : i32
    %c0_i32_1 = arith.constant 0 : i32
    %c0_i32_2 = arith.constant 0 : i32
    return %c0_i32, %c0_i32_0, %c0_i32_1 : i32, i32, i32
  }
  func.func @transform_7(%arg0: i32) -> (i32, i32, i32) {
    %c0_i32 = arith.constant 0 : i32
    %c0_i32_0 = arith.constant 0 : i32
    %c0_i32_1 = arith.constant 0 : i32
    %c0_i32_2 = arith.constant 0 : i32
    return %c0_i32, %c0_i32_0, %c0_i32_1 : i32, i32, i32
  }
  func.func @transform_8(%arg0: i32) -> (i32, i32, i32) {
    %c0_i32 = arith.constant 0 : i32
    %c0_i32_0 = arith.constant 0 : i32
    %c0_i32_1 = arith.constant 0 : i32
    %c0_i32_2 = arith.constant 0 : i32
    return %c0_i32, %c0_i32_0, %c0_i32_1 : i32, i32, i32
  }
  func.func @transform_9(%arg0: i32) -> (i32, i32, i32) {
    %c0_i32 = arith.constant 0 : i32
    %c0_i32_0 = arith.constant 0 : i32
    %c0_i32_1 = arith.constant 0 : i32
    %c0_i32_2 = arith.constant 0 : i32
    return %c0_i32, %c0_i32_0, %c0_i32_1 : i32, i32, i32
  }
  func.func @transform_10(%arg0: i32) -> (i32, i32, i32) {
    %c0_i32 = arith.constant 0 : i32
    %c0_i32_0 = arith.constant 0 : i32
    %c0_i32_1 = arith.constant 0 : i32
    %c0_i32_2 = arith.constant 0 : i32
    return %c0_i32, %c0_i32_0, %c0_i32_1 : i32, i32, i32
  }
  func.func @transform_11(%arg0: i32) -> (i32, i32, i32) {
    %c0_i32 = arith.constant 0 : i32
    %c0_i32_0 = arith.constant 0 : i32
    %c0_i32_1 = arith.constant 0 : i32
    %c0_i32_2 = arith.constant 0 : i32
    return %c0_i32, %c0_i32_0, %c0_i32_1 : i32, i32, i32
  }
  func.func @transform_12(%arg0: i32) -> (i32, i32, i32) {
    %c0_i32 = arith.constant 0 : i32
    %c0_i32_0 = arith.constant 0 : i32
    %c0_i32_1 = arith.constant 0 : i32
    %c0_i32_2 = arith.constant 0 : i32
    return %c0_i32, %c0_i32_0, %c0_i32_1 : i32, i32, i32
  }
  func.func @transform_13(%arg0: i32) -> (i32, i32, i32) {
    %c0_i32 = arith.constant 0 : i32
    %c0_i32_0 = arith.constant 0 : i32
    %c0_i32_1 = arith.constant 0 : i32
    %c0_i32_2 = arith.constant 0 : i32
    return %c0_i32, %c0_i32_0, %c0_i32_1 : i32, i32, i32
  }
  func.func @transform_14(%arg0: i32) -> (i32, i32, i32) {
    %c0_i32 = arith.constant 0 : i32
    %c0_i32_0 = arith.constant 0 : i32
    %c0_i32_1 = arith.constant 0 : i32
    %c0_i32_2 = arith.constant 0 : i32
    return %c0_i32, %c0_i32_0, %c0_i32_1 : i32, i32, i32
  }
  func.func @transform_15(%arg0: i32) -> (i32, i32) {
    %c0_i32 = arith.constant 0 : i32
    %c0_i32_0 = arith.constant 0 : i32
    %c0_i32_1 = arith.constant 0 : i32
    return %c0_i32, %c0_i32_0 : i32, i32
  }
  func.func @transform_16(%arg0: i32) -> (i32, i32) {
    %c0_i32 = arith.constant 0 : i32
    %c0_i32_0 = arith.constant 0 : i32
    %c0_i32_1 = arith.constant 0 : i32
    return %c0_i32, %c0_i32_0 : i32, i32
  }
  func.func @transform_17(%arg0: i32) -> (i32, i32, i32) {
    %c0_i32 = arith.constant 0 : i32
    %c0_i32_0 = arith.constant 0 : i32
    %c0_i32_1 = arith.constant 0 : i32
    return %arg0, %c0_i32, %c0_i32_0 : i32, i32, i32
  }
}

</mosaic_0001>

<bundles_post_ra>
// kernel: transformer_encoder_forward.4
= control target key start
LH: loop header
LB: loop body
LE: loop exit
PB: predicated region body
PF: predicated region fallthrough
CT: control target
= control target key end

     0   :  { %s2908_s24 = smov 0   ;;  %s3285_s0 = inlined_call_operand.vmem [shape: f32[2,4,16], index: 0, kind: input, shape index: {}]   ;;  %s3286_s1 = inlined_call_operand.vmem [shape: bf16[16,32], index: 1, kind: input, shape index: {}]   ;;  %s3287_s2 = inlined_call_operand.vmem [shape: f32[1,32], index: 2, kind: input, shape index: {}]   ;;  %s3288_s3 = inlined_call_operand.vmem [shape: bf16[2,32,96], index: 3, kind: input, shape index: {}]   ;;  %s3289_s4 = inlined_call_operand.vmem [shape: f32[2,1,96], index: 4, kind: input, shape index: {}]   ;;  %s3290_s5 = inlined_call_operand.vmem [shape: bf16[2,32,32], index: 5, kind: input, shape index: {}]   ;;  %s3291_s6 = inlined_call_operand.vmem [shape: f32[2,1,32], index: 6, kind: input, shape index: {}]   ;;  %s3292_s7 = inlined_call_operand.vmem [shape: bf16[2,32,64], index: 7, kind: input, shape index: {}]   ;;  %s3293_s8 = inlined_call_operand.vmem [shape: f32[2,1,64], index: 8, kind: input, shape index: {}]   ;;  %s3294_s9 = inlined_call_operand.vmem [shape: bf16[2,64,32], index: 9, kind: input, shape index: {}]   ;;  %s3295_s10 = inlined_call_operand.vmem [shape: f32[2,1,32], index: 10, kind: input, shape index: {}]   ;;  %s3296_s11 = inlined_call_operand.vmem [shape: f32[2,1,32], index: 11, kind: input, shape index: {}]   ;;  %s3297_s12 = inlined_call_operand.vmem [shape: f32[2,1,32], index: 12, kind: input, shape index: {}]   ;;  %s3298_s13 = inlined_call_operand.vmem [shape: f32[2,1,32], index: 13, kind: input, shape index: {}]   ;;  %s3299_s14 = inlined_call_operand.vmem [shape: f32[2,1,32], index: 14, kind: input, shape index: {}]   ;;  %s3300_s15 = inlined_call_operand.vmem [shape: bf16[32,32], index: 15, kind: input, shape index: {}]   ;;  %s3301_s16 = inlined_call_operand.vmem [shape: f32[1,32], index: 16, kind: input, shape index: {}]   ;;  %s3302_s17 = inlined_call_operand.vmem [shape: f32[2,4,32], index: 17, kind: output, shape index: {}]  }
   0x1   :  { %3313 = sst [smem:[#allocation2_spill]] %s3285_s0 }
   0x2   :  { %3314 = sst [smem:[#allocation3_spill]] %s3286_s1 }
   0x3 LB: > { %s2356_s25 = sadd.s32 4294967295, %s2800_s24   ;;  %p2360_p0 = scmp.ge.s32.totalorder %s2800_s24, 1  ;;  %s2800_s24 = sphi %s2908_s24, %s27_s24  }
   0x4   : > { %p486_p1 = scmp.lt.s32.totalorder %s2800_s24, 3 }
   0x6   : > { %p487_p2 = pnand %p2360_p0, %p486_p1 }
   0x7   : > { %s3315_s28 = sld [smem:[#allocation3_spill]] (!%p487_p2)  ;;  %v2802_v1 = vmov (!%p487_p2), 0.0   ;;  %p536_p3 = scmp.lt.s32.totalorder (!%p487_p2), %s2356_s25, 1  ;;  %v2732_v2 = vld [vmem:[%s3288_s3] sm:$0xff] (!%p487_p2)   ;;  %vm2803_vm0 = vmmov (!%p487_p2), 0   ;;  %vm562_vm1 = vcmask (!%p487_p2), 130048  }
   0x8   : > { %490 = sbr.rel (%p487_p2) target bundleno = 5534 (0x159e), region = 88  ;;  %2525 = vmatprep.subr.bf16.mxu0 (!%p487_p2), %v2802_v1  ;;  %2531 = vmatprep.subr.bf16.mxu1 (!%p487_p2), %v2802_v1  ;;  %s3316_s1 = sld [smem:[#allocation2_spill]] (!%p487_p2)  ;;  %v2733_v5 = vld [vmem:[%s3288_s3 + $0x8] sm:$0xff] (!%p487_p2)   ;;  %v2363_v6 = vld [vmem:[%s3287_s2] ss:$0 sm:$0xff] (!%p487_p2)  ;;  %vm630_vm2 = vcmask (!%p487_p2), 261120  }
   0x9   : > { %2527 = vmatprep.mubr.msk.bf16.mxu0 (!%p487_p2), %vm2803_vm0, %v2802_v1  ;;  %2532 = vmatpush3.bf16.msra.mxu1 (!%p487_p2), %v2732_v2  ;;  %v2366_v13 = vld [vmem:[%s3289_s4] ss:$0 sm:$0xff] (!%p487_p2)  ;;  %s2804_s29 = smov (!%p487_p2), 120   ;;  %s2805_s0 = smov (!%p487_p2), 96   ;;  %vm678_vm3 = vcmask (!%p487_p2), 64512   ;;  %vm726_vm4 = vcmask (!%p487_p2), 27648  }
   0xa   : > { %2535 = vmatprep.mubr.msk.bf16.mxu1 (!%p487_p2), %vm2803_vm0, %v2802_v1  ;;  %2533 = vmatprep.subr.bf16.mxu1 (!%p487_p2), %v2802_v1  ;;  %s3312_s18 = smov (!%p487_p2), 80   ;;  %s2807_s19 = smov (!%p487_p2), 88   ;;  %vm745_vm5 = vcmask (!%p487_p2), 1041408   ;;  %vm741_vm6 = vcmask (!%p487_p2), 31744   ;;  %vm1136_vm7 = vcmask (!%p487_p2), 195584   ;;  %vm1208_vm8 = vcmask (!%p487_p2), 257024  }
   0xb   : > { %s2810_s21 = smov (!%p487_p2), 104   ;;  %s3307_s22 = smov (!%p487_p2), 56   ;;  %vm1345_vm9 = vcmask (!%p487_p2), 523264  }
   0xc   : > { %s3306_s23 = smov (!%p487_p2), 64   ;;  %s3305_s26 = smov (!%p487_p2), 40  }
   0xd   : > { %v2731_v0 = vld [vmem:[%s3315_s28] sm:$0xff] (!%p487_p2)   ;;  %2534 = vmatpush3.bf16.msra.mxu1 (!%p487_p2), %v2733_v5  ;;  %s3304_s27 = smov (!%p487_p2), 48   ;;  %s3310_s28 = smov (!%p487_p2), 8  }
   0xe   : > { %2526 = vmatpush3.bf16.msra.mxu0 (!%p487_p2), %v2731_v0  ;;  %2545 = vmatprep.subr.bf16.mxu1 (!%p487_p2), %v2802_v1 }
   0xf   : > { %s3328_s25 = smov (!%p536_p3, %s2356_s25), 1  ;;  %2539 = vmatprep.subr.bf16.mxu0 %v2802_v1 }
  0x10   : > { %s3303_s30 = sshll.u32 %s3328_s25, 2 }
  0x11   : > { %s539_s20 = scalar_lea.vmem %s3316_s1, %s3303_s30  ;;  %s3311_s1 = smov 72  }
  0x12   : > { %v545_v3 = vld [vmem:[%s539_s20] sm:$0xf]  ;;  %s2809_s20 = smov 112   ;;  %s3308_s30 = smov 24  }
  0x13   : > { %v548_v4 = vpack.c.bf16 %v545_v3, %v545_v3 }
  0x15   : > { %2528 = vmatmul.mubr.msk.bf16.vlgmr.msra.gmra.mrb[0].mxu0 %vm562_vm1, %v548_v4 }
  0x16   : > { %2541 = vmatprep.mubr.msk.bf16.mxu0 %vm2803_vm0, %v2802_v1 }
  0xe8   : > { %v600_v7 = vpop.f32.mrb[0].mxu0 }
  0xe9   : > { %v2948_v8 = vadd.f32 %v2363_v6, %v600_v7  ;;  %v2529_v9 = vpop.f32.mrb[1].mxu0 }
  0xea   : > { %v603_v10 = vpop.f32.mrb[2].mxu0 }
  0xeb   : > { %v610_v11 = vpack.c.bf16 %v2948_v8, %v2948_v8  ;;  %v2530_v12 = vpop.f32.mrb[3].mxu0 }
  0xed   : > { %2536 = vmatmul.mubr.msk.bf16.vlgmr.msra.gmra.mrb[0].mxu1 %vm630_vm2, %v610_v11 }
  0xee   : > { %2547 = vmatprep.mubr.msk.bf16.mxu1 %vm2803_vm0, %v2802_v1 }
 0x1c0   : > { %v668_v14 = vpop.f32.mrb[0].mxu1 }
 0x1c1   : > { %v669_v15 = vadd.f32 %v2366_v13, %v668_v14  ;;  %v2537_v16 = vpop.f32.mrb[1].mxu1 }
 0x1c2   : > { %v671_v17 = vpop.f32.mrb[2].mxu1 }
 0x1c3   : > { %v2958_v18 = vpack.c.bf16 %v669_v15, %v669_v15  ;;  %v2538_v19 = vpop.f32.mrb[3].mxu1 }
 0x1c5   : > { %789 = vrot.lane.b32.xlu1 %v2958_v18, %s2804_s29  ;;  %676 = vrot.lane.b32.xlu0 %v2958_v18, %s2805_s0 }
 0x1c9   : > { %902 = vrot.lane.b32.xlu1 %v2958_v18, %s3312_s18  ;;  %791 = vrot.lane.b32.xlu0 %v2958_v18, %s2807_s19  ;;  %s3324_s18 = smov 16  }
 0x1cd   : > { %1013 = vrot.lane.b32.xlu1 %v2958_v18, %s3311_s1  ;;  %900 = vrot.lane.b32.xlu0 %v2958_v18, %s2809_s20  ;;  %s3325_s1 = smov 24  }
 0x1d1   : > { %1011 = vrot.lane.b32.xlu0 %v2958_v18, %s2810_s21 }
 0x237   : > { %v677_v20 = vpop.permute.xlu0 %676  ;;  %v790_v23 = vpop.permute.xlu1 %789 }
 0x238   : > { %v683_v21 = vsel %vm678_vm3, %v677_v20, 0 }
 0x239   : > { %2540 = vmatpush3.bf16.xpose.msra.mxu0 %v683_v21 }
 0x23a   : > { %2551 = vmatprep.subr.bf16.mxu0 %v2802_v1 }
 0x23b   : > { %v792_v22 = vpop.permute.xlu0 %791  ;;  %v903_v25 = vpop.permute.xlu1 %902 }
 0x23c   : > { %v797_v24 = vsel %vm678_vm3, %v792_v22, 0  ;;  %v908_v26 = vsel %vm678_vm3, %v903_v25, 0 }
 0x23f   : > { %v1014_v27 = vpop.permute.xlu1 %1013  ;;  %v901_v28 = vpop.permute.xlu0 %900 }
 0x240   : > { %2542 = vmatmul.mubr.msk.bf16.vlgmr.msra.gmra.mrb[4].mxu0 %vm678_vm3, %v2958_v18  ;;  %v1019_v29 = vsel %vm678_vm3, %v1014_v27, 0 }
 0x241   : > { %2552 = vmatpush3.bf16.xpose.msra.mxu0 %v797_v24  ;;  %2553 = vmatprep.mubr.msk.bf16.mxu0 %vm2803_vm0, %v2802_v1 }
 0x242   : > { %2563 = vmatprep.subr.bf16.mxu0 %v2802_v1 }
 0x243   : > { %v1012_v30 = vpop.permute.xlu0 %1011 }
 0x248   : > { %2554 = vmatmul.mubr.msk.bf16.vlgmr.msra.gmra.mrb[8].mxu0 %vm678_vm3, %v790_v23 }
 0x249   : > { %2564 = vmatpush3.bf16.xpose.msra.mxu0 %v908_v26  ;;  %2565 = vmatprep.mubr.msk.bf16.mxu0 %vm2803_vm0, %v2802_v1 }
 0x24a   : > { %2575 = vmatprep.subr.bf16.mxu0 %v2802_v1 }
 0x250   : > { %2566 = vmatmul.mubr.msk.bf16.vlgmr.msra.gmra.mrb[12].mxu0 %vm678_vm3, %v901_v28 }
 0x251   : > { %2576 = vmatpush3.bf16.xpose.msra.mxu0 %v1019_v29  ;;  %2577 = vmatprep.mubr.msk.bf16.mxu0 %vm2803_vm0, %v2802_v1 }
 0x252   : > { %2587 = vmatprep.subr.bf16.mxu0 %v2802_v1 }
 0x258   : > { %2578 = vmatmul.mubr.msk.bf16.vlgmr.msra.gmra.mrb[16].mxu0 %vm678_vm3, %v1012_v30 }
 0x259   : > { %2591 = vmatprep.mubr.msk.bf16.mxu0 %vm2803_vm0, %v2802_v1 }
 0x313   : > { %v719_v31 = vpop.f32.mrb[4].mxu0 }
 0x314   : > { %v725_v32 = vmul.f32 0.35355338, %v719_v31  ;;  %v2543_v33 = vpop.f32.mrb[5].mxu0 }
 0x315   : > { %v722_v34 = vpop.f32.mrb[6].mxu0 }
 0x316   : > { %v2544_v35 = vpop.f32.mrb[7].mxu0  ;;  %v727_v36 = vsel %vm726_vm4, %v725_v32, -inf }
 0x317   : > { %728 = vmax.xlane.f32.xlu1 %v727_v36 }
 0x31b   : > { %v833_v37 = vpop.f32.mrb[8].mxu0 }
 0x31c   : > { %v839_v38 = vmul.f32 0.35355338, %v833_v37  ;;  %v2555_v39 = vpop.f32.mrb[9].mxu0 }
 0x31d   : > { %v836_v40 = vpop.f32.mrb[10].mxu0 }
 0x31e   : > { %v2556_v41 = vpop.f32.mrb[11].mxu0  ;;  %v840_v42 = vsel %vm726_vm4, %v839_v38, -inf }
 0x31f   : > { %841 = vmax.xlane.f32.xlu0 %v840_v42 }
 0x323   : > { %v944_v43 = vpop.f32.mrb[12].mxu0 }
 0x324   : > { %v950_v44 = vmul.f32 0.35355338, %v944_v43  ;;  %v2567_v45 = vpop.f32.mrb[13].mxu0 }
 0x325   : > { %v947_v46 = vpop.f32.mrb[14].mxu0  ;;  %v2734_v45 = vld [vmem:[%s3290_s5] sm:$0xff]  }
 0x326   : > { %v2568_v47 = vpop.f32.mrb[15].mxu0  ;;  %v951_v48 = vsel %vm726_vm4, %v950_v44, -inf  ;;  %2588 = vmatpush3.bf16.msra.mxu0 %v2734_v45  ;;  %v2735_v46 = vld [vmem:[%s3290_s5 + $0x8] sm:$0xff]  }
 0x327   : > { %952 = vmax.xlane.f32.xlu0 %v951_v48  ;;  %2589 = vmatprep.subr.bf16.mxu0 %v2802_v1 }
 0x32a   : > { %2590 = vmatpush3.bf16.msra.mxu0 %v2735_v46 }
 0x32b   : > { %v1055_v49 = vpop.f32.mrb[16].mxu0  ;;  %2603 = vmatprep.subr.bf16.mxu0 %v2802_v1 }
 0x32c   : > { %v1061_v50 = vmul.f32 0.35355338, %v1055_v49  ;;  %v2579_v51 = vpop.f32.mrb[17].mxu0 }
 0x32d   : > { %v1058_v52 = vpop.f32.mrb[18].mxu0 }
 0x32e   : > { %v2580_v53 = vpop.f32.mrb[19].mxu0  ;;  %v1062_v54 = vsel %vm726_vm4, %v1061_v50, -inf }
 0x32f   : > { %1063 = vmax.xlane.f32.xlu1 %v1062_v54 }
 0x3a4   : > { %v729_v55 = vpop.xlane.xlu1 %728 }
 0x3a5   : > { %v730_v56 = vsub.f32 %v725_v32, %v729_v55 }
 0x3a7   : > { %v731_v57 = vmul.f32 1.442695, %v730_v56 }
 0x3a9   : > { %2754 = vpow2.f32 %v731_v57 }
 0x3ac   : > { %v842_v58 = vpop.xlane.xlu0 %841 }
 0x3ad   : > { %v843_v59 = vsub.f32 %v839_v38, %v842_v58 }
 0x3af   : > { %v844_v60 = vmul.f32 1.442695, %v843_v59 }
 0x3b1   : > { %2756 = vpow2.f32 %v844_v60 }
 0x3b3   : > { %v2755_v61 = vpop.eup %2754 }
 0x3b4   : > { %v953_v62 = vpop.xlane.xlu0 %952  ;;  %v733_v63 = vsel %vm726_vm4, %v2755_v61, 0.0 }
 0x3b5   : > { %v954_v0 = vsub.f32 %v950_v44, %v953_v62  ;;  %734 = vadd.xlane.f32.xlu0 %v733_v63  ;;  %v2378_v62 = vld [vmem:[%s3291_s6] ss:$0 sm:$0xff] }
 0x3b7   : > { %v955_v2 = vmul.f32 1.442695, %v954_v0 }
 0x3b9   : > { %2758 = vpow2.f32 %v955_v2 }
 0x3bb   : > { %v2757_v3 = vpop.eup %2756 }
 0x3bc   : > { %v846_v4 = vsel %vm726_vm4, %v2757_v3, 0.0  ;;  %v1064_v7 = vpop.xlane.xlu1 %1063 }
 0x3bd   : > { %847 = vadd.xlane.f32.xlu1 %v846_v4  ;;  %v1065_v9 = vsub.f32 %v1061_v50, %v1064_v7 }
 0x3bf   : > { %v1066_v10 = vmul.f32 1.442695, %v1065_v9 }
 0x3c1   : > { %2760 = vpow2.f32 %v1066_v10 }
 0x3c3   : > { %v2759_v5 = vpop.eup %2758 }
 0x3c4   : > { %v957_v6 = vsel %vm726_vm4, %v2759_v5, 0.0 }
 0x3c5   : > { %958 = vadd.xlane.f32.xlu0 %v957_v6 }
 0x3cb   : > { %v2761_v11 = vpop.eup %2760 }
 0x3cc   : > { %v1068_v12 = vsel %vm726_vm4, %v2761_v11, 0.0 }
 0x3ce   : > { %852 = vrot.lane.b32.xlu1 %v2958_v18, %s3307_s22  ;;  %s3309_s22 = smov 16  }
 0x3db   : > { %739 = vrot.lane.b32.xlu0 %v2958_v18, %s3306_s23  ;;  %s3317_s23 = smov 80  }
 0x3df   : > { %1074 = vrot.lane.b32.xlu0 %v2958_v18, %s3305_s26  ;;  %s3318_s26 = smov 72  }
 0x3f2   : > { %1069 = vadd.xlane.f32.xlu1 %v1068_v12 }
 0x403   : > { %963 = vrot.lane.b32.xlu1 %v2958_v18, %s3304_s27 }
 0x442   : > { %v735_v13 = vpop.xlane.xlu0 %734 }
 0x443   : > { %2762 = vrcp.f32 %v735_v13  ;;  %v2736_v13 = vld [vmem:[%s3292_s7] sm:$0xff]  }
 0x44a   : > { %v848_v14 = vpop.xlane.xlu1 %847 }
 0x44b   : > { %2764 = vrcp.f32 %v848_v14  ;;  %v2738_v14 = vld [vmem:[%s3294_s9] sm:$0xff]  }
 0x44d   : > { %v2763_v15 = vpop.eup %2762 }
 0x44e   : > { %v737_v17 = vmul.f32 %v2763_v15, %v2755_v61  ;;  %v853_v21 = vpop.permute.xlu1 %852  ;;  %v2739_v15 = vld [vmem:[%s3294_s9 + $0x8] sm:$0xff]  }
 0x44f   : > { %v858_v18 = vsel %vm745_vm5, %v853_v21, 0  ;;  %v2382_v21 = vld [vmem:[%s3296_s11] ss:$0 sm:$0xff] }
 0x450   : > { %v738_v22 = vpack.c.bf16 %v737_v17, %v737_v17 }
 0x452   : > { %v959_v16 = vpop.xlane.xlu0 %958 }
 0x453   : > { %2766 = vrcp.f32 %v959_v16 }
 0x455   : > { %v2765_v23 = vpop.eup %2764 }
 0x456   : > { %v740_v19 = vpop.permute.xlu0 %739  ;;  %v850_v24 = vmul.f32 %v2765_v23, %v2757_v3  ;;  %v2383_v23 = vld [vmem:[%s3297_s12] ss:$0 sm:$0xff] }
 0x457   : > { %v747_v20 = vsel %vm745_vm5, %v740_v19, 0 }
 0x458   : > { %2546 = vmatpush3.bf16.msra.mxu1 %v747_v20  ;;  %v851_v25 = vpack.c.bf16 %v850_v24, %v850_v24 }
 0x459   : > { %2557 = vmatprep.subr.bf16.mxu1 %v2802_v1 }
 0x45a   : > { %v1075_v31 = vpop.permute.xlu0 %1074 }
 0x45b   : > { %2548 = vmatmul.mubr.msk.bf16.vlgmr.msra.gmra.mrb[4].mxu1 %vm741_vm6, %v738_v22  ;;  %v1080_v33 = vsel %vm745_vm5, %v1075_v31, 0 }
 0x45c   : > { %2558 = vmatpush3.bf16.msra.mxu1 %v858_v18  ;;  %2559 = vmatprep.mubr.msk.bf16.mxu1 %vm2803_vm0, %v2802_v1 }
 0x45d   : > { %2569 = vmatprep.subr.bf16.mxu1 %v2802_v1  ;;  %v2767_v26 = vpop.eup %2766 }
 0x45e   : > { %v961_v28 = vmul.f32 %v2767_v26, %v2759_v5  ;;  %v2740_v26 = vld [vmem:[%s3294_s9 + $0x10] sm:$0xff]  }
 0x460   : > { %v962_v32 = vpack.c.bf16 %v961_v28, %v961_v28  ;;  %v2384_v28 = vld [vmem:[%s3293_s8] ss:$0 sm:$0xff] }
 0x463   : > { %2560 = vmatmul.mubr.msk.bf16.vlgmr.msra.gmra.mrb[8].mxu1 %vm741_vm6, %v851_v25 }
 0x464   : > { %2571 = vmatprep.mubr.msk.bf16.mxu1 %vm2803_vm0, %v2802_v1 }
 0x47f   : > { %v1070_v27 = vpop.xlane.xlu1 %1069 }
 0x480   : > { %2768 = vrcp.f32 %v1070_v27  ;;  %v2741_v27 = vld [vmem:[%s3294_s9 + $0x18] sm:$0xff]  }
 0x483   : > { %v964_v29 = vpop.permute.xlu1 %963 }
 0x484   : > { %v969_v30 = vsel %vm745_vm5, %v964_v29, 0 }
 0x485   : > { %2570 = vmatpush3.bf16.msra.mxu1 %v969_v30 }
 0x486   : > { %2581 = vmatprep.subr.bf16.mxu1 %v2802_v1 }
 0x488   : > { %2572 = vmatmul.mubr.msk.bf16.vlgmr.msra.gmra.mrb[12].mxu1 %vm741_vm6, %v962_v32 }
 0x489   : > { %2582 = vmatpush3.bf16.msra.mxu1 %v1080_v33  ;;  %2583 = vmatprep.mubr.msk.bf16.mxu1 %vm2803_vm0, %v2802_v1 }
 0x48a   : > { %v2769_v34 = vpop.eup %2768  ;;  %2595 = vmatprep.subr.bf16.mxu1 %v2802_v1 }
 0x48b   : > { %v1072_v35 = vmul.f32 %v2769_v34, %v2761_v11 }
 0x48d   : > { %v1073_v36 = vpack.c.bf16 %v1072_v35, %v1072_v35 }
 0x490   : > { %2584 = vmatmul.mubr.msk.bf16.vlgmr.msra.gmra.mrb[16].mxu1 %vm741_vm6, %v1073_v36  ;;  %v2388_v36 = vld [vmem:[%s3295_s10] ss:$0 sm:$0xff] }
 0x491   : > { %2599 = vmatprep.mubr.msk.bf16.mxu1 %vm2803_vm0, %v2802_v1  ;;  %2596 = vmatpush3.bf16.msra.mxu1 %v2736_v13 }
 0x492   : > { %2597 = vmatprep.subr.bf16.mxu1 %v2802_v1 }
 0x52e   : > { %v783_v37 = vpop.f32.mrb[4].mxu1 }
 0x52f   : > { %v2549_v38 = vpop.f32.mrb[5].mxu1 }
 0x530   : > { %v786_v39 = vpop.f32.mrb[6].mxu1 }
 0x531   : > { %v2550_v40 = vpop.f32.mrb[7].mxu1 }
 0x536   : > { %v894_v41 = vpop.f32.mrb[8].mxu1 }
 0x537   : > { %1123 = vrot.lane.b32.xlu1 %v894_v41, %s3310_s28  ;;  %v2561_v42 = vpop.f32.mrb[9].mxu1 }
 0x538   : > { %v897_v43 = vpop.f32.mrb[10].mxu1 }
 0x539   : > { %v2562_v44 = vpop.f32.mrb[11].mxu1 }
 0x55b   : > { %v1005_v47 = vpop.f32.mrb[12].mxu1 }
 0x55c   : > { %1127 = vrot.lane.b32.xlu0 %v1005_v47, %s3309_s22  ;;  %v2573_v48 = vpop.f32.mrb[13].mxu1 }
 0x55d   : > { %v1008_v49 = vpop.f32.mrb[14].mxu1 }
 0x55e   : > { %v2574_v50 = vpop.f32.mrb[15].mxu1  ;;  %v2742_v49 = vld [vmem:[%s3288_s3 + $0x10] sm:$0xff]  }
 0x55f   : > { %v2743_v50 = vld [vmem:[%s3288_s3 + $0x18] sm:$0xff]  }
 0x563   : > { %v1116_v51 = vpop.f32.mrb[16].mxu1 }
 0x564   : > { %1131 = vrot.lane.b32.xlu1 %v1116_v51, %s3308_s30  ;;  %v2585_v52 = vpop.f32.mrb[17].mxu1 }
 0x565   : > { %v1119_v53 = vpop.f32.mrb[18].mxu1 }
 0x566   : > { %v2586_v54 = vpop.f32.mrb[19].mxu1 }
 0x5a9   : > { %v1124_v55 = vpop.permute.xlu1 %1123 }
 0x5aa   : > { %v1134_v57 = vsel %vm678_vm3, %v783_v37, %v1124_v55  ;;  %v2394_v55 = vld [vmem:[%s3298_s13] ss:$0 sm:$0xff] }
 0x5ce   : > { %v1128_v56 = vpop.permute.xlu0 %1127 }
 0x5cf   : > { %v1135_v58 = vsel %vm562_vm1, %v1134_v57, %v1128_v56  ;;  %v2395_v57 = vld [vmem:[%s3299_s14] ss:$0 sm:$0xff] }
 0x5d6   : > { %v1132_v59 = vpop.permute.xlu1 %1131 }
 0x5d7   : > { %v1137_v60 = vsel %vm1136_vm7, %v1135_v58, %v1132_v59 }
 0x5d8   : > { %v1142_v61 = vpack.c.bf16 %v1137_v60, %v1137_v60 }
 0x5da   : > { %2592 = vmatmul.mubr.msk.bf16.vlgmr.msra.gmra.mrb[20].mxu0 %vm630_vm2, %v1142_v61  ;;  %v2401_v61 = vld [vmem:[%s3289_s4 + $0x1] ss:$0 sm:$0xff] }
 0x5db   : > { %2611 = vmatprep.mubr.msk.bf16.mxu0 %vm2803_vm0, %v2802_v1  ;;  %2604 = vmatpush3.bf16.msra.mxu0 %v2738_v14 }
 0x5dc   : > { %2605 = vmatprep.subr.bf16.mxu0 %v2802_v1 }
 0x5df   : > { %2606 = vmatpush3.bf16.msra.mxu0 %v2739_v15 }
 0x5e0   : > { %2607 = vmatprep.subr.bf16.mxu0 %v2802_v1 }
 0x5e3   : > { %2608 = vmatpush3.bf16.msra.mxu0 %v2740_v26 }
 0x5e4   : > { %2609 = vmatprep.subr.bf16.mxu0 %v2802_v1 }
 0x5e7   : > { %2610 = vmatpush3.bf16.msra.mxu0 %v2741_v27 }
 0x5e8   : > { %2629 = vmatprep.subr.bf16.mxu0 %v2802_v1 }
 0x6ad   : > { %v1199_v63 = vpop.f32.mrb[20].mxu0 }
 0x6ae   : > { %v1200_v0 = vadd.f32 %v2378_v62, %v1199_v63  ;;  %v2593_v2 = vpop.f32.mrb[21].mxu0 }
 0x6af   : > { %v1202_v3 = vpop.f32.mrb[22].mxu0 }
 0x6b0   : > { %v2594_v4 = vpop.f32.mrb[23].mxu0  ;;  %v1205_v5 = vadd.f32 %v1200_v0, %v2948_v8  ;;  %v2737_v8 = vld [vmem:[%s3292_s7 + $0x8] sm:$0xff]  }
 0x6b1   : > { %2598 = vmatpush3.bf16.msra.mxu1 %v2737_v8 }
 0x6b2   : > { %v1209_v6 = vsel %vm1208_vm8, %v1205_v5, 0.0  ;;  %2615 = vmatprep.subr.bf16.mxu1 %v2802_v1 }
 0x6b3   : > { %1210 = vadd.xlane.f32.xlu0 %v1209_v6 }
 0x740   : > { %v1211_v7 = vpop.xlane.xlu0 %1210 }
 0x741   : > { %v1213_v9 = vmul.f32 0.03125, %v1211_v7 }
 0x743   : > { %v1214_v10 = vsub.f32 %v1205_v5, %v1213_v9 }
 0x745   : > { %v1215_v11 = vmul.f32 %v1214_v10, %v1214_v10 }
 0x747   : > { %v1216_v12 = vsel %vm1208_vm8, %v1215_v11, 0.0 }
 0x748   : > { %1217 = vadd.xlane.f32.xlu1 %v1216_v12 }
 0x7d5   : > { %v1218_v16 = vpop.xlane.xlu1 %1217 }
 0x7d6   : > { %v1219_v17 = vmul.f32 0.03125, %v1218_v16 }
 0x7d8   : > { %v1220_v19 = vadd.f32 1e-05, %v1219_v17 }
 0x7da   : > { %2770 = vrsqrt.f32 %v1220_v19 }
 0x7e4   : > { %v2771_v20 = vpop.eup %2770 }
 0x7e5   : > { %v1222_v22 = vmul.f32 %v2771_v20, %v1214_v10 }
 0x7e7   : > { %v1229_v18 = vmul.f32 %v2382_v21, %v1222_v22 }
 0x7e9   : > { %v1236_v24 = vadd.f32 %v2383_v23, %v1229_v18 }
 0x7eb   : > { %v1241_v25 = vpack.c.bf16 %v1236_v24, %v1236_v24 }
 0x7ed   : > { %2600 = vmatmul.mubr.msk.bf16.vlgmr.msra.gmra.mrb[20].mxu1 %vm630_vm2, %v1241_v25 }
 0x7ee   : > { %2619 = vmatprep.mubr.msk.bf16.mxu1 %vm2803_vm0, %v2802_v1  ;;  %2616 = vmatpush3.bf16.msra.mxu1 %v2742_v49 }
 0x7ef   : > { %2617 = vmatprep.subr.bf16.mxu1 %v2802_v1 }
 0x7f2   : > { %2618 = vmatpush3.bf16.msra.mxu1 %v2743_v50 }
 0x7f3   : > { %2623 = vmatprep.subr.bf16.mxu1 %v2802_v1 }
 0x8c0   : > { %v1298_v29 = vpop.f32.mrb[20].mxu1 }
 0x8c1   : > { %v1299_v30 = vadd.f32 %v2384_v28, %v1298_v29  ;;  %v2601_v31 = vpop.f32.mrb[21].mxu1 }
 0x8c2   : > { %v1301_v32 = vpop.f32.mrb[22].mxu1 }
 0x8c3   : > { %v1304_v33 = vmax.f32 %v1299_v30, 0.0  ;;  %v2602_v34 = vpop.f32.mrb[23].mxu1 }
 0x8c5   : > { %v1313_v35 = vpack.c.bf16 %v1304_v33, %v1304_v33 }
 0x8c7   : > { %2612 = vmatmul.mubr.msk.bf16.vlgmr.msra.gmra.mrb[24].mxu0 %vm1345_vm9, %v1313_v35 }
 0x8c8   : > { %2631 = vmatprep.mubr.msk.bf16.mxu0 %vm2803_vm0, %v2802_v1 }
 0x99a   : > { %v1383_v37 = vpop.f32.mrb[24].mxu0 }
 0x99b   : > { %v1384_v38 = vadd.f32 %v2388_v36, %v1383_v37  ;;  %v2613_v39 = vpop.f32.mrb[25].mxu0 }
 0x99c   : > { %v1386_v40 = vpop.f32.mrb[26].mxu0 }
 0x99d   : > { %v2614_v41 = vpop.f32.mrb[27].mxu0  ;;  %v1389_v42 = vadd.f32 %v1384_v38, %v1236_v24 }
 0x99f   : > { %v1392_v43 = vsel %vm1208_vm8, %v1389_v42, 0.0 }
 0x9a0   : > { %1393 = vadd.xlane.f32.xlu0 %v1392_v43 }
 0xa2d   : > { %v1394_v44 = vpop.xlane.xlu0 %1393 }
 0xa2e   : > { %v1395_v45 = vmul.f32 0.03125, %v1394_v44 }
 0xa30   : > { %v1396_v46 = vsub.f32 %v1389_v42, %v1395_v45 }
 0xa32   : > { %v1397_v47 = vmul.f32 %v1396_v46, %v1396_v46 }
 0xa34   : > { %v1398_v48 = vsel %vm1208_vm8, %v1397_v47, 0.0 }
 0xa35   : > { %1399 = vadd.xlane.f32.xlu0 %v1398_v48 }
 0xac2   : > { %v1400_v51 = vpop.xlane.xlu0 %1399 }
 0xac3   : > { %v1401_v52 = vmul.f32 0.03125, %v1400_v51 }
 0xac5   : > { %v1402_v53 = vadd.f32 1e-05, %v1401_v52 }
 0xac7   : > { %2772 = vrsqrt.f32 %v1402_v53 }
 0xad1   : > { %v2773_v54 = vpop.eup %2772 }
 0xad2   : > { %v1404_v56 = vmul.f32 %v2773_v54, %v1396_v46 }
 0xad4   : > { %v1411_v58 = vmul.f32 %v2394_v55, %v1404_v56 }
 0xad6   : > { %v3112_v59 = vadd.f32 %v2395_v57, %v1411_v58 }
 0xad8   : > { %v1424_v60 = vpack.c.bf16 %v3112_v59, %v3112_v59 }
 0xada   : > { %2620 = vmatmul.mubr.msk.bf16.vlgmr.msra.gmra.mrb[24].mxu1 %vm630_vm2, %v1424_v60 }
 0xadb   : > { %2625 = vmatprep.mubr.msk.bf16.mxu1 %vm2803_vm0, %v2802_v1 }
 0xbad   : > { %v1482_v62 = vpop.f32.mrb[24].mxu1 }
 0xbae   : > { %v1483_v63 = vadd.f32 %v2401_v61, %v1482_v62  ;;  %v2621_v0 = vpop.f32.mrb[25].mxu1 }
 0xbaf   : > { %v1485_v2 = vpop.f32.mrb[26].mxu1 }
 0xbb0   : > { %v3122_v3 = vpack.c.bf16 %v1483_v63, %v1483_v63  ;;  %v2622_v4 = vpop.f32.mrb[27].mxu1 }
 0xbb2   : > { %1601 = vrot.lane.b32.xlu0 %v3122_v3, %s2807_s19  ;;  %1490 = vrot.lane.b32.xlu1 %v3122_v3, %s2805_s0  ;;  %s3320_s0 = smov 64   ;;  %s3321_s19 = smov 40  }
 0xbb6   : > { %1710 = vrot.lane.b32.xlu0 %v3122_v3, %s2809_s20  ;;  %1599 = vrot.lane.b32.xlu1 %v3122_v3, %s2804_s29  ;;  %s3319_s29 = smov 56   ;;  %s3322_s20 = smov 48  }
 0xbba   : > { %1821 = vrot.lane.b32.xlu0 %v3122_v3, %s2810_s21  ;;  %1712 = vrot.lane.b32.xlu1 %v3122_v3, %s3317_s23  ;;  %s3323_s21 = smov 8  }
 0xbbe   : > { %1823 = vrot.lane.b32.xlu1 %v3122_v3, %s3318_s26 }
 0xc24   : > { %v1491_v5 = vpop.permute.xlu1 %1490  ;;  %v1602_v7 = vpop.permute.xlu0 %1601 }
 0xc25   : > { %v1496_v6 = vsel %vm678_vm3, %v1491_v5, 0  ;;  %v1607_v10 = vsel %vm678_vm3, %v1602_v7, 0 }
 0xc26   : > { %2624 = vmatpush3.bf16.xpose.msra.mxu1 %v1496_v6 }
 0xc27   : > { %2635 = vmatprep.subr.bf16.mxu1 %v2802_v1 }
 0xc28   : > { %v1600_v9 = vpop.permute.xlu1 %1599  ;;  %v1711_v8 = vpop.permute.xlu0 %1710 }
 0xc2c   : > { %v1713_v11 = vpop.permute.xlu1 %1712  ;;  %v1822_v15 = vpop.permute.xlu0 %1821 }
 0xc2d   : > { %2626 = vmatmul.mubr.msk.bf16.vlgmr.msra.gmra.mrb[28].mxu1 %vm678_vm3, %v3122_v3  ;;  %v1718_v12 = vsel %vm678_vm3, %v1713_v11, 0 }
 0xc2e   : > { %2636 = vmatpush3.bf16.xpose.msra.mxu1 %v1607_v10  ;;  %2637 = vmatprep.mubr.msk.bf16.mxu1 %vm2803_vm0, %v2802_v1 }
 0xc2f   : > { %2647 = vmatprep.subr.bf16.mxu1 %v2802_v1 }
 0xc30   : > { %v1824_v13 = vpop.permute.xlu1 %1823 }
 0xc31   : > { %v1829_v14 = vsel %vm678_vm3, %v1824_v13, 0 }
 0xc35   : > { %2638 = vmatmul.mubr.msk.bf16.vlgmr.msra.gmra.mrb[32].mxu1 %vm678_vm3, %v1600_v9 }
 0xc36   : > { %2648 = vmatpush3.bf16.xpose.msra.mxu1 %v1718_v12  ;;  %2649 = vmatprep.mubr.msk.bf16.mxu1 %vm2803_vm0, %v2802_v1 }
 0xc37   : > { %2659 = vmatprep.subr.bf16.mxu1 %v2802_v1 }
 0xc3d   : > { %2650 = vmatmul.mubr.msk.bf16.vlgmr.msra.gmra.mrb[36].mxu1 %vm678_vm3, %v1711_v8 }
 0xc3e   : > { %2660 = vmatpush3.bf16.xpose.msra.mxu1 %v1829_v14  ;;  %2661 = vmatprep.mubr.msk.bf16.mxu1 %vm2803_vm0, %v2802_v1 }
 0xc3f   : > { %2671 = vmatprep.subr.bf16.mxu1 %v2802_v1 }
 0xc45   : > { %2662 = vmatmul.mubr.msk.bf16.vlgmr.msra.gmra.mrb[40].mxu1 %vm678_vm3, %v1822_v15 }
 0xc46   : > { %2675 = vmatprep.mubr.msk.bf16.mxu1 %vm2803_vm0, %v2802_v1 }
 0xd00   : > { %v1532_v16 = vpop.f32.mrb[28].mxu1 }
 0xd01   : > { %v1538_v17 = vmul.f32 0.35355338, %v1532_v16  ;;  %v2627_v19 = vpop.f32.mrb[29].mxu1 }
 0xd02   : > { %v1535_v20 = vpop.f32.mrb[30].mxu1 }
 0xd03   : > { %v2628_v21 = vpop.f32.mrb[31].mxu1  ;;  %v1539_v22 = vsel %vm726_vm4, %v1538_v17, -inf }
 0xd04   : > { %1540 = vmax.xlane.f32.xlu1 %v1539_v22 }
 0xd08   : > { %v1643_v23 = vpop.f32.mrb[32].mxu1 }
 0xd09   : > { %v1649_v18 = vmul.f32 0.35355338, %v1643_v23  ;;  %v2639_v24 = vpop.f32.mrb[33].mxu1 }
 0xd0a   : > { %v1646_v25 = vpop.f32.mrb[34].mxu1 }
 0xd0b   : > { %v2640_v26 = vpop.f32.mrb[35].mxu1  ;;  %v1650_v27 = vsel %vm726_vm4, %v1649_v18, -inf }
 0xd0c   : > { %1651 = vmax.xlane.f32.xlu0 %v1650_v27 }
 0xd10   : > { %v1754_v28 = vpop.f32.mrb[36].mxu1 }
 0xd11   : > { %v1760_v29 = vmul.f32 0.35355338, %v1754_v28  ;;  %v2651_v30 = vpop.f32.mrb[37].mxu1 }
 0xd12   : > { %v1757_v31 = vpop.f32.mrb[38].mxu1  ;;  %v2744_v30 = vld [vmem:[%s3290_s5 + $0x10] sm:$0xff]  }
 0xd13   : > { %v2652_v32 = vpop.f32.mrb[39].mxu1  ;;  %v1761_v33 = vsel %vm726_vm4, %v1760_v29, -inf  ;;  %2672 = vmatpush3.bf16.msra.mxu1 %v2744_v30  ;;  %v2745_v31 = vld [vmem:[%s3290_s5 + $0x18] sm:$0xff]  }
 0xd14   : > { %1762 = vmax.xlane.f32.xlu0 %v1761_v33  ;;  %2673 = vmatprep.subr.bf16.mxu1 %v2802_v1 }
 0xd17   : > { %2674 = vmatpush3.bf16.msra.mxu1 %v2745_v31 }
 0xd18   : > { %v1865_v34 = vpop.f32.mrb[40].mxu1  ;;  %2687 = vmatprep.subr.bf16.mxu1 %v2802_v1 }
 0xd19   : > { %v1871_v35 = vmul.f32 0.35355338, %v1865_v34  ;;  %v2663_v36 = vpop.f32.mrb[41].mxu1 }
 0xd1a   : > { %v1868_v37 = vpop.f32.mrb[42].mxu1 }
 0xd1b   : > { %v2664_v38 = vpop.f32.mrb[43].mxu1  ;;  %v1872_v39 = vsel %vm726_vm4, %v1871_v35, -inf }
 0xd1c   : > { %1873 = vmax.xlane.f32.xlu1 %v1872_v39 }
 0xd91   : > { %v1541_v40 = vpop.xlane.xlu1 %1540 }
 0xd92   : > { %v1542_v41 = vsub.f32 %v1538_v17, %v1541_v40 }
 0xd94   : > { %v1543_v42 = vmul.f32 1.442695, %v1542_v41 }
 0xd96   : > { %2774 = vpow2.f32 %v1543_v42 }
 0xd99   : > { %v1652_v43 = vpop.xlane.xlu0 %1651 }
 0xd9a   : > { %v1653_v44 = vsub.f32 %v1649_v18, %v1652_v43 }
 0xd9c   : > { %v1654_v45 = vmul.f32 1.442695, %v1653_v44 }
 0xd9e   : > { %2776 = vpow2.f32 %v1654_v45 }
 0xda0   : > { %v2775_v46 = vpop.eup %2774 }
 0xda1   : > { %v1763_v47 = vpop.xlane.xlu0 %1762  ;;  %v1545_v48 = vsel %vm726_vm4, %v2775_v46, 0.0 }
 0xda2   : > { %v1764_v49 = vsub.f32 %v1760_v29, %v1763_v47  ;;  %1546 = vadd.xlane.f32.xlu0 %v1545_v48  ;;  %v2418_v47 = vld [vmem:[%s3291_s6 + $0x1] ss:$0 sm:$0xff] }
 0xda4   : > { %v1765_v50 = vmul.f32 1.442695, %v1764_v49 }
 0xda6   : > { %2778 = vpow2.f32 %v1765_v50 }
 0xda8   : > { %v2777_v51 = vpop.eup %2776 }
 0xda9   : > { %v1656_v52 = vsel %vm726_vm4, %v2777_v51, 0.0  ;;  %v1874_v55 = vpop.xlane.xlu1 %1873 }
 0xdaa   : > { %1657 = vadd.xlane.f32.xlu1 %v1656_v52  ;;  %v1875_v56 = vsub.f32 %v1871_v35, %v1874_v55 }
 0xdac   : > { %v1876_v57 = vmul.f32 1.442695, %v1875_v56 }
 0xdae   : > { %2780 = vpow2.f32 %v1876_v57 }
 0xdb0   : > { %v2779_v53 = vpop.eup %2778 }
 0xdb1   : > { %v1767_v54 = vsel %vm726_vm4, %v2779_v53, 0.0 }
 0xdb2   : > { %1768 = vadd.xlane.f32.xlu0 %v1767_v54 }
 0xdb8   : > { %v2781_v58 = vpop.eup %2780 }
 0xdb9   : > { %v1878_v60 = vsel %vm726_vm4, %v2781_v58, 0.0 }
 0xdbb   : > { %1662 = vrot.lane.b32.xlu1 %v3122_v3, %s3319_s29 }
 0xdc8   : > { %1551 = vrot.lane.b32.xlu0 %v3122_v3, %s3320_s0 }
 0xdcc   : > { %1884 = vrot.lane.b32.xlu0 %v3122_v3, %s3321_s19 }
 0xddf   : > { %1879 = vadd.xlane.f32.xlu1 %v1878_v60 }
 0xdf0   : > { %1773 = vrot.lane.b32.xlu1 %v3122_v3, %s3322_s20 }
 0xe2f   : > { %v1547_v61 = vpop.xlane.xlu0 %1546 }
 0xe30   : > { %2782 = vrcp.f32 %v1547_v61  ;;  %v2746_v61 = vld [vmem:[%s3292_s7 + $0x10] sm:$0xff]  }
 0xe37   : > { %v1658_v62 = vpop.xlane.xlu1 %1657 }
 0xe38   : > { %2784 = vrcp.f32 %v1658_v62  ;;  %v2748_v62 = vld [vmem:[%s3294_s9 + $0x20] sm:$0xff]  }
 0xe3a   : > { %v2783_v63 = vpop.eup %2782 }
 0xe3b   : > { %v1549_v2 = vmul.f32 %v2783_v63, %v2775_v46  ;;  %v1663_v6 = vpop.permute.xlu1 %1662  ;;  %v2749_v63 = vld [vmem:[%s3294_s9 + $0x28] sm:$0xff]  }
 0xe3c   : > { %v1668_v10 = vsel %vm745_vm5, %v1663_v6, 0  ;;  %v2424_v6 = vld [vmem:[%s3296_s11 + $0x1] ss:$0 sm:$0xff] }
 0xe3d   : > { %v1550_v7 = vpack.c.bf16 %v1549_v2, %v1549_v2 }
 0xe3f   : > { %v1769_v0 = vpop.xlane.xlu0 %1768 }
 0xe40   : > { %2786 = vrcp.f32 %v1769_v0 }
 0xe42   : > { %v2785_v9 = vpop.eup %2784 }
 0xe43   : > { %v1552_v4 = vpop.permute.xlu0 %1551  ;;  %v1660_v3 = vmul.f32 %v2785_v9, %v2777_v51  ;;  %v2425_v9 = vld [vmem:[%s3297_s12 + $0x1] ss:$0 sm:$0xff] }
 0xe44   : > { %v1557_v5 = vsel %vm745_vm5, %v1552_v4, 0 }
 0xe45   : > { %2630 = vmatpush3.bf16.msra.mxu0 %v1557_v5  ;;  %v1661_v11 = vpack.c.bf16 %v1660_v3, %v1660_v3 }
 0xe46   : > { %2641 = vmatprep.subr.bf16.mxu0 %v2802_v1 }
 0xe47   : > { %v1885_v16 = vpop.permute.xlu0 %1884 }
 0xe48   : > { %2632 = vmatmul.mubr.msk.bf16.vlgmr.msra.gmra.mrb[28].mxu0 %vm741_vm6, %v1550_v7  ;;  %v1890_v19 = vsel %vm745_vm5, %v1885_v16, 0 }
 0xe49   : > { %2642 = vmatpush3.bf16.msra.mxu0 %v1668_v10  ;;  %2643 = vmatprep.mubr.msk.bf16.mxu0 %vm2803_vm0, %v2802_v1 }
 0xe4a   : > { %2653 = vmatprep.subr.bf16.mxu0 %v2802_v1  ;;  %v2787_v12 = vpop.eup %2786 }
 0xe4b   : > { %v1771_v8 = vmul.f32 %v2787_v12, %v2779_v53  ;;  %v2750_v12 = vld [vmem:[%s3294_s9 + $0x30] sm:$0xff]  }
 0xe4d   : > { %v1772_v17 = vpack.c.bf16 %v1771_v8, %v1771_v8  ;;  %v2431_v8 = vld [vmem:[%s3293_s8 + $0x1] ss:$0 sm:$0xff] }
 0xe50   : > { %2644 = vmatmul.mubr.msk.bf16.vlgmr.msra.gmra.mrb[32].mxu0 %vm741_vm6, %v1661_v11 }
 0xe51   : > { %2655 = vmatprep.mubr.msk.bf16.mxu0 %vm2803_vm0, %v2802_v1 }
 0xe6c   : > { %v1880_v13 = vpop.xlane.xlu1 %1879 }
 0xe6d   : > { %2788 = vrcp.f32 %v1880_v13  ;;  %v2751_v13 = vld [vmem:[%s3294_s9 + $0x38] sm:$0xff]  }
 0xe70   : > { %v1774_v14 = vpop.permute.xlu1 %1773 }
 0xe71   : > { %v1779_v15 = vsel %vm745_vm5, %v1774_v14, 0 }
 0xe72   : > { %2654 = vmatpush3.bf16.msra.mxu0 %v1779_v15 }
 0xe73   : > { %2665 = vmatprep.subr.bf16.mxu0 %v2802_v1 }
 0xe75   : > { %2656 = vmatmul.mubr.msk.bf16.vlgmr.msra.gmra.mrb[36].mxu0 %vm741_vm6, %v1772_v17 }
 0xe76   : > { %2666 = vmatpush3.bf16.msra.mxu0 %v1890_v19  ;;  %2667 = vmatprep.mubr.msk.bf16.mxu0 %vm2803_vm0, %v2802_v1 }
 0xe77   : > { %v2789_v20 = vpop.eup %2788  ;;  %2679 = vmatprep.subr.bf16.mxu0 %v2802_v1 }
 0xe78   : > { %v1882_v21 = vmul.f32 %v2789_v20, %v2781_v58 }
 0xe7a   : > { %v1883_v22 = vpack.c.bf16 %v1882_v21, %v1882_v21 }
 0xe7d   : > { %2668 = vmatmul.mubr.msk.bf16.vlgmr.msra.gmra.mrb[40].mxu0 %vm741_vm6, %v1883_v22  ;;  %v2444_v22 = vld [vmem:[%s3295_s10 + $0x1] ss:$0 sm:$0xff] }
 0xe7e   : > { %2683 = vmatprep.mubr.msk.bf16.mxu0 %vm2803_vm0, %v2802_v1  ;;  %2680 = vmatpush3.bf16.msra.mxu0 %v2746_v61 }
 0xe7f   : > { %2681 = vmatprep.subr.bf16.mxu0 %v2802_v1 }
 0xf1b   : > { %v1593_v23 = vpop.f32.mrb[28].mxu0 }
 0xf1c   : > { %v2633_v18 = vpop.f32.mrb[29].mxu0 }
 0xf1d   : > { %v1596_v24 = vpop.f32.mrb[30].mxu0 }
 0xf1e   : > { %v2634_v25 = vpop.f32.mrb[31].mxu0 }
 0xf23   : > { %v1704_v26 = vpop.f32.mrb[32].mxu0 }
 0xf24   : > { %1933 = vrot.lane.b32.xlu1 %v1704_v26, %s3323_s21  ;;  %v2645_v27 = vpop.f32.mrb[33].mxu0  ;;  %s3326_s21 = sshll.u32 %s3328_s25, 2 }
 0xf25   : > { %v1707_v28 = vpop.f32.mrb[34].mxu0  ;;  %s543_s22 = scalar_lea.vmem %s3302_s17, %s3326_s21 }
 0xf26   : > { %v2646_v29 = vpop.f32.mrb[35].mxu0 }
 0xf48   : > { %v1815_v32 = vpop.f32.mrb[36].mxu0 }
 0xf49   : > { %1937 = vrot.lane.b32.xlu0 %v1815_v32, %s3324_s18  ;;  %v2657_v33 = vpop.f32.mrb[37].mxu0 }
 0xf4a   : > { %v1818_v34 = vpop.f32.mrb[38].mxu0 }
 0xf4b   : > { %v2658_v35 = vpop.f32.mrb[39].mxu0  ;;  %v2752_v34 = vld [vmem:[%s3300_s15] sm:$0xff]  }
 0xf4c   : > { %v2753_v35 = vld [vmem:[%s3300_s15 + $0x8] sm:$0xff]  }
 0xf50   : > { %v1926_v36 = vpop.f32.mrb[40].mxu0 }
 0xf51   : > { %1941 = vrot.lane.b32.xlu1 %v1926_v36, %s3325_s1  ;;  %v2669_v37 = vpop.f32.mrb[41].mxu0 }
 0xf52   : > { %v1929_v38 = vpop.f32.mrb[42].mxu0 }
 0xf53   : > { %v2670_v39 = vpop.f32.mrb[43].mxu0 }
 0xf96   : > { %v1934_v40 = vpop.permute.xlu1 %1933 }
 0xf97   : > { %v1944_v42 = vsel %vm678_vm3, %v1593_v23, %v1934_v40  ;;  %v2452_v40 = vld [vmem:[%s3298_s13 + $0x1] ss:$0 sm:$0xff] }
 0xfbb   : > { %v1938_v41 = vpop.permute.xlu0 %1937 }
 0xfbc   : > { %v1945_v43 = vsel %vm562_vm1, %v1944_v42, %v1938_v41 }
 0xfc3   : > { %v1942_v44 = vpop.permute.xlu1 %1941 }
 0xfc4   : > { %v1946_v45 = vsel %vm1136_vm7, %v1945_v43, %v1942_v44 }
 0xfc5   : > { %v1952_v46 = vpack.c.bf16 %v1946_v45, %v1946_v45  ;;  %v2454_v45 = vld [vmem:[%s3301_s16] ss:$0 sm:$0xff] }
 0xfc7   : > { %2676 = vmatmul.mubr.msk.bf16.vlgmr.msra.gmra.mrb[44].mxu1 %vm630_vm2, %v1952_v46 }
 0xfc8   : > { %2695 = vmatprep.mubr.msk.bf16.mxu1 %vm2803_vm0, %v2802_v1  ;;  %2688 = vmatpush3.bf16.msra.mxu1 %v2748_v62 }
 0xfc9   : > { %2689 = vmatprep.subr.bf16.mxu1 %v2802_v1 }
 0xfcc   : > { %2690 = vmatpush3.bf16.msra.mxu1 %v2749_v63 }
 0xfcd   : > { %2691 = vmatprep.subr.bf16.mxu1 %v2802_v1 }
 0xfd0   : > { %2692 = vmatpush3.bf16.msra.mxu1 %v2750_v12 }
 0xfd1   : > { %2693 = vmatprep.subr.bf16.mxu1 %v2802_v1 }
 0xfd4   : > { %2694 = vmatpush3.bf16.msra.mxu1 %v2751_v13 }
0x109a   : > { %v2010_v48 = vpop.f32.mrb[44].mxu1 }
0x109b   : > { %v2011_v49 = vadd.f32 %v2418_v47, %v2010_v48  ;;  %v2677_v50 = vpop.f32.mrb[45].mxu1 }
0x109c   : > { %v2013_v51 = vpop.f32.mrb[46].mxu1 }
0x109d   : > { %v2678_v52 = vpop.f32.mrb[47].mxu1  ;;  %v2016_v53 = vadd.f32 %v2011_v49, %v3112_v59  ;;  %v2747_v59 = vld [vmem:[%s3292_s7 + $0x18] sm:$0xff]  }
0x109e   : > { %2682 = vmatpush3.bf16.msra.mxu0 %v2747_v59 }
0x109f   : > { %v2021_v54 = vsel %vm1208_vm8, %v2016_v53, 0.0  ;;  %2699 = vmatprep.subr.bf16.mxu0 %v2802_v1 }
0x10a0   : > { %2022 = vadd.xlane.f32.xlu0 %v2021_v54 }
0x112d   : > { %v2023_v55 = vpop.xlane.xlu0 %2022 }
0x112e   : > { %v2024_v56 = vmul.f32 0.03125, %v2023_v55 }
0x1130   : > { %v2025_v57 = vsub.f32 %v2016_v53, %v2024_v56 }
0x1132   : > { %v2026_v58 = vmul.f32 %v2025_v57, %v2025_v57 }
0x1134   : > { %v2027_v60 = vsel %vm1208_vm8, %v2026_v58, 0.0 }
0x1135   : > { %2028 = vadd.xlane.f32.xlu1 %v2027_v60 }
0x11c2   : > { %v2029_v0 = vpop.xlane.xlu1 %2028 }
0x11c3   : > { %v2030_v2 = vmul.f32 0.03125, %v2029_v0 }
0x11c5   : > { %v2031_v4 = vadd.f32 1e-05, %v2030_v2 }
0x11c7   : > { %2790 = vrsqrt.f32 %v2031_v4 }
0x11d1   : > { %v2791_v5 = vpop.eup %2790 }
0x11d2   : > { %v2033_v7 = vmul.f32 %v2791_v5, %v2025_v57 }
0x11d4   : > { %v2040_v10 = vmul.f32 %v2424_v6, %v2033_v7 }
0x11d6   : > { %v2047_v3 = vadd.f32 %v2425_v9, %v2040_v10 }
0x11d8   : > { %v2053_v11 = vpack.c.bf16 %v2047_v3, %v2047_v3 }
0x11da   : > { %2684 = vmatmul.mubr.msk.bf16.vlgmr.msra.gmra.mrb[44].mxu0 %vm630_vm2, %v2053_v11 }
0x11db   : > { %2703 = vmatprep.mubr.msk.bf16.mxu0 %vm2803_vm0, %v2802_v1  ;;  %2700 = vmatpush3.bf16.msra.mxu0 %v2752_v34 }
0x11dc   : > { %2701 = vmatprep.subr.bf16.mxu0 %v2802_v1  ;;  %v2453_v1 = vld [vmem:[%s3299_s14 + $0x1] ss:$0 sm:$0xff] }
0x11df   : > { %2702 = vmatpush3.bf16.msra.mxu0 %v2753_v35 }
0x12ad   : > { %v2111_v14 = vpop.f32.mrb[44].mxu0 }
0x12ae   : > { %v2112_v15 = vadd.f32 %v2431_v8, %v2111_v14  ;;  %v2685_v16 = vpop.f32.mrb[45].mxu0 }
0x12af   : > { %v2114_v17 = vpop.f32.mrb[46].mxu0 }
0x12b0   : > { %v2117_v19 = vmax.f32 %v2112_v15, 0.0  ;;  %v2686_v20 = vpop.f32.mrb[47].mxu0 }
0x12b2   : > { %v2127_v21 = vpack.c.bf16 %v2117_v19, %v2117_v19 }
0x12b4   : > { %2696 = vmatmul.mubr.msk.bf16.vlgmr.msra.gmra.mrb[48].mxu1 %vm1345_vm9, %v2127_v21 }
0x1387   : > { %v2197_v23 = vpop.f32.mrb[48].mxu1 }
0x1388   : > { %v2198_v18 = vadd.f32 %v2444_v22, %v2197_v23  ;;  %v2697_v24 = vpop.f32.mrb[49].mxu1 }
0x1389   : > { %v2200_v25 = vpop.f32.mrb[50].mxu1 }
0x138a   : > { %v2698_v26 = vpop.f32.mrb[51].mxu1  ;;  %v2203_v27 = vadd.f32 %v2198_v18, %v2047_v3 }
0x138c   : > { %v2208_v28 = vsel %vm1208_vm8, %v2203_v27, 0.0 }
0x138d   : > { %2209 = vadd.xlane.f32.xlu0 %v2208_v28 }
0x141a   : > { %v2210_v29 = vpop.xlane.xlu0 %2209 }
0x141b   : > { %v2211_v30 = vmul.f32 0.03125, %v2210_v29 }
0x141d   : > { %v2212_v31 = vsub.f32 %v2203_v27, %v2211_v30 }
0x141f   : > { %v2213_v32 = vmul.f32 %v2212_v31, %v2212_v31 }
0x1421   : > { %v2214_v33 = vsel %vm1208_vm8, %v2213_v32, 0.0 }
0x1422   : > { %2215 = vadd.xlane.f32.xlu0 %v2214_v33 }
0x14af   : > { %v2216_v36 = vpop.xlane.xlu0 %2215 }
0x14b0   : > { %v2217_v37 = vmul.f32 0.03125, %v2216_v36 }
0x14b2   : > { %v2218_v38 = vadd.f32 1e-05, %v2217_v37 }
0x14b4   : > { %2792 = vrsqrt.f32 %v2218_v38 }
0x14be   : > { %v2793_v39 = vpop.eup %2792 }
0x14bf   : > { %v2220_v41 = vmul.f32 %v2793_v39, %v2212_v31 }
0x14c1   : > { %v2227_v42 = vmul.f32 %v2452_v40, %v2220_v41 }
0x14c3   : > { %v2234_v43 = vadd.f32 %v2453_v1, %v2227_v42 }
0x14c5   : > { %v2239_v44 = vpack.c.bf16 %v2234_v43, %v2234_v43 }
0x14c7   : > { %2704 = vmatmul.mubr.msk.bf16.vlgmr.msra.gmra.mrb[48].mxu0 %vm630_vm2, %v2239_v44 }
0x159a   : > { %v2296_v46 = vpop.f32.mrb[48].mxu0 }
0x159b   : > { %v2297_v47 = vadd.f32 %v2454_v45, %v2296_v46  ;;  %v2705_v48 = vpop.f32.mrb[49].mxu0 }
0x159c   : > { %v2299_v49 = vpop.f32.mrb[50].mxu0 }
0x159d   : > { %2302 = vst.msk [vmem:[%s543_s22] sm:$0xf] %vm1208_vm8, %v2297_v47  ;;  %v2706_v50 = vpop.f32.mrb[51].mxu0 }
0x159e PF: > { %s27_s24 = sadd.s32 1, %s2800_s24  }
0x159f   : > { %p24_p4 = scmp.ge.s32.totalorder %s27_s24, 4  }
0x15a1   :  { %26 = sbr.rel (!%p24_p4) target bundleno = 3 (0x3), region = 130 }

// kernel: transformer_encoder_forward.6
= control target key start
LH: loop header
LB: loop body
LE: loop exit
PB: predicated region body
PF: predicated region fallthrough
CT: control target
= control target key end

     0   :  { %s2921_s24 = smov 0   ;;  %s3302_s0 = inlined_call_operand.vmem [shape: f32[2,4,32], index: 0, kind: input, shape index: {}]   ;;  %s3303_s1 = inlined_call_operand.vmem [shape: bf16[32,32], index: 1, kind: input, shape index: {}]   ;;  %s3304_s2 = inlined_call_operand.vmem [shape: f32[1,32], index: 2, kind: input, shape index: {}]   ;;  %s3305_s3 = inlined_call_operand.vmem [shape: bf16[2,32,96], index: 3, kind: input, shape index: {}]   ;;  %s3306_s4 = inlined_call_operand.vmem [shape: f32[2,1,96], index: 4, kind: input, shape index: {}]   ;;  %s3307_s5 = inlined_call_operand.vmem [shape: bf16[2,32,32], index: 5, kind: input, shape index: {}]   ;;  %s3308_s6 = inlined_call_operand.vmem [shape: f32[2,1,32], index: 6, kind: input, shape index: {}]   ;;  %s3309_s7 = inlined_call_operand.vmem [shape: bf16[2,32,64], index: 7, kind: input, shape index: {}]   ;;  %s3310_s8 = inlined_call_operand.vmem [shape: f32[2,1,64], index: 8, kind: input, shape index: {}]   ;;  %s3311_s9 = inlined_call_operand.vmem [shape: bf16[2,64,32], index: 9, kind: input, shape index: {}]   ;;  %s3312_s10 = inlined_call_operand.vmem [shape: f32[2,1,32], index: 10, kind: input, shape index: {}]   ;;  %s3313_s11 = inlined_call_operand.vmem [shape: f32[2,1,32], index: 11, kind: input, shape index: {}]   ;;  %s3314_s12 = inlined_call_operand.vmem [shape: f32[2,1,32], index: 12, kind: input, shape index: {}]   ;;  %s3315_s13 = inlined_call_operand.vmem [shape: f32[2,1,32], index: 13, kind: input, shape index: {}]   ;;  %s3316_s14 = inlined_call_operand.vmem [shape: f32[2,1,32], index: 14, kind: input, shape index: {}]   ;;  %s3317_s15 = inlined_call_operand.vmem [shape: bf16[32,32], index: 15, kind: input, shape index: {}]   ;;  %s3318_s16 = inlined_call_operand.vmem [shape: f32[1,32], index: 16, kind: input, shape index: {}]   ;;  %s3319_s17 = inlined_call_operand.vmem [shape: f32[2,4,32], index: 17, kind: output, shape index: {}]  }
   0x1   :  { %3332 = sst [smem:[#allocation2_spill]] %s3302_s0 }
   0x2   :  { %3333 = sst [smem:[#allocation3_spill]] %s3303_s1 }
   0x3 LB: > { %s2364_s25 = sadd.s32 4294967295, %s2813_s24   ;;  %p2368_p0 = scmp.ge.s32.totalorder %s2813_s24, 1  ;;  %s2813_s24 = sphi %s2921_s24, %s27_s24  }
   0x4   : > { %p486_p1 = scmp.lt.s32.totalorder %s2813_s24, 3 }
   0x6   : > { %p487_p2 = pnand %p2368_p0, %p486_p1 }
   0x7   : > { %s3334_s28 = sld [smem:[#allocation3_spill]] (!%p487_p2)  ;;  %v2815_v1 = vmov (!%p487_p2), 0.0   ;;  %vm2816_vm0 = vmmov (!%p487_p2), 0   ;;  %p536_p3 = scmp.lt.s32.totalorder (!%p487_p2), %s2364_s25, 1  ;;  %v2745_v3 = vld [vmem:[%s3305_s3] sm:$0xff] (!%p487_p2)   ;;  %vm570_vm1 = vcmask (!%p487_p2), 261120  }
   0x8   : > { %490 = sbr.rel (%p487_p2) target bundleno = 5534 (0x159e), region = 88  ;;  %2535 = vmatprep.subr.bf16.mxu0 (!%p487_p2), %v2815_v1  ;;  %2543 = vmatprep.subr.bf16.mxu1 (!%p487_p2), %v2815_v1  ;;  %s3335_s21 = sld [smem:[#allocation2_spill]] (!%p487_p2)  ;;  %v2746_v6 = vld [vmem:[%s3305_s3 + $0x8] sm:$0xff] (!%p487_p2)   ;;  %v2371_v7 = vld [vmem:[%s3304_s2] ss:$0 sm:$0xff] (!%p487_p2)  ;;  %vm685_vm2 = vcmask (!%p487_p2), 64512  }
   0x9   : > { %2539 = vmatprep.mubr.msk.bf16.mxu0 (!%p487_p2), %vm2816_vm0, %v2815_v1  ;;  %2547 = vmatprep.mubr.msk.bf16.mxu1 (!%p487_p2), %vm2816_vm0, %v2815_v1  ;;  %v2375_v14 = vld [vmem:[%s3306_s4] ss:$0 sm:$0xff] (!%p487_p2)  ;;  %s2817_s18 = smov (!%p487_p2), 120   ;;  %s2818_s1 = smov (!%p487_p2), 96   ;;  %vm733_vm3 = vcmask (!%p487_p2), 27648   ;;  %vm752_vm4 = vcmask (!%p487_p2), 1041408  }
   0xa   : > { %2544 = vmatpush3.bf16.msra.mxu1 (!%p487_p2), %v2745_v3  ;;  %s3330_s20 = smov (!%p487_p2), 80   ;;  %s2822_s23 = smov (!%p487_p2), 112   ;;  %vm748_vm5 = vcmask (!%p487_p2), 31744   ;;  %vm1142_vm6 = vcmask (!%p487_p2), 130048   ;;  %vm1144_vm7 = vcmask (!%p487_p2), 195584   ;;  %vm1216_vm8 = vcmask (!%p487_p2), 257024  }
   0xb   : > { %2545 = vmatprep.subr.bf16.mxu1 (!%p487_p2), %v2815_v1  ;;  %s3331_s26 = smov (!%p487_p2), 104   ;;  %s3325_s27 = smov (!%p487_p2), 56   ;;  %vm1353_vm9 = vcmask (!%p487_p2), 523264  }
   0xc   : > { %s3324_s29 = smov (!%p487_p2), 64   ;;  %s3323_s0 = smov (!%p487_p2), 40  }
   0xd   : > { %v2743_v0 = vld [vmem:[%s3334_s28] sm:$0xff] (!%p487_p2)   ;;  %v2744_v2 = vld [vmem:[%s3334_s28 + $0x8] sm:$0xff] (!%p487_p2)   ;;  %s3322_s30 = smov (!%p487_p2), 48  }
   0xe   : > { %2536 = vmatpush3.bf16.msra.mxu0 (!%p487_p2), %v2743_v0  ;;  %2546 = vmatpush3.bf16.msra.mxu1 (!%p487_p2), %v2746_v6 }
   0xf   : > { %2537 = vmatprep.subr.bf16.mxu0 %v2815_v1  ;;  %s3348_s25 = smov (!%p536_p3, %s2364_s25), 1  ;;  %2557 = vmatprep.subr.bf16.mxu1 %v2815_v1 }
  0x10   : > { %s3321_s19 = sshll.u32 %s3348_s25, 2 }
  0x11   : > { %s539_s22 = scalar_lea.vmem %s3335_s21, %s3321_s19  ;;  %s2820_s21 = smov 88  }
  0x12   : > { %2538 = vmatpush3.bf16.msra.mxu0 %v2744_v2  ;;  %v545_v4 = vld [vmem:[%s539_s22] sm:$0xf]  ;;  %s3326_s22 = smov 72   ;;  %s3329_s19 = smov 8  }
  0x13   : > { %2551 = vmatprep.subr.bf16.mxu0 %v2815_v1  ;;  %v550_v5 = vpack.c.bf16 %v545_v4, %v545_v4 }
  0x15   : > { %2540 = vmatmul.mubr.msk.bf16.vlgmr.msra.gmra.mrb[0].mxu0 %vm570_vm1, %v550_v5 }
  0x16   : > { %2553 = vmatprep.mubr.msk.bf16.mxu0 %vm2816_vm0, %v2815_v1 }
  0xe8   : > { %v608_v8 = vpop.f32.mrb[0].mxu0 }
  0xe9   : > { %v2965_v9 = vadd.f32 %v2371_v7, %v608_v8  ;;  %v2541_v10 = vpop.f32.mrb[1].mxu0 }
  0xea   : > { %v611_v11 = vpop.f32.mrb[2].mxu0 }
  0xeb   : > { %v618_v12 = vpack.c.bf16 %v2965_v9, %v2965_v9  ;;  %v2542_v13 = vpop.f32.mrb[3].mxu0 }
  0xed   : > { %2548 = vmatmul.mubr.msk.bf16.vlgmr.msra.gmra.mrb[0].mxu1 %vm570_vm1, %v618_v12 }
  0xee   : > { %2559 = vmatprep.mubr.msk.bf16.mxu1 %vm2816_vm0, %v2815_v1 }
 0x1c0   : > { %v675_v15 = vpop.f32.mrb[0].mxu1 }
 0x1c1   : > { %v676_v16 = vadd.f32 %v2375_v14, %v675_v15  ;;  %v2549_v17 = vpop.f32.mrb[1].mxu1 }
 0x1c2   : > { %v678_v18 = vpop.f32.mrb[2].mxu1 }
 0x1c3   : > { %v2975_v19 = vpack.c.bf16 %v676_v16, %v676_v16  ;;  %v2550_v20 = vpop.f32.mrb[3].mxu1 }
 0x1c5   : > { %796 = vrot.lane.b32.xlu1 %v2975_v19, %s2817_s18  ;;  %683 = vrot.lane.b32.xlu0 %v2975_v19, %s2818_s1 }
 0x1c9   : > { %909 = vrot.lane.b32.xlu1 %v2975_v19, %s3330_s20  ;;  %798 = vrot.lane.b32.xlu0 %v2975_v19, %s2820_s21  ;;  %s3346_s20 = sshll.u32 %s3348_s25, 2 }
 0x1cd   : > { %1020 = vrot.lane.b32.xlu1 %v2975_v19, %s3326_s22  ;;  %907 = vrot.lane.b32.xlu0 %v2975_v19, %s2822_s23  ;;  %s3328_s22 = smov 16  }
 0x1d1   : > { %1018 = vrot.lane.b32.xlu0 %v2975_v19, %s3331_s26 }
 0x237   : > { %v684_v21 = vpop.permute.xlu0 %683  ;;  %v797_v24 = vpop.permute.xlu1 %796 }
 0x238   : > { %v690_v22 = vsel %vm685_vm2, %v684_v21, 0 }
 0x239   : > { %2552 = vmatpush3.bf16.xpose.msra.mxu0 %v690_v22 }
 0x23a   : > { %2563 = vmatprep.subr.bf16.mxu0 %v2815_v1 }
 0x23b   : > { %v799_v23 = vpop.permute.xlu0 %798  ;;  %v910_v26 = vpop.permute.xlu1 %909 }
 0x23c   : > { %v804_v25 = vsel %vm685_vm2, %v799_v23, 0  ;;  %v915_v27 = vsel %vm685_vm2, %v910_v26, 0 }
 0x23f   : > { %v1021_v28 = vpop.permute.xlu1 %1020  ;;  %v908_v29 = vpop.permute.xlu0 %907 }
 0x240   : > { %2554 = vmatmul.mubr.msk.bf16.vlgmr.msra.gmra.mrb[4].mxu0 %vm685_vm2, %v2975_v19  ;;  %v1026_v30 = vsel %vm685_vm2, %v1021_v28, 0 }
 0x241   : > { %2564 = vmatpush3.bf16.xpose.msra.mxu0 %v804_v25  ;;  %2565 = vmatprep.mubr.msk.bf16.mxu0 %vm2816_vm0, %v2815_v1 }
 0x242   : > { %2575 = vmatprep.subr.bf16.mxu0 %v2815_v1 }
 0x243   : > { %v1019_v31 = vpop.permute.xlu0 %1018 }
 0x248   : > { %2566 = vmatmul.mubr.msk.bf16.vlgmr.msra.gmra.mrb[8].mxu0 %vm685_vm2, %v797_v24 }
 0x249   : > { %2576 = vmatpush3.bf16.xpose.msra.mxu0 %v915_v27  ;;  %2577 = vmatprep.mubr.msk.bf16.mxu0 %vm2816_vm0, %v2815_v1 }
 0x24a   : > { %2587 = vmatprep.subr.bf16.mxu0 %v2815_v1 }
 0x250   : > { %2578 = vmatmul.mubr.msk.bf16.vlgmr.msra.gmra.mrb[12].mxu0 %vm685_vm2, %v908_v29 }
 0x251   : > { %2588 = vmatpush3.bf16.xpose.msra.mxu0 %v1026_v30  ;;  %2589 = vmatprep.mubr.msk.bf16.mxu0 %vm2816_vm0, %v2815_v1 }
 0x252   : > { %2599 = vmatprep.subr.bf16.mxu0 %v2815_v1 }
 0x258   : > { %2590 = vmatmul.mubr.msk.bf16.vlgmr.msra.gmra.mrb[16].mxu0 %vm685_vm2, %v1019_v31 }
 0x259   : > { %2603 = vmatprep.mubr.msk.bf16.mxu0 %vm2816_vm0, %v2815_v1 }
 0x313   : > { %v726_v32 = vpop.f32.mrb[4].mxu0 }
 0x314   : > { %v732_v33 = vmul.f32 0.35355338, %v726_v32  ;;  %v2555_v34 = vpop.f32.mrb[5].mxu0 }
 0x315   : > { %v729_v35 = vpop.f32.mrb[6].mxu0 }
 0x316   : > { %v2556_v36 = vpop.f32.mrb[7].mxu0  ;;  %v734_v37 = vsel %vm733_vm3, %v732_v33, -inf }
 0x317   : > { %735 = vmax.xlane.f32.xlu1 %v734_v37 }
 0x31b   : > { %v840_v38 = vpop.f32.mrb[8].mxu0 }
 0x31c   : > { %v846_v39 = vmul.f32 0.35355338, %v840_v38  ;;  %v2567_v40 = vpop.f32.mrb[9].mxu0 }
 0x31d   : > { %v843_v41 = vpop.f32.mrb[10].mxu0 }
 0x31e   : > { %v2568_v42 = vpop.f32.mrb[11].mxu0  ;;  %v847_v43 = vsel %vm733_vm3, %v846_v39, -inf }
 0x31f   : > { %848 = vmax.xlane.f32.xlu0 %v847_v43 }
 0x323   : > { %v951_v44 = vpop.f32.mrb[12].mxu0 }
 0x324   : > { %v957_v45 = vmul.f32 0.35355338, %v951_v44  ;;  %v2579_v46 = vpop.f32.mrb[13].mxu0 }
 0x325   : > { %v954_v47 = vpop.f32.mrb[14].mxu0  ;;  %v2747_v46 = vld [vmem:[%s3307_s5] sm:$0xff]  }
 0x326   : > { %v2580_v48 = vpop.f32.mrb[15].mxu0  ;;  %v958_v49 = vsel %vm733_vm3, %v957_v45, -inf  ;;  %2600 = vmatpush3.bf16.msra.mxu0 %v2747_v46  ;;  %v2748_v47 = vld [vmem:[%s3307_s5 + $0x8] sm:$0xff]  }
 0x327   : > { %959 = vmax.xlane.f32.xlu0 %v958_v49  ;;  %2601 = vmatprep.subr.bf16.mxu0 %v2815_v1 }
 0x32a   : > { %2602 = vmatpush3.bf16.msra.mxu0 %v2748_v47 }
 0x32b   : > { %v1062_v50 = vpop.f32.mrb[16].mxu0  ;;  %2615 = vmatprep.subr.bf16.mxu0 %v2815_v1 }
 0x32c   : > { %v1068_v51 = vmul.f32 0.35355338, %v1062_v50  ;;  %v2591_v52 = vpop.f32.mrb[17].mxu0 }
 0x32d   : > { %v1065_v53 = vpop.f32.mrb[18].mxu0 }
 0x32e   : > { %v2592_v54 = vpop.f32.mrb[19].mxu0  ;;  %v1069_v55 = vsel %vm733_vm3, %v1068_v51, -inf }
 0x32f   : > { %1070 = vmax.xlane.f32.xlu1 %v1069_v55 }
 0x3a4   : > { %v736_v56 = vpop.xlane.xlu1 %735 }
 0x3a5   : > { %v737_v57 = vsub.f32 %v732_v33, %v736_v56 }
 0x3a7   : > { %v738_v58 = vmul.f32 1.442695, %v737_v57 }
 0x3a9   : > { %2767 = vpow2.f32 %v738_v58 }
 0x3ac   : > { %v849_v59 = vpop.xlane.xlu0 %848 }
 0x3ad   : > { %v850_v60 = vsub.f32 %v846_v39, %v849_v59 }
 0x3af   : > { %v851_v61 = vmul.f32 1.442695, %v850_v60 }
 0x3b1   : > { %2769 = vpow2.f32 %v851_v61 }
 0x3b3   : > { %v2768_v62 = vpop.eup %2767 }
 0x3b4   : > { %v960_v63 = vpop.xlane.xlu0 %959  ;;  %v740_v0 = vsel %vm733_vm3, %v2768_v62, 0.0 }
 0x3b5   : > { %v961_v2 = vsub.f32 %v957_v45, %v960_v63  ;;  %741 = vadd.xlane.f32.xlu0 %v740_v0  ;;  %v2387_v63 = vld [vmem:[%s3308_s6] ss:$0 sm:$0xff] }
 0x3b7   : > { %v962_v3 = vmul.f32 1.442695, %v961_v2 }
 0x3b9   : > { %2771 = vpow2.f32 %v962_v3 }
 0x3bb   : > { %v2770_v4 = vpop.eup %2769 }
 0x3bc   : > { %v853_v5 = vsel %vm733_vm3, %v2770_v4, 0.0  ;;  %v1071_v8 = vpop.xlane.xlu1 %1070 }
 0x3bd   : > { %854 = vadd.xlane.f32.xlu1 %v853_v5  ;;  %v1072_v10 = vsub.f32 %v1068_v51, %v1071_v8 }
 0x3bf   : > { %v1073_v11 = vmul.f32 1.442695, %v1072_v10 }
 0x3c1   : > { %2773 = vpow2.f32 %v1073_v11 }
 0x3c3   : > { %v2772_v6 = vpop.eup %2771 }
 0x3c4   : > { %v964_v7 = vsel %vm733_vm3, %v2772_v6, 0.0 }
 0x3c5   : > { %965 = vadd.xlane.f32.xlu0 %v964_v7 }
 0x3cb   : > { %v2774_v12 = vpop.eup %2773 }
 0x3cc   : > { %v1075_v13 = vsel %vm733_vm3, %v2774_v12, 0.0 }
 0x3ce   : > { %859 = vrot.lane.b32.xlu1 %v2975_v19, %s3325_s27  ;;  %s3336_s27 = smov 104  }
 0x3db   : > { %746 = vrot.lane.b32.xlu0 %v2975_v19, %s3324_s29  ;;  %s3337_s29 = smov 80  }
 0x3df   : > { %1081 = vrot.lane.b32.xlu0 %v2975_v19, %s3323_s0  ;;  %s3327_s0 = smov 24  }
 0x3f2   : > { %1076 = vadd.xlane.f32.xlu1 %v1075_v13 }
 0x403   : > { %970 = vrot.lane.b32.xlu1 %v2975_v19, %s3322_s30  ;;  %s3343_s30 = smov 8  }
 0x442   : > { %v742_v14 = vpop.xlane.xlu0 %741 }
 0x443   : > { %2775 = vrcp.f32 %v742_v14  ;;  %v2749_v14 = vld [vmem:[%s3309_s7] sm:$0xff]  }
 0x44a   : > { %v855_v15 = vpop.xlane.xlu1 %854 }
 0x44b   : > { %2777 = vrcp.f32 %v855_v15  ;;  %v2751_v15 = vld [vmem:[%s3311_s9] sm:$0xff]  }
 0x44d   : > { %v2776_v16 = vpop.eup %2775 }
 0x44e   : > { %v744_v18 = vmul.f32 %v2776_v16, %v2768_v62  ;;  %v860_v22 = vpop.permute.xlu1 %859  ;;  %v2752_v16 = vld [vmem:[%s3311_s9 + $0x8] sm:$0xff]  }
 0x44f   : > { %v865_v19 = vsel %vm752_vm4, %v860_v22, 0  ;;  %v2391_v22 = vld [vmem:[%s3313_s11] ss:$0 sm:$0xff] }
 0x450   : > { %v745_v23 = vpack.c.bf16 %v744_v18, %v744_v18 }
 0x452   : > { %v966_v17 = vpop.xlane.xlu0 %965 }
 0x453   : > { %2779 = vrcp.f32 %v966_v17 }
 0x455   : > { %v2778_v24 = vpop.eup %2777 }
 0x456   : > { %v747_v20 = vpop.permute.xlu0 %746  ;;  %v857_v25 = vmul.f32 %v2778_v24, %v2770_v4  ;;  %v2392_v24 = vld [vmem:[%s3314_s12] ss:$0 sm:$0xff] }
 0x457   : > { %v754_v21 = vsel %vm752_vm4, %v747_v20, 0 }
 0x458   : > { %2558 = vmatpush3.bf16.msra.mxu1 %v754_v21  ;;  %v858_v26 = vpack.c.bf16 %v857_v25, %v857_v25 }
 0x459   : > { %2569 = vmatprep.subr.bf16.mxu1 %v2815_v1 }
 0x45a   : > { %v1082_v32 = vpop.permute.xlu0 %1081 }
 0x45b   : > { %2560 = vmatmul.mubr.msk.bf16.vlgmr.msra.gmra.mrb[4].mxu1 %vm748_vm5, %v745_v23  ;;  %v1087_v34 = vsel %vm752_vm4, %v1082_v32, 0 }
 0x45c   : > { %2570 = vmatpush3.bf16.msra.mxu1 %v865_v19  ;;  %2571 = vmatprep.mubr.msk.bf16.mxu1 %vm2816_vm0, %v2815_v1 }
 0x45d   : > { %2581 = vmatprep.subr.bf16.mxu1 %v2815_v1  ;;  %v2780_v27 = vpop.eup %2779 }
 0x45e   : > { %v968_v29 = vmul.f32 %v2780_v27, %v2772_v6  ;;  %v2753_v27 = vld [vmem:[%s3311_s9 + $0x10] sm:$0xff]  }
 0x460   : > { %v969_v33 = vpack.c.bf16 %v968_v29, %v968_v29  ;;  %v2393_v29 = vld [vmem:[%s3310_s8] ss:$0 sm:$0xff] }
 0x463   : > { %2572 = vmatmul.mubr.msk.bf16.vlgmr.msra.gmra.mrb[8].mxu1 %vm748_vm5, %v858_v26 }
 0x464   : > { %2583 = vmatprep.mubr.msk.bf16.mxu1 %vm2816_vm0, %v2815_v1 }
 0x47f   : > { %v1077_v28 = vpop.xlane.xlu1 %1076 }
 0x480   : > { %2781 = vrcp.f32 %v1077_v28  ;;  %v2754_v28 = vld [vmem:[%s3311_s9 + $0x18] sm:$0xff]  }
 0x483   : > { %v971_v30 = vpop.permute.xlu1 %970 }
 0x484   : > { %v976_v31 = vsel %vm752_vm4, %v971_v30, 0 }
 0x485   : > { %2582 = vmatpush3.bf16.msra.mxu1 %v976_v31 }
 0x486   : > { %2593 = vmatprep.subr.bf16.mxu1 %v2815_v1 }
 0x488   : > { %2584 = vmatmul.mubr.msk.bf16.vlgmr.msra.gmra.mrb[12].mxu1 %vm748_vm5, %v969_v33 }
 0x489   : > { %2594 = vmatpush3.bf16.msra.mxu1 %v1087_v34  ;;  %2595 = vmatprep.mubr.msk.bf16.mxu1 %vm2816_vm0, %v2815_v1 }
 0x48a   : > { %v2782_v35 = vpop.eup %2781  ;;  %2607 = vmatprep.subr.bf16.mxu1 %v2815_v1 }
 0x48b   : > { %v1079_v36 = vmul.f32 %v2782_v35, %v2774_v12 }
 0x48d   : > { %v1080_v37 = vpack.c.bf16 %v1079_v36, %v1079_v36 }
 0x490   : > { %2596 = vmatmul.mubr.msk.bf16.vlgmr.msra.gmra.mrb[16].mxu1 %vm748_vm5, %v1080_v37  ;;  %v2397_v37 = vld [vmem:[%s3312_s10] ss:$0 sm:$0xff] }
 0x491   : > { %2611 = vmatprep.mubr.msk.bf16.mxu1 %vm2816_vm0, %v2815_v1  ;;  %2608 = vmatpush3.bf16.msra.mxu1 %v2749_v14 }
 0x492   : > { %2609 = vmatprep.subr.bf16.mxu1 %v2815_v1 }
 0x52e   : > { %v790_v38 = vpop.f32.mrb[4].mxu1 }
 0x52f   : > { %v2561_v39 = vpop.f32.mrb[5].mxu1 }
 0x530   : > { %v793_v40 = vpop.f32.mrb[6].mxu1 }
 0x531   : > { %v2562_v41 = vpop.f32.mrb[7].mxu1 }
 0x536   : > { %v901_v42 = vpop.f32.mrb[8].mxu1 }
 0x537   : > { %1130 = vrot.lane.b32.xlu1 %v901_v42, %s3329_s19  ;;  %v2573_v43 = vpop.f32.mrb[9].mxu1 }
 0x538   : > { %v904_v44 = vpop.f32.mrb[10].mxu1 }
 0x539   : > { %v2574_v45 = vpop.f32.mrb[11].mxu1 }
 0x55b   : > { %v1012_v48 = vpop.f32.mrb[12].mxu1 }
 0x55c   : > { %1134 = vrot.lane.b32.xlu0 %v1012_v48, %s3328_s22  ;;  %v2585_v49 = vpop.f32.mrb[13].mxu1 }
 0x55d   : > { %v1015_v50 = vpop.f32.mrb[14].mxu1 }
 0x55e   : > { %v2586_v51 = vpop.f32.mrb[15].mxu1  ;;  %v2755_v50 = vld [vmem:[%s3305_s3 + $0x10] sm:$0xff]  }
 0x55f   : > { %v2756_v51 = vld [vmem:[%s3305_s3 + $0x18] sm:$0xff]  }
 0x563   : > { %v1123_v52 = vpop.f32.mrb[16].mxu1 }
 0x564   : > { %1138 = vrot.lane.b32.xlu1 %v1123_v52, %s3327_s0  ;;  %v2597_v53 = vpop.f32.mrb[17].mxu1  ;;  %s3338_s0 = smov 72  }
 0x565   : > { %v1126_v54 = vpop.f32.mrb[18].mxu1 }
 0x566   : > { %v2598_v55 = vpop.f32.mrb[19].mxu1 }
 0x5a9   : > { %v1131_v56 = vpop.permute.xlu1 %1130 }
 0x5aa   : > { %v1141_v58 = vsel %vm685_vm2, %v790_v38, %v1131_v56  ;;  %v2403_v56 = vld [vmem:[%s3315_s13] ss:$0 sm:$0xff] }
 0x5ce   : > { %v1135_v57 = vpop.permute.xlu0 %1134 }
 0x5cf   : > { %v1143_v59 = vsel %vm1142_vm6, %v1141_v58, %v1135_v57  ;;  %v2404_v58 = vld [vmem:[%s3316_s14] ss:$0 sm:$0xff] }
 0x5d6   : > { %v1139_v60 = vpop.permute.xlu1 %1138 }
 0x5d7   : > { %v1145_v61 = vsel %vm1144_vm7, %v1143_v59, %v1139_v60 }
 0x5d8   : > { %v1150_v62 = vpack.c.bf16 %v1145_v61, %v1145_v61 }
 0x5da   : > { %2604 = vmatmul.mubr.msk.bf16.vlgmr.msra.gmra.mrb[20].mxu0 %vm570_vm1, %v1150_v62  ;;  %v2410_v62 = vld [vmem:[%s3306_s4 + $0x1] ss:$0 sm:$0xff] }
 0x5db   : > { %2623 = vmatprep.mubr.msk.bf16.mxu0 %vm2816_vm0, %v2815_v1  ;;  %2616 = vmatpush3.bf16.msra.mxu0 %v2751_v15 }
 0x5dc   : > { %2617 = vmatprep.subr.bf16.mxu0 %v2815_v1 }
 0x5df   : > { %2618 = vmatpush3.bf16.msra.mxu0 %v2752_v16 }
 0x5e0   : > { %2619 = vmatprep.subr.bf16.mxu0 %v2815_v1 }
 0x5e3   : > { %2620 = vmatpush3.bf16.msra.mxu0 %v2753_v27 }
 0x5e4   : > { %2621 = vmatprep.subr.bf16.mxu0 %v2815_v1 }
 0x5e7   : > { %2622 = vmatpush3.bf16.msra.mxu0 %v2754_v28 }
 0x5e8   : > { %2641 = vmatprep.subr.bf16.mxu0 %v2815_v1 }
 0x6ad   : > { %v1207_v0 = vpop.f32.mrb[20].mxu0 }
 0x6ae   : > { %v1208_v2 = vadd.f32 %v2387_v63, %v1207_v0  ;;  %v2605_v3 = vpop.f32.mrb[21].mxu0 }
 0x6af   : > { %v1210_v4 = vpop.f32.mrb[22].mxu0 }
 0x6b0   : > { %v2606_v5 = vpop.f32.mrb[23].mxu0  ;;  %v1213_v6 = vadd.f32 %v1208_v2, %v2965_v9  ;;  %v2750_v9 = vld [vmem:[%s3309_s7 + $0x8] sm:$0xff]  }
 0x6b1   : > { %2610 = vmatpush3.bf16.msra.mxu1 %v2750_v9 }
 0x6b2   : > { %v1217_v7 = vsel %vm1216_vm8, %v1213_v6, 0.0  ;;  %2627 = vmatprep.subr.bf16.mxu1 %v2815_v1 }
 0x6b3   : > { %1218 = vadd.xlane.f32.xlu0 %v1217_v7 }
 0x740   : > { %v1219_v8 = vpop.xlane.xlu0 %1218 }
 0x741   : > { %v1221_v10 = vmul.f32 0.03125, %v1219_v8 }
 0x743   : > { %v1222_v11 = vsub.f32 %v1213_v6, %v1221_v10 }
 0x745   : > { %v1223_v12 = vmul.f32 %v1222_v11, %v1222_v11 }
 0x747   : > { %v1224_v13 = vsel %vm1216_vm8, %v1223_v12, 0.0 }
 0x748   : > { %1225 = vadd.xlane.f32.xlu1 %v1224_v13 }
 0x7d5   : > { %v1226_v17 = vpop.xlane.xlu1 %1225 }
 0x7d6   : > { %v1227_v18 = vmul.f32 0.03125, %v1226_v17 }
 0x7d8   : > { %v1228_v20 = vadd.f32 1e-05, %v1227_v18 }
 0x7da   : > { %2783 = vrsqrt.f32 %v1228_v20 }
 0x7e4   : > { %v2784_v21 = vpop.eup %2783 }
 0x7e5   : > { %v1230_v23 = vmul.f32 %v2784_v21, %v1222_v11 }
 0x7e7   : > { %v1237_v19 = vmul.f32 %v2391_v22, %v1230_v23 }
 0x7e9   : > { %v1244_v25 = vadd.f32 %v2392_v24, %v1237_v19 }
 0x7eb   : > { %v1249_v26 = vpack.c.bf16 %v1244_v25, %v1244_v25 }
 0x7ed   : > { %2612 = vmatmul.mubr.msk.bf16.vlgmr.msra.gmra.mrb[20].mxu1 %vm570_vm1, %v1249_v26 }
 0x7ee   : > { %2631 = vmatprep.mubr.msk.bf16.mxu1 %vm2816_vm0, %v2815_v1  ;;  %2628 = vmatpush3.bf16.msra.mxu1 %v2755_v50 }
 0x7ef   : > { %2629 = vmatprep.subr.bf16.mxu1 %v2815_v1 }
 0x7f2   : > { %2630 = vmatpush3.bf16.msra.mxu1 %v2756_v51 }
 0x7f3   : > { %2635 = vmatprep.subr.bf16.mxu1 %v2815_v1 }
 0x8c0   : > { %v1306_v30 = vpop.f32.mrb[20].mxu1 }
 0x8c1   : > { %v1307_v31 = vadd.f32 %v2393_v29, %v1306_v30  ;;  %v2613_v32 = vpop.f32.mrb[21].mxu1 }
 0x8c2   : > { %v1309_v33 = vpop.f32.mrb[22].mxu1 }
 0x8c3   : > { %v1312_v34 = vmax.f32 %v1307_v31, 0.0  ;;  %v2614_v35 = vpop.f32.mrb[23].mxu1 }
 0x8c5   : > { %v1321_v36 = vpack.c.bf16 %v1312_v34, %v1312_v34 }
 0x8c7   : > { %2624 = vmatmul.mubr.msk.bf16.vlgmr.msra.gmra.mrb[24].mxu0 %vm1353_vm9, %v1321_v36 }
 0x8c8   : > { %2643 = vmatprep.mubr.msk.bf16.mxu0 %vm2816_vm0, %v2815_v1 }
 0x99a   : > { %v1391_v38 = vpop.f32.mrb[24].mxu0 }
 0x99b   : > { %v1392_v39 = vadd.f32 %v2397_v37, %v1391_v38  ;;  %v2625_v40 = vpop.f32.mrb[25].mxu0 }
 0x99c   : > { %v1394_v41 = vpop.f32.mrb[26].mxu0 }
 0x99d   : > { %v2626_v42 = vpop.f32.mrb[27].mxu0  ;;  %v1397_v43 = vadd.f32 %v1392_v39, %v1244_v25 }
 0x99f   : > { %v1400_v44 = vsel %vm1216_vm8, %v1397_v43, 0.0 }
 0x9a0   : > { %1401 = vadd.xlane.f32.xlu0 %v1400_v44 }
 0xa2d   : > { %v1402_v45 = vpop.xlane.xlu0 %1401 }
 0xa2e   : > { %v1403_v46 = vmul.f32 0.03125, %v1402_v45 }
 0xa30   : > { %v1404_v47 = vsub.f32 %v1397_v43, %v1403_v46 }
 0xa32   : > { %v1405_v48 = vmul.f32 %v1404_v47, %v1404_v47 }
 0xa34   : > { %v1406_v49 = vsel %vm1216_vm8, %v1405_v48, 0.0 }
 0xa35   : > { %1407 = vadd.xlane.f32.xlu0 %v1406_v49 }
 0xac2   : > { %v1408_v52 = vpop.xlane.xlu0 %1407 }
 0xac3   : > { %v1409_v53 = vmul.f32 0.03125, %v1408_v52 }
 0xac5   : > { %v1410_v54 = vadd.f32 1e-05, %v1409_v53 }
 0xac7   : > { %2785 = vrsqrt.f32 %v1410_v54 }
 0xad1   : > { %v2786_v55 = vpop.eup %2785 }
 0xad2   : > { %v1412_v57 = vmul.f32 %v2786_v55, %v1404_v47 }
 0xad4   : > { %v1419_v59 = vmul.f32 %v2403_v56, %v1412_v57 }
 0xad6   : > { %v3129_v60 = vadd.f32 %v2404_v58, %v1419_v59 }
 0xad8   : > { %v1432_v61 = vpack.c.bf16 %v3129_v60, %v3129_v60 }
 0xada   : > { %2632 = vmatmul.mubr.msk.bf16.vlgmr.msra.gmra.mrb[24].mxu1 %vm570_vm1, %v1432_v61 }
 0xadb   : > { %2637 = vmatprep.mubr.msk.bf16.mxu1 %vm2816_vm0, %v2815_v1 }
 0xbad   : > { %v1490_v63 = vpop.f32.mrb[24].mxu1 }
 0xbae   : > { %v1491_v0 = vadd.f32 %v2410_v62, %v1490_v63  ;;  %v2633_v2 = vpop.f32.mrb[25].mxu1 }
 0xbaf   : > { %v1493_v3 = vpop.f32.mrb[26].mxu1 }
 0xbb0   : > { %v3139_v4 = vpack.c.bf16 %v1491_v0, %v1491_v0  ;;  %v2634_v5 = vpop.f32.mrb[27].mxu1 }
 0xbb2   : > { %1609 = vrot.lane.b32.xlu0 %v3139_v4, %s2820_s21  ;;  %1498 = vrot.lane.b32.xlu1 %v3139_v4, %s2818_s1  ;;  %s3340_s1 = smov 64   ;;  %s3341_s21 = smov 40  }
 0xbb6   : > { %1718 = vrot.lane.b32.xlu0 %v3139_v4, %s2822_s23  ;;  %1607 = vrot.lane.b32.xlu1 %v3139_v4, %s2817_s18  ;;  %s3339_s18 = smov 56   ;;  %s3342_s23 = smov 48  }
 0xbba   : > { %1829 = vrot.lane.b32.xlu0 %v3139_v4, %s3336_s27  ;;  %1720 = vrot.lane.b32.xlu1 %v3139_v4, %s3337_s29  ;;  %s3344_s27 = smov 16   ;;  %s3345_s29 = smov 24  }
 0xbbe   : > { %1831 = vrot.lane.b32.xlu1 %v3139_v4, %s3338_s0 }
 0xc24   : > { %v1499_v6 = vpop.permute.xlu1 %1498  ;;  %v1610_v8 = vpop.permute.xlu0 %1609 }
 0xc25   : > { %v1504_v7 = vsel %vm685_vm2, %v1499_v6, 0  ;;  %v1615_v11 = vsel %vm685_vm2, %v1610_v8, 0 }
 0xc26   : > { %2636 = vmatpush3.bf16.xpose.msra.mxu1 %v1504_v7 }
 0xc27   : > { %2647 = vmatprep.subr.bf16.mxu1 %v2815_v1 }
 0xc28   : > { %v1608_v10 = vpop.permute.xlu1 %1607  ;;  %v1719_v9 = vpop.permute.xlu0 %1718 }
 0xc2c   : > { %v1721_v12 = vpop.permute.xlu1 %1720  ;;  %v1830_v16 = vpop.permute.xlu0 %1829 }
 0xc2d   : > { %2638 = vmatmul.mubr.msk.bf16.vlgmr.msra.gmra.mrb[28].mxu1 %vm685_vm2, %v3139_v4  ;;  %v1726_v13 = vsel %vm685_vm2, %v1721_v12, 0 }
 0xc2e   : > { %2648 = vmatpush3.bf16.xpose.msra.mxu1 %v1615_v11  ;;  %2649 = vmatprep.mubr.msk.bf16.mxu1 %vm2816_vm0, %v2815_v1 }
 0xc2f   : > { %2659 = vmatprep.subr.bf16.mxu1 %v2815_v1 }
 0xc30   : > { %v1832_v14 = vpop.permute.xlu1 %1831 }
 0xc31   : > { %v1837_v15 = vsel %vm685_vm2, %v1832_v14, 0 }
 0xc35   : > { %2650 = vmatmul.mubr.msk.bf16.vlgmr.msra.gmra.mrb[32].mxu1 %vm685_vm2, %v1608_v10 }
 0xc36   : > { %2660 = vmatpush3.bf16.xpose.msra.mxu1 %v1726_v13  ;;  %2661 = vmatprep.mubr.msk.bf16.mxu1 %vm2816_vm0, %v2815_v1 }
 0xc37   : > { %2671 = vmatprep.subr.bf16.mxu1 %v2815_v1 }
 0xc3d   : > { %2662 = vmatmul.mubr.msk.bf16.vlgmr.msra.gmra.mrb[36].mxu1 %vm685_vm2, %v1719_v9 }
 0xc3e   : > { %2672 = vmatpush3.bf16.xpose.msra.mxu1 %v1837_v15  ;;  %2673 = vmatprep.mubr.msk.bf16.mxu1 %vm2816_vm0, %v2815_v1 }
 0xc3f   : > { %2683 = vmatprep.subr.bf16.mxu1 %v2815_v1 }
 0xc45   : > { %2674 = vmatmul.mubr.msk.bf16.vlgmr.msra.gmra.mrb[40].mxu1 %vm685_vm2, %v1830_v16 }
 0xc46   : > { %2687 = vmatprep.mubr.msk.bf16.mxu1 %vm2816_vm0, %v2815_v1 }
 0xd00   : > { %v1540_v17 = vpop.f32.mrb[28].mxu1 }
 0xd01   : > { %v1546_v18 = vmul.f32 0.35355338, %v1540_v17  ;;  %v2639_v20 = vpop.f32.mrb[29].mxu1 }
 0xd02   : > { %v1543_v21 = vpop.f32.mrb[30].mxu1 }
 0xd03   : > { %v2640_v22 = vpop.f32.mrb[31].mxu1  ;;  %v1547_v23 = vsel %vm733_vm3, %v1546_v18, -inf }
 0xd04   : > { %1548 = vmax.xlane.f32.xlu1 %v1547_v23 }
 0xd08   : > { %v1651_v24 = vpop.f32.mrb[32].mxu1 }
 0xd09   : > { %v1657_v19 = vmul.f32 0.35355338, %v1651_v24  ;;  %v2651_v25 = vpop.f32.mrb[33].mxu1 }
 0xd0a   : > { %v1654_v26 = vpop.f32.mrb[34].mxu1 }
 0xd0b   : > { %v2652_v27 = vpop.f32.mrb[35].mxu1  ;;  %v1658_v28 = vsel %vm733_vm3, %v1657_v19, -inf }
 0xd0c   : > { %1659 = vmax.xlane.f32.xlu0 %v1658_v28 }
 0xd10   : > { %v1762_v29 = vpop.f32.mrb[36].mxu1 }
 0xd11   : > { %v1768_v30 = vmul.f32 0.35355338, %v1762_v29  ;;  %v2663_v31 = vpop.f32.mrb[37].mxu1 }
 0xd12   : > { %v1765_v32 = vpop.f32.mrb[38].mxu1  ;;  %v2757_v31 = vld [vmem:[%s3307_s5 + $0x10] sm:$0xff]  }
 0xd13   : > { %v2664_v33 = vpop.f32.mrb[39].mxu1  ;;  %v1769_v34 = vsel %vm733_vm3, %v1768_v30, -inf  ;;  %2684 = vmatpush3.bf16.msra.mxu1 %v2757_v31  ;;  %v2758_v32 = vld [vmem:[%s3307_s5 + $0x18] sm:$0xff]  }
 0xd14   : > { %1770 = vmax.xlane.f32.xlu0 %v1769_v34  ;;  %2685 = vmatprep.subr.bf16.mxu1 %v2815_v1 }
 0xd17   : > { %2686 = vmatpush3.bf16.msra.mxu1 %v2758_v32 }
 0xd18   : > { %v1873_v35 = vpop.f32.mrb[40].mxu1  ;;  %2699 = vmatprep.subr.bf16.mxu1 %v2815_v1 }
 0xd19   : > { %v1879_v36 = vmul.f32 0.35355338, %v1873_v35  ;;  %v2675_v37 = vpop.f32.mrb[41].mxu1 }
 0xd1a   : > { %v1876_v38 = vpop.f32.mrb[42].mxu1 }
 0xd1b   : > { %v2676_v39 = vpop.f32.mrb[43].mxu1  ;;  %v1880_v40 = vsel %vm733_vm3, %v1879_v36, -inf }
 0xd1c   : > { %1881 = vmax.xlane.f32.xlu1 %v1880_v40 }
 0xd91   : > { %v1549_v41 = vpop.xlane.xlu1 %1548 }
 0xd92   : > { %v1550_v42 = vsub.f32 %v1546_v18, %v1549_v41 }
 0xd94   : > { %v1551_v43 = vmul.f32 1.442695, %v1550_v42 }
 0xd96   : > { %2787 = vpow2.f32 %v1551_v43 }
 0xd99   : > { %v1660_v44 = vpop.xlane.xlu0 %1659 }
 0xd9a   : > { %v1661_v45 = vsub.f32 %v1657_v19, %v1660_v44 }
 0xd9c   : > { %v1662_v46 = vmul.f32 1.442695, %v1661_v45 }
 0xd9e   : > { %2789 = vpow2.f32 %v1662_v46 }
 0xda0   : > { %v2788_v47 = vpop.eup %2787 }
 0xda1   : > { %v1771_v48 = vpop.xlane.xlu0 %1770  ;;  %v1553_v49 = vsel %vm733_vm3, %v2788_v47, 0.0 }
 0xda2   : > { %v1772_v50 = vsub.f32 %v1768_v30, %v1771_v48  ;;  %1554 = vadd.xlane.f32.xlu0 %v1553_v49  ;;  %v2427_v48 = vld [vmem:[%s3308_s6 + $0x1] ss:$0 sm:$0xff] }
 0xda4   : > { %v1773_v51 = vmul.f32 1.442695, %v1772_v50 }
 0xda6   : > { %2791 = vpow2.f32 %v1773_v51 }
 0xda8   : > { %v2790_v52 = vpop.eup %2789 }
 0xda9   : > { %v1664_v53 = vsel %vm733_vm3, %v2790_v52, 0.0  ;;  %v1882_v56 = vpop.xlane.xlu1 %1881 }
 0xdaa   : > { %1665 = vadd.xlane.f32.xlu1 %v1664_v53  ;;  %v1883_v57 = vsub.f32 %v1879_v36, %v1882_v56 }
 0xdac   : > { %v1884_v58 = vmul.f32 1.442695, %v1883_v57 }
 0xdae   : > { %2793 = vpow2.f32 %v1884_v58 }
 0xdb0   : > { %v2792_v54 = vpop.eup %2791 }
 0xdb1   : > { %v1775_v55 = vsel %vm733_vm3, %v2792_v54, 0.0 }
 0xdb2   : > { %1776 = vadd.xlane.f32.xlu0 %v1775_v55 }
 0xdb8   : > { %v2794_v59 = vpop.eup %2793 }
 0xdb9   : > { %v1886_v61 = vsel %vm733_vm3, %v2794_v59, 0.0 }
 0xdbb   : > { %1670 = vrot.lane.b32.xlu1 %v3139_v4, %s3339_s18 }
 0xdc8   : > { %1559 = vrot.lane.b32.xlu0 %v3139_v4, %s3340_s1 }
 0xdcc   : > { %1892 = vrot.lane.b32.xlu0 %v3139_v4, %s3341_s21 }
 0xddf   : > { %1887 = vadd.xlane.f32.xlu1 %v1886_v61 }
 0xdf0   : > { %1781 = vrot.lane.b32.xlu1 %v3139_v4, %s3342_s23 }
 0xe2f   : > { %v1555_v62 = vpop.xlane.xlu0 %1554 }
 0xe30   : > { %2795 = vrcp.f32 %v1555_v62  ;;  %v2759_v62 = vld [vmem:[%s3309_s7 + $0x10] sm:$0xff]  }
 0xe37   : > { %v1666_v63 = vpop.xlane.xlu1 %1665 }
 0xe38   : > { %2797 = vrcp.f32 %v1666_v63  ;;  %v2761_v63 = vld [vmem:[%s3311_s9 + $0x20] sm:$0xff]  }
 0xe3a   : > { %v2796_v0 = vpop.eup %2795 }
 0xe3b   : > { %v1557_v3 = vmul.f32 %v2796_v0, %v2788_v47  ;;  %v1671_v7 = vpop.permute.xlu1 %1670  ;;  %v2762_v0 = vld [vmem:[%s3311_s9 + $0x28] sm:$0xff]  }
 0xe3c   : > { %v1676_v11 = vsel %vm752_vm4, %v1671_v7, 0  ;;  %v2433_v7 = vld [vmem:[%s3313_s11 + $0x1] ss:$0 sm:$0xff] }
 0xe3d   : > { %v1558_v8 = vpack.c.bf16 %v1557_v3, %v1557_v3 }
 0xe3f   : > { %v1777_v2 = vpop.xlane.xlu0 %1776 }
 0xe40   : > { %2799 = vrcp.f32 %v1777_v2 }
 0xe42   : > { %v2798_v10 = vpop.eup %2797 }
 0xe43   : > { %v1560_v5 = vpop.permute.xlu0 %1559  ;;  %v1668_v4 = vmul.f32 %v2798_v10, %v2790_v52  ;;  %v2434_v10 = vld [vmem:[%s3314_s12 + $0x1] ss:$0 sm:$0xff] }
 0xe44   : > { %v1565_v6 = vsel %vm752_vm4, %v1560_v5, 0 }
 0xe45   : > { %2642 = vmatpush3.bf16.msra.mxu0 %v1565_v6  ;;  %v1669_v12 = vpack.c.bf16 %v1668_v4, %v1668_v4 }
 0xe46   : > { %2653 = vmatprep.subr.bf16.mxu0 %v2815_v1 }
 0xe47   : > { %v1893_v17 = vpop.permute.xlu0 %1892 }
 0xe48   : > { %2644 = vmatmul.mubr.msk.bf16.vlgmr.msra.gmra.mrb[28].mxu0 %vm748_vm5, %v1558_v8  ;;  %v1898_v20 = vsel %vm752_vm4, %v1893_v17, 0 }
 0xe49   : > { %2654 = vmatpush3.bf16.msra.mxu0 %v1676_v11  ;;  %2655 = vmatprep.mubr.msk.bf16.mxu0 %vm2816_vm0, %v2815_v1 }
 0xe4a   : > { %2665 = vmatprep.subr.bf16.mxu0 %v2815_v1  ;;  %v2800_v13 = vpop.eup %2799 }
 0xe4b   : > { %v1779_v9 = vmul.f32 %v2800_v13, %v2792_v54  ;;  %v2763_v13 = vld [vmem:[%s3311_s9 + $0x30] sm:$0xff]  }
 0xe4d   : > { %v1780_v18 = vpack.c.bf16 %v1779_v9, %v1779_v9  ;;  %v2440_v9 = vld [vmem:[%s3310_s8 + $0x1] ss:$0 sm:$0xff] }
 0xe50   : > { %2656 = vmatmul.mubr.msk.bf16.vlgmr.msra.gmra.mrb[32].mxu0 %vm748_vm5, %v1669_v12 }
 0xe51   : > { %2667 = vmatprep.mubr.msk.bf16.mxu0 %vm2816_vm0, %v2815_v1 }
 0xe6c   : > { %v1888_v14 = vpop.xlane.xlu1 %1887 }
 0xe6d   : > { %2801 = vrcp.f32 %v1888_v14  ;;  %v2764_v14 = vld [vmem:[%s3311_s9 + $0x38] sm:$0xff]  }
 0xe70   : > { %v1782_v15 = vpop.permute.xlu1 %1781 }
 0xe71   : > { %v1787_v16 = vsel %vm752_vm4, %v1782_v15, 0 }
 0xe72   : > { %2666 = vmatpush3.bf16.msra.mxu0 %v1787_v16 }
 0xe73   : > { %2677 = vmatprep.subr.bf16.mxu0 %v2815_v1 }
 0xe75   : > { %2668 = vmatmul.mubr.msk.bf16.vlgmr.msra.gmra.mrb[36].mxu0 %vm748_vm5, %v1780_v18 }
 0xe76   : > { %2678 = vmatpush3.bf16.msra.mxu0 %v1898_v20  ;;  %2679 = vmatprep.mubr.msk.bf16.mxu0 %vm2816_vm0, %v2815_v1 }
 0xe77   : > { %v2802_v21 = vpop.eup %2801  ;;  %2691 = vmatprep.subr.bf16.mxu0 %v2815_v1 }
 0xe78   : > { %v1890_v22 = vmul.f32 %v2802_v21, %v2794_v59 }
 0xe7a   : > { %v1891_v23 = vpack.c.bf16 %v1890_v22, %v1890_v22 }
 0xe7d   : > { %2680 = vmatmul.mubr.msk.bf16.vlgmr.msra.gmra.mrb[40].mxu0 %vm748_vm5, %v1891_v23  ;;  %v2453_v23 = vld [vmem:[%s3312_s10 + $0x1] ss:$0 sm:$0xff] }
 0xe7e   : > { %2695 = vmatprep.mubr.msk.bf16.mxu0 %vm2816_vm0, %v2815_v1  ;;  %2692 = vmatpush3.bf16.msra.mxu0 %v2759_v62 }
 0xe7f   : > { %2693 = vmatprep.subr.bf16.mxu0 %v2815_v1 }
 0xf1b   : > { %v1601_v24 = vpop.f32.mrb[28].mxu0 }
 0xf1c   : > { %v2645_v19 = vpop.f32.mrb[29].mxu0 }
 0xf1d   : > { %v1604_v25 = vpop.f32.mrb[30].mxu0 }
 0xf1e   : > { %v2646_v26 = vpop.f32.mrb[31].mxu0 }
 0xf23   : > { %v1712_v27 = vpop.f32.mrb[32].mxu0 }
 0xf24   : > { %1941 = vrot.lane.b32.xlu1 %v1712_v27, %s3343_s30  ;;  %v2657_v28 = vpop.f32.mrb[33].mxu0 }
 0xf25   : > { %v1715_v29 = vpop.f32.mrb[34].mxu0 }
 0xf26   : > { %v2658_v30 = vpop.f32.mrb[35].mxu0 }
 0xf48   : > { %v1823_v33 = vpop.f32.mrb[36].mxu0 }
 0xf49   : > { %1945 = vrot.lane.b32.xlu0 %v1823_v33, %s3344_s27  ;;  %v2669_v34 = vpop.f32.mrb[37].mxu0 }
 0xf4a   : > { %v1826_v35 = vpop.f32.mrb[38].mxu0 }
 0xf4b   : > { %v2670_v36 = vpop.f32.mrb[39].mxu0  ;;  %v2765_v35 = vld [vmem:[%s3317_s15] sm:$0xff]  }
 0xf4c   : > { %v2766_v36 = vld [vmem:[%s3317_s15 + $0x8] sm:$0xff]  }
 0xf50   : > { %v1934_v37 = vpop.f32.mrb[40].mxu0 }
 0xf51   : > { %1949 = vrot.lane.b32.xlu1 %v1934_v37, %s3345_s29  ;;  %v2681_v38 = vpop.f32.mrb[41].mxu0  ;;  %s543_s29 = scalar_lea.vmem %s3319_s17, %s3346_s20 }
 0xf52   : > { %v1937_v39 = vpop.f32.mrb[42].mxu0 }
 0xf53   : > { %v2682_v40 = vpop.f32.mrb[43].mxu0 }
 0xf96   : > { %v1942_v41 = vpop.permute.xlu1 %1941 }
 0xf97   : > { %v1952_v43 = vsel %vm685_vm2, %v1601_v24, %v1942_v41  ;;  %v2461_v41 = vld [vmem:[%s3315_s13 + $0x1] ss:$0 sm:$0xff] }
 0xfbb   : > { %v1946_v42 = vpop.permute.xlu0 %1945 }
 0xfbc   : > { %v1953_v44 = vsel %vm1142_vm6, %v1952_v43, %v1946_v42 }
 0xfc3   : > { %v1950_v45 = vpop.permute.xlu1 %1949 }
 0xfc4   : > { %v1954_v46 = vsel %vm1144_vm7, %v1953_v44, %v1950_v45 }
 0xfc5   : > { %v1960_v47 = vpack.c.bf16 %v1954_v46, %v1954_v46  ;;  %v2463_v46 = vld [vmem:[%s3318_s16] ss:$0 sm:$0xff] }
 0xfc7   : > { %2688 = vmatmul.mubr.msk.bf16.vlgmr.msra.gmra.mrb[44].mxu1 %vm570_vm1, %v1960_v47 }
 0xfc8   : > { %2707 = vmatprep.mubr.msk.bf16.mxu1 %vm2816_vm0, %v2815_v1  ;;  %2700 = vmatpush3.bf16.msra.mxu1 %v2761_v63 }
 0xfc9   : > { %2701 = vmatprep.subr.bf16.mxu1 %v2815_v1 }
 0xfcc   : > { %2702 = vmatpush3.bf16.msra.mxu1 %v2762_v0 }
 0xfcd   : > { %2703 = vmatprep.subr.bf16.mxu1 %v2815_v1 }
 0xfd0   : > { %2704 = vmatpush3.bf16.msra.mxu1 %v2763_v13 }
 0xfd1   : > { %2705 = vmatprep.subr.bf16.mxu1 %v2815_v1 }
 0xfd4   : > { %2706 = vmatpush3.bf16.msra.mxu1 %v2764_v14 }
0x109a   : > { %v2018_v49 = vpop.f32.mrb[44].mxu1 }
0x109b   : > { %v2019_v50 = vadd.f32 %v2427_v48, %v2018_v49  ;;  %v2689_v51 = vpop.f32.mrb[45].mxu1 }
0x109c   : > { %v2021_v52 = vpop.f32.mrb[46].mxu1 }
0x109d   : > { %v2690_v53 = vpop.f32.mrb[47].mxu1  ;;  %v2024_v54 = vadd.f32 %v2019_v50, %v3129_v60  ;;  %v2760_v60 = vld [vmem:[%s3309_s7 + $0x18] sm:$0xff]  }
0x109e   : > { %2694 = vmatpush3.bf16.msra.mxu0 %v2760_v60 }
0x109f   : > { %v2029_v55 = vsel %vm1216_vm8, %v2024_v54, 0.0  ;;  %2711 = vmatprep.subr.bf16.mxu0 %v2815_v1 }
0x10a0   : > { %2030 = vadd.xlane.f32.xlu0 %v2029_v55 }
0x112d   : > { %v2031_v56 = vpop.xlane.xlu0 %2030 }
0x112e   : > { %v2032_v57 = vmul.f32 0.03125, %v2031_v56 }
0x1130   : > { %v2033_v58 = vsub.f32 %v2024_v54, %v2032_v57 }
0x1132   : > { %v2034_v59 = vmul.f32 %v2033_v58, %v2033_v58 }
0x1134   : > { %v2035_v61 = vsel %vm1216_vm8, %v2034_v59, 0.0 }
0x1135   : > { %2036 = vadd.xlane.f32.xlu1 %v2035_v61 }
0x11c2   : > { %v2037_v2 = vpop.xlane.xlu1 %2036 }
0x11c3   : > { %v2038_v3 = vmul.f32 0.03125, %v2037_v2 }
0x11c5   : > { %v2039_v5 = vadd.f32 1e-05, %v2038_v3 }
0x11c7   : > { %2803 = vrsqrt.f32 %v2039_v5 }
0x11d1   : > { %v2804_v6 = vpop.eup %2803 }
0x11d2   : > { %v2041_v8 = vmul.f32 %v2804_v6, %v2033_v58 }
0x11d4   : > { %v2048_v11 = vmul.f32 %v2433_v7, %v2041_v8 }
0x11d6   : > { %v2055_v4 = vadd.f32 %v2434_v10, %v2048_v11 }
0x11d8   : > { %v2061_v12 = vpack.c.bf16 %v2055_v4, %v2055_v4 }
0x11da   : > { %2696 = vmatmul.mubr.msk.bf16.vlgmr.msra.gmra.mrb[44].mxu0 %vm570_vm1, %v2061_v12 }
0x11db   : > { %2715 = vmatprep.mubr.msk.bf16.mxu0 %vm2816_vm0, %v2815_v1  ;;  %2712 = vmatpush3.bf16.msra.mxu0 %v2765_v35 }
0x11dc   : > { %2713 = vmatprep.subr.bf16.mxu0 %v2815_v1  ;;  %v2462_v1 = vld [vmem:[%s3316_s14 + $0x1] ss:$0 sm:$0xff] }
0x11df   : > { %2714 = vmatpush3.bf16.msra.mxu0 %v2766_v36 }
0x12ad   : > { %v2119_v15 = vpop.f32.mrb[44].mxu0 }
0x12ae   : > { %v2120_v16 = vadd.f32 %v2440_v9, %v2119_v15  ;;  %v2697_v17 = vpop.f32.mrb[45].mxu0 }
0x12af   : > { %v2122_v18 = vpop.f32.mrb[46].mxu0 }
0x12b0   : > { %v2125_v20 = vmax.f32 %v2120_v16, 0.0  ;;  %v2698_v21 = vpop.f32.mrb[47].mxu0 }
0x12b2   : > { %v2135_v22 = vpack.c.bf16 %v2125_v20, %v2125_v20 }
0x12b4   : > { %2708 = vmatmul.mubr.msk.bf16.vlgmr.msra.gmra.mrb[48].mxu1 %vm1353_vm9, %v2135_v22 }
0x1387   : > { %v2205_v24 = vpop.f32.mrb[48].mxu1 }
0x1388   : > { %v2206_v19 = vadd.f32 %v2453_v23, %v2205_v24  ;;  %v2709_v25 = vpop.f32.mrb[49].mxu1 }
0x1389   : > { %v2208_v26 = vpop.f32.mrb[50].mxu1 }
0x138a   : > { %v2710_v27 = vpop.f32.mrb[51].mxu1  ;;  %v2211_v28 = vadd.f32 %v2206_v19, %v2055_v4 }
0x138c   : > { %v2216_v29 = vsel %vm1216_vm8, %v2211_v28, 0.0 }
0x138d   : > { %2217 = vadd.xlane.f32.xlu0 %v2216_v29 }
0x141a   : > { %v2218_v30 = vpop.xlane.xlu0 %2217 }
0x141b   : > { %v2219_v31 = vmul.f32 0.03125, %v2218_v30 }
0x141d   : > { %v2220_v32 = vsub.f32 %v2211_v28, %v2219_v31 }
0x141f   : > { %v2221_v33 = vmul.f32 %v2220_v32, %v2220_v32 }
0x1421   : > { %v2222_v34 = vsel %vm1216_vm8, %v2221_v33, 0.0 }
0x1422   : > { %2223 = vadd.xlane.f32.xlu0 %v2222_v34 }
0x14af   : > { %v2224_v37 = vpop.xlane.xlu0 %2223 }
0x14b0   : > { %v2225_v38 = vmul.f32 0.03125, %v2224_v37 }
0x14b2   : > { %v2226_v39 = vadd.f32 1e-05, %v2225_v38 }
0x14b4   : > { %2805 = vrsqrt.f32 %v2226_v39 }
0x14be   : > { %v2806_v40 = vpop.eup %2805 }
0x14bf   : > { %v2228_v42 = vmul.f32 %v2806_v40, %v2220_v32 }
0x14c1   : > { %v2235_v43 = vmul.f32 %v2461_v41, %v2228_v42 }
0x14c3   : > { %v2242_v44 = vadd.f32 %v2462_v1, %v2235_v43 }
0x14c5   : > { %v2247_v45 = vpack.c.bf16 %v2242_v44, %v2242_v44 }
0x14c7   : > { %2716 = vmatmul.mubr.msk.bf16.vlgmr.msra.gmra.mrb[48].mxu0 %vm570_vm1, %v2247_v45 }
0x159a   : > { %v2304_v47 = vpop.f32.mrb[48].mxu0 }
0x159b   : > { %v2305_v48 = vadd.f32 %v2463_v46, %v2304_v47  ;;  %v2717_v49 = vpop.f32.mrb[49].mxu0 }
0x159c   : > { %v2307_v50 = vpop.f32.mrb[50].mxu0 }
0x159d   : > { %2310 = vst.msk [vmem:[%s543_s29] sm:$0xf] %vm1216_vm8, %v2305_v48  ;;  %v2718_v51 = vpop.f32.mrb[51].mxu0 }
0x159e PF: > { %s27_s24 = sadd.s32 1, %s2813_s24  }
0x159f   : > { %p24_p4 = scmp.ge.s32.totalorder %s27_s24, 4  }
0x15a1   :  { %26 = sbr.rel (!%p24_p4) target bundleno = 3 (0x3), region = 130 }

// kernel: transformer_encoder_forward.5
= control target key start
LH: loop header
LB: loop body
LE: loop exit
PB: predicated region body
PF: predicated region fallthrough
CT: control target
= control target key end

     0   :  { %s3248_s24 = smov 0   ;;  %s3698_s0 = inlined_call_operand.vmem [shape: f32[2,12,64], index: 0, kind: input, shape index: {}]   ;;  %s3699_s1 = inlined_call_operand.vmem [shape: bf16[64,32], index: 1, kind: input, shape index: {}]   ;;  %s3700_s2 = inlined_call_operand.vmem [shape: f32[1,32], index: 2, kind: input, shape index: {}]   ;;  %s3701_s3 = inlined_call_operand.vmem [shape: bf16[2,32,96], index: 3, kind: input, shape index: {}]   ;;  %s3702_s4 = inlined_call_operand.vmem [shape: f32[2,1,96], index: 4, kind: input, shape index: {}]   ;;  %s3703_s5 = inlined_call_operand.vmem [shape: bf16[2,32,32], index: 5, kind: input, shape index: {}]   ;;  %s3704_s6 = inlined_call_operand.vmem [shape: f32[2,1,32], index: 6, kind: input, shape index: {}]   ;;  %s3705_s7 = inlined_call_operand.vmem [shape: bf16[2,32,64], index: 7, kind: input, shape index: {}]   ;;  %s3706_s8 = inlined_call_operand.vmem [shape: f32[2,1,64], index: 8, kind: input, shape index: {}]   ;;  %s3707_s9 = inlined_call_operand.vmem [shape: bf16[2,64,32], index: 9, kind: input, shape index: {}]   ;;  %s3708_s10 = inlined_call_operand.vmem [shape: f32[2,1,32], index: 10, kind: input, shape index: {}]   ;;  %s3709_s11 = inlined_call_operand.vmem [shape: f32[2,1,32], index: 11, kind: input, shape index: {}]   ;;  %s3710_s12 = inlined_call_operand.vmem [shape: f32[2,1,32], index: 12, kind: input, shape index: {}]   ;;  %s3711_s13 = inlined_call_operand.vmem [shape: f32[2,1,32], index: 13, kind: input, shape index: {}]   ;;  %s3712_s14 = inlined_call_operand.vmem [shape: f32[2,1,32], index: 14, kind: input, shape index: {}]   ;;  %s3713_s15 = inlined_call_operand.vmem [shape: bf16[32,32], index: 15, kind: input, shape index: {}]   ;;  %s3714_s16 = inlined_call_operand.vmem [shape: f32[1,32], index: 16, kind: input, shape index: {}]   ;;  %s3715_s17 = inlined_call_operand.vmem [shape: f32[2,12,32], index: 17, kind: output, shape index: {}]  }
   0x1   :  { %3728 = sst [smem:[#allocation2_spill]] %s3698_s0 }
   0x2   :  { %3729 = sst [smem:[#allocation3_spill]] %s3699_s1 }
   0x3 LB: > { %s2607_s25 = sadd.s32 4294967295, %s3140_s24   ;;  %p2611_p0 = scmp.ge.s32.totalorder %s3140_s24, 1  ;;  %s3140_s24 = sphi %s3248_s24, %s27_s24  }
   0x4   : > { %p487_p1 = scmp.lt.s32.totalorder %s3140_s24, 3 }
   0x6   : > { %p488_p2 = pnand %p2611_p0, %p487_p1 }
   0x7   : > { %s3730_s28 = sld [smem:[#allocation3_spill]] (!%p488_p2)  ;;  %v3142_v1 = vmov (!%p488_p2), 0.0   ;;  %vm3143_vm0 = vmmov (!%p488_p2), 0   ;;  %p539_p3 = scmp.lt.s32.totalorder (!%p488_p2), %s2607_s25, 1  ;;  %vm592_vm1 = vcmask (!%p488_p2), 523264   ;;  %v3032_v8 = vld [vmem:[%s3701_s3] sm:$0xff] (!%p488_p2)  }
   0x8   : > { %491 = sbr.rel (%p488_p2) target bundleno = 5596 (0x15dc), region = 88  ;;  %2786 = vmatprep.subr.bf16.mxu0 (!%p488_p2), %v3142_v1  ;;  %2798 = vmatprep.subr.bf16.mxu1 (!%p488_p2), %v3142_v1  ;;  %s3731_s21 = sld [smem:[#allocation2_spill]] (!%p488_p2)  ;;  %v3033_v9 = vld [vmem:[%s3701_s3 + $0x8] sm:$0xff] (!%p488_p2)   ;;  %v2616_v10 = vld [vmem:[%s3700_s2] ss:$0 sm:$0xff] (!%p488_p2)  ;;  %vm661_vm2 = vcmask (!%p488_p2), 261120  }
   0x9   : > { %2794 = vmatprep.mubr.msk.bf16.mxu0 (!%p488_p2), %vm3143_vm0, %v3142_v1  ;;  %2802 = vmatprep.mubr.msk.bf16.mxu1 (!%p488_p2), %vm3143_vm0, %v3142_v1  ;;  %v2622_v18 = vld [vmem:[%s3702_s4] ss:$0 sm:$0xff] (!%p488_p2)  ;;  %s3145_s23 = smov (!%p488_p2), 96   ;;  %s3726_s26 = smov (!%p488_p2), 80   ;;  %vm710_vm3 = vcmask (!%p488_p2), 64512   ;;  %vm760_vm4 = vcmask (!%p488_p2), 97280  }
   0xa   : > { %2799 = vmatpush3.bf16.msra.mxu1 (!%p488_p2), %v3032_v8  ;;  %s3147_s27 = smov (!%p488_p2), 88   ;;  %s3725_s29 = smov (!%p488_p2), 72   ;;  %vm764_vm5 = vcmask (!%p488_p2), 93184   ;;  %vm790_vm6 = vcmask (!%p488_p2), 1045504   ;;  %vm1236_vm7 = vcmask (!%p488_p2), 130048   ;;  %vm1239_vm8 = vcmask (!%p488_p2), 195584  }
   0xb   : > { %2800 = vmatprep.subr.bf16.mxu1 (!%p488_p2), %v3142_v1  ;;  %s3149_s0 = smov (!%p488_p2), 112   ;;  %s3727_s30 = smov (!%p488_p2), 104   ;;  %vm1317_vm9 = vcmask (!%p488_p2), 257024  }
   0xc   : > { %s3721_s18 = smov (!%p488_p2), 56   ;;  %s3720_s1 = smov (!%p488_p2), 64  }
   0xd   : > { %v3028_v0 = vld [vmem:[%s3730_s28] sm:$0xff] (!%p488_p2)   ;;  %v3029_v2 = vld [vmem:[%s3730_s28 + $0x8] sm:$0xff] (!%p488_p2)   ;;  %v3030_v3 = vld [vmem:[%s3730_s28 + $0x10] sm:$0xff] (!%p488_p2)   ;;  %s3719_s20 = smov (!%p488_p2), 48  }
   0xe   : > { %2787 = vmatpush3.bf16.msra.mxu0 (!%p488_p2), %v3028_v0  ;;  %v3031_v4 = vld [vmem:[%s3730_s28 + $0x18] sm:$0xff] (!%p488_p2)   ;;  %2801 = vmatpush3.bf16.msra.mxu1 (!%p488_p2), %v3033_v9 }
   0xf   : > { %2788 = vmatprep.subr.bf16.mxu0 %v3142_v1  ;;  %s3744_s25 = smov (!%p539_p3, %s2607_s25), 1  ;;  %2806 = vmatprep.subr.bf16.mxu1 %v3142_v1 }
  0x10   : > { %s3717_s19 = sshll.u32 %s3744_s25, 4 }
  0x11   : > { %s543_s22 = scalar_lea.vmem %s3731_s21, %s3717_s19  ;;  %s3718_s21 = smov 40  }
  0x12   : > { %2789 = vmatpush3.bf16.msra.mxu0 %v3029_v2  ;;  %v550_v5 = vld [vmem:[%s543_s22] sm:$0xff]  ;;  %v551_v6 = vld [vmem:[%s543_s22 + $0x8] sm:$0xf]  ;;  %s3144_s22 = smov 120   ;;  %s3723_s19 = smov 16  }
  0x13   : > { %2790 = vmatprep.subr.bf16.mxu0 %v3142_v1  ;;  %v560_v7 = vpack.c.bf16 %v551_v6, %v550_v5 }
  0x16   : > { %2791 = vmatpush3.bf16.msra.mxu0 %v3030_v3 }
  0x17   : > { %2792 = vmatprep.subr.bf16.mxu0 %v3142_v1 }
  0x1a   : > { %2793 = vmatpush3.bf16.msra.mxu0 %v3031_v4 }
  0x1b   : > { %2812 = vmatprep.subr.bf16.mxu0 %v3142_v1 }
  0x1d   : > { %2795 = vmatmul.mubr.msk.bf16.vlgmr.msra.gmra.mrb[0].mxu0 %vm592_vm1, %v560_v7 }
  0x1e   : > { %2814 = vmatprep.mubr.msk.bf16.mxu0 %vm3143_vm0, %v3142_v1 }
  0xf0   : > { %v630_v11 = vpop.f32.mrb[0].mxu0 }
  0xf1   : > { %v2796_v12 = vpop.f32.mrb[1].mxu0  ;;  %v3300_v14 = vadd.f32 %v2616_v10, %v630_v11 }
  0xf2   : > { %v633_v13 = vpop.f32.mrb[2].mxu0 }
  0xf3   : > { %v3302_v15 = vadd.f32 %v2616_v10, %v633_v13  ;;  %v2797_v16 = vpop.f32.mrb[3].mxu0 }
  0xf5   : > { %v641_v17 = vpack.c.bf16 %v3302_v15, %v3300_v14 }
  0xf7   : > { %2803 = vmatmul.mubr.msk.bf16.vlgmr.msra.gmra.mrb[0].mxu1 %vm661_vm2, %v641_v17 }
  0xf8   : > { %2808 = vmatprep.mubr.msk.bf16.mxu1 %vm3143_vm0, %v3142_v1 }
 0x1ca   : > { %v699_v19 = vpop.f32.mrb[0].mxu1 }
 0x1cb   : > { %v2804_v20 = vpop.f32.mrb[1].mxu1  ;;  %v700_v22 = vadd.f32 %v2622_v18, %v699_v19 }
 0x1cc   : > { %v702_v21 = vpop.f32.mrb[2].mxu1 }
 0x1cd   : > { %v703_v23 = vadd.f32 %v2622_v18, %v702_v21  ;;  %v2805_v24 = vpop.f32.mrb[3].mxu1 }
 0x1cf   : > { %v3312_v25 = vpack.c.bf16 %v703_v23, %v700_v22 }
 0x1d1   : > { %835 = vrot.lane.b32.xlu1 %v3312_v25, %s3144_s22  ;;  %708 = vrot.lane.b32.xlu0 %v3312_v25, %s3145_s23 }
 0x1d5   : > { %962 = vrot.lane.b32.xlu1 %v3312_v25, %s3726_s26  ;;  %837 = vrot.lane.b32.xlu0 %v3312_v25, %s3147_s27 }
 0x1d9   : > { %1087 = vrot.lane.b32.xlu1 %v3312_v25, %s3725_s29  ;;  %960 = vrot.lane.b32.xlu0 %v3312_v25, %s3149_s0  ;;  %s3734_s29 = smov 72  }
 0x1dd   : > { %1085 = vrot.lane.b32.xlu0 %v3312_v25, %s3727_s30  ;;  %s3739_s30 = smov 8  }
 0x243   : > { %v709_v26 = vpop.permute.xlu0 %708  ;;  %v836_v29 = vpop.permute.xlu1 %835 }
 0x244   : > { %v715_v27 = vsel %vm710_vm3, %v709_v26, 0 }
 0x245   : > { %2807 = vmatpush3.bf16.xpose.msra.mxu1 %v715_v27 }
 0x246   : > { %2818 = vmatprep.subr.bf16.mxu1 %v3142_v1 }
 0x247   : > { %v838_v28 = vpop.permute.xlu0 %837  ;;  %v963_v31 = vpop.permute.xlu1 %962 }
 0x248   : > { %v843_v30 = vsel %vm710_vm3, %v838_v28, 0  ;;  %v968_v32 = vsel %vm710_vm3, %v963_v31, 0 }
 0x24b   : > { %v1088_v33 = vpop.permute.xlu1 %1087  ;;  %v961_v34 = vpop.permute.xlu0 %960 }
 0x24c   : > { %2809 = vmatmul.mubr.msk.bf16.vlgmr.msra.gmra.mrb[4].mxu1 %vm710_vm3, %v3312_v25  ;;  %v1093_v35 = vsel %vm710_vm3, %v1088_v33, 0 }
 0x24d   : > { %2819 = vmatpush3.bf16.xpose.msra.mxu1 %v843_v30  ;;  %2820 = vmatprep.mubr.msk.bf16.mxu1 %vm3143_vm0, %v3142_v1 }
 0x24e   : > { %2830 = vmatprep.subr.bf16.mxu1 %v3142_v1 }
 0x24f   : > { %v1086_v36 = vpop.permute.xlu0 %1085 }
 0x254   : > { %2821 = vmatmul.mubr.msk.bf16.vlgmr.msra.gmra.mrb[8].mxu1 %vm710_vm3, %v836_v29 }
 0x255   : > { %2831 = vmatpush3.bf16.xpose.msra.mxu1 %v968_v32  ;;  %2832 = vmatprep.mubr.msk.bf16.mxu1 %vm3143_vm0, %v3142_v1 }
 0x256   : > { %2842 = vmatprep.subr.bf16.mxu1 %v3142_v1 }
 0x25c   : > { %2833 = vmatmul.mubr.msk.bf16.vlgmr.msra.gmra.mrb[12].mxu1 %vm710_vm3, %v961_v34 }
 0x25d   : > { %2843 = vmatpush3.bf16.xpose.msra.mxu1 %v1093_v35  ;;  %2844 = vmatprep.mubr.msk.bf16.mxu1 %vm3143_vm0, %v3142_v1 }
 0x25e   : > { %2854 = vmatprep.subr.bf16.mxu1 %v3142_v1 }
 0x264   : > { %2845 = vmatmul.mubr.msk.bf16.vlgmr.msra.gmra.mrb[16].mxu1 %vm710_vm3, %v1086_v36 }
 0x265   : > { %2858 = vmatprep.mubr.msk.bf16.mxu1 %vm3143_vm0, %v3142_v1 }
 0x31f   : > { %v751_v37 = vpop.f32.mrb[4].mxu1 }
 0x320   : > { %v758_v38 = vmul.f32 0.35355338, %v751_v37  ;;  %v2810_v39 = vpop.f32.mrb[5].mxu1 }
 0x321   : > { %v754_v40 = vpop.f32.mrb[6].mxu1 }
 0x322   : > { %v759_v41 = vmul.f32 0.35355338, %v754_v40  ;;  %v2811_v42 = vpop.f32.mrb[7].mxu1  ;;  %v761_v43 = vsel %vm760_vm4, %v758_v38, -inf }
 0x323   : > { %762 = vmax.xlane.f32.xlu1 %v761_v43 }
 0x324   : > { %v765_v44 = vsel %vm764_vm5, %v759_v41, -inf }
 0x325   : > { %766 = vmax.xlane.f32.xlu0 %v765_v44 }
 0x327   : > { %v879_v45 = vpop.f32.mrb[8].mxu1 }
 0x328   : > { %v886_v46 = vmul.f32 0.35355338, %v879_v45  ;;  %v2822_v47 = vpop.f32.mrb[9].mxu1 }
 0x329   : > { %v882_v48 = vpop.f32.mrb[10].mxu1 }
 0x32a   : > { %v887_v49 = vmul.f32 0.35355338, %v882_v48  ;;  %v2823_v50 = vpop.f32.mrb[11].mxu1  ;;  %v888_v51 = vsel %vm760_vm4, %v886_v46, -inf }
 0x32b   : > { %889 = vmax.xlane.f32.xlu0 %v888_v51 }
 0x32c   : > { %v891_v52 = vsel %vm764_vm5, %v887_v49, -inf }
 0x32d   : > { %892 = vmax.xlane.f32.xlu1 %v891_v52 }
 0x32f   : > { %v1004_v53 = vpop.f32.mrb[12].mxu1 }
 0x330   : > { %v1011_v54 = vmul.f32 0.35355338, %v1004_v53  ;;  %v2834_v55 = vpop.f32.mrb[13].mxu1 }
 0x331   : > { %v1007_v56 = vpop.f32.mrb[14].mxu1 }
 0x332   : > { %v1012_v57 = vmul.f32 0.35355338, %v1007_v56  ;;  %v2835_v58 = vpop.f32.mrb[15].mxu1  ;;  %v1013_v59 = vsel %vm760_vm4, %v1011_v54, -inf }
 0x333   : > { %1014 = vmax.xlane.f32.xlu0 %v1013_v59 }
 0x334   : > { %v1016_v60 = vsel %vm764_vm5, %v1012_v57, -inf }
 0x335   : > { %1017 = vmax.xlane.f32.xlu1 %v1016_v60 }
 0x337   : > { %v1129_v61 = vpop.f32.mrb[16].mxu1 }
 0x338   : > { %v1136_v62 = vmul.f32 0.35355338, %v1129_v61  ;;  %v2846_v63 = vpop.f32.mrb[17].mxu1 }
 0x339   : > { %v1132_v0 = vpop.f32.mrb[18].mxu1 }
 0x33a   : > { %v1137_v2 = vmul.f32 0.35355338, %v1132_v0  ;;  %v2847_v3 = vpop.f32.mrb[19].mxu1  ;;  %v1138_v4 = vsel %vm760_vm4, %v1136_v62, -inf }
 0x33b   : > { %1139 = vmax.xlane.f32.xlu0 %v1138_v4 }
 0x33c   : > { %v1141_v5 = vsel %vm764_vm5, %v1137_v2, -inf }
 0x33d   : > { %1142 = vmax.xlane.f32.xlu1 %v1141_v5 }
 0x3b0   : > { %v763_v6 = vpop.xlane.xlu1 %762 }
 0x3b1   : > { %v768_v7 = vsub.f32 %v758_v38, %v763_v6 }
 0x3b2   : > { %v767_v8 = vpop.xlane.xlu0 %766 }
 0x3b3   : > { %v770_v9 = vmul.f32 1.442695, %v768_v7  ;;  %v769_v10 = vsub.f32 %v759_v41, %v767_v8 }
 0x3b5   : > { %3054 = vpow2.f32 %v770_v9  ;;  %v772_v11 = vmul.f32 1.442695, %v769_v10 }
 0x3b7   : > { %3056 = vpow2.f32 %v772_v11 }
 0x3b8   : > { %v890_v12 = vpop.xlane.xlu0 %889 }
 0x3b9   : > { %v894_v13 = vsub.f32 %v886_v46, %v890_v12 }
 0x3ba   : > { %v893_v23 = vpop.xlane.xlu1 %892 }
 0x3bb   : > { %v896_v16 = vmul.f32 1.442695, %v894_v13  ;;  %v895_v24 = vsub.f32 %v887_v49, %v893_v23 }
 0x3bd   : > { %3058 = vpow2.f32 %v896_v16  ;;  %v898_v28 = vmul.f32 1.442695, %v895_v24 }
 0x3bf   : > { %v3055_v17 = vpop.eup %3054  ;;  %3060 = vpow2.f32 %v898_v28 }
 0x3c0   : > { %v774_v18 = vsel %vm760_vm4, %v3055_v17, 0.0  ;;  %v1015_v27 = vpop.xlane.xlu0 %1014 }
 0x3c1   : > { %v3057_v19 = vpop.eup %3056  ;;  %775 = vadd.xlane.f32.xlu0 %v774_v18  ;;  %v1019_v31 = vsub.f32 %v1011_v54, %v1015_v27 }
 0x3c2   : > { %v777_v20 = vsel %vm764_vm5, %v3057_v19, 0.0  ;;  %v1018_v26 = vpop.xlane.xlu1 %1017 }
 0x3c3   : > { %778 = vadd.xlane.f32.xlu1 %v777_v20  ;;  %v1020_v29 = vsub.f32 %v1012_v57, %v1018_v26  ;;  %v1021_v35 = vmul.f32 1.442695, %v1019_v31  ;;  %v3034_v31 = vld [vmem:[%s3703_s5] sm:$0xff]  }
 0x3c4   : > { %2855 = vmatpush3.bf16.msra.mxu1 %v3034_v31  ;;  %v2638_v31 = vld [vmem:[%s3709_s11] ss:$0 sm:$0xff] }
 0x3c5   : > { %v1023_v33 = vmul.f32 1.442695, %v1020_v29  ;;  %2856 = vmatprep.subr.bf16.mxu1 %v3142_v1 }
 0x3c7   : > { %v3359_v21 = vpop.eup %3058  ;;  %3062 = vpow2.f32 %v1023_v33 }
 0x3c8   : > { %v900_v22 = vsel %vm760_vm4, %v3359_v21, 0.0  ;;  %v1140_v32 = vpop.xlane.xlu0 %1139  ;;  %3064 = vpow2.f32 %v1021_v35 }
 0x3c9   : > { %901 = vadd.xlane.f32.xlu0 %v900_v22  ;;  %v1144_v36 = vsub.f32 %v1136_v62, %v1140_v32  ;;  %v3061_v39 = vpop.eup %3060 }
 0x3ca   : > { %v1143_v30 = vpop.xlane.xlu1 %1142  ;;  %v903_v40 = vsel %vm764_vm5, %v3061_v39, 0.0 }
 0x3cb   : > { %v1145_v34 = vsub.f32 %v1137_v2, %v1143_v30  ;;  %v1146_v38 = vmul.f32 1.442695, %v1144_v36  ;;  %v3035_v36 = vld [vmem:[%s3703_s5 + $0x8] sm:$0xff]  }
 0x3cc   : > { %2857 = vmatpush3.bf16.msra.mxu1 %v3035_v36 }
 0x3cd   : > { %v1148_v37 = vmul.f32 1.442695, %v1145_v34  ;;  %2870 = vmatprep.subr.bf16.mxu1 %v3142_v1 }
 0x3cf   : > { %3066 = vpow2.f32 %v1148_v37 }
 0x3d0   : > { %3068 = vpow2.f32 %v1146_v38 }
 0x3d1   : > { %v3368_v41 = vpop.eup %3062 }
 0x3d2   : > { %v3065_v42 = vpop.eup %3064  ;;  %v1028_v43 = vsel %vm764_vm5, %v3368_v41, 0.0 }
 0x3d3   : > { %v1025_v45 = vsel %vm760_vm4, %v3065_v42, 0.0 }
 0x3d4   : > { %911 = vrot.lane.b32.xlu1 %v3312_v25, %s3721_s18  ;;  %s3732_s18 = smov 104  }
 0x3d9   : > { %v3372_v44 = vpop.eup %3066 }
 0x3da   : > { %v3375_v46 = vpop.eup %3068  ;;  %v1153_v47 = vsel %vm764_vm5, %v3372_v44, 0.0 }
 0x3db   : > { %v1150_v48 = vsel %vm760_vm4, %v3375_v46, 0.0 }
 0x3df   : > { %785 = vrot.lane.b32.xlu0 %v3312_v25, %s3720_s1  ;;  %s3733_s1 = smov 80  }
 0x3f8   : > { %904 = vadd.xlane.f32.xlu1 %v903_v40 }
 0x3fc   : > { %1029 = vadd.xlane.f32.xlu1 %v1028_v43 }
 0x3fe   : > { %1026 = vadd.xlane.f32.xlu0 %v1025_v45 }
 0x400   : > { %1154 = vadd.xlane.f32.xlu1 %v1153_v47 }
 0x402   : > { %1151 = vadd.xlane.f32.xlu0 %v1150_v48 }
 0x411   : > { %1036 = vrot.lane.b32.xlu1 %v3312_v25, %s3719_s20  ;;  %s3724_s20 = smov 8  }
 0x418   : > { %1161 = vrot.lane.b32.xlu0 %v3312_v25, %s3718_s21  ;;  %s3722_s21 = smov 24  }
 0x44e   : > { %v776_v49 = vpop.xlane.xlu0 %775 }
 0x44f   : > { %3070 = vrcp.f32 %v776_v49 }
 0x450   : > { %v779_v50 = vpop.xlane.xlu1 %778 }
 0x451   : > { %3072 = vrcp.f32 %v779_v50 }
 0x454   : > { %v912_v58 = vpop.permute.xlu1 %911 }
 0x455   : > { %v917_v25 = vsel %vm790_vm6, %v912_v58, 0 }
 0x456   : > { %v902_v51 = vpop.xlane.xlu0 %901 }
 0x457   : > { %3074 = vrcp.f32 %v902_v51 }
 0x459   : > { %v3071_v52 = vpop.eup %3070 }
 0x45a   : > { %v786_v53 = vpop.permute.xlu0 %785  ;;  %v782_v56 = vmul.f32 %v3071_v52, %v3055_v17 }
 0x45b   : > { %v3073_v54 = vpop.eup %3072  ;;  %v792_v55 = vsel %vm790_vm6, %v786_v53, 0 }
 0x45c   : > { %v783_v57 = vmul.f32 %v3073_v54, %v3057_v19  ;;  %2813 = vmatpush3.bf16.msra.mxu0 %v792_v55 }
 0x45d   : > { %2824 = vmatprep.subr.bf16.mxu0 %v3142_v1 }
 0x45e   : > { %v784_v59 = vpack.c.bf16 %v783_v57, %v782_v56 }
 0x460   : > { %2815 = vmatmul.mubr.msk.bf16.vlgmr.msra.gmra.mrb[4].mxu0 %vm760_vm4, %v784_v59 }
 0x461   : > { %2825 = vmatpush3.bf16.msra.mxu0 %v917_v25  ;;  %2826 = vmatprep.mubr.msk.bf16.mxu0 %vm3143_vm0, %v3142_v1  ;;  %v3075_v0 = vpop.eup %3074 }
 0x462   : > { %2836 = vmatprep.subr.bf16.mxu0 %v3142_v1  ;;  %v908_v4 = vmul.f32 %v3075_v0, %v3359_v21 }
 0x485   : > { %v905_v60 = vpop.xlane.xlu1 %904 }
 0x486   : > { %3076 = vrcp.f32 %v905_v60  ;;  %v2634_v60 = vld [vmem:[%s3704_s6] ss:$0 sm:$0xff] }
 0x489   : > { %v1030_v61 = vpop.xlane.xlu1 %1029 }
 0x48a   : > { %3078 = vrcp.f32 %v1030_v61 }
 0x48b   : > { %v1027_v62 = vpop.xlane.xlu0 %1026 }
 0x48c   : > { %3080 = vrcp.f32 %v1027_v62 }
 0x48d   : > { %v1155_v63 = vpop.xlane.xlu1 %1154 }
 0x48f   : > { %v1152_v2 = vpop.xlane.xlu0 %1151 }
 0x490   : > { %v3077_v3 = vpop.eup %3076  ;;  %3082 = vrcp.f32 %v1152_v2 }
 0x491   : > { %v909_v5 = vmul.f32 %v3077_v3, %v3061_v39  ;;  %v1037_v6 = vpop.permute.xlu1 %1036  ;;  %3084 = vrcp.f32 %v1155_v63 }
 0x492   : > { %v1042_v9 = vsel %vm790_vm6, %v1037_v6, 0 }
 0x493   : > { %v910_v7 = vpack.c.bf16 %v909_v5, %v908_v4  ;;  %v1162_v13 = vpop.permute.xlu0 %1161 }
 0x494   : > { %v3079_v8 = vpop.eup %3078  ;;  %v1167_v18 = vsel %vm790_vm6, %v1162_v13, 0 }
 0x495   : > { %2827 = vmatmul.mubr.msk.bf16.vlgmr.msra.gmra.mrb[8].mxu0 %vm760_vm4, %v910_v7  ;;  %v1034_v12 = vmul.f32 %v3079_v8, %v3368_v41 }
 0x496   : > { %v3081_v10 = vpop.eup %3080  ;;  %2837 = vmatpush3.bf16.msra.mxu0 %v1042_v9  ;;  %2838 = vmatprep.mubr.msk.bf16.mxu0 %vm3143_vm0, %v3142_v1 }
 0x497   : > { %v1033_v11 = vmul.f32 %v3081_v10, %v3065_v42  ;;  %2848 = vmatprep.subr.bf16.mxu0 %v3142_v1 }
 0x499   : > { %v1035_v16 = vpack.c.bf16 %v1034_v12, %v1033_v11 }
 0x49a   : > { %v3083_v17 = vpop.eup %3082 }
 0x49b   : > { %v3085_v19 = vpop.eup %3084  ;;  %v1158_v20 = vmul.f32 %v3083_v17, %v3375_v46 }
 0x49c   : > { %v1159_v21 = vmul.f32 %v3085_v19, %v3372_v44  ;;  %v3037_v19 = vld [vmem:[%s3705_s7 + $0x8] sm:$0xff]  }
 0x49d   : > { %2839 = vmatmul.mubr.msk.bf16.vlgmr.msra.gmra.mrb[12].mxu0 %vm760_vm4, %v1035_v16 }
 0x49e   : > { %2849 = vmatpush3.bf16.msra.mxu0 %v1167_v18  ;;  %2850 = vmatprep.mubr.msk.bf16.mxu0 %vm3143_vm0, %v3142_v1  ;;  %v1160_v22 = vpack.c.bf16 %v1159_v21, %v1158_v20  ;;  %v3038_v20 = vld [vmem:[%s3707_s9] sm:$0xff]   ;;  %v3039_v21 = vld [vmem:[%s3707_s9 + $0x8] sm:$0xff]  }
 0x49f   : > { %2862 = vmatprep.subr.bf16.mxu0 %v3142_v1 }
 0x4a5   : > { %2851 = vmatmul.mubr.msk.bf16.vlgmr.msra.gmra.mrb[16].mxu0 %vm760_vm4, %v1160_v22 }
 0x4a6   : > { %2866 = vmatprep.mubr.msk.bf16.mxu0 %vm3143_vm0, %v3142_v1 }
 0x533   : > { %v828_v23 = vpop.f32.mrb[4].mxu0 }
 0x534   : > { %v2816_v24 = vpop.f32.mrb[5].mxu0 }
 0x535   : > { %v831_v26 = vpop.f32.mrb[6].mxu0 }
 0x536   : > { %v2817_v27 = vpop.f32.mrb[7].mxu0 }
 0x568   : > { %v953_v28 = vpop.f32.mrb[8].mxu0 }
 0x569   : > { %v2828_v29 = vpop.f32.mrb[9].mxu0 }
 0x56a   : > { %v956_v30 = vpop.f32.mrb[10].mxu0 }
 0x56b   : > { %v2998_v32 = vpack.i.bf16 %v956_v30, %v953_v28  ;;  %v2829_v33 = vpop.f32.mrb[11].mxu0 }
 0x56d   : > { %2999 = vrot.lane.b32.xlu1 %v2998_v32, %s3724_s20 }
 0x570   : > { %v1078_v34 = vpop.f32.mrb[12].mxu0 }
 0x571   : > { %v2840_v35 = vpop.f32.mrb[13].mxu0 }
 0x572   : > { %v1081_v37 = vpop.f32.mrb[14].mxu0  ;;  %v2639_v35 = vld [vmem:[%s3710_s12] ss:$0 sm:$0xff] }
 0x573   : > { %v3003_v38 = vpack.i.bf16 %v1081_v37, %v1078_v34  ;;  %v2841_v39 = vpop.f32.mrb[15].mxu0 }
 0x575   : > { %3004 = vrot.lane.b32.xlu0 %v3003_v38, %s3723_s19  ;;  %s3742_s19 = sshll.u32 %s3744_s25, 4 }
 0x578   : > { %v1203_v40 = vpop.f32.mrb[16].mxu0 }
 0x579   : > { %v2852_v41 = vpop.f32.mrb[17].mxu0 }
 0x57a   : > { %v1206_v42 = vpop.f32.mrb[18].mxu0  ;;  %v3041_v41 = vld [vmem:[%s3707_s9 + $0x18] sm:$0xff]  }
 0x57b   : > { %v3008_v43 = vpack.i.bf16 %v1206_v42, %v1203_v40  ;;  %v2853_v44 = vpop.f32.mrb[19].mxu0  ;;  %v3040_v40 = vld [vmem:[%s3707_s9 + $0x10] sm:$0xff]   ;;  %v2640_v42 = vld [vmem:[%s3706_s8] ss:$0 sm:$0xff] }
 0x57d   : > { %3009 = vrot.lane.b32.xlu1 %v3008_v43, %s3722_s21 }
 0x5df   : > { %v3000_v45 = vpop.permute.xlu1 %2999 }
 0x5e0   : > { %v3002_v47 = vunpack.i.h.bf16 %v3000_v45  ;;  %v3001_v48 = vunpack.i.l.bf16 %v3000_v45 }
 0x5e2   : > { %v1235_v52 = vsel %vm710_vm3, %v831_v26, %v3002_v47  ;;  %v1234_v53 = vsel %vm710_vm3, %v828_v23, %v3001_v48 }
 0x5e7   : > { %v3005_v46 = vpop.permute.xlu0 %3004 }
 0x5e8   : > { %v3007_v49 = vunpack.i.h.bf16 %v3005_v46  ;;  %v3006_v50 = vunpack.i.l.bf16 %v3005_v46 }
 0x5ea   : > { %v1238_v56 = vsel %vm1236_vm7, %v1235_v52, %v3007_v49  ;;  %v1237_v57 = vsel %vm1236_vm7, %v1234_v53, %v3006_v50  ;;  %v2644_v52 = vld [vmem:[%s3708_s10] ss:$0 sm:$0xff] }
 0x5ef   : > { %v3010_v51 = vpop.permute.xlu1 %3009 }
 0x5f0   : > { %v3012_v54 = vunpack.i.h.bf16 %v3010_v51  ;;  %v3011_v55 = vunpack.i.l.bf16 %v3010_v51 }
 0x5f2   : > { %v1241_v58 = vsel %vm1239_vm8, %v1238_v56, %v3012_v54  ;;  %v1240_v59 = vsel %vm1239_vm8, %v1237_v57, %v3011_v55 }
 0x5f3   : > { %v1246_v25 = vpack.c.bf16 %v1241_v58, %v1240_v59 }
 0x5f5   : > { %2859 = vmatmul.mubr.msk.bf16.vlgmr.msra.gmra.mrb[20].mxu1 %vm661_vm2, %v1246_v25 }
 0x5f6   : > { %2878 = vmatprep.mubr.msk.bf16.mxu1 %vm3143_vm0, %v3142_v1  ;;  %2871 = vmatpush3.bf16.msra.mxu1 %v3038_v20 }
 0x5f7   : > { %2872 = vmatprep.subr.bf16.mxu1 %v3142_v1 }
 0x5fa   : > { %2873 = vmatpush3.bf16.msra.mxu1 %v3039_v21 }
 0x5fb   : > { %2874 = vmatprep.subr.bf16.mxu1 %v3142_v1 }
 0x5fe   : > { %2875 = vmatpush3.bf16.msra.mxu1 %v3040_v40 }
 0x5ff   : > { %2876 = vmatprep.subr.bf16.mxu1 %v3142_v1 }
 0x602   : > { %2877 = vmatpush3.bf16.msra.mxu1 %v3041_v41 }
 0x603   : > { %2896 = vmatprep.subr.bf16.mxu1 %v3142_v1 }
 0x6c8   : > { %v1303_v61 = vpop.f32.mrb[20].mxu1 }
 0x6c9   : > { %v1304_v62 = vadd.f32 %v2634_v60, %v1303_v61  ;;  %v2860_v63 = vpop.f32.mrb[21].mxu1 }
 0x6ca   : > { %v1306_v0 = vpop.f32.mrb[22].mxu1 }
 0x6cb   : > { %v1307_v2 = vadd.f32 %v2634_v60, %v1306_v0  ;;  %v2861_v3 = vpop.f32.mrb[23].mxu1  ;;  %v1310_v4 = vadd.f32 %v1304_v62, %v3300_v14 }
 0x6cd   : > { %v1314_v5 = vsel %vm661_vm2, %v1310_v4, 0.0  ;;  %v1311_v6 = vadd.f32 %v1307_v2, %v3302_v15  ;;  %v3036_v15 = vld [vmem:[%s3705_s7] sm:$0xff]  }
 0x6ce   : > { %1315 = vadd.xlane.f32.xlu0 %v1314_v5  ;;  %2863 = vmatpush3.bf16.msra.mxu0 %v3036_v15  ;;  %v2650_v15 = vld [vmem:[%s3711_s13] ss:$0 sm:$0xff] }
 0x6cf   : > { %v1318_v7 = vsel %vm1317_vm9, %v1311_v6, 0.0  ;;  %2864 = vmatprep.subr.bf16.mxu0 %v3142_v1 }
 0x6d0   : > { %1319 = vadd.xlane.f32.xlu1 %v1318_v7 }
 0x6d2   : > { %2865 = vmatpush3.bf16.msra.mxu0 %v3037_v19 }
 0x6d3   : > { %2882 = vmatprep.subr.bf16.mxu0 %v3142_v1 }
 0x75b   : > { %v1316_v8 = vpop.xlane.xlu0 %1315 }
 0x75c   : > { %v1322_v9 = vmul.f32 0.03125, %v1316_v8 }
 0x75d   : > { %v1320_v10 = vpop.xlane.xlu1 %1319 }
 0x75e   : > { %v1324_v11 = vsub.f32 %v1310_v4, %v1322_v9  ;;  %v1323_v12 = vmul.f32 0.03125, %v1320_v10  ;;  %v3042_v9 = vld [vmem:[%s3701_s3 + $0x10] sm:$0xff]   ;;  %v3043_v10 = vld [vmem:[%s3701_s3 + $0x18] sm:$0xff]  }
 0x760   : > { %v1325_v13 = vsub.f32 %v1311_v6, %v1323_v12  ;;  %v1326_v16 = vmul.f32 %v1324_v11, %v1324_v11 }
 0x762   : > { %v1328_v17 = vsel %vm661_vm2, %v1326_v16, 0.0  ;;  %v1327_v18 = vmul.f32 %v1325_v13, %v1325_v13 }
 0x763   : > { %1329 = vadd.xlane.f32.xlu0 %v1328_v17 }
 0x764   : > { %v1331_v14 = vsel %vm1317_vm9, %v1327_v18, 0.0 }
 0x767   : > { %1332 = vadd.xlane.f32.xlu0 %v1331_v14 }
 0x7f0   : > { %v1330_v22 = vpop.xlane.xlu0 %1329 }
 0x7f1   : > { %v1334_v23 = vmul.f32 0.03125, %v1330_v22 }
 0x7f3   : > { %v1336_v24 = vadd.f32 1e-05, %v1334_v23  ;;  %v2651_v23 = vld [vmem:[%s3712_s14] ss:$0 sm:$0xff] }
 0x7f4   : > { %v1333_v26 = vpop.xlane.xlu0 %1332 }
 0x7f5   : > { %3086 = vrsqrt.f32 %v1336_v24  ;;  %v1335_v27 = vmul.f32 0.03125, %v1333_v26 }
 0x7f7   : > { %v1337_v28 = vadd.f32 1e-05, %v1335_v27 }
 0x7f9   : > { %3088 = vrsqrt.f32 %v1337_v28 }
 0x7ff   : > { %v3087_v29 = vpop.eup %3086 }
 0x800   : > { %v1340_v30 = vmul.f32 %v3087_v29, %v1324_v11  ;;  %v2657_v29 = vld [vmem:[%s3702_s4 + $0x1] ss:$0 sm:$0xff] }
 0x802   : > { %v1348_v33 = vmul.f32 %v2638_v31, %v1340_v30 }
 0x803   : > { %v3089_v32 = vpop.eup %3088 }
 0x804   : > { %v1341_v34 = vmul.f32 %v3089_v32, %v1325_v13  ;;  %v1356_v37 = vadd.f32 %v2639_v35, %v1348_v33 }
 0x806   : > { %v1349_v36 = vmul.f32 %v2638_v31, %v1341_v34 }
 0x808   : > { %v1357_v38 = vadd.f32 %v2639_v35, %v1349_v36 }
 0x80a   : > { %v1362_v39 = vpack.c.bf16 %v1357_v38, %v1356_v37 }
 0x80c   : > { %2867 = vmatmul.mubr.msk.bf16.vlgmr.msra.gmra.mrb[20].mxu0 %vm661_vm2, %v1362_v39 }
 0x80d   : > { %2886 = vmatprep.mubr.msk.bf16.mxu0 %vm3143_vm0, %v3142_v1  ;;  %2883 = vmatpush3.bf16.msra.mxu0 %v3042_v9 }
 0x80e   : > { %2884 = vmatprep.subr.bf16.mxu0 %v3142_v1 }
 0x811   : > { %2885 = vmatpush3.bf16.msra.mxu0 %v3043_v10 }
 0x812   : > { %2890 = vmatprep.subr.bf16.mxu0 %v3142_v1 }
 0x8df   : > { %v1419_v43 = vpop.f32.mrb[20].mxu0 }
 0x8e0   : > { %v1420_v44 = vadd.f32 %v2640_v42, %v1419_v43  ;;  %v2868_v45 = vpop.f32.mrb[21].mxu0 }
 0x8e1   : > { %v1422_v46 = vpop.f32.mrb[22].mxu0 }
 0x8e2   : > { %v1423_v47 = vadd.f32 %v2640_v42, %v1422_v46  ;;  %v2869_v48 = vpop.f32.mrb[23].mxu0  ;;  %v1426_v49 = vmax.f32 %v1420_v44, 0.0 }
 0x8e4   : > { %v1427_v50 = vmax.f32 %v1423_v47, 0.0 }
 0x8e6   : > { %v1436_v51 = vpack.c.bf16 %v1427_v50, %v1426_v49 }
 0x8e8   : > { %2879 = vmatmul.mubr.msk.bf16.vlgmr.msra.gmra.mrb[24].mxu1 %vm592_vm1, %v1436_v51 }
 0x8e9   : > { %2898 = vmatprep.mubr.msk.bf16.mxu1 %vm3143_vm0, %v3142_v1 }
 0x9bb   : > { %v1505_v53 = vpop.f32.mrb[24].mxu1 }
 0x9bc   : > { %v1506_v54 = vadd.f32 %v2644_v52, %v1505_v53  ;;  %v2880_v55 = vpop.f32.mrb[25].mxu1 }
 0x9bd   : > { %v1508_v56 = vpop.f32.mrb[26].mxu1 }
 0x9be   : > { %v1509_v57 = vadd.f32 %v2644_v52, %v1508_v56  ;;  %v2881_v58 = vpop.f32.mrb[27].mxu1  ;;  %v1512_v59 = vadd.f32 %v1506_v54, %v1356_v37 }
 0x9c0   : > { %v1516_v25 = vsel %vm661_vm2, %v1512_v59, 0.0  ;;  %v1513_v60 = vadd.f32 %v1509_v57, %v1357_v38 }
 0x9c1   : > { %1517 = vadd.xlane.f32.xlu1 %v1516_v25 }
 0x9c2   : > { %v1519_v61 = vsel %vm1317_vm9, %v1513_v60, 0.0 }
 0x9c3   : > { %1520 = vadd.xlane.f32.xlu0 %v1519_v61 }
 0xa4e   : > { %v1518_v62 = vpop.xlane.xlu1 %1517 }
 0xa4f   : > { %v1522_v63 = vmul.f32 0.03125, %v1518_v62 }
 0xa50   : > { %v1521_v0 = vpop.xlane.xlu0 %1520 }
 0xa51   : > { %v1524_v2 = vsub.f32 %v1512_v59, %v1522_v63  ;;  %v1523_v3 = vmul.f32 0.03125, %v1521_v0 }
 0xa53   : > { %v1525_v4 = vsub.f32 %v1513_v60, %v1523_v3  ;;  %v1526_v5 = vmul.f32 %v1524_v2, %v1524_v2 }
 0xa55   : > { %v1528_v6 = vsel %vm661_vm2, %v1526_v5, 0.0  ;;  %v1527_v7 = vmul.f32 %v1525_v4, %v1525_v4 }
 0xa56   : > { %1529 = vadd.xlane.f32.xlu1 %v1528_v6 }
 0xa57   : > { %v1531_v8 = vsel %vm1317_vm9, %v1527_v7, 0.0 }
 0xa58   : > { %1532 = vadd.xlane.f32.xlu0 %v1531_v8 }
 0xae3   : > { %v1530_v11 = vpop.xlane.xlu1 %1529 }
 0xae4   : > { %v1534_v12 = vmul.f32 0.03125, %v1530_v11 }
 0xae5   : > { %v1533_v13 = vpop.xlane.xlu0 %1532 }
 0xae6   : > { %v1536_v16 = vadd.f32 1e-05, %v1534_v12  ;;  %v1535_v17 = vmul.f32 0.03125, %v1533_v13 }
 0xae8   : > { %3090 = vrsqrt.f32 %v1536_v16  ;;  %v1537_v18 = vadd.f32 1e-05, %v1535_v17 }
 0xaea   : > { %3092 = vrsqrt.f32 %v1537_v18 }
 0xaf2   : > { %v3091_v14 = vpop.eup %3090 }
 0xaf3   : > { %v1540_v19 = vmul.f32 %v3091_v14, %v1524_v2 }
 0xaf4   : > { %v3093_v20 = vpop.eup %3092 }
 0xaf5   : > { %v1548_v21 = vmul.f32 %v2650_v15, %v1540_v19  ;;  %v1541_v22 = vmul.f32 %v3093_v20, %v1525_v4 }
 0xaf7   : > { %v1549_v24 = vmul.f32 %v2650_v15, %v1541_v22  ;;  %v3498_v26 = vadd.f32 %v2651_v23, %v1548_v21 }
 0xaf9   : > { %v3500_v27 = vadd.f32 %v2651_v23, %v1549_v24 }
 0xafb   : > { %v1563_v28 = vpack.c.bf16 %v3500_v27, %v3498_v26 }
 0xafd   : > { %2887 = vmatmul.mubr.msk.bf16.vlgmr.msra.gmra.mrb[24].mxu0 %vm661_vm2, %v1563_v28 }
 0xafe   : > { %2892 = vmatprep.mubr.msk.bf16.mxu0 %vm3143_vm0, %v3142_v1 }
 0xbd0   : > { %v1621_v30 = vpop.f32.mrb[24].mxu0 }
 0xbd1   : > { %v2888_v31 = vpop.f32.mrb[25].mxu0  ;;  %v1622_v33 = vadd.f32 %v2657_v29, %v1621_v30 }
 0xbd2   : > { %v1624_v32 = vpop.f32.mrb[26].mxu0 }
 0xbd3   : > { %v1625_v34 = vadd.f32 %v2657_v29, %v1624_v32  ;;  %v2889_v35 = vpop.f32.mrb[27].mxu0 }
 0xbd5   : > { %v3510_v36 = vpack.c.bf16 %v1625_v34, %v1622_v33 }
 0xbd7   : > { %1755 = vrot.lane.b32.xlu0 %v3510_v36, %s3147_s27  ;;  %1630 = vrot.lane.b32.xlu1 %v3510_v36, %s3145_s23  ;;  %s3736_s23 = smov 64   ;;  %s3737_s27 = smov 48  }
 0xbdb   : > { %1878 = vrot.lane.b32.xlu0 %v3510_v36, %s3149_s0  ;;  %1753 = vrot.lane.b32.xlu1 %v3510_v36, %s3144_s22  ;;  %s3735_s22 = smov 56   ;;  %s3738_s0 = smov 40  }
 0xbdf   : > { %2003 = vrot.lane.b32.xlu0 %v3510_v36, %s3732_s18  ;;  %1880 = vrot.lane.b32.xlu1 %v3510_v36, %s3733_s1  ;;  %s3740_s18 = smov 16   ;;  %s3741_s1 = smov 24  }
 0xbe3   : > { %2005 = vrot.lane.b32.xlu1 %v3510_v36, %s3734_s29 }
 0xc49   : > { %v1631_v37 = vpop.permute.xlu1 %1630  ;;  %v1756_v39 = vpop.permute.xlu0 %1755 }
 0xc4a   : > { %v1636_v38 = vsel %vm710_vm3, %v1631_v37, 0  ;;  %v1761_v41 = vsel %vm710_vm3, %v1756_v39, 0 }
 0xc4b   : > { %2891 = vmatpush3.bf16.xpose.msra.mxu0 %v1636_v38 }
 0xc4c   : > { %2902 = vmatprep.subr.bf16.mxu0 %v3142_v1 }
 0xc4d   : > { %v1754_v40 = vpop.permute.xlu1 %1753  ;;  %v1879_v45 = vpop.permute.xlu0 %1878 }
 0xc51   : > { %v1881_v42 = vpop.permute.xlu1 %1880  ;;  %v2004_v47 = vpop.permute.xlu0 %2003 }
 0xc52   : > { %2893 = vmatmul.mubr.msk.bf16.vlgmr.msra.gmra.mrb[28].mxu0 %vm710_vm3, %v3510_v36  ;;  %v1886_v43 = vsel %vm710_vm3, %v1881_v42, 0 }
 0xc53   : > { %2903 = vmatpush3.bf16.xpose.msra.mxu0 %v1761_v41  ;;  %2904 = vmatprep.mubr.msk.bf16.mxu0 %vm3143_vm0, %v3142_v1 }
 0xc54   : > { %2914 = vmatprep.subr.bf16.mxu0 %v3142_v1 }
 0xc55   : > { %v2006_v44 = vpop.permute.xlu1 %2005 }
 0xc56   : > { %v2011_v46 = vsel %vm710_vm3, %v2006_v44, 0 }
 0xc5a   : > { %2905 = vmatmul.mubr.msk.bf16.vlgmr.msra.gmra.mrb[32].mxu0 %vm710_vm3, %v1754_v40 }
 0xc5b   : > { %2915 = vmatpush3.bf16.xpose.msra.mxu0 %v1886_v43  ;;  %2916 = vmatprep.mubr.msk.bf16.mxu0 %vm3143_vm0, %v3142_v1 }
 0xc5c   : > { %2926 = vmatprep.subr.bf16.mxu0 %v3142_v1 }
 0xc62   : > { %2917 = vmatmul.mubr.msk.bf16.vlgmr.msra.gmra.mrb[36].mxu0 %vm710_vm3, %v1879_v45 }
 0xc63   : > { %2927 = vmatpush3.bf16.xpose.msra.mxu0 %v2011_v46  ;;  %2928 = vmatprep.mubr.msk.bf16.mxu0 %vm3143_vm0, %v3142_v1 }
 0xc64   : > { %2938 = vmatprep.subr.bf16.mxu0 %v3142_v1 }
 0xc6a   : > { %2929 = vmatmul.mubr.msk.bf16.vlgmr.msra.gmra.mrb[40].mxu0 %vm710_vm3, %v2004_v47 }
 0xc6b   : > { %2942 = vmatprep.mubr.msk.bf16.mxu0 %vm3143_vm0, %v3142_v1 }
 0xd25   : > { %v1672_v48 = vpop.f32.mrb[28].mxu0 }
 0xd26   : > { %v1679_v49 = vmul.f32 0.35355338, %v1672_v48  ;;  %v2894_v50 = vpop.f32.mrb[29].mxu0 }
 0xd27   : > { %v1675_v51 = vpop.f32.mrb[30].mxu0 }
 0xd28   : > { %v1680_v52 = vmul.f32 0.35355338, %v1675_v51  ;;  %v2895_v53 = vpop.f32.mrb[31].mxu0  ;;  %v1681_v54 = vsel %vm760_vm4, %v1679_v49, -inf }
 0xd29   : > { %1682 = vmax.xlane.f32.xlu1 %v1681_v54 }
 0xd2a   : > { %v1684_v55 = vsel %vm764_vm5, %v1680_v52, -inf }
 0xd2b   : > { %1685 = vmax.xlane.f32.xlu0 %v1684_v55 }
 0xd2d   : > { %v1797_v56 = vpop.f32.mrb[32].mxu0 }
 0xd2e   : > { %v1804_v57 = vmul.f32 0.35355338, %v1797_v56  ;;  %v2906_v58 = vpop.f32.mrb[33].mxu0 }
 0xd2f   : > { %v1800_v59 = vpop.f32.mrb[34].mxu0 }
 0xd30   : > { %v1805_v25 = vmul.f32 0.35355338, %v1800_v59  ;;  %v2907_v60 = vpop.f32.mrb[35].mxu0  ;;  %v1806_v61 = vsel %vm760_vm4, %v1804_v57, -inf }
 0xd31   : > { %1807 = vmax.xlane.f32.xlu0 %v1806_v61 }
 0xd32   : > { %v1809_v62 = vsel %vm764_vm5, %v1805_v25, -inf }
 0xd33   : > { %1810 = vmax.xlane.f32.xlu1 %v1809_v62 }
 0xd35   : > { %v1922_v63 = vpop.f32.mrb[36].mxu0 }
 0xd36   : > { %v1929_v0 = vmul.f32 0.35355338, %v1922_v63  ;;  %v2918_v2 = vpop.f32.mrb[37].mxu0 }
 0xd37   : > { %v1925_v3 = vpop.f32.mrb[38].mxu0 }
 0xd38   : > { %v1930_v4 = vmul.f32 0.35355338, %v1925_v3  ;;  %v2919_v5 = vpop.f32.mrb[39].mxu0  ;;  %v1931_v6 = vsel %vm760_vm4, %v1929_v0, -inf }
 0xd39   : > { %1932 = vmax.xlane.f32.xlu0 %v1931_v6 }
 0xd3a   : > { %v1934_v7 = vsel %vm764_vm5, %v1930_v4, -inf }
 0xd3b   : > { %1935 = vmax.xlane.f32.xlu1 %v1934_v7 }
 0xd3d   : > { %v2047_v8 = vpop.f32.mrb[40].mxu0 }
 0xd3e   : > { %v2054_v9 = vmul.f32 0.35355338, %v2047_v8  ;;  %v2930_v10 = vpop.f32.mrb[41].mxu0 }
 0xd3f   : > { %v2050_v11 = vpop.f32.mrb[42].mxu0 }
 0xd40   : > { %v2055_v12 = vmul.f32 0.35355338, %v2050_v11  ;;  %v2931_v13 = vpop.f32.mrb[43].mxu0  ;;  %v2056_v16 = vsel %vm760_vm4, %v2054_v9, -inf }
 0xd41   : > { %2057 = vmax.xlane.f32.xlu0 %v2056_v16 }
 0xd42   : > { %v2059_v17 = vsel %vm764_vm5, %v2055_v12, -inf }
 0xd43   : > { %2060 = vmax.xlane.f32.xlu1 %v2059_v17 }
 0xdb6   : > { %v1683_v18 = vpop.xlane.xlu1 %1682 }
 0xdb7   : > { %v1687_v14 = vsub.f32 %v1679_v49, %v1683_v18 }
 0xdb8   : > { %v1686_v15 = vpop.xlane.xlu0 %1685 }
 0xdb9   : > { %v1689_v19 = vmul.f32 1.442695, %v1687_v14  ;;  %v1688_v20 = vsub.f32 %v1680_v52, %v1686_v15 }
 0xdbb   : > { %3094 = vpow2.f32 %v1689_v19  ;;  %v1691_v21 = vmul.f32 1.442695, %v1688_v20 }
 0xdbd   : > { %3096 = vpow2.f32 %v1691_v21 }
 0xdbe   : > { %v1808_v22 = vpop.xlane.xlu0 %1807 }
 0xdbf   : > { %v1812_v23 = vsub.f32 %v1804_v57, %v1808_v22 }
 0xdc0   : > { %v1811_v34 = vpop.xlane.xlu1 %1810 }
 0xdc1   : > { %v1814_v24 = vmul.f32 1.442695, %v1812_v23  ;;  %v1813_v35 = vsub.f32 %v1805_v25, %v1811_v34 }
 0xdc3   : > { %3098 = vpow2.f32 %v1814_v24  ;;  %v1816_v39 = vmul.f32 1.442695, %v1813_v35 }
 0xdc5   : > { %v3095_v28 = vpop.eup %3094  ;;  %3100 = vpow2.f32 %v1816_v39 }
 0xdc6   : > { %v1693_v29 = vsel %vm760_vm4, %v3095_v28, 0.0  ;;  %v1933_v38 = vpop.xlane.xlu0 %1932 }
 0xdc7   : > { %v3097_v30 = vpop.eup %3096  ;;  %1694 = vadd.xlane.f32.xlu0 %v1693_v29  ;;  %v1937_v42 = vsub.f32 %v1929_v0, %v1933_v38 }
 0xdc8   : > { %v1696_v31 = vsel %vm764_vm5, %v3097_v30, 0.0  ;;  %v1936_v37 = vpop.xlane.xlu1 %1935 }
 0xdc9   : > { %1697 = vadd.xlane.f32.xlu1 %v1696_v31  ;;  %v1938_v40 = vsub.f32 %v1930_v4, %v1936_v37  ;;  %v1939_v46 = vmul.f32 1.442695, %v1937_v42  ;;  %v3044_v42 = vld [vmem:[%s3703_s5 + $0x10] sm:$0xff]  }
 0xdca   : > { %2939 = vmatpush3.bf16.msra.mxu0 %v3044_v42  ;;  %v2680_v42 = vld [vmem:[%s3709_s11 + $0x1] ss:$0 sm:$0xff] }
 0xdcb   : > { %v1941_v44 = vmul.f32 1.442695, %v1938_v40  ;;  %2940 = vmatprep.subr.bf16.mxu0 %v3142_v1 }
 0xdcd   : > { %v3557_v32 = vpop.eup %3098  ;;  %3102 = vpow2.f32 %v1941_v44 }
 0xdce   : > { %v1818_v33 = vsel %vm760_vm4, %v3557_v32, 0.0  ;;  %v2058_v43 = vpop.xlane.xlu0 %2057  ;;  %3104 = vpow2.f32 %v1939_v46 }
 0xdcf   : > { %1819 = vadd.xlane.f32.xlu0 %v1818_v33  ;;  %v2062_v47 = vsub.f32 %v2054_v9, %v2058_v43  ;;  %v3101_v50 = vpop.eup %3100 }
 0xdd0   : > { %v2061_v41 = vpop.xlane.xlu1 %2060  ;;  %v1821_v51 = vsel %vm764_vm5, %v3101_v50, 0.0 }
 0xdd1   : > { %v2063_v45 = vsub.f32 %v2055_v12, %v2061_v41  ;;  %v2064_v49 = vmul.f32 1.442695, %v2062_v47  ;;  %v3045_v47 = vld [vmem:[%s3703_s5 + $0x18] sm:$0xff]  }
 0xdd2   : > { %2941 = vmatpush3.bf16.msra.mxu0 %v3045_v47 }
 0xdd3   : > { %v2066_v48 = vmul.f32 1.442695, %v2063_v45  ;;  %2954 = vmatprep.subr.bf16.mxu0 %v3142_v1 }
 0xdd5   : > { %3106 = vpow2.f32 %v2066_v48 }
 0xdd6   : > { %3108 = vpow2.f32 %v2064_v49 }
 0xdd7   : > { %v3103_v52 = vpop.eup %3102 }
 0xdd8   : > { %v3105_v53 = vpop.eup %3104  ;;  %v1946_v54 = vsel %vm764_vm5, %v3103_v52, 0.0 }
 0xdd9   : > { %v1943_v56 = vsel %vm760_vm4, %v3105_v53, 0.0 }
 0xdda   : > { %1829 = vrot.lane.b32.xlu1 %v3510_v36, %s3735_s22 }
 0xddf   : > { %v3567_v55 = vpop.eup %3106 }
 0xde0   : > { %v3109_v57 = vpop.eup %3108  ;;  %v2071_v58 = vsel %vm764_vm5, %v3567_v55, 0.0 }
 0xde1   : > { %v2068_v59 = vsel %vm760_vm4, %v3109_v57, 0.0 }
 0xde5   : > { %1704 = vrot.lane.b32.xlu0 %v3510_v36, %s3736_s23 }
 0xdfe   : > { %1822 = vadd.xlane.f32.xlu1 %v1821_v51 }
 0xe02   : > { %1947 = vadd.xlane.f32.xlu1 %v1946_v54 }
 0xe04   : > { %1944 = vadd.xlane.f32.xlu0 %v1943_v56 }
 0xe06   : > { %2072 = vadd.xlane.f32.xlu1 %v2071_v58 }
 0xe08   : > { %2069 = vadd.xlane.f32.xlu0 %v2068_v59 }
 0xe17   : > { %1954 = vrot.lane.b32.xlu1 %v3510_v36, %s3737_s27 }
 0xe1e   : > { %2079 = vrot.lane.b32.xlu0 %v3510_v36, %s3738_s0 }
 0xe54   : > { %v1695_v25 = vpop.xlane.xlu0 %1694 }
 0xe55   : > { %3110 = vrcp.f32 %v1695_v25 }
 0xe56   : > { %v1698_v60 = vpop.xlane.xlu1 %1697 }
 0xe57   : > { %3112 = vrcp.f32 %v1698_v60 }
 0xe5a   : > { %v1830_v5 = vpop.permute.xlu1 %1829 }
 0xe5b   : > { %v1835_v7 = vsel %vm790_vm6, %v1830_v5, 0 }
 0xe5c   : > { %v1820_v61 = vpop.xlane.xlu0 %1819 }
 0xe5d   : > { %3114 = vrcp.f32 %v1820_v61 }
 0xe5f   : > { %v3111_v62 = vpop.eup %3110 }
 0xe60   : > { %v1705_v63 = vpop.permute.xlu0 %1704  ;;  %v1701_v3 = vmul.f32 %v3111_v62, %v3095_v28 }
 0xe61   : > { %v3113_v0 = vpop.eup %3112  ;;  %v1710_v2 = vsel %vm790_vm6, %v1705_v63, 0 }
 0xe62   : > { %v1702_v4 = vmul.f32 %v3113_v0, %v3097_v30  ;;  %2897 = vmatpush3.bf16.msra.mxu1 %v1710_v2 }
 0xe63   : > { %2908 = vmatprep.subr.bf16.mxu1 %v3142_v1 }
 0xe64   : > { %v1703_v6 = vpack.c.bf16 %v1702_v4, %v1701_v3 }
 0xe66   : > { %2899 = vmatmul.mubr.msk.bf16.vlgmr.msra.gmra.mrb[28].mxu1 %vm760_vm4, %v1703_v6 }
 0xe67   : > { %2909 = vmatpush3.bf16.msra.mxu1 %v1835_v7  ;;  %2910 = vmatprep.mubr.msk.bf16.mxu1 %vm3143_vm0, %v3142_v1  ;;  %v3115_v11 = vpop.eup %3114 }
 0xe68   : > { %2920 = vmatprep.subr.bf16.mxu1 %v3142_v1  ;;  %v1826_v16 = vmul.f32 %v3115_v11, %v3557_v32 }
 0xe8b   : > { %v1823_v36 = vpop.xlane.xlu1 %1822 }
 0xe8c   : > { %3116 = vrcp.f32 %v1823_v36  ;;  %v2674_v36 = vld [vmem:[%s3704_s6 + $0x1] ss:$0 sm:$0xff] }
 0xe8f   : > { %v1948_v8 = vpop.xlane.xlu1 %1947 }
 0xe90   : > { %3118 = vrcp.f32 %v1948_v8 }
 0xe91   : > { %v1945_v9 = vpop.xlane.xlu0 %1944 }
 0xe92   : > { %3120 = vrcp.f32 %v1945_v9 }
 0xe93   : > { %v2073_v10 = vpop.xlane.xlu1 %2072 }
 0xe95   : > { %v2070_v12 = vpop.xlane.xlu0 %2069 }
 0xe96   : > { %v3117_v13 = vpop.eup %3116  ;;  %3122 = vrcp.f32 %v2070_v12 }
 0xe97   : > { %v1827_v17 = vmul.f32 %v3117_v13, %v3101_v50  ;;  %v1955_v18 = vpop.permute.xlu1 %1954  ;;  %3124 = vrcp.f32 %v2073_v10 }
 0xe98   : > { %v1960_v19 = vsel %vm790_vm6, %v1955_v18, 0 }
 0xe99   : > { %v1828_v14 = vpack.c.bf16 %v1827_v17, %v1826_v16  ;;  %v2080_v23 = vpop.permute.xlu0 %2079 }
 0xe9a   : > { %v3119_v15 = vpop.eup %3118  ;;  %v2085_v29 = vsel %vm790_vm6, %v2080_v23, 0 }
 0xe9b   : > { %2911 = vmatmul.mubr.msk.bf16.vlgmr.msra.gmra.mrb[32].mxu1 %vm760_vm4, %v1828_v14  ;;  %v1952_v22 = vmul.f32 %v3119_v15, %v3103_v52 }
 0xe9c   : > { %v3121_v20 = vpop.eup %3120  ;;  %2921 = vmatpush3.bf16.msra.mxu1 %v1960_v19  ;;  %2922 = vmatprep.mubr.msk.bf16.mxu1 %vm3143_vm0, %v3142_v1 }
 0xe9d   : > { %v1951_v21 = vmul.f32 %v3121_v20, %v3105_v53  ;;  %2932 = vmatprep.subr.bf16.mxu1 %v3142_v1 }
 0xe9f   : > { %v1953_v24 = vpack.c.bf16 %v1952_v22, %v1951_v21 }
 0xea0   : > { %v3123_v28 = vpop.eup %3122 }
 0xea1   : > { %v3125_v30 = vpop.eup %3124  ;;  %v2076_v31 = vmul.f32 %v3123_v28, %v3109_v57 }
 0xea2   : > { %v2077_v32 = vmul.f32 %v3125_v30, %v3567_v55  ;;  %v3047_v30 = vld [vmem:[%s3705_s7 + $0x18] sm:$0xff]  }
 0xea3   : > { %2923 = vmatmul.mubr.msk.bf16.vlgmr.msra.gmra.mrb[36].mxu1 %vm760_vm4, %v1953_v24 }
 0xea4   : > { %2933 = vmatpush3.bf16.msra.mxu1 %v2085_v29  ;;  %2934 = vmatprep.mubr.msk.bf16.mxu1 %vm3143_vm0, %v3142_v1  ;;  %v2078_v33 = vpack.c.bf16 %v2077_v32, %v2076_v31  ;;  %v3048_v31 = vld [vmem:[%s3707_s9 + $0x20] sm:$0xff]   ;;  %v3049_v32 = vld [vmem:[%s3707_s9 + $0x28] sm:$0xff]  }
 0xea5   : > { %2946 = vmatprep.subr.bf16.mxu1 %v3142_v1 }
 0xeab   : > { %2935 = vmatmul.mubr.msk.bf16.vlgmr.msra.gmra.mrb[40].mxu1 %vm760_vm4, %v2078_v33 }
 0xeac   : > { %2950 = vmatprep.mubr.msk.bf16.mxu1 %vm3143_vm0, %v3142_v1 }
 0xf39   : > { %v1746_v34 = vpop.f32.mrb[28].mxu1 }
 0xf3a   : > { %v2900_v35 = vpop.f32.mrb[29].mxu1 }
 0xf3b   : > { %v1749_v37 = vpop.f32.mrb[30].mxu1 }
 0xf3c   : > { %v2901_v38 = vpop.f32.mrb[31].mxu1 }
 0xf6e   : > { %v1871_v39 = vpop.f32.mrb[32].mxu1 }
 0xf6f   : > { %v2912_v40 = vpop.f32.mrb[33].mxu1 }
 0xf70   : > { %v1874_v41 = vpop.f32.mrb[34].mxu1 }
 0xf71   : > { %v3013_v43 = vpack.i.bf16 %v1874_v41, %v1871_v39  ;;  %v2913_v44 = vpop.f32.mrb[35].mxu1 }
 0xf73   : > { %3014 = vrot.lane.b32.xlu1 %v3013_v43, %s3739_s30 }
 0xf76   : > { %v1996_v45 = vpop.f32.mrb[36].mxu1 }
 0xf77   : > { %v2924_v46 = vpop.f32.mrb[37].mxu1 }
 0xf78   : > { %v1999_v48 = vpop.f32.mrb[38].mxu1  ;;  %v2681_v46 = vld [vmem:[%s3710_s12 + $0x1] ss:$0 sm:$0xff] }
 0xf79   : > { %v3018_v49 = vpack.i.bf16 %v1999_v48, %v1996_v45  ;;  %v2925_v50 = vpop.f32.mrb[39].mxu1 }
 0xf7b   : > { %3019 = vrot.lane.b32.xlu0 %v3018_v49, %s3740_s18 }
 0xf7e   : > { %v2121_v51 = vpop.f32.mrb[40].mxu1 }
 0xf7f   : > { %v2936_v52 = vpop.f32.mrb[41].mxu1 }
 0xf80   : > { %v2124_v53 = vpop.f32.mrb[42].mxu1  ;;  %v3051_v52 = vld [vmem:[%s3707_s9 + $0x38] sm:$0xff]  }
 0xf81   : > { %v3023_v54 = vpack.i.bf16 %v2124_v53, %v2121_v51  ;;  %v2937_v55 = vpop.f32.mrb[43].mxu1  ;;  %v3050_v51 = vld [vmem:[%s3707_s9 + $0x30] sm:$0xff]   ;;  %v2687_v53 = vld [vmem:[%s3706_s8 + $0x1] ss:$0 sm:$0xff] }
 0xf83   : > { %3024 = vrot.lane.b32.xlu1 %v3023_v54, %s3741_s1  ;;  %s548_s1 = scalar_lea.vmem %s3715_s17, %s3742_s19 }
 0xfe5   : > { %v3015_v56 = vpop.permute.xlu1 %3014 }
 0xfe6   : > { %v3017_v58 = vunpack.i.h.bf16 %v3015_v56  ;;  %v3016_v59 = vunpack.i.l.bf16 %v3015_v56 }
 0xfe8   : > { %v2153_v62 = vsel %vm710_vm3, %v1749_v37, %v3017_v58  ;;  %v2152_v63 = vsel %vm710_vm3, %v1746_v34, %v3016_v59 }
 0xfed   : > { %v3020_v57 = vpop.permute.xlu0 %3019 }
 0xfee   : > { %v3022_v25 = vunpack.i.h.bf16 %v3020_v57  ;;  %v3021_v60 = vunpack.i.l.bf16 %v3020_v57 }
 0xff0   : > { %v2154_v3 = vsel %vm1236_vm7, %v2152_v63, %v3021_v60  ;;  %v2155_v4 = vsel %vm1236_vm7, %v2153_v62, %v3022_v25  ;;  %v2700_v62 = vld [vmem:[%s3708_s10 + $0x1] ss:$0 sm:$0xff] }
 0xff5   : > { %v3025_v61 = vpop.permute.xlu1 %3024 }
 0xff6   : > { %v3027_v0 = vunpack.i.h.bf16 %v3025_v61  ;;  %v3026_v2 = vunpack.i.l.bf16 %v3025_v61 }
 0xff8   : > { %v2156_v5 = vsel %vm1239_vm8, %v2154_v3, %v3026_v2  ;;  %v2157_v6 = vsel %vm1239_vm8, %v2155_v4, %v3027_v0 }
 0xff9   : > { %v2163_v7 = vpack.c.bf16 %v2157_v6, %v2156_v5 }
 0xffb   : > { %2943 = vmatmul.mubr.msk.bf16.vlgmr.msra.gmra.mrb[44].mxu0 %vm661_vm2, %v2163_v7 }
 0xffc   : > { %2962 = vmatprep.mubr.msk.bf16.mxu0 %vm3143_vm0, %v3142_v1  ;;  %2955 = vmatpush3.bf16.msra.mxu0 %v3048_v31 }
 0xffd   : > { %2956 = vmatprep.subr.bf16.mxu0 %v3142_v1 }
0x1000   : > { %2957 = vmatpush3.bf16.msra.mxu0 %v3049_v32 }
0x1001   : > { %2958 = vmatprep.subr.bf16.mxu0 %v3142_v1 }
0x1004   : > { %2959 = vmatpush3.bf16.msra.mxu0 %v3050_v51 }
0x1005   : > { %2960 = vmatprep.subr.bf16.mxu0 %v3142_v1 }
0x1008   : > { %2961 = vmatpush3.bf16.msra.mxu0 %v3051_v52 }
0x10ce   : > { %v2221_v8 = vpop.f32.mrb[44].mxu0 }
0x10cf   : > { %v2222_v9 = vadd.f32 %v2674_v36, %v2221_v8  ;;  %v2944_v10 = vpop.f32.mrb[45].mxu0 }
0x10d0   : > { %v2224_v11 = vpop.f32.mrb[46].mxu0 }
0x10d1   : > { %v2225_v12 = vadd.f32 %v2674_v36, %v2224_v11  ;;  %v2945_v13 = vpop.f32.mrb[47].mxu0  ;;  %v2228_v16 = vadd.f32 %v2222_v9, %v3498_v26 }
0x10d3   : > { %v2234_v17 = vsel %vm661_vm2, %v2228_v16, 0.0  ;;  %v2229_v18 = vadd.f32 %v2225_v12, %v3500_v27  ;;  %v3046_v27 = vld [vmem:[%s3705_s7 + $0x10] sm:$0xff]  }
0x10d4   : > { %2235 = vadd.xlane.f32.xlu0 %v2234_v17  ;;  %2947 = vmatpush3.bf16.msra.mxu1 %v3046_v27  ;;  %v2708_v27 = vld [vmem:[%s3711_s13 + $0x1] ss:$0 sm:$0xff] }
0x10d5   : > { %v2237_v14 = vsel %vm1317_vm9, %v2229_v18, 0.0  ;;  %2948 = vmatprep.subr.bf16.mxu1 %v3142_v1 }
0x10d6   : > { %2238 = vadd.xlane.f32.xlu1 %v2237_v14 }
0x10d8   : > { %2949 = vmatpush3.bf16.msra.mxu1 %v3047_v30 }
0x10d9   : > { %2966 = vmatprep.subr.bf16.mxu1 %v3142_v1 }
0x1161   : > { %v2236_v15 = vpop.xlane.xlu0 %2235 }
0x1162   : > { %v2240_v19 = vmul.f32 0.03125, %v2236_v15 }
0x1163   : > { %v2239_v20 = vpop.xlane.xlu1 %2238 }
0x1164   : > { %v2242_v21 = vsub.f32 %v2228_v16, %v2240_v19  ;;  %v2241_v22 = vmul.f32 0.03125, %v2239_v20  ;;  %v3052_v19 = vld [vmem:[%s3713_s15] sm:$0xff]   ;;  %v3053_v20 = vld [vmem:[%s3713_s15 + $0x8] sm:$0xff]  }
0x1166   : > { %v2243_v23 = vsub.f32 %v2229_v18, %v2241_v22  ;;  %v2244_v24 = vmul.f32 %v2242_v21, %v2242_v21 }
0x1168   : > { %v2246_v28 = vsel %vm661_vm2, %v2244_v24, 0.0  ;;  %v2245_v29 = vmul.f32 %v2243_v23, %v2243_v23 }
0x1169   : > { %2247 = vadd.xlane.f32.xlu0 %v2246_v28 }
0x116a   : > { %v2249_v26 = vsel %vm1317_vm9, %v2245_v29, 0.0 }
0x116d   : > { %2250 = vadd.xlane.f32.xlu0 %v2249_v26 }
0x11f6   : > { %v2248_v33 = vpop.xlane.xlu0 %2247 }
0x11f7   : > { %v2252_v34 = vmul.f32 0.03125, %v2248_v33 }
0x11f9   : > { %v2254_v35 = vadd.f32 1e-05, %v2252_v34 }
0x11fa   : > { %v2251_v37 = vpop.xlane.xlu0 %2250 }
0x11fb   : > { %3126 = vrsqrt.f32 %v2254_v35  ;;  %v2253_v38 = vmul.f32 0.03125, %v2251_v37 }
0x11fd   : > { %v2255_v39 = vadd.f32 1e-05, %v2253_v38 }
0x11ff   : > { %3128 = vrsqrt.f32 %v2255_v39  ;;  %v2710_v39 = vld [vmem:[%s3714_s16] ss:$0 sm:$0xff] }
0x1205   : > { %v3127_v40 = vpop.eup %3126 }
0x1206   : > { %v2258_v41 = vmul.f32 %v3127_v40, %v2242_v21 }
0x1208   : > { %v2266_v44 = vmul.f32 %v2680_v42, %v2258_v41 }
0x1209   : > { %v3129_v43 = vpop.eup %3128 }
0x120a   : > { %v2259_v45 = vmul.f32 %v3129_v43, %v2243_v23  ;;  %v2274_v48 = vadd.f32 %v2681_v46, %v2266_v44 }
0x120c   : > { %v2267_v47 = vmul.f32 %v2680_v42, %v2259_v45 }
0x120e   : > { %v2275_v49 = vadd.f32 %v2681_v46, %v2267_v47 }
0x1210   : > { %v2281_v50 = vpack.c.bf16 %v2275_v49, %v2274_v48 }
0x1212   : > { %2951 = vmatmul.mubr.msk.bf16.vlgmr.msra.gmra.mrb[44].mxu1 %vm661_vm2, %v2281_v50 }
0x1213   : > { %2970 = vmatprep.mubr.msk.bf16.mxu1 %vm3143_vm0, %v3142_v1  ;;  %2967 = vmatpush3.bf16.msra.mxu1 %v3052_v19 }
0x1214   : > { %2968 = vmatprep.subr.bf16.mxu1 %v3142_v1  ;;  %v2709_v1 = vld [vmem:[%s3712_s14 + $0x1] ss:$0 sm:$0xff] }
0x1217   : > { %2969 = vmatpush3.bf16.msra.mxu1 %v3053_v20 }
0x12e5   : > { %v2339_v54 = vpop.f32.mrb[44].mxu1 }
0x12e6   : > { %v2340_v55 = vadd.f32 %v2687_v53, %v2339_v54  ;;  %v2952_v56 = vpop.f32.mrb[45].mxu1 }
0x12e7   : > { %v2342_v57 = vpop.f32.mrb[46].mxu1 }
0x12e8   : > { %v2343_v58 = vadd.f32 %v2687_v53, %v2342_v57  ;;  %v2953_v59 = vpop.f32.mrb[47].mxu1  ;;  %v2346_v25 = vmax.f32 %v2340_v55, 0.0 }
0x12ea   : > { %v2347_v60 = vmax.f32 %v2343_v58, 0.0 }
0x12ec   : > { %v2357_v61 = vpack.c.bf16 %v2347_v60, %v2346_v25 }
0x12ee   : > { %2963 = vmatmul.mubr.msk.bf16.vlgmr.msra.gmra.mrb[48].mxu0 %vm592_vm1, %v2357_v61 }
0x13c1   : > { %v2427_v63 = vpop.f32.mrb[48].mxu0 }
0x13c2   : > { %v2428_v0 = vadd.f32 %v2700_v62, %v2427_v63  ;;  %v2964_v2 = vpop.f32.mrb[49].mxu0 }
0x13c3   : > { %v2430_v3 = vpop.f32.mrb[50].mxu0 }
0x13c4   : > { %v2431_v4 = vadd.f32 %v2700_v62, %v2430_v3  ;;  %v2965_v5 = vpop.f32.mrb[51].mxu0  ;;  %v2434_v6 = vadd.f32 %v2428_v0, %v2274_v48 }
0x13c6   : > { %v2440_v7 = vsel %vm661_vm2, %v2434_v6, 0.0  ;;  %v2435_v36 = vadd.f32 %v2431_v4, %v2275_v49 }
0x13c7   : > { %2441 = vadd.xlane.f32.xlu1 %v2440_v7 }
0x13c8   : > { %v2443_v8 = vsel %vm1317_vm9, %v2435_v36, 0.0 }
0x13c9   : > { %2444 = vadd.xlane.f32.xlu0 %v2443_v8 }
0x1454   : > { %v2442_v9 = vpop.xlane.xlu1 %2441 }
0x1455   : > { %v2446_v10 = vmul.f32 0.03125, %v2442_v9 }
0x1456   : > { %v2445_v11 = vpop.xlane.xlu0 %2444 }
0x1457   : > { %v2448_v12 = vsub.f32 %v2434_v6, %v2446_v10  ;;  %v2447_v13 = vmul.f32 0.03125, %v2445_v11 }
0x1459   : > { %v2449_v16 = vsub.f32 %v2435_v36, %v2447_v13  ;;  %v2450_v17 = vmul.f32 %v2448_v12, %v2448_v12 }
0x145b   : > { %v2452_v18 = vsel %vm661_vm2, %v2450_v17, 0.0  ;;  %v2451_v14 = vmul.f32 %v2449_v16, %v2449_v16 }
0x145c   : > { %2453 = vadd.xlane.f32.xlu1 %v2452_v18 }
0x145d   : > { %v2455_v15 = vsel %vm1317_vm9, %v2451_v14, 0.0 }
0x145e   : > { %2456 = vadd.xlane.f32.xlu0 %v2455_v15 }
0x14e9   : > { %v2454_v21 = vpop.xlane.xlu1 %2453 }
0x14ea   : > { %v2458_v22 = vmul.f32 0.03125, %v2454_v21 }
0x14eb   : > { %v2457_v23 = vpop.xlane.xlu0 %2456 }
0x14ec   : > { %v2460_v24 = vadd.f32 1e-05, %v2458_v22  ;;  %v2459_v28 = vmul.f32 0.03125, %v2457_v23 }
0x14ee   : > { %3130 = vrsqrt.f32 %v2460_v24  ;;  %v2461_v29 = vadd.f32 1e-05, %v2459_v28 }
0x14f0   : > { %3132 = vrsqrt.f32 %v2461_v29 }
0x14f8   : > { %v3131_v26 = vpop.eup %3130 }
0x14f9   : > { %v2464_v30 = vmul.f32 %v3131_v26, %v2448_v12 }
0x14fa   : > { %v3133_v31 = vpop.eup %3132 }
0x14fb   : > { %v2472_v32 = vmul.f32 %v2708_v27, %v2464_v30  ;;  %v2465_v33 = vmul.f32 %v3133_v31, %v2449_v16 }
0x14fd   : > { %v2473_v34 = vmul.f32 %v2708_v27, %v2465_v33  ;;  %v2480_v35 = vadd.f32 %v2709_v1, %v2472_v32 }
0x14ff   : > { %v2481_v37 = vadd.f32 %v2709_v1, %v2473_v34 }
0x1501   : > { %v2486_v38 = vpack.c.bf16 %v2481_v37, %v2480_v35 }
0x1503   : > { %2971 = vmatmul.mubr.msk.bf16.vlgmr.msra.gmra.mrb[48].mxu1 %vm661_vm2, %v2486_v38 }
0x15d6   : > { %v2543_v40 = vpop.f32.mrb[48].mxu1 }
0x15d7   : > { %v2544_v41 = vadd.f32 %v2710_v39, %v2543_v40  ;;  %v2972_v42 = vpop.f32.mrb[49].mxu1 }
0x15d8   : > { %v2546_v43 = vpop.f32.mrb[50].mxu1 }
0x15d9   : > { %2550 = vst.msk [vmem:[%s548_s1] sm:$0xff] %vm661_vm2, %v2544_v41  ;;  %v2547_v44 = vadd.f32 %v2710_v39, %v2546_v43  ;;  %v2973_v45 = vpop.f32.mrb[51].mxu1 }
0x15db   : > { %2551 = vst.msk [vmem:[%s548_s1 + $0x8] sm:$0xf] %vm1317_vm9, %v2547_v44 }
0x15dc PF: > { %s27_s24 = sadd.s32 1, %s3140_s24  }
0x15dd   : > { %p24_p4 = scmp.ge.s32.totalorder %s27_s24, 4  }
0x15df   :  { %26 = sbr.rel (!%p24_p4) target bundleno = 3 (0x3), region = 130 }

// kernel: transformer_encoder_forward.7
= control target key start
LH: loop header
LB: loop body
LE: loop exit
PB: predicated region body
PF: predicated region fallthrough
CT: control target
= control target key end

     0   :  { %s3277_s24 = smov 0   ;;  %s3732_s0 = inlined_call_operand.vmem [shape: f32[2,12,96], index: 0, kind: input, shape index: {}]   ;;  %s3733_s1 = inlined_call_operand.vmem [shape: bf16[96,32], index: 1, kind: input, shape index: {}]   ;;  %s3734_s2 = inlined_call_operand.vmem [shape: f32[1,32], index: 2, kind: input, shape index: {}]   ;;  %s3735_s3 = inlined_call_operand.vmem [shape: bf16[2,32,96], index: 3, kind: input, shape index: {}]   ;;  %s3736_s4 = inlined_call_operand.vmem [shape: f32[2,1,96], index: 4, kind: input, shape index: {}]   ;;  %s3737_s5 = inlined_call_operand.vmem [shape: bf16[2,32,32], index: 5, kind: input, shape index: {}]   ;;  %s3738_s6 = inlined_call_operand.vmem [shape: f32[2,1,32], index: 6, kind: input, shape index: {}]   ;;  %s3739_s7 = inlined_call_operand.vmem [shape: bf16[2,32,64], index: 7, kind: input, shape index: {}]   ;;  %s3740_s8 = inlined_call_operand.vmem [shape: f32[2,1,64], index: 8, kind: input, shape index: {}]   ;;  %s3741_s9 = inlined_call_operand.vmem [shape: bf16[2,64,32], index: 9, kind: input, shape index: {}]   ;;  %s3742_s10 = inlined_call_operand.vmem [shape: f32[2,1,32], index: 10, kind: input, shape index: {}]   ;;  %s3743_s11 = inlined_call_operand.vmem [shape: f32[2,1,32], index: 11, kind: input, shape index: {}]   ;;  %s3744_s12 = inlined_call_operand.vmem [shape: f32[2,1,32], index: 12, kind: input, shape index: {}]   ;;  %s3745_s13 = inlined_call_operand.vmem [shape: f32[2,1,32], index: 13, kind: input, shape index: {}]   ;;  %s3746_s14 = inlined_call_operand.vmem [shape: f32[2,1,32], index: 14, kind: input, shape index: {}]   ;;  %s3747_s15 = inlined_call_operand.vmem [shape: bf16[32,4], index: 15, kind: input, shape index: {}]   ;;  %s3748_s16 = inlined_call_operand.vmem [shape: f32[1,4], index: 16, kind: input, shape index: {}]   ;;  %s3749_s17 = inlined_call_operand.vmem [shape: f32[2,12,4], index: 17, kind: output, shape index: {}]  }
   0x1   :  { %3762 = sst [smem:[#allocation2_spill]] %s3732_s0 }
   0x2   :  { %3763 = sst [smem:[#allocation3_spill]] %s3733_s1 }
   0x3 LB: > { %s2626_s25 = sadd.s32 4294967295, %s3169_s24   ;;  %p2630_p0 = scmp.ge.s32.totalorder %s3169_s24, 1  ;;  %s3169_s24 = sphi %s3277_s24, %s27_s24  }
   0x4   : > { %p487_p1 = scmp.lt.s32.totalorder %s3169_s24, 3 }
   0x6   : > { %p488_p2 = pnand %p2630_p0, %p487_p1 }
   0x7   : > { %s3764_s28 = sld [smem:[#allocation3_spill]] (!%p488_p2)  ;;  %v3171_v1 = vmov (!%p488_p2), 0.0   ;;  %vm3172_vm0 = vmmov (!%p488_p2), 0   ;;  %p539_p3 = scmp.lt.s32.totalorder (!%p488_p2), %s2626_s25, 1  ;;  %vm608_vm1 = vcmask (!%p488_p2), 785408   ;;  %v3061_v10 = vld [vmem:[%s3735_s3] sm:$0xff] (!%p488_p2)  }
   0x8   : > { %491 = sbr.rel (%p488_p2) target bundleno = 5600 (0x15e0), region = 88  ;;  %2809 = vmatprep.subr.bf16.mxu0 (!%p488_p2), %v3171_v1  ;;  %2825 = vmatprep.subr.bf16.mxu1 (!%p488_p2), %v3171_v1  ;;  %s3765_s27 = sld [smem:[#allocation2_spill]] (!%p488_p2)  ;;  %v3062_v11 = vld [vmem:[%s3735_s3 + $0x8] sm:$0xff] (!%p488_p2)   ;;  %v2635_v12 = vld [vmem:[%s3734_s2] ss:$0 sm:$0xff] (!%p488_p2)  ;;  %vm677_vm2 = vcmask (!%p488_p2), 261120  }
   0x9   : > { %2821 = vmatprep.mubr.msk.bf16.mxu0 (!%p488_p2), %vm3172_vm0, %v3171_v1  ;;  %2829 = vmatprep.mubr.msk.bf16.mxu1 (!%p488_p2), %vm3172_vm0, %v3171_v1  ;;  %v2643_v20 = vld [vmem:[%s3736_s4] ss:$0 sm:$0xff] (!%p488_p2)  ;;  %s3174_s0 = smov (!%p488_p2), 96   ;;  %s3760_s30 = smov (!%p488_p2), 80   ;;  %vm726_vm3 = vcmask (!%p488_p2), 64512   ;;  %vm776_vm4 = vcmask (!%p488_p2), 97280  }
   0xa   : > { %2826 = vmatpush3.bf16.msra.mxu1 (!%p488_p2), %v3061_v10  ;;  %s3176_s18 = smov (!%p488_p2), 88   ;;  %s3759_s19 = smov (!%p488_p2), 72   ;;  %vm780_vm5 = vcmask (!%p488_p2), 93184   ;;  %vm806_vm6 = vcmask (!%p488_p2), 1045504   ;;  %vm1252_vm7 = vcmask (!%p488_p2), 130048   ;;  %vm1255_vm8 = vcmask (!%p488_p2), 195584  }
   0xb   : > { %2827 = vmatprep.subr.bf16.mxu1 (!%p488_p2), %v3171_v1  ;;  %s3178_s1 = smov (!%p488_p2), 112   ;;  %s3761_s21 = smov (!%p488_p2), 104   ;;  %vm1333_vm9 = vcmask (!%p488_p2), 257024   ;;  %vm1484_vm10 = vcmask (!%p488_p2), 523264   ;;  %vm2567_vm11 = vcmask (!%p488_p2), 31744   ;;  %vm2569_vm12 = vcmask (!%p488_p2), 27648  }
   0xc   : > { %s3755_s22 = smov (!%p488_p2), 56   ;;  %s3754_s23 = smov (!%p488_p2), 64  }
   0xd   : > { %v3055_v0 = vld [vmem:[%s3764_s28] sm:$0xff] (!%p488_p2)   ;;  %v3056_v2 = vld [vmem:[%s3764_s28 + $0x8] sm:$0xff] (!%p488_p2)   ;;  %v3057_v3 = vld [vmem:[%s3764_s28 + $0x10] sm:$0xff] (!%p488_p2)   ;;  %s3753_s26 = smov (!%p488_p2), 48  }
   0xe   : > { %2810 = vmatpush3.bf16.msra.mxu0 (!%p488_p2), %v3055_v0  ;;  %v3058_v4 = vld [vmem:[%s3764_s28 + $0x18] sm:$0xff] (!%p488_p2)   ;;  %v3059_v5 = vld [vmem:[%s3764_s28 + $0x20] sm:$0xff] (!%p488_p2)   ;;  %v3060_v6 = vld [vmem:[%s3764_s28 + $0x28] sm:$0xff] (!%p488_p2)   ;;  %2828 = vmatpush3.bf16.msra.mxu1 (!%p488_p2), %v3062_v11 }
   0xf   : > { %2811 = vmatprep.subr.bf16.mxu0 %v3171_v1  ;;  %s3778_s25 = smov (!%p539_p3, %s2626_s25), 1  ;;  %2833 = vmatprep.subr.bf16.mxu1 %v3171_v1 }
  0x10   : > { %s3751_s20 = sshll.u32 %s3778_s25, 4 }
  0x11   : > { %s543_s29 = scalar_lea.vmem %s3765_s27, %s3751_s20  ;;  %s3752_s27 = smov 40  }
  0x12   : > { %2812 = vmatpush3.bf16.msra.mxu0 %v3056_v2  ;;  %v550_v7 = vld [vmem:[%s543_s29] sm:$0xff]  ;;  %v551_v8 = vld [vmem:[%s543_s29 + $0x8] sm:$0xf]  ;;  %s3173_s29 = smov 120   ;;  %s3756_s20 = smov 8  }
  0x13   : > { %2813 = vmatprep.subr.bf16.mxu0 %v3171_v1  ;;  %v564_v9 = vpack.c.bf16 %v551_v8, %v550_v7 }
  0x16   : > { %2814 = vmatpush3.bf16.msra.mxu0 %v3057_v3 }
  0x17   : > { %2815 = vmatprep.subr.bf16.mxu0 %v3171_v1 }
  0x1a   : > { %2816 = vmatpush3.bf16.msra.mxu0 %v3058_v4 }
  0x1b   : > { %2817 = vmatprep.subr.bf16.mxu0 %v3171_v1 }
  0x1e   : > { %2818 = vmatpush3.bf16.msra.mxu0 %v3059_v5 }
  0x1f   : > { %2819 = vmatprep.subr.bf16.mxu0 %v3171_v1 }
  0x22   : > { %2820 = vmatpush3.bf16.msra.mxu0 %v3060_v6 }
  0x23   : > { %2845 = vmatprep.subr.bf16.mxu0 %v3171_v1 }
  0x25   : > { %2822 = vmatmul.mubr.msk.bf16.vlgmr.msra.gmra.mrb[0].mxu0 %vm608_vm1, %v564_v9 }
  0x26   : > { %2847 = vmatprep.mubr.msk.bf16.mxu0 %vm3172_vm0, %v3171_v1 }
  0xf8   : > { %v646_v13 = vpop.f32.mrb[0].mxu0 }
  0xf9   : > { %v2823_v14 = vpop.f32.mrb[1].mxu0  ;;  %v3336_v16 = vadd.f32 %v2635_v12, %v646_v13 }
  0xfa   : > { %v649_v15 = vpop.f32.mrb[2].mxu0 }
  0xfb   : > { %v3338_v17 = vadd.f32 %v2635_v12, %v649_v15  ;;  %v2824_v18 = vpop.f32.mrb[3].mxu0 }
  0xfd   : > { %v657_v19 = vpack.c.bf16 %v3338_v17, %v3336_v16 }
  0xff   : > { %2830 = vmatmul.mubr.msk.bf16.vlgmr.msra.gmra.mrb[0].mxu1 %vm677_vm2, %v657_v19 }
 0x100   : > { %2835 = vmatprep.mubr.msk.bf16.mxu1 %vm3172_vm0, %v3171_v1 }
 0x1d2   : > { %v715_v21 = vpop.f32.mrb[0].mxu1 }
 0x1d3   : > { %v2831_v22 = vpop.f32.mrb[1].mxu1  ;;  %v716_v24 = vadd.f32 %v2643_v20, %v715_v21 }
 0x1d4   : > { %v718_v23 = vpop.f32.mrb[2].mxu1 }
 0x1d5   : > { %v719_v25 = vadd.f32 %v2643_v20, %v718_v23  ;;  %v2832_v26 = vpop.f32.mrb[3].mxu1 }
 0x1d7   : > { %v3348_v27 = vpack.c.bf16 %v719_v25, %v716_v24 }
 0x1d9   : > { %851 = vrot.lane.b32.xlu1 %v3348_v27, %s3173_s29  ;;  %724 = vrot.lane.b32.xlu0 %v3348_v27, %s3174_s0 }
 0x1dd   : > { %978 = vrot.lane.b32.xlu1 %v3348_v27, %s3760_s30  ;;  %853 = vrot.lane.b32.xlu0 %v3348_v27, %s3176_s18 }
 0x1e1   : > { %1103 = vrot.lane.b32.xlu1 %v3348_v27, %s3759_s19  ;;  %976 = vrot.lane.b32.xlu0 %v3348_v27, %s3178_s1 }
 0x1e5   : > { %1101 = vrot.lane.b32.xlu0 %v3348_v27, %s3761_s21  ;;  %s3773_s21 = smov 8  }
 0x24b   : > { %v725_v28 = vpop.permute.xlu0 %724  ;;  %v852_v30 = vpop.permute.xlu1 %851 }
 0x24c   : > { %v731_v29 = vsel %vm726_vm3, %v725_v28, 0 }
 0x24d   : > { %2834 = vmatpush3.bf16.xpose.msra.mxu1 %v731_v29 }
 0x24e   : > { %2839 = vmatprep.subr.bf16.mxu1 %v3171_v1 }
 0x24f   : > { %v854_v31 = vpop.permute.xlu0 %853  ;;  %v979_v33 = vpop.permute.xlu1 %978 }
 0x250   : > { %v859_v32 = vsel %vm726_vm3, %v854_v31, 0  ;;  %v984_v34 = vsel %vm726_vm3, %v979_v33, 0 }
 0x251   : > { %2846 = vmatpush3.bf16.xpose.msra.mxu0 %v859_v32 }
 0x252   : > { %2857 = vmatprep.subr.bf16.mxu0 %v3171_v1 }
 0x253   : > { %v1104_v35 = vpop.permute.xlu1 %1103  ;;  %v977_v36 = vpop.permute.xlu0 %976 }
 0x254   : > { %2836 = vmatmul.mubr.msk.bf16.vlgmr.msra.gmra.mrb[4].mxu1 %vm726_vm3, %v3348_v27  ;;  %v1109_v37 = vsel %vm726_vm3, %v1104_v35, 0 }
 0x255   : > { %2841 = vmatprep.mubr.msk.bf16.mxu1 %vm3172_vm0, %v3171_v1 }
 0x257   : > { %v1102_v38 = vpop.permute.xlu0 %1101 }
 0x258   : > { %2848 = vmatmul.mubr.msk.bf16.vlgmr.msra.gmra.mrb[4].mxu0 %vm726_vm3, %v852_v30 }
 0x259   : > { %2858 = vmatpush3.bf16.xpose.msra.mxu0 %v984_v34  ;;  %2859 = vmatprep.mubr.msk.bf16.mxu0 %vm3172_vm0, %v3171_v1 }
 0x25a   : > { %2869 = vmatprep.subr.bf16.mxu0 %v3171_v1 }
 0x260   : > { %2860 = vmatmul.mubr.msk.bf16.vlgmr.msra.gmra.mrb[8].mxu0 %vm726_vm3, %v977_v36 }
 0x261   : > { %2870 = vmatpush3.bf16.xpose.msra.mxu0 %v1109_v37  ;;  %2871 = vmatprep.mubr.msk.bf16.mxu0 %vm3172_vm0, %v3171_v1 }
 0x262   : > { %2881 = vmatprep.subr.bf16.mxu0 %v3171_v1 }
 0x268   : > { %2872 = vmatmul.mubr.msk.bf16.vlgmr.msra.gmra.mrb[12].mxu0 %vm726_vm3, %v1102_v38 }
 0x269   : > { %2885 = vmatprep.mubr.msk.bf16.mxu0 %vm3172_vm0, %v3171_v1 }
 0x327   : > { %v767_v39 = vpop.f32.mrb[4].mxu1 }
 0x328   : > { %v774_v40 = vmul.f32 0.35355338, %v767_v39  ;;  %v2837_v41 = vpop.f32.mrb[5].mxu1 }
 0x329   : > { %v770_v42 = vpop.f32.mrb[6].mxu1 }
 0x32a   : > { %v775_v43 = vmul.f32 0.35355338, %v770_v42  ;;  %v2838_v44 = vpop.f32.mrb[7].mxu1  ;;  %v777_v45 = vsel %vm776_vm4, %v774_v40, -inf }
 0x32b   : > { %778 = vmax.xlane.f32.xlu1 %v777_v45  ;;  %v895_v46 = vpop.f32.mrb[4].mxu0 }
 0x32c   : > { %v902_v47 = vmul.f32 0.35355338, %v895_v46  ;;  %v2849_v48 = vpop.f32.mrb[5].mxu0  ;;  %v781_v49 = vsel %vm780_vm5, %v775_v43, -inf }
 0x32d   : > { %782 = vmax.xlane.f32.xlu0 %v781_v49  ;;  %v898_v50 = vpop.f32.mrb[6].mxu0 }
 0x32e   : > { %v903_v51 = vmul.f32 0.35355338, %v898_v50  ;;  %v2850_v52 = vpop.f32.mrb[7].mxu0  ;;  %v904_v53 = vsel %vm776_vm4, %v902_v47, -inf }
 0x330   : > { %v907_v54 = vsel %vm780_vm5, %v903_v51, -inf }
 0x331   : > { %905 = vmax.xlane.f32.xlu0 %v904_v53  ;;  %908 = vmax.xlane.f32.xlu1 %v907_v54 }
 0x333   : > { %v1020_v55 = vpop.f32.mrb[8].mxu0 }
 0x334   : > { %v3389_v56 = vmul.f32 0.35355338, %v1020_v55  ;;  %v2861_v57 = vpop.f32.mrb[9].mxu0 }
 0x335   : > { %v1023_v58 = vpop.f32.mrb[10].mxu0 }
 0x336   : > { %v1028_v59 = vmul.f32 0.35355338, %v1023_v58  ;;  %v2862_v60 = vpop.f32.mrb[11].mxu0  ;;  %v1029_v61 = vsel %vm776_vm4, %v3389_v56, -inf }
 0x337   : > { %1030 = vmax.xlane.f32.xlu0 %v1029_v61 }
 0x338   : > { %v1032_v62 = vsel %vm780_vm5, %v1028_v59, -inf }
 0x339   : > { %1033 = vmax.xlane.f32.xlu1 %v1032_v62 }
 0x33b   : > { %v1145_v63 = vpop.f32.mrb[12].mxu0 }
 0x33c   : > { %v3394_v0 = vmul.f32 0.35355338, %v1145_v63  ;;  %v2873_v2 = vpop.f32.mrb[13].mxu0 }
 0x33d   : > { %v1148_v3 = vpop.f32.mrb[14].mxu0 }
 0x33e   : > { %v1153_v4 = vmul.f32 0.35355338, %v1148_v3  ;;  %v2874_v5 = vpop.f32.mrb[15].mxu0  ;;  %v1154_v6 = vsel %vm776_vm4, %v3394_v0, -inf }
 0x33f   : > { %1155 = vmax.xlane.f32.xlu0 %v1154_v6 }
 0x340   : > { %v1157_v7 = vsel %vm780_vm5, %v1153_v4, -inf }
 0x341   : > { %1158 = vmax.xlane.f32.xlu1 %v1157_v7 }
 0x352   : > { %927 = vrot.lane.b32.xlu1 %v3348_v27, %s3755_s22  ;;  %s3766_s22 = smov 104  }
 0x3b8   : > { %v779_v8 = vpop.xlane.xlu1 %778 }
 0x3b9   : > { %v784_v9 = vsub.f32 %v774_v40, %v779_v8 }
 0x3ba   : > { %v783_v10 = vpop.xlane.xlu0 %782 }
 0x3bb   : > { %v786_v11 = vmul.f32 1.442695, %v784_v9  ;;  %v785_v12 = vsub.f32 %v775_v43, %v783_v10 }
 0x3bd   : > { %3083 = vpow2.f32 %v786_v11  ;;  %v788_v13 = vmul.f32 1.442695, %v785_v12 }
 0x3be   : > { %v906_v14 = vpop.xlane.xlu0 %905  ;;  %v909_v15 = vpop.xlane.xlu1 %908 }
 0x3bf   : > { %3085 = vpow2.f32 %v788_v13  ;;  %v910_v18 = vsub.f32 %v902_v47, %v906_v14  ;;  %v911_v19 = vsub.f32 %v903_v51, %v909_v15 }
 0x3c1   : > { %v912_v20 = vmul.f32 1.442695, %v910_v18  ;;  %v914_v21 = vmul.f32 1.442695, %v911_v19 }
 0x3c3   : > { %3087 = vpow2.f32 %v912_v20 }
 0x3c4   : > { %3089 = vpow2.f32 %v914_v21  ;;  %v1031_v41 = vpop.xlane.xlu0 %1030 }
 0x3c5   : > { %v1035_v42 = vsub.f32 %v3389_v56, %v1031_v41 }
 0x3c6   : > { %v1034_v22 = vpop.xlane.xlu1 %1033 }
 0x3c7   : > { %v3084_v23 = vpop.eup %3083  ;;  %v1036_v24 = vsub.f32 %v1028_v59, %v1034_v22  ;;  %v1037_v44 = vmul.f32 1.442695, %v1035_v42 }
 0x3c8   : > { %v790_v25 = vsel %vm776_vm4, %v3084_v23, 0.0 }
 0x3c9   : > { %v3086_v26 = vpop.eup %3085  ;;  %v1039_v28 = vmul.f32 1.442695, %v1036_v24  ;;  %791 = vadd.xlane.f32.xlu0 %v790_v25 }
 0x3ca   : > { %v793_v29 = vsel %vm780_vm5, %v3086_v26, 0.0 }
 0x3cb   : > { %3091 = vpow2.f32 %v1039_v28  ;;  %794 = vadd.xlane.f32.xlu1 %v793_v29 }
 0x3cc   : > { %v1156_v43 = vpop.xlane.xlu0 %1155 }
 0x3cd   : > { %v3088_v30 = vpop.eup %3087  ;;  %v1160_v45 = vsub.f32 %v3394_v0, %v1156_v43 }
 0x3ce   : > { %v3090_v31 = vpop.eup %3089  ;;  %v1159_v32 = vpop.xlane.xlu1 %1158  ;;  %v916_v33 = vsel %vm776_vm4, %v3088_v30, 0.0 }
 0x3cf   : > { %v1161_v34 = vsub.f32 %v1153_v4, %v1159_v32  ;;  %917 = vadd.xlane.f32.xlu0 %v916_v33  ;;  %v919_v35 = vsel %vm780_vm5, %v3090_v31, 0.0  ;;  %v1162_v46 = vmul.f32 1.442695, %v1160_v45 }
 0x3d0   : > { %920 = vadd.xlane.f32.xlu1 %v919_v35  ;;  %v3063_v35 = vld [vmem:[%s3737_s5] sm:$0xff]  }
 0x3d1   : > { %v1164_v36 = vmul.f32 1.442695, %v1161_v34  ;;  %2882 = vmatpush3.bf16.msra.mxu0 %v3063_v35 }
 0x3d2   : > { %v928_v51 = vpop.permute.xlu1 %927  ;;  %2883 = vmatprep.subr.bf16.mxu0 %v3171_v1 }
 0x3d3   : > { %3093 = vpow2.f32 %v1164_v36  ;;  %v933_v0 = vsel %vm806_vm6, %v928_v51, 0 }
 0x3d4   : > { %3095 = vpow2.f32 %v1037_v44 }
 0x3d5   : > { %v3405_v37 = vpop.eup %3091  ;;  %3097 = vpow2.f32 %v1162_v46 }
 0x3d6   : > { %v1044_v38 = vsel %vm780_vm5, %v3405_v37, 0.0 }
 0x3d7   : > { %1045 = vadd.xlane.f32.xlu1 %v1044_v38  ;;  %v3064_v38 = vld [vmem:[%s3737_s5 + $0x8] sm:$0xff]  }
 0x3d8   : > { %2884 = vmatpush3.bf16.msra.mxu0 %v3064_v38 }
 0x3d9   : > { %2897 = vmatprep.subr.bf16.mxu0 %v3171_v1 }
 0x3dd   : > { %v3409_v39 = vpop.eup %3093 }
 0x3de   : > { %v1169_v40 = vsel %vm780_vm5, %v3409_v39, 0.0  ;;  %v3096_v47 = vpop.eup %3095 }
 0x3df   : > { %1170 = vadd.xlane.f32.xlu1 %v1169_v40  ;;  %v1041_v48 = vsel %vm776_vm4, %v3096_v47, 0.0  ;;  %v3098_v49 = vpop.eup %3097 }
 0x3e0   : > { %v1166_v50 = vsel %vm776_vm4, %v3098_v49, 0.0 }
 0x3e5   : > { %801 = vrot.lane.b32.xlu0 %v3348_v27, %s3754_s23  ;;  %s3767_s23 = smov 80  }
 0x3f0   : > { %1052 = vrot.lane.b32.xlu1 %v3348_v27, %s3753_s26  ;;  %s3757_s26 = smov 24  }
 0x404   : > { %1042 = vadd.xlane.f32.xlu0 %v1041_v48 }
 0x408   : > { %1167 = vadd.xlane.f32.xlu0 %v1166_v50 }
 0x41e   : > { %1177 = vrot.lane.b32.xlu0 %v3348_v27, %s3752_s27 }
 0x456   : > { %v792_v52 = vpop.xlane.xlu0 %791 }
 0x457   : > { %3099 = vrcp.f32 %v792_v52 }
 0x458   : > { %v795_v53 = vpop.xlane.xlu1 %794 }
 0x459   : > { %3101 = vrcp.f32 %v795_v53 }
 0x45c   : > { %v918_v54 = vpop.xlane.xlu0 %917 }
 0x45d   : > { %3103 = vrcp.f32 %v918_v54  ;;  %v921_v55 = vpop.xlane.xlu1 %920 }
 0x45e   : > { %3105 = vrcp.f32 %v921_v55 }
 0x460   : > { %v802_v56 = vpop.permute.xlu0 %801 }
 0x461   : > { %v3100_v57 = vpop.eup %3099  ;;  %v808_v58 = vsel %vm806_vm6, %v802_v56, 0 }
 0x462   : > { %2840 = vmatpush3.bf16.msra.mxu1 %v808_v58  ;;  %v798_v60 = vmul.f32 %v3100_v57, %v3084_v23 }
 0x463   : > { %v3102_v59 = vpop.eup %3101  ;;  %2851 = vmatprep.subr.bf16.mxu1 %v3171_v1 }
 0x464   : > { %v799_v27 = vmul.f32 %v3102_v59, %v3086_v26  ;;  %v1046_v2 = vpop.xlane.xlu1 %1045 }
 0x465   : > { %3107 = vrcp.f32 %v1046_v2 }
 0x466   : > { %v800_v61 = vpack.c.bf16 %v799_v27, %v798_v60 }
 0x467   : > { %v3104_v62 = vpop.eup %3103 }
 0x468   : > { %v3106_v63 = vpop.eup %3105  ;;  %2842 = vmatmul.mubr.msk.bf16.vlgmr.msra.gmra.mrb[8].mxu1 %vm776_vm4, %v800_v61  ;;  %v924_v3 = vmul.f32 %v3104_v62, %v3088_v30  ;;  %v2655_v62 = vld [vmem:[%s3738_s6] ss:$0 sm:$0xff] }
 0x469   : > { %2852 = vmatpush3.bf16.msra.mxu1 %v933_v0  ;;  %2853 = vmatprep.mubr.msk.bf16.mxu1 %vm3172_vm0, %v3171_v1  ;;  %v925_v4 = vmul.f32 %v3106_v63, %v3090_v31 }
 0x46a   : > { %2863 = vmatprep.subr.bf16.mxu1 %v3171_v1 }
 0x46b   : > { %v926_v6 = vpack.c.bf16 %v925_v4, %v924_v3 }
 0x46c   : > { %v1171_v5 = vpop.xlane.xlu1 %1170 }
 0x46f   : > { %v3108_v11 = vpop.eup %3107 }
 0x470   : > { %2854 = vmatmul.mubr.msk.bf16.vlgmr.msra.gmra.mrb[12].mxu1 %vm776_vm4, %v926_v6  ;;  %v1053_v7 = vpop.permute.xlu1 %1052  ;;  %v1050_v13 = vmul.f32 %v3108_v11, %v3405_v37 }
 0x471   : > { %v1058_v8 = vsel %vm806_vm6, %v1053_v7, 0  ;;  %2865 = vmatprep.mubr.msk.bf16.mxu1 %vm3172_vm0, %v3171_v1 }
 0x472   : > { %2864 = vmatpush3.bf16.msra.mxu1 %v1058_v8 }
 0x473   : > { %2875 = vmatprep.subr.bf16.mxu1 %v3171_v1 }
 0x491   : > { %v1043_v9 = vpop.xlane.xlu0 %1042 }
 0x492   : > { %3109 = vrcp.f32 %v1043_v9 }
 0x495   : > { %v1168_v10 = vpop.xlane.xlu0 %1167 }
 0x496   : > { %3111 = vrcp.f32 %v1168_v10 }
 0x497   : > { %3113 = vrcp.f32 %v1171_v5 }
 0x499   : > { %v1178_v15 = vpop.permute.xlu0 %1177 }
 0x49a   : > { %v1183_v20 = vsel %vm806_vm6, %v1178_v15, 0 }
 0x49c   : > { %v3110_v12 = vpop.eup %3109 }
 0x49d   : > { %v1049_v14 = vmul.f32 %v3110_v12, %v3096_v47 }
 0x49f   : > { %v1051_v18 = vpack.c.bf16 %v1050_v13, %v1049_v14 }
 0x4a0   : > { %v3112_v19 = vpop.eup %3111 }
 0x4a1   : > { %2866 = vmatmul.mubr.msk.bf16.vlgmr.msra.gmra.mrb[16].mxu1 %vm776_vm4, %v1051_v18  ;;  %v3114_v21 = vpop.eup %3113  ;;  %v1174_v22 = vmul.f32 %v3112_v19, %v3098_v49 }
 0x4a2   : > { %2876 = vmatpush3.bf16.msra.mxu1 %v1183_v20  ;;  %2877 = vmatprep.mubr.msk.bf16.mxu1 %vm3172_vm0, %v3171_v1  ;;  %v1175_v23 = vmul.f32 %v3114_v21, %v3409_v39  ;;  %v3066_v21 = vld [vmem:[%s3739_s7 + $0x8] sm:$0xff]  }
 0x4a3   : > { %2889 = vmatprep.subr.bf16.mxu1 %v3171_v1 }
 0x4a4   : > { %v1176_v24 = vpack.c.bf16 %v1175_v23, %v1174_v22  ;;  %v3067_v22 = vld [vmem:[%s3741_s9] sm:$0xff]   ;;  %v3068_v23 = vld [vmem:[%s3741_s9 + $0x8] sm:$0xff]  }
 0x4a9   : > { %2878 = vmatmul.mubr.msk.bf16.vlgmr.msra.gmra.mrb[20].mxu1 %vm776_vm4, %v1176_v24 }
 0x4aa   : > { %2893 = vmatprep.mubr.msk.bf16.mxu1 %vm3172_vm0, %v3171_v1 }
 0x53b   : > { %v844_v25 = vpop.f32.mrb[8].mxu1 }
 0x53c   : > { %v2843_v26 = vpop.f32.mrb[9].mxu1 }
 0x53d   : > { %v847_v28 = vpop.f32.mrb[10].mxu1 }
 0x53e   : > { %v2844_v29 = vpop.f32.mrb[11].mxu1 }
 0x543   : > { %v969_v30 = vpop.f32.mrb[12].mxu1 }
 0x544   : > { %v2855_v31 = vpop.f32.mrb[13].mxu1 }
 0x545   : > { %v972_v32 = vpop.f32.mrb[14].mxu1 }
 0x546   : > { %v3025_v33 = vpack.i.bf16 %v972_v32, %v969_v30  ;;  %v2856_v34 = vpop.f32.mrb[15].mxu1 }
 0x548   : > { %3026 = vrot.lane.b32.xlu1 %v3025_v33, %s3756_s20  ;;  %s3758_s20 = smov 16   ;;  %v2659_v33 = vld [vmem:[%s3743_s11] ss:$0 sm:$0xff] }
 0x574   : > { %v1094_v36 = vpop.f32.mrb[16].mxu1 }
 0x575   : > { %v2867_v37 = vpop.f32.mrb[17].mxu1 }
 0x576   : > { %v1097_v39 = vpop.f32.mrb[18].mxu1  ;;  %v2660_v37 = vld [vmem:[%s3744_s12] ss:$0 sm:$0xff] }
 0x577   : > { %v3030_v40 = vpack.i.bf16 %v1097_v39, %v1094_v36  ;;  %v2868_v41 = vpop.f32.mrb[19].mxu1 }
 0x579   : > { %3031 = vrot.lane.b32.xlu0 %v3030_v40, %s3758_s20  ;;  %s3768_s20 = smov 72  }
 0x57c   : > { %v1219_v42 = vpop.f32.mrb[20].mxu1 }
 0x57d   : > { %v2879_v43 = vpop.f32.mrb[21].mxu1 }
 0x57e   : > { %v1222_v44 = vpop.f32.mrb[22].mxu1  ;;  %v3070_v43 = vld [vmem:[%s3741_s9 + $0x18] sm:$0xff]  }
 0x57f   : > { %v3035_v45 = vpack.i.bf16 %v1222_v44, %v1219_v42  ;;  %v2880_v46 = vpop.f32.mrb[23].mxu1  ;;  %v3069_v42 = vld [vmem:[%s3741_s9 + $0x10] sm:$0xff]   ;;  %v2661_v44 = vld [vmem:[%s3740_s8] ss:$0 sm:$0xff] }
 0x581   : > { %3036 = vrot.lane.b32.xlu1 %v3035_v45, %s3757_s26  ;;  %s3776_s26 = sshll.u32 %s3778_s25, 4 }
 0x5ba   : > { %v3027_v47 = vpop.permute.xlu1 %3026 }
 0x5bb   : > { %v3029_v49 = vunpack.i.h.bf16 %v3027_v47  ;;  %v3028_v50 = vunpack.i.l.bf16 %v3027_v47 }
 0x5bd   : > { %v1251_v54 = vsel %vm726_vm3, %v847_v28, %v3029_v49  ;;  %v1250_v55 = vsel %vm726_vm3, %v844_v25, %v3028_v50 }
 0x5eb   : > { %v3032_v48 = vpop.permute.xlu0 %3031 }
 0x5ec   : > { %v3034_v51 = vunpack.i.h.bf16 %v3032_v48  ;;  %v3033_v52 = vunpack.i.l.bf16 %v3032_v48 }
 0x5ee   : > { %v1253_v58 = vsel %vm1252_vm7, %v1250_v55, %v3033_v52  ;;  %v1254_v59 = vsel %vm1252_vm7, %v1251_v54, %v3034_v51  ;;  %v2665_v54 = vld [vmem:[%s3742_s10] ss:$0 sm:$0xff] }
 0x5f3   : > { %v3037_v53 = vpop.permute.xlu1 %3036 }
 0x5f4   : > { %v3039_v56 = vunpack.i.h.bf16 %v3037_v53  ;;  %v3038_v57 = vunpack.i.l.bf16 %v3037_v53 }
 0x5f6   : > { %v1256_v60 = vsel %vm1255_vm8, %v1253_v58, %v3038_v57  ;;  %v1257_v27 = vsel %vm1255_vm8, %v1254_v59, %v3039_v56 }
 0x5f7   : > { %v1262_v61 = vpack.c.bf16 %v1257_v27, %v1256_v60 }
 0x5f9   : > { %2886 = vmatmul.mubr.msk.bf16.vlgmr.msra.gmra.mrb[16].mxu0 %vm677_vm2, %v1262_v61 }
 0x5fa   : > { %2905 = vmatprep.mubr.msk.bf16.mxu0 %vm3172_vm0, %v3171_v1  ;;  %2898 = vmatpush3.bf16.msra.mxu0 %v3067_v22 }
 0x5fb   : > { %2899 = vmatprep.subr.bf16.mxu0 %v3171_v1 }
 0x5fe   : > { %2900 = vmatpush3.bf16.msra.mxu0 %v3068_v23 }
 0x5ff   : > { %2901 = vmatprep.subr.bf16.mxu0 %v3171_v1 }
 0x602   : > { %2902 = vmatpush3.bf16.msra.mxu0 %v3069_v42 }
 0x603   : > { %2903 = vmatprep.subr.bf16.mxu0 %v3171_v1 }
 0x606   : > { %2904 = vmatpush3.bf16.msra.mxu0 %v3070_v43 }
 0x607   : > { %2923 = vmatprep.subr.bf16.mxu0 %v3171_v1 }
 0x6cc   : > { %v1319_v63 = vpop.f32.mrb[16].mxu0 }
 0x6cd   : > { %v1320_v0 = vadd.f32 %v2655_v62, %v1319_v63  ;;  %v2887_v2 = vpop.f32.mrb[17].mxu0 }
 0x6ce   : > { %v1322_v3 = vpop.f32.mrb[18].mxu0 }
 0x6cf   : > { %v1323_v4 = vadd.f32 %v2655_v62, %v1322_v3  ;;  %v2888_v5 = vpop.f32.mrb[19].mxu0  ;;  %v1326_v6 = vadd.f32 %v1320_v0, %v3336_v16 }
 0x6d1   : > { %v1330_v7 = vsel %vm677_vm2, %v1326_v6, 0.0  ;;  %v1327_v8 = vadd.f32 %v1323_v4, %v3338_v17  ;;  %v3065_v17 = vld [vmem:[%s3739_s7] sm:$0xff]  }
 0x6d2   : > { %1331 = vadd.xlane.f32.xlu0 %v1330_v7  ;;  %2890 = vmatpush3.bf16.msra.mxu1 %v3065_v17  ;;  %v2671_v17 = vld [vmem:[%s3745_s13] ss:$0 sm:$0xff] }
 0x6d3   : > { %v1334_v9 = vsel %vm1333_vm9, %v1327_v8, 0.0  ;;  %2891 = vmatprep.subr.bf16.mxu1 %v3171_v1 }
 0x6d4   : > { %1335 = vadd.xlane.f32.xlu1 %v1334_v9 }
 0x6d6   : > { %2892 = vmatpush3.bf16.msra.mxu1 %v3066_v21 }
 0x6d7   : > { %2909 = vmatprep.subr.bf16.mxu1 %v3171_v1 }
 0x75f   : > { %v1332_v10 = vpop.xlane.xlu0 %1331 }
 0x760   : > { %v1338_v11 = vmul.f32 0.03125, %v1332_v10 }
 0x761   : > { %v1336_v12 = vpop.xlane.xlu1 %1335 }
 0x762   : > { %v1340_v13 = vsub.f32 %v1326_v6, %v1338_v11  ;;  %v1339_v14 = vmul.f32 0.03125, %v1336_v12  ;;  %v3071_v11 = vld [vmem:[%s3735_s3 + $0x10] sm:$0xff]   ;;  %v3072_v12 = vld [vmem:[%s3735_s3 + $0x18] sm:$0xff]  }
 0x764   : > { %v1341_v15 = vsub.f32 %v1327_v8, %v1339_v14  ;;  %v1342_v18 = vmul.f32 %v1340_v13, %v1340_v13 }
 0x766   : > { %v1344_v19 = vsel %vm677_vm2, %v1342_v18, 0.0  ;;  %v1343_v20 = vmul.f32 %v1341_v15, %v1341_v15 }
 0x767   : > { %1345 = vadd.xlane.f32.xlu0 %v1344_v19 }
 0x768   : > { %v1347_v16 = vsel %vm1333_vm9, %v1343_v20, 0.0 }
 0x76b   : > { %1348 = vadd.xlane.f32.xlu0 %v1347_v16 }
 0x7f4   : > { %v1346_v24 = vpop.xlane.xlu0 %1345 }
 0x7f5   : > { %v1350_v25 = vmul.f32 0.03125, %v1346_v24 }
 0x7f7   : > { %v1352_v26 = vadd.f32 1e-05, %v1350_v25  ;;  %v2672_v25 = vld [vmem:[%s3746_s14] ss:$0 sm:$0xff] }
 0x7f8   : > { %v1349_v28 = vpop.xlane.xlu0 %1348 }
 0x7f9   : > { %3115 = vrsqrt.f32 %v1352_v26  ;;  %v1351_v29 = vmul.f32 0.03125, %v1349_v28 }
 0x7fb   : > { %v1353_v30 = vadd.f32 1e-05, %v1351_v29 }
 0x7fd   : > { %3117 = vrsqrt.f32 %v1353_v30 }
 0x803   : > { %v3116_v31 = vpop.eup %3115 }
 0x804   : > { %v1356_v32 = vmul.f32 %v3116_v31, %v1340_v13  ;;  %v2678_v31 = vld [vmem:[%s3736_s4 + $0x1] ss:$0 sm:$0xff] }
 0x806   : > { %v1364_v35 = vmul.f32 %v2659_v33, %v1356_v32 }
 0x807   : > { %v3118_v34 = vpop.eup %3117 }
 0x808   : > { %v1357_v36 = vmul.f32 %v3118_v34, %v1341_v15  ;;  %v1372_v39 = vadd.f32 %v2660_v37, %v1364_v35 }
 0x80a   : > { %v1365_v38 = vmul.f32 %v2659_v33, %v1357_v36 }
 0x80c   : > { %v1373_v40 = vadd.f32 %v2660_v37, %v1365_v38 }
 0x80e   : > { %v1378_v41 = vpack.c.bf16 %v1373_v40, %v1372_v39 }
 0x810   : > { %2894 = vmatmul.mubr.msk.bf16.vlgmr.msra.gmra.mrb[24].mxu1 %vm677_vm2, %v1378_v41 }
 0x811   : > { %2913 = vmatprep.mubr.msk.bf16.mxu1 %vm3172_vm0, %v3171_v1  ;;  %2910 = vmatpush3.bf16.msra.mxu1 %v3071_v11 }
 0x812   : > { %2911 = vmatprep.subr.bf16.mxu1 %v3171_v1 }
 0x815   : > { %2912 = vmatpush3.bf16.msra.mxu1 %v3072_v12 }
 0x816   : > { %2917 = vmatprep.subr.bf16.mxu1 %v3171_v1 }
 0x8e3   : > { %v1435_v45 = vpop.f32.mrb[24].mxu1 }
 0x8e4   : > { %v1436_v46 = vadd.f32 %v2661_v44, %v1435_v45  ;;  %v2895_v47 = vpop.f32.mrb[25].mxu1 }
 0x8e5   : > { %v1438_v48 = vpop.f32.mrb[26].mxu1 }
 0x8e6   : > { %v1439_v49 = vadd.f32 %v2661_v44, %v1438_v48  ;;  %v2896_v50 = vpop.f32.mrb[27].mxu1  ;;  %v1442_v51 = vmax.f32 %v1436_v46, 0.0 }
 0x8e8   : > { %v1443_v52 = vmax.f32 %v1439_v49, 0.0 }
 0x8ea   : > { %v1452_v53 = vpack.c.bf16 %v1443_v52, %v1442_v51 }
 0x8ec   : > { %2906 = vmatmul.mubr.msk.bf16.vlgmr.msra.gmra.mrb[20].mxu0 %vm1484_vm10, %v1452_v53 }
 0x8ed   : > { %2925 = vmatprep.mubr.msk.bf16.mxu0 %vm3172_vm0, %v3171_v1 }
 0x9bf   : > { %v1522_v55 = vpop.f32.mrb[20].mxu0 }
 0x9c0   : > { %v1523_v56 = vadd.f32 %v2665_v54, %v1522_v55  ;;  %v2907_v57 = vpop.f32.mrb[21].mxu0 }
 0x9c1   : > { %v1525_v58 = vpop.f32.mrb[22].mxu0 }
 0x9c2   : > { %v1526_v59 = vadd.f32 %v2665_v54, %v1525_v58  ;;  %v2908_v60 = vpop.f32.mrb[23].mxu0  ;;  %v1529_v27 = vadd.f32 %v1523_v56, %v1372_v39 }
 0x9c4   : > { %v1533_v61 = vsel %vm677_vm2, %v1529_v27, 0.0  ;;  %v1530_v62 = vadd.f32 %v1526_v59, %v1373_v40 }
 0x9c5   : > { %1534 = vadd.xlane.f32.xlu1 %v1533_v61 }
 0x9c6   : > { %v1536_v63 = vsel %vm1333_vm9, %v1530_v62, 0.0 }
 0x9c7   : > { %1537 = vadd.xlane.f32.xlu0 %v1536_v63 }
 0xa52   : > { %v1535_v0 = vpop.xlane.xlu1 %1534 }
 0xa53   : > { %v1539_v2 = vmul.f32 0.03125, %v1535_v0 }
 0xa54   : > { %v1538_v3 = vpop.xlane.xlu0 %1537 }
 0xa55   : > { %v1541_v4 = vsub.f32 %v1529_v27, %v1539_v2  ;;  %v1540_v5 = vmul.f32 0.03125, %v1538_v3 }
 0xa57   : > { %v1542_v6 = vsub.f32 %v1530_v62, %v1540_v5  ;;  %v1543_v7 = vmul.f32 %v1541_v4, %v1541_v4 }
 0xa59   : > { %v1545_v8 = vsel %vm677_vm2, %v1543_v7, 0.0  ;;  %v1544_v9 = vmul.f32 %v1542_v6, %v1542_v6 }
 0xa5a   : > { %1546 = vadd.xlane.f32.xlu1 %v1545_v8 }
 0xa5b   : > { %v1548_v10 = vsel %vm1333_vm9, %v1544_v9, 0.0 }
 0xa5c   : > { %1549 = vadd.xlane.f32.xlu0 %v1548_v10 }
 0xae7   : > { %v1547_v13 = vpop.xlane.xlu1 %1546 }
 0xae8   : > { %v1551_v14 = vmul.f32 0.03125, %v1547_v13 }
 0xae9   : > { %v1550_v15 = vpop.xlane.xlu0 %1549 }
 0xaea   : > { %v1553_v18 = vadd.f32 1e-05, %v1551_v14  ;;  %v1552_v19 = vmul.f32 0.03125, %v1550_v15 }
 0xaec   : > { %3119 = vrsqrt.f32 %v1553_v18  ;;  %v1554_v20 = vadd.f32 1e-05, %v1552_v19 }
 0xaee   : > { %3121 = vrsqrt.f32 %v1554_v20 }
 0xaf6   : > { %v3120_v16 = vpop.eup %3119 }
 0xaf7   : > { %v1557_v21 = vmul.f32 %v3120_v16, %v1541_v4 }
 0xaf8   : > { %v3122_v22 = vpop.eup %3121 }
 0xaf9   : > { %v1565_v23 = vmul.f32 %v2671_v17, %v1557_v21  ;;  %v1558_v24 = vmul.f32 %v3122_v22, %v1542_v6 }
 0xafb   : > { %v1566_v26 = vmul.f32 %v2671_v17, %v1558_v24  ;;  %v3534_v28 = vadd.f32 %v2672_v25, %v1565_v23 }
 0xafd   : > { %v3536_v29 = vadd.f32 %v2672_v25, %v1566_v26 }
 0xaff   : > { %v1580_v30 = vpack.c.bf16 %v3536_v29, %v3534_v28 }
 0xb01   : > { %2914 = vmatmul.mubr.msk.bf16.vlgmr.msra.gmra.mrb[28].mxu1 %vm677_vm2, %v1580_v30 }
 0xb02   : > { %2919 = vmatprep.mubr.msk.bf16.mxu1 %vm3172_vm0, %v3171_v1 }
 0xbd4   : > { %v1638_v32 = vpop.f32.mrb[28].mxu1 }
 0xbd5   : > { %v2915_v33 = vpop.f32.mrb[29].mxu1  ;;  %v1639_v35 = vadd.f32 %v2678_v31, %v1638_v32 }
 0xbd6   : > { %v1641_v34 = vpop.f32.mrb[30].mxu1 }
 0xbd7   : > { %v1642_v36 = vadd.f32 %v2678_v31, %v1641_v34  ;;  %v2916_v37 = vpop.f32.mrb[31].mxu1 }
 0xbd9   : > { %v3546_v38 = vpack.c.bf16 %v1642_v36, %v1639_v35 }
 0xbdb   : > { %1772 = vrot.lane.b32.xlu0 %v3546_v38, %s3176_s18  ;;  %1647 = vrot.lane.b32.xlu1 %v3546_v38, %s3174_s0  ;;  %s3770_s0 = smov 64   ;;  %s3771_s18 = smov 48  }
 0xbdf   : > { %1895 = vrot.lane.b32.xlu0 %v3546_v38, %s3178_s1  ;;  %1770 = vrot.lane.b32.xlu1 %v3546_v38, %s3173_s29  ;;  %s3769_s29 = smov 56   ;;  %s3772_s1 = smov 40  }
 0xbe3   : > { %2020 = vrot.lane.b32.xlu0 %v3546_v38, %s3766_s22  ;;  %1897 = vrot.lane.b32.xlu1 %v3546_v38, %s3767_s23  ;;  %s3774_s22 = smov 16   ;;  %s3775_s23 = smov 24  }
 0xbe7   : > { %2022 = vrot.lane.b32.xlu1 %v3546_v38, %s3768_s20 }
 0xc4d   : > { %v1648_v39 = vpop.permute.xlu1 %1647  ;;  %v1773_v41 = vpop.permute.xlu0 %1772 }
 0xc4e   : > { %v1653_v40 = vsel %vm726_vm3, %v1648_v39, 0  ;;  %v1778_v43 = vsel %vm726_vm3, %v1773_v41, 0 }
 0xc4f   : > { %2918 = vmatpush3.bf16.xpose.msra.mxu1 %v1653_v40 }
 0xc50   : > { %2929 = vmatprep.subr.bf16.mxu1 %v3171_v1 }
 0xc51   : > { %v1771_v42 = vpop.permute.xlu1 %1770  ;;  %v1896_v47 = vpop.permute.xlu0 %1895 }
 0xc55   : > { %v1898_v44 = vpop.permute.xlu1 %1897  ;;  %v2021_v49 = vpop.permute.xlu0 %2020 }
 0xc56   : > { %2920 = vmatmul.mubr.msk.bf16.vlgmr.msra.gmra.mrb[32].mxu1 %vm726_vm3, %v3546_v38  ;;  %v1903_v45 = vsel %vm726_vm3, %v1898_v44, 0 }
 0xc57   : > { %2930 = vmatpush3.bf16.xpose.msra.mxu1 %v1778_v43  ;;  %2931 = vmatprep.mubr.msk.bf16.mxu1 %vm3172_vm0, %v3171_v1 }
 0xc58   : > { %2941 = vmatprep.subr.bf16.mxu1 %v3171_v1 }
 0xc59   : > { %v2023_v46 = vpop.permute.xlu1 %2022 }
 0xc5a   : > { %v2028_v48 = vsel %vm726_vm3, %v2023_v46, 0 }
 0xc5e   : > { %2932 = vmatmul.mubr.msk.bf16.vlgmr.msra.gmra.mrb[36].mxu1 %vm726_vm3, %v1771_v42 }
 0xc5f   : > { %2942 = vmatpush3.bf16.xpose.msra.mxu1 %v1903_v45  ;;  %2943 = vmatprep.mubr.msk.bf16.mxu1 %vm3172_vm0, %v3171_v1 }
 0xc60   : > { %2953 = vmatprep.subr.bf16.mxu1 %v3171_v1 }
 0xc66   : > { %2944 = vmatmul.mubr.msk.bf16.vlgmr.msra.gmra.mrb[40].mxu1 %vm726_vm3, %v1896_v47 }
 0xc67   : > { %2954 = vmatpush3.bf16.xpose.msra.mxu1 %v2028_v48  ;;  %2955 = vmatprep.mubr.msk.bf16.mxu1 %vm3172_vm0, %v3171_v1 }
 0xc68   : > { %2965 = vmatprep.subr.bf16.mxu1 %v3171_v1 }
 0xc6e   : > { %2956 = vmatmul.mubr.msk.bf16.vlgmr.msra.gmra.mrb[44].mxu1 %vm726_vm3, %v2021_v49 }
 0xc6f   : > { %2969 = vmatprep.mubr.msk.bf16.mxu1 %vm3172_vm0, %v3171_v1 }
 0xd29   : > { %v1689_v50 = vpop.f32.mrb[32].mxu1 }
 0xd2a   : > { %v1696_v51 = vmul.f32 0.35355338, %v1689_v50  ;;  %v2921_v52 = vpop.f32.mrb[33].mxu1 }
 0xd2b   : > { %v1692_v53 = vpop.f32.mrb[34].mxu1 }
 0xd2c   : > { %v1697_v54 = vmul.f32 0.35355338, %v1692_v53  ;;  %v2922_v55 = vpop.f32.mrb[35].mxu1  ;;  %v1698_v56 = vsel %vm776_vm4, %v1696_v51, -inf }
 0xd2d   : > { %1699 = vmax.xlane.f32.xlu1 %v1698_v56 }
 0xd2e   : > { %v1701_v57 = vsel %vm780_vm5, %v1697_v54, -inf }
 0xd2f   : > { %1702 = vmax.xlane.f32.xlu0 %v1701_v57 }
 0xd31   : > { %v1814_v58 = vpop.f32.mrb[36].mxu1 }
 0xd32   : > { %v1821_v59 = vmul.f32 0.35355338, %v1814_v58  ;;  %v2933_v60 = vpop.f32.mrb[37].mxu1 }
 0xd33   : > { %v1817_v27 = vpop.f32.mrb[38].mxu1 }
 0xd34   : > { %v1822_v61 = vmul.f32 0.35355338, %v1817_v27  ;;  %v2934_v62 = vpop.f32.mrb[39].mxu1  ;;  %v1823_v63 = vsel %vm776_vm4, %v1821_v59, -inf }
 0xd35   : > { %1824 = vmax.xlane.f32.xlu0 %v1823_v63 }
 0xd36   : > { %v1826_v0 = vsel %vm780_vm5, %v1822_v61, -inf }
 0xd37   : > { %1827 = vmax.xlane.f32.xlu1 %v1826_v0 }
 0xd39   : > { %v1939_v2 = vpop.f32.mrb[40].mxu1 }
 0xd3a   : > { %v1946_v3 = vmul.f32 0.35355338, %v1939_v2  ;;  %v2945_v4 = vpop.f32.mrb[41].mxu1 }
 0xd3b   : > { %v1942_v5 = vpop.f32.mrb[42].mxu1 }
 0xd3c   : > { %v1947_v6 = vmul.f32 0.35355338, %v1942_v5  ;;  %v2946_v7 = vpop.f32.mrb[43].mxu1  ;;  %v1948_v8 = vsel %vm776_vm4, %v1946_v3, -inf }
 0xd3d   : > { %1949 = vmax.xlane.f32.xlu0 %v1948_v8 }
 0xd3e   : > { %v1951_v9 = vsel %vm780_vm5, %v1947_v6, -inf }
 0xd3f   : > { %1952 = vmax.xlane.f32.xlu1 %v1951_v9 }
 0xd41   : > { %v2064_v10 = vpop.f32.mrb[44].mxu1 }
 0xd42   : > { %v2071_v11 = vmul.f32 0.35355338, %v2064_v10  ;;  %v2957_v12 = vpop.f32.mrb[45].mxu1 }
 0xd43   : > { %v2067_v13 = vpop.f32.mrb[46].mxu1 }
 0xd44   : > { %v2072_v14 = vmul.f32 0.35355338, %v2067_v13  ;;  %v2958_v15 = vpop.f32.mrb[47].mxu1  ;;  %v2073_v18 = vsel %vm776_vm4, %v2071_v11, -inf }
 0xd45   : > { %2074 = vmax.xlane.f32.xlu0 %v2073_v18 }
 0xd46   : > { %v2076_v19 = vsel %vm780_vm5, %v2072_v14, -inf }
 0xd47   : > { %2077 = vmax.xlane.f32.xlu1 %v2076_v19 }
 0xdba   : > { %v1700_v20 = vpop.xlane.xlu1 %1699 }
 0xdbb   : > { %v1704_v16 = vsub.f32 %v1696_v51, %v1700_v20 }
 0xdbc   : > { %v1703_v17 = vpop.xlane.xlu0 %1702 }
 0xdbd   : > { %v1706_v21 = vmul.f32 1.442695, %v1704_v16  ;;  %v1705_v22 = vsub.f32 %v1697_v54, %v1703_v17 }
 0xdbf   : > { %3123 = vpow2.f32 %v1706_v21  ;;  %v1708_v23 = vmul.f32 1.442695, %v1705_v22 }
 0xdc1   : > { %3125 = vpow2.f32 %v1708_v23 }
 0xdc2   : > { %v1825_v24 = vpop.xlane.xlu0 %1824 }
 0xdc3   : > { %v1829_v25 = vsub.f32 %v1821_v59, %v1825_v24 }
 0xdc4   : > { %v1828_v36 = vpop.xlane.xlu1 %1827 }
 0xdc5   : > { %v1831_v26 = vmul.f32 1.442695, %v1829_v25  ;;  %v1830_v37 = vsub.f32 %v1822_v61, %v1828_v36 }
 0xdc7   : > { %3127 = vpow2.f32 %v1831_v26  ;;  %v1833_v41 = vmul.f32 1.442695, %v1830_v37 }
 0xdc9   : > { %v3124_v30 = vpop.eup %3123  ;;  %3129 = vpow2.f32 %v1833_v41 }
 0xdca   : > { %v1710_v31 = vsel %vm776_vm4, %v3124_v30, 0.0  ;;  %v1950_v40 = vpop.xlane.xlu0 %1949 }
 0xdcb   : > { %v3126_v32 = vpop.eup %3125  ;;  %1711 = vadd.xlane.f32.xlu0 %v1710_v31  ;;  %v1954_v44 = vsub.f32 %v1946_v3, %v1950_v40 }
 0xdcc   : > { %v1713_v33 = vsel %vm780_vm5, %v3126_v32, 0.0  ;;  %v1953_v39 = vpop.xlane.xlu1 %1952 }
 0xdcd   : > { %1714 = vadd.xlane.f32.xlu1 %v1713_v33  ;;  %v1955_v42 = vsub.f32 %v1947_v6, %v1953_v39  ;;  %v1956_v48 = vmul.f32 1.442695, %v1954_v44  ;;  %v3073_v44 = vld [vmem:[%s3737_s5 + $0x10] sm:$0xff]  }
 0xdce   : > { %2966 = vmatpush3.bf16.msra.mxu1 %v3073_v44  ;;  %v2701_v44 = vld [vmem:[%s3743_s11 + $0x1] ss:$0 sm:$0xff] }
 0xdcf   : > { %v1958_v46 = vmul.f32 1.442695, %v1955_v42  ;;  %2967 = vmatprep.subr.bf16.mxu1 %v3171_v1 }
 0xdd1   : > { %v3593_v34 = vpop.eup %3127  ;;  %3131 = vpow2.f32 %v1958_v46 }
 0xdd2   : > { %v1835_v35 = vsel %vm776_vm4, %v3593_v34, 0.0  ;;  %v2075_v45 = vpop.xlane.xlu0 %2074  ;;  %3133 = vpow2.f32 %v1956_v48 }
 0xdd3   : > { %1836 = vadd.xlane.f32.xlu0 %v1835_v35  ;;  %v2079_v49 = vsub.f32 %v2071_v11, %v2075_v45  ;;  %v3130_v52 = vpop.eup %3129 }
 0xdd4   : > { %v2078_v43 = vpop.xlane.xlu1 %2077  ;;  %v1838_v53 = vsel %vm780_vm5, %v3130_v52, 0.0 }
 0xdd5   : > { %v2080_v47 = vsub.f32 %v2072_v14, %v2078_v43  ;;  %v2081_v51 = vmul.f32 1.442695, %v2079_v49  ;;  %v3074_v49 = vld [vmem:[%s3737_s5 + $0x18] sm:$0xff]  }
 0xdd6   : > { %2968 = vmatpush3.bf16.msra.mxu1 %v3074_v49 }
 0xdd7   : > { %v2083_v50 = vmul.f32 1.442695, %v2080_v47  ;;  %2981 = vmatprep.subr.bf16.mxu1 %v3171_v1 }
 0xdd9   : > { %3135 = vpow2.f32 %v2083_v50 }
 0xdda   : > { %3137 = vpow2.f32 %v2081_v51 }
 0xddb   : > { %v3132_v54 = vpop.eup %3131 }
 0xddc   : > { %v3134_v55 = vpop.eup %3133  ;;  %v1963_v56 = vsel %vm780_vm5, %v3132_v54, 0.0 }
 0xddd   : > { %v1960_v58 = vsel %vm776_vm4, %v3134_v55, 0.0 }
 0xdde   : > { %1846 = vrot.lane.b32.xlu1 %v3546_v38, %s3769_s29 }
 0xde3   : > { %v3603_v57 = vpop.eup %3135 }
 0xde4   : > { %v3138_v59 = vpop.eup %3137  ;;  %v2088_v60 = vsel %vm780_vm5, %v3603_v57, 0.0 }
 0xde5   : > { %v2085_v27 = vsel %vm776_vm4, %v3138_v59, 0.0 }
 0xde9   : > { %1721 = vrot.lane.b32.xlu0 %v3546_v38, %s3770_s0 }
 0xe02   : > { %1839 = vadd.xlane.f32.xlu1 %v1838_v53 }
 0xe06   : > { %1964 = vadd.xlane.f32.xlu1 %v1963_v56 }
 0xe08   : > { %1961 = vadd.xlane.f32.xlu0 %v1960_v58 }
 0xe0a   : > { %2089 = vadd.xlane.f32.xlu1 %v2088_v60 }
 0xe0c   : > { %2086 = vadd.xlane.f32.xlu0 %v2085_v27 }
 0xe1b   : > { %1971 = vrot.lane.b32.xlu1 %v3546_v38, %s3771_s18 }
 0xe22   : > { %2096 = vrot.lane.b32.xlu0 %v3546_v38, %s3772_s1 }
 0xe58   : > { %v1712_v61 = vpop.xlane.xlu0 %1711 }
 0xe59   : > { %3139 = vrcp.f32 %v1712_v61 }
 0xe5a   : > { %v1715_v62 = vpop.xlane.xlu1 %1714 }
 0xe5b   : > { %3141 = vrcp.f32 %v1715_v62 }
 0xe5e   : > { %v1847_v7 = vpop.permute.xlu1 %1846 }
 0xe5f   : > { %v1852_v9 = vsel %vm806_vm6, %v1847_v7, 0 }
 0xe60   : > { %v1837_v63 = vpop.xlane.xlu0 %1836 }
 0xe61   : > { %3143 = vrcp.f32 %v1837_v63 }
 0xe63   : > { %v3140_v0 = vpop.eup %3139 }
 0xe64   : > { %v1722_v2 = vpop.permute.xlu0 %1721  ;;  %v1718_v5 = vmul.f32 %v3140_v0, %v3124_v30 }
 0xe65   : > { %v3142_v3 = vpop.eup %3141  ;;  %v1727_v4 = vsel %vm806_vm6, %v1722_v2, 0 }
 0xe66   : > { %v1719_v6 = vmul.f32 %v3142_v3, %v3126_v32  ;;  %2924 = vmatpush3.bf16.msra.mxu0 %v1727_v4 }
 0xe67   : > { %2935 = vmatprep.subr.bf16.mxu0 %v3171_v1 }
 0xe68   : > { %v1720_v8 = vpack.c.bf16 %v1719_v6, %v1718_v5 }
 0xe6a   : > { %2926 = vmatmul.mubr.msk.bf16.vlgmr.msra.gmra.mrb[24].mxu0 %vm776_vm4, %v1720_v8 }
 0xe6b   : > { %2936 = vmatpush3.bf16.msra.mxu0 %v1852_v9  ;;  %2937 = vmatprep.mubr.msk.bf16.mxu0 %vm3172_vm0, %v3171_v1  ;;  %v3144_v13 = vpop.eup %3143 }
 0xe6c   : > { %2947 = vmatprep.subr.bf16.mxu0 %v3171_v1  ;;  %v1843_v18 = vmul.f32 %v3144_v13, %v3593_v34 }
 0xe8f   : > { %v1840_v38 = vpop.xlane.xlu1 %1839 }
 0xe90   : > { %3145 = vrcp.f32 %v1840_v38  ;;  %v2695_v38 = vld [vmem:[%s3738_s6 + $0x1] ss:$0 sm:$0xff] }
 0xe93   : > { %v1965_v10 = vpop.xlane.xlu1 %1964 }
 0xe94   : > { %3147 = vrcp.f32 %v1965_v10 }
 0xe95   : > { %v1962_v11 = vpop.xlane.xlu0 %1961 }
 0xe96   : > { %3149 = vrcp.f32 %v1962_v11 }
 0xe97   : > { %v2090_v12 = vpop.xlane.xlu1 %2089 }
 0xe99   : > { %v2087_v14 = vpop.xlane.xlu0 %2086 }
 0xe9a   : > { %v3146_v15 = vpop.eup %3145  ;;  %3151 = vrcp.f32 %v2087_v14 }
 0xe9b   : > { %v1844_v19 = vmul.f32 %v3146_v15, %v3130_v52  ;;  %v1972_v20 = vpop.permute.xlu1 %1971  ;;  %3153 = vrcp.f32 %v2090_v12 }
 0xe9c   : > { %v1977_v21 = vsel %vm806_vm6, %v1972_v20, 0 }
 0xe9d   : > { %v1845_v16 = vpack.c.bf16 %v1844_v19, %v1843_v18  ;;  %v2097_v25 = vpop.permute.xlu0 %2096 }
 0xe9e   : > { %v3148_v17 = vpop.eup %3147  ;;  %v2102_v31 = vsel %vm806_vm6, %v2097_v25, 0 }
 0xe9f   : > { %2938 = vmatmul.mubr.msk.bf16.vlgmr.msra.gmra.mrb[28].mxu0 %vm776_vm4, %v1845_v16  ;;  %v1969_v24 = vmul.f32 %v3148_v17, %v3132_v54 }
 0xea0   : > { %v3150_v22 = vpop.eup %3149  ;;  %2948 = vmatpush3.bf16.msra.mxu0 %v1977_v21  ;;  %2949 = vmatprep.mubr.msk.bf16.mxu0 %vm3172_vm0, %v3171_v1 }
 0xea1   : > { %v1968_v23 = vmul.f32 %v3150_v22, %v3134_v55  ;;  %2959 = vmatprep.subr.bf16.mxu0 %v3171_v1 }
 0xea3   : > { %v1970_v26 = vpack.c.bf16 %v1969_v24, %v1968_v23 }
 0xea4   : > { %v3152_v30 = vpop.eup %3151 }
 0xea5   : > { %v3154_v32 = vpop.eup %3153  ;;  %v2093_v33 = vmul.f32 %v3152_v30, %v3138_v59 }
 0xea6   : > { %v2094_v34 = vmul.f32 %v3154_v32, %v3603_v57  ;;  %v3076_v32 = vld [vmem:[%s3739_s7 + $0x18] sm:$0xff]  }
 0xea7   : > { %2950 = vmatmul.mubr.msk.bf16.vlgmr.msra.gmra.mrb[32].mxu0 %vm776_vm4, %v1970_v26 }
 0xea8   : > { %2960 = vmatpush3.bf16.msra.mxu0 %v2102_v31  ;;  %2961 = vmatprep.mubr.msk.bf16.mxu0 %vm3172_vm0, %v3171_v1  ;;  %v2095_v35 = vpack.c.bf16 %v2094_v34, %v2093_v33  ;;  %v3077_v33 = vld [vmem:[%s3741_s9 + $0x20] sm:$0xff]   ;;  %v3078_v34 = vld [vmem:[%s3741_s9 + $0x28] sm:$0xff]  }
 0xea9   : > { %2973 = vmatprep.subr.bf16.mxu0 %v3171_v1 }
 0xeaf   : > { %2962 = vmatmul.mubr.msk.bf16.vlgmr.msra.gmra.mrb[36].mxu0 %vm776_vm4, %v2095_v35 }
 0xeb0   : > { %2977 = vmatprep.mubr.msk.bf16.mxu0 %vm3172_vm0, %v3171_v1 }
 0xf3d   : > { %v1763_v36 = vpop.f32.mrb[24].mxu0 }
 0xf3e   : > { %v2927_v37 = vpop.f32.mrb[25].mxu0 }
 0xf3f   : > { %v1766_v39 = vpop.f32.mrb[26].mxu0 }
 0xf40   : > { %v2928_v40 = vpop.f32.mrb[27].mxu0 }
 0xf72   : > { %v1888_v41 = vpop.f32.mrb[28].mxu0 }
 0xf73   : > { %v2939_v42 = vpop.f32.mrb[29].mxu0 }
 0xf74   : > { %v1891_v43 = vpop.f32.mrb[30].mxu0 }
 0xf75   : > { %v3040_v45 = vpack.i.bf16 %v1891_v43, %v1888_v41  ;;  %v2940_v46 = vpop.f32.mrb[31].mxu0 }
 0xf77   : > { %3041 = vrot.lane.b32.xlu1 %v3040_v45, %s3773_s21 }
 0xf7a   : > { %v2013_v47 = vpop.f32.mrb[32].mxu0 }
 0xf7b   : > { %v2951_v48 = vpop.f32.mrb[33].mxu0 }
 0xf7c   : > { %v2016_v50 = vpop.f32.mrb[34].mxu0  ;;  %v2702_v48 = vld [vmem:[%s3744_s12 + $0x1] ss:$0 sm:$0xff] }
 0xf7d   : > { %v3045_v51 = vpack.i.bf16 %v2016_v50, %v2013_v47  ;;  %v2952_v52 = vpop.f32.mrb[35].mxu0 }
 0xf7f   : > { %3046 = vrot.lane.b32.xlu0 %v3045_v51, %s3774_s22 }
 0xf82   : > { %v2138_v53 = vpop.f32.mrb[36].mxu0 }
 0xf83   : > { %v2963_v54 = vpop.f32.mrb[37].mxu0 }
 0xf84   : > { %v2141_v55 = vpop.f32.mrb[38].mxu0  ;;  %v3080_v54 = vld [vmem:[%s3741_s9 + $0x38] sm:$0xff]  }
 0xf85   : > { %v3050_v56 = vpack.i.bf16 %v2141_v55, %v2138_v53  ;;  %v2964_v57 = vpop.f32.mrb[39].mxu0  ;;  %v3079_v53 = vld [vmem:[%s3741_s9 + $0x30] sm:$0xff]   ;;  %v2708_v55 = vld [vmem:[%s3740_s8 + $0x1] ss:$0 sm:$0xff] }
 0xf87   : > { %3051 = vrot.lane.b32.xlu1 %v3050_v56, %s3775_s23  ;;  %s548_s23 = scalar_lea.vmem %s3749_s17, %s3776_s26 }
 0xfe9   : > { %v3042_v58 = vpop.permute.xlu1 %3041 }
 0xfea   : > { %v3044_v60 = vunpack.i.h.bf16 %v3042_v58  ;;  %v3043_v27 = vunpack.i.l.bf16 %v3042_v58 }
 0xfec   : > { %v2170_v0 = vsel %vm726_vm3, %v1766_v39, %v3044_v60  ;;  %v2169_v2 = vsel %vm726_vm3, %v1763_v36, %v3043_v27 }
 0xff1   : > { %v3047_v59 = vpop.permute.xlu0 %3046 }
 0xff2   : > { %v3049_v61 = vunpack.i.h.bf16 %v3047_v59  ;;  %v3048_v62 = vunpack.i.l.bf16 %v3047_v59 }
 0xff4   : > { %v2172_v5 = vsel %vm1252_vm7, %v2170_v0, %v3049_v61  ;;  %v2171_v6 = vsel %vm1252_vm7, %v2169_v2, %v3048_v62  ;;  %v2721_v0 = vld [vmem:[%s3742_s10 + $0x1] ss:$0 sm:$0xff] }
 0xff9   : > { %v3052_v63 = vpop.permute.xlu1 %3051 }
 0xffa   : > { %v3054_v3 = vunpack.i.h.bf16 %v3052_v63  ;;  %v3053_v4 = vunpack.i.l.bf16 %v3052_v63 }
 0xffc   : > { %v2174_v7 = vsel %vm1255_vm8, %v2172_v5, %v3054_v3  ;;  %v2173_v8 = vsel %vm1255_vm8, %v2171_v6, %v3053_v4 }
 0xffd   : > { %v2180_v9 = vpack.c.bf16 %v2174_v7, %v2173_v8 }
 0xfff   : > { %2970 = vmatmul.mubr.msk.bf16.vlgmr.msra.gmra.mrb[48].mxu1 %vm677_vm2, %v2180_v9 }
0x1000   : > { %2989 = vmatprep.mubr.msk.bf16.mxu1 %vm3172_vm0, %v3171_v1  ;;  %2982 = vmatpush3.bf16.msra.mxu1 %v3077_v33 }
0x1001   : > { %2983 = vmatprep.subr.bf16.mxu1 %v3171_v1 }
0x1004   : > { %2984 = vmatpush3.bf16.msra.mxu1 %v3078_v34 }
0x1005   : > { %2985 = vmatprep.subr.bf16.mxu1 %v3171_v1 }
0x1008   : > { %2986 = vmatpush3.bf16.msra.mxu1 %v3079_v53 }
0x1009   : > { %2987 = vmatprep.subr.bf16.mxu1 %v3171_v1 }
0x100c   : > { %2988 = vmatpush3.bf16.msra.mxu1 %v3080_v54 }
0x10d2   : > { %v2238_v10 = vpop.f32.mrb[48].mxu1 }
0x10d3   : > { %v2239_v11 = vadd.f32 %v2695_v38, %v2238_v10  ;;  %v2971_v12 = vpop.f32.mrb[49].mxu1 }
0x10d4   : > { %v2241_v13 = vpop.f32.mrb[50].mxu1 }
0x10d5   : > { %v2242_v14 = vadd.f32 %v2695_v38, %v2241_v13  ;;  %v2972_v15 = vpop.f32.mrb[51].mxu1  ;;  %v2245_v18 = vadd.f32 %v2239_v11, %v3534_v28 }
0x10d7   : > { %v2251_v19 = vsel %vm677_vm2, %v2245_v18, 0.0  ;;  %v2246_v20 = vadd.f32 %v2242_v14, %v3536_v29  ;;  %v3075_v29 = vld [vmem:[%s3739_s7 + $0x10] sm:$0xff]  }
0x10d8   : > { %2252 = vadd.xlane.f32.xlu0 %v2251_v19  ;;  %2974 = vmatpush3.bf16.msra.mxu0 %v3075_v29  ;;  %v2729_v29 = vld [vmem:[%s3745_s13 + $0x1] ss:$0 sm:$0xff] }
0x10d9   : > { %v2254_v16 = vsel %vm1333_vm9, %v2246_v20, 0.0  ;;  %2975 = vmatprep.subr.bf16.mxu0 %v3171_v1 }
0x10da   : > { %2255 = vadd.xlane.f32.xlu1 %v2254_v16 }
0x10dc   : > { %2976 = vmatpush3.bf16.msra.mxu0 %v3076_v32 }
0x10dd   : > { %2993 = vmatprep.subr.bf16.mxu0 %v3171_v1 }
0x1165   : > { %v2253_v17 = vpop.xlane.xlu0 %2252 }
0x1166   : > { %v2257_v21 = vmul.f32 0.03125, %v2253_v17 }
0x1167   : > { %v2256_v22 = vpop.xlane.xlu1 %2255 }
0x1168   : > { %v2259_v23 = vsub.f32 %v2245_v18, %v2257_v21  ;;  %v2258_v24 = vmul.f32 0.03125, %v2256_v22  ;;  %v3081_v21 = vld [vmem:[%s3747_s15] sm:$0xff]   ;;  %v3082_v22 = vld [vmem:[%s3747_s15 + $0x8] sm:$0xff]  }
0x116a   : > { %v2260_v25 = vsub.f32 %v2246_v20, %v2258_v24  ;;  %v2261_v26 = vmul.f32 %v2259_v23, %v2259_v23 }
0x116c   : > { %v2263_v30 = vsel %vm677_vm2, %v2261_v26, 0.0  ;;  %v2262_v31 = vmul.f32 %v2260_v25, %v2260_v25 }
0x116d   : > { %2264 = vadd.xlane.f32.xlu0 %v2263_v30 }
0x116e   : > { %v2266_v28 = vsel %vm1333_vm9, %v2262_v31, 0.0 }
0x1171   : > { %2267 = vadd.xlane.f32.xlu0 %v2266_v28 }
0x11fa   : > { %v2265_v35 = vpop.xlane.xlu0 %2264 }
0x11fb   : > { %v2269_v36 = vmul.f32 0.03125, %v2265_v35 }
0x11fd   : > { %v2271_v37 = vadd.f32 1e-05, %v2269_v36 }
0x11fe   : > { %v2268_v39 = vpop.xlane.xlu0 %2267 }
0x11ff   : > { %3155 = vrsqrt.f32 %v2271_v37  ;;  %v2270_v40 = vmul.f32 0.03125, %v2268_v39 }
0x1201   : > { %v2272_v41 = vadd.f32 1e-05, %v2270_v40 }
0x1203   : > { %3157 = vrsqrt.f32 %v2272_v41  ;;  %v2731_v41 = vld [vmem:[%s3748_s16] ss:$0 sm:$0xff] }
0x1209   : > { %v3156_v42 = vpop.eup %3155 }
0x120a   : > { %v2275_v43 = vmul.f32 %v3156_v42, %v2259_v23 }
0x120c   : > { %v2283_v46 = vmul.f32 %v2701_v44, %v2275_v43 }
0x120d   : > { %v3158_v45 = vpop.eup %3157 }
0x120e   : > { %v2276_v47 = vmul.f32 %v3158_v45, %v2260_v25  ;;  %v2291_v50 = vadd.f32 %v2702_v48, %v2283_v46 }
0x1210   : > { %v2284_v49 = vmul.f32 %v2701_v44, %v2276_v47 }
0x1212   : > { %v2292_v51 = vadd.f32 %v2702_v48, %v2284_v49 }
0x1214   : > { %v2298_v52 = vpack.c.bf16 %v2292_v51, %v2291_v50 }
0x1216   : > { %2978 = vmatmul.mubr.msk.bf16.vlgmr.msra.gmra.mrb[40].mxu0 %vm677_vm2, %v2298_v52 }
0x1217   : > { %2997 = vmatprep.mubr.msk.bf16.mxu0 %vm3172_vm0, %v3171_v1  ;;  %2994 = vmatpush3.bf16.msra.mxu0 %v3081_v21 }
0x1218   : > { %2995 = vmatprep.subr.bf16.mxu0 %v3171_v1  ;;  %v2730_v1 = vld [vmem:[%s3746_s14 + $0x1] ss:$0 sm:$0xff] }
0x121b   : > { %2996 = vmatpush3.bf16.msra.mxu0 %v3082_v22 }
0x12e9   : > { %v2356_v56 = vpop.f32.mrb[40].mxu0 }
0x12ea   : > { %v2357_v57 = vadd.f32 %v2708_v55, %v2356_v56  ;;  %v2979_v58 = vpop.f32.mrb[41].mxu0 }
0x12eb   : > { %v2359_v59 = vpop.f32.mrb[42].mxu0 }
0x12ec   : > { %v2360_v60 = vadd.f32 %v2708_v55, %v2359_v59  ;;  %v2980_v27 = vpop.f32.mrb[43].mxu0  ;;  %v2363_v61 = vmax.f32 %v2357_v57, 0.0 }
0x12ee   : > { %v2364_v62 = vmax.f32 %v2360_v60, 0.0 }
0x12f0   : > { %v2374_v63 = vpack.c.bf16 %v2364_v62, %v2363_v61 }
0x12f2   : > { %2990 = vmatmul.mubr.msk.bf16.vlgmr.msra.gmra.mrb[52].mxu1 %vm1484_vm10, %v2374_v63 }
0x13c5   : > { %v2444_v2 = vpop.f32.mrb[52].mxu1 }
0x13c6   : > { %v2445_v3 = vadd.f32 %v2721_v0, %v2444_v2  ;;  %v2991_v4 = vpop.f32.mrb[53].mxu1 }
0x13c7   : > { %v2447_v5 = vpop.f32.mrb[54].mxu1 }
0x13c8   : > { %v2448_v6 = vadd.f32 %v2721_v0, %v2447_v5  ;;  %v2992_v7 = vpop.f32.mrb[55].mxu1  ;;  %v2451_v8 = vadd.f32 %v2445_v3, %v2291_v50 }
0x13ca   : > { %v2457_v9 = vsel %vm677_vm2, %v2451_v8, 0.0  ;;  %v2452_v38 = vadd.f32 %v2448_v6, %v2292_v51 }
0x13cb   : > { %2458 = vadd.xlane.f32.xlu1 %v2457_v9 }
0x13cc   : > { %v2460_v10 = vsel %vm1333_vm9, %v2452_v38, 0.0 }
0x13cd   : > { %2461 = vadd.xlane.f32.xlu0 %v2460_v10 }
0x1458   : > { %v2459_v11 = vpop.xlane.xlu1 %2458 }
0x1459   : > { %v2463_v12 = vmul.f32 0.03125, %v2459_v11 }
0x145a   : > { %v2462_v13 = vpop.xlane.xlu0 %2461 }
0x145b   : > { %v2465_v14 = vsub.f32 %v2451_v8, %v2463_v12  ;;  %v2464_v15 = vmul.f32 0.03125, %v2462_v13 }
0x145d   : > { %v2466_v18 = vsub.f32 %v2452_v38, %v2464_v15  ;;  %v2467_v19 = vmul.f32 %v2465_v14, %v2465_v14 }
0x145f   : > { %v2469_v20 = vsel %vm677_vm2, %v2467_v19, 0.0  ;;  %v2468_v16 = vmul.f32 %v2466_v18, %v2466_v18 }
0x1460   : > { %2470 = vadd.xlane.f32.xlu1 %v2469_v20 }
0x1461   : > { %v2472_v17 = vsel %vm1333_vm9, %v2468_v16, 0.0 }
0x1462   : > { %2473 = vadd.xlane.f32.xlu0 %v2472_v17 }
0x14ed   : > { %v2471_v23 = vpop.xlane.xlu1 %2470 }
0x14ee   : > { %v2475_v24 = vmul.f32 0.03125, %v2471_v23 }
0x14ef   : > { %v2474_v25 = vpop.xlane.xlu0 %2473 }
0x14f0   : > { %v2477_v26 = vadd.f32 1e-05, %v2475_v24  ;;  %v2476_v30 = vmul.f32 0.03125, %v2474_v25 }
0x14f2   : > { %3159 = vrsqrt.f32 %v2477_v26  ;;  %v2478_v31 = vadd.f32 1e-05, %v2476_v30 }
0x14f4   : > { %3161 = vrsqrt.f32 %v2478_v31 }
0x14fc   : > { %v3160_v28 = vpop.eup %3159 }
0x14fd   : > { %v2481_v32 = vmul.f32 %v3160_v28, %v2465_v14 }
0x14fe   : > { %v3162_v33 = vpop.eup %3161 }
0x14ff   : > { %v2489_v34 = vmul.f32 %v2729_v29, %v2481_v32  ;;  %v2482_v35 = vmul.f32 %v3162_v33, %v2466_v18 }
0x1501   : > { %v2490_v36 = vmul.f32 %v2729_v29, %v2482_v35  ;;  %v2497_v37 = vadd.f32 %v2730_v1, %v2489_v34 }
0x1503   : > { %v2498_v39 = vadd.f32 %v2730_v1, %v2490_v36 }
0x1505   : > { %v2503_v40 = vpack.c.bf16 %v2498_v39, %v2497_v37 }
0x1507   : > { %2998 = vmatmul.mubr.msk.bf16.vlgmr.msra.gmra.mrb[44].mxu0 %vm677_vm2, %v2503_v40 }
0x15da   : > { %v2560_v42 = vpop.f32.mrb[44].mxu0 }
0x15db   : > { %v2561_v43 = vadd.f32 %v2731_v41, %v2560_v42  ;;  %v2999_v44 = vpop.f32.mrb[45].mxu0 }
0x15dc   : > { %v2563_v45 = vpop.f32.mrb[46].mxu0 }
0x15dd   : > { %2568 = vst.msk [vmem:[%s548_s23] sm:$0xff] %vm2567_vm11, %v2561_v43  ;;  %v2564_v46 = vadd.f32 %v2731_v41, %v2563_v45  ;;  %v3000_v47 = vpop.f32.mrb[47].mxu0 }
0x15df   : > { %2570 = vst.msk [vmem:[%s548_s23 + $0x8] sm:$0xf] %vm2569_vm12, %v2564_v46 }
0x15e0 PF: > { %s27_s24 = sadd.s32 1, %s3169_s24  }
0x15e1   : > { %p24_p4 = scmp.ge.s32.totalorder %s27_s24, 4  }
0x15e3   :  { %26 = sbr.rel (!%p24_p4) target bundleno = 3 (0x3), region = 130 }

</bundles_post_ra>
